<compile_context>
chip_gen: v7x
topology: tpu7x:2x2x1
jax: 0.10.0
libtpu: 0.0.40
codegen_flags: <defaults>
</compile_context>

<pallas_src>
import math
import functools
import numpy as np

import jax
import jax.numpy as jnp
from jax.experimental import pallas as pl
from jax.experimental.pallas import tpu as pltpu

MXU_DTYPE = jnp.bfloat16


# ----------------------------------------------------------------------------
# In-kernel helpers (f32 epilogue math)
# ----------------------------------------------------------------------------

def _mish(y):
    # mish(y) = y * tanh(softplus(y)) = y * g / (g + 2), g = e^y (e^y + 2); 1 exp.
    u = jnp.exp(jnp.minimum(y, 30.0))
    g = u * (u + 2.0)
    return y * g / (g + 2.0)


def _silu(y):
    return y / (1.0 + jnp.exp(-y))


def _layer_norm(x, w, b, eps=1e-5):
    mu = jnp.mean(x, axis=-1, keepdims=True)
    var = jnp.mean((x - mu) ** 2, axis=-1, keepdims=True)
    return (x - mu) * jax.lax.rsqrt(var + eps) * w + b


def _group_norm(h, gmat, w, b, eps=1e-5):
    # h: (T, C) f32. gmat: (C, C) intra-group averaging matrix (f32, host-built).
    mu_c = jnp.mean(h, axis=0, keepdims=True)            # per-channel mean over T
    ms_c = jnp.mean(h * h, axis=0, keepdims=True)
    gm = jnp.dot(mu_c, gmat, preferred_element_type=jnp.float32)   # group mean
    gs = jnp.dot(ms_c, gmat, preferred_element_type=jnp.float32)   # group E[x^2]
    var = gs - gm * gm
    return (h - gm) * jax.lax.rsqrt(var + eps) * w + b


def _shifted_conv(pad_ref, w_ref, t_out):
    # pad_ref already holds the time-padded, masked input; conv = K shifted matmuls.
    acc = None
    for k in range(w_ref.shape[0]):
        xk = pad_ref[pl.ds(k, t_out), :].astype(MXU_DTYPE)
        term = jnp.dot(xk, w_ref[k], preferred_element_type=jnp.float32)
        acc = term if acc is None else acc + term
    return acc


# ----------------------------------------------------------------------------
# Fused kernels
# ----------------------------------------------------------------------------

def _time_mlp_kernel(x_ref, w1_ref, b1_ref, w2_ref, b2_ref, o_ref):
    # linear -> silu -> linear, then the resnet-mlp Mish() is pre-applied once here
    # (the same mish(t_emb) feeds every ResnetBlock1D).
    h = jnp.dot(x_ref[...].astype(MXU_DTYPE), w1_ref[...],
                preferred_element_type=jnp.float32) + b1_ref[...]
    h = _silu(h)
    h = jnp.dot(h.astype(MXU_DTYPE), w2_ref[...],
                preferred_element_type=jnp.float32) + b2_ref[...]
    o_ref[...] = _mish(h)


def _resnet_kernel(x_ref, m_ref, temb_ref,
                   w1_ref, b1_ref, g1w_ref, g1b_ref,
                   mlpw_ref, mlpb_ref,
                   w2_ref, b2_ref, g2w_ref, g2b_ref,
                   resw_ref, resb_ref, gmat_ref,
                   o_ref, pad1_ref, pad2_ref):
    T = x_ref.shape[1]
    x = x_ref[0]                                  # (T, Cin) f32
    m = m_ref[0]                                  # (T, 1)
    xm = x * m
    gmat = gmat_ref[...]

    # --- Block1D #1: conv(k=3, pad=1) -> GroupNorm(8) -> mish -> mask ---
    pad1_ref[...] = jnp.zeros_like(pad1_ref)
    pad1_ref[pl.ds(1, T), :] = xm
    h = _shifted_conv(pad1_ref, w1_ref, T) + b1_ref[...]
    h = _group_norm(h, gmat, g1w_ref[...], g1b_ref[...])
    h = _mish(h) * m

    # --- time-embedding projection (Mish already applied to temb outside) ---
    tp = jnp.dot(temb_ref[0].astype(MXU_DTYPE), mlpw_ref[...],
                 preferred_element_type=jnp.float32) + mlpb_ref[...]
    h = h + tp                                    # (1, Cout) broadcast over T

    # --- Block1D #2 ---
    hm = h * m
    pad2_ref[...] = jnp.zeros_like(pad2_ref)
    pad2_ref[pl.ds(1, T), :] = hm
    h2 = _shifted_conv(pad2_ref, w2_ref, T) + b2_ref[...]
    h2 = _group_norm(h2, gmat, g2w_ref[...], g2b_ref[...])
    h2 = _mish(h2) * m

    # --- 1x1 residual conv ---
    res = jnp.dot(xm.astype(MXU_DTYPE), resw_ref[...],
                  preferred_element_type=jnp.float32) + resb_ref[...]
    o_ref[0] = h2 + res


def _transformer_kernel(x_ref, mc_ref, mr_ref,
                        n1w_ref, n1b_ref,
                        wq_ref, wk_ref, wv_ref, wo_ref, ob_ref,
                        n3w_ref, n3b_ref,
                        fiw_ref, fib_ref, fa_ref, frb_ref,
                        fow_ref, fob_ref, o_ref):
    H = wq_ref.shape[0]
    D = wq_ref.shape[2]
    x = x_ref[0]                                   # (T, C) f32
    # diffusers / Matcha quirk: scores = mask_product + scale * Q@K^T where the raw
    # 0/1 mask product is the additive bias (padding is NOT -inf-masked). Deliberate.
    bias = mc_ref[0] * mr_ref[0]                   # (T,1)*(1,T) -> (T,T)
    scale = 1.0 / math.sqrt(D)

    h = _layer_norm(x, n1w_ref[...], n1b_ref[...])
    hb = h.astype(MXU_DTYPE)

    attn = None
    for hd in range(H):                            # unrolled: all heads, one grid step
        q = jnp.dot(hb, wq_ref[hd], preferred_element_type=jnp.float32) * scale
        k = jnp.dot(hb, wk_ref[hd], preferred_element_type=jnp.float32)
        v = jnp.dot(hb, wv_ref[hd], preferred_element_type=jnp.float32)
        s = bias + jax.lax.dot_general(
            q.astype(MXU_DTYPE), k.astype(MXU_DTYPE),
            (((1,), (1,)), ((), ())), preferred_element_type=jnp.float32)
        s = s - jnp.max(s, axis=-1, keepdims=True)
        p = jnp.exp(s)
        p = p / jnp.sum(p, axis=-1, keepdims=True)          # exact reciprocal
        o = jnp.dot(p.astype(MXU_DTYPE), v.astype(MXU_DTYPE),
                    preferred_element_type=jnp.float32)
        proj = jnp.dot(o.astype(MXU_DTYPE), wo_ref[hd],
                       preferred_element_type=jnp.float32)
        attn = proj if attn is None else attn + proj
    x = x + attn + ob_ref[...]

    h = _layer_norm(x, n3w_ref[...], n3b_ref[...])
    y = jnp.dot(h.astype(MXU_DTYPE), fiw_ref[...],
                preferred_element_type=jnp.float32) + fib_ref[...]
    y = y + frb_ref[...] * jnp.sin(y * fa_ref[...]) ** 2     # SnakeBeta (log-scale)
    ff = jnp.dot(y.astype(MXU_DTYPE), fow_ref[...],
                 preferred_element_type=jnp.float32) + fob_ref[...]
    o_ref[0] = x + ff


def _conv_kernel(lp, x_ref, m_ref, w_ref, b_ref, o_ref, pad_ref):
    T_in = x_ref.shape[1]
    K = w_ref.shape[0]
    T_out = pad_ref.shape[0] - (K - 1)
    xm = x_ref[0] * m_ref[0]
    pad_ref[...] = jnp.zeros_like(pad_ref)
    pad_ref[pl.ds(lp, T_in), :] = xm
    o_ref[0] = _shifted_conv(pad_ref, w_ref, T_out) + b_ref[...]


def _final_kernel(x_ref, m_ref, w_ref, b_ref, gw_ref, gb_ref, gmat_ref,
                  pw_ref, pb_ref, o_ref, pad_ref):
    # final Block1D (conv + GroupNorm + mish + mask) fused with the 1x1 projection
    # and the trailing output mask.
    T = x_ref.shape[1]
    m = m_ref[0]
    xm = x_ref[0] * m
    pad_ref[...] = jnp.zeros_like(pad_ref)
    pad_ref[pl.ds(1, T), :] = xm
    h = _shifted_conv(pad_ref, w_ref, T) + b_ref[...]
    h = _group_norm(h, gmat_ref[...], gw_ref[...], gb_ref[...])
    h = _mish(h) * m
    out = jnp.dot(h.astype(MXU_DTYPE), pw_ref[...],
                  preferred_element_type=jnp.float32) + pb_ref[...]
    o_ref[0] = out * m


# ----------------------------------------------------------------------------
# pallas_call wrappers
# ----------------------------------------------------------------------------

def _const_spec(arr):
    """Full-extent BlockSpec for a weight shared by all grid steps."""
    if arr.ndim == 2:
        return pl.BlockSpec(arr.shape, lambda b: (0, 0))
    assert arr.ndim == 3
    return pl.BlockSpec(arr.shape, lambda b: (0, 0, 0))


def time_mlp(p, emb):
    B, Cin = emb.shape
    Td = p['b1'].shape[-1]
    return pl.pallas_call(
        _time_mlp_kernel,
        out_shape=jax.ShapeDtypeStruct((B, Td), jnp.float32),
        grid=(1,),
        in_specs=[pl.BlockSpec((B, Cin), lambda i: (0, 0)),
                  pl.BlockSpec(p['w1'].shape, lambda i: (0, 0)),
                  pl.BlockSpec((1, Td), lambda i: (0, 0)),
                  pl.BlockSpec(p['w2'].shape, lambda i: (0, 0)),
                  pl.BlockSpec((1, Td), lambda i: (0, 0))],
        out_specs=pl.BlockSpec((B, Td), lambda i: (0, 0)),
        compiler_params=pltpu.CompilerParams(dimension_semantics=("arbitrary",)),
    )(emb, p['w1'], p['b1'], p['w2'], p['b2'])


def resnet_block(p, x, mask_col, temb):
    B, T, Cin = x.shape
    Cout = p['conv1_b'].shape[-1]
    Td = temb.shape[-1]
    return pl.pallas_call(
        _resnet_kernel,
        out_shape=jax.ShapeDtypeStruct((B, T, Cout), jnp.float32),
        grid=(B,),
        in_specs=[pl.BlockSpec((1, T, Cin), lambda b: (b, 0, 0)),
                  pl.BlockSpec((1, T, 1), lambda b: (b, 0, 0)),
                  pl.BlockSpec((1, 1, Td), lambda b: (b, 0, 0)),
                  _const_spec(p['conv1_w']), _const_spec(p['conv1_b']),
                  _const_spec(p['gn1_w']), _const_spec(p['gn1_b']),
                  _const_spec(p['mlp_w']), _const_spec(p['mlp_b']),
                  _const_spec(p['conv2_w']), _const_spec(p['conv2_b']),
                  _const_spec(p['gn2_w']), _const_spec(p['gn2_b']),
                  _const_spec(p['res_w']), _const_spec(p['res_b']),
                  _const_spec(p['gmat'])],
        out_specs=pl.BlockSpec((1, T, Cout), lambda b: (b, 0, 0)),
        scratch_shapes=[pltpu.VMEM((T + 2, Cin), jnp.float32),
                        pltpu.VMEM((T + 2, Cout), jnp.float32)],
        compiler_params=pltpu.CompilerParams(dimension_semantics=("parallel",)),
    )(x, mask_col, temb,
      p['conv1_w'], p['conv1_b'], p['gn1_w'], p['gn1_b'],
      p['mlp_w'], p['mlp_b'],
      p['conv2_w'], p['conv2_b'], p['gn2_w'], p['gn2_b'],
      p['res_w'], p['res_b'], p['gmat'])


def transformer_block(p, x, mask_col, mask_row):
    B, T, C = x.shape
    return pl.pallas_call(
        _transformer_kernel,
        out_shape=jax.ShapeDtypeStruct((B, T, C), jnp.float32),
        grid=(B,),
        in_specs=[pl.BlockSpec((1, T, C), lambda b: (b, 0, 0)),
                  pl.BlockSpec((1, T, 1), lambda b: (b, 0, 0)),
                  pl.BlockSpec((1, 1, T), lambda b: (b, 0, 0)),
                  _const_spec(p['n1_w']), _const_spec(p['n1_b']),
                  _const_spec(p['wq']), _const_spec(p['wk']), _const_spec(p['wv']),
                  _const_spec(p['wo']), _const_spec(p['out_b']),
                  _const_spec(p['n3_w']), _const_spec(p['n3_b']),
                  _const_spec(p['ff_in_w']), _const_spec(p['ff_in_b']),
                  _const_spec(p['ff_alpha']), _const_spec(p['ff_rbeta']),
                  _const_spec(p['ff_out_w']), _const_spec(p['ff_out_b'])],
        out_specs=pl.BlockSpec((1, T, C), lambda b: (b, 0, 0)),
        compiler_params=pltpu.CompilerParams(dimension_semantics=("parallel",)),
    )(x, mask_col, mask_row,
      p['n1_w'], p['n1_b'], p['wq'], p['wk'], p['wv'], p['wo'], p['out_b'],
      p['n3_w'], p['n3_b'], p['ff_in_w'], p['ff_in_b'],
      p['ff_alpha'], p['ff_rbeta'], p['ff_out_w'], p['ff_out_b'])


def conv1d_block(x, mask_col, w, b, lp=1, rp=1):
    """Masked conv1d, channels-last, arbitrary (lp, rp) zero time padding."""
    B, T, Cin = x.shape
    K, _, Cout = w.shape
    T_out = T + lp + rp - (K - 1)
    return pl.pallas_call(
        functools.partial(_conv_kernel, lp),
        out_shape=jax.ShapeDtypeStruct((B, T_out, Cout), jnp.float32),
        grid=(B,),
        in_specs=[pl.BlockSpec((1, T, Cin), lambda b: (b, 0, 0)),
                  pl.BlockSpec((1, T, 1), lambda b: (b, 0, 0)),
                  _const_spec(w), _const_spec(b)],
        out_specs=pl.BlockSpec((1, T_out, Cout), lambda b: (b, 0, 0)),
        scratch_shapes=[pltpu.VMEM((lp + T + rp, Cin), jnp.float32)],
        compiler_params=pltpu.CompilerParams(dimension_semantics=("parallel",)),
    )(x, mask_col, w, b)


def final_block(p, x, mask_col):
    B, T, C = x.shape
    Co = p['proj_b'].shape[-1]
    return pl.pallas_call(
        _final_kernel,
        out_shape=jax.ShapeDtypeStruct((B, T, Co), jnp.float32),
        grid=(B,),
        in_specs=[pl.BlockSpec((1, T, C), lambda b: (b, 0, 0)),
                  pl.BlockSpec((1, T, 1), lambda b: (b, 0, 0)),
                  _const_spec(p['conv_w']), _const_spec(p['conv_b']),
                  _const_spec(p['gn_w']), _const_spec(p['gn_b']),
                  _const_spec(p['gmat']),
                  _const_spec(p['proj_w']), _const_spec(p['proj_b'])],
        out_specs=pl.BlockSpec((1, T, Co), lambda b: (b, 0, 0)),
        scratch_shapes=[pltpu.VMEM((T + 2, C), jnp.float32)],
        compiler_params=pltpu.CompilerParams(dimension_semantics=("parallel",)),
    )(x, mask_col, p['conv_w'], p['conv_b'], p['gn_w'], p['gn_b'], p['gmat'],
      p['proj_w'], p['proj_b'])


# ----------------------------------------------------------------------------
# Cheap JAX glue
# ----------------------------------------------------------------------------

def sinusoidal_pos_emb(t, dim, scale=1000.0):
    half = dim // 2
    freqs = jnp.exp(jnp.arange(half, dtype=jnp.float32) *
                    (-math.log(10000.0) / (half - 1)))
    args = scale * t[:, None] * freqs[None, :]
    return jnp.concatenate([jnp.sin(args), jnp.cos(args)], axis=-1)


# ----------------------------------------------------------------------------
# Parameter construction (deterministic, kernel-ready layouts, bf16 matmul weights)
# ----------------------------------------------------------------------------

_ROOT_KEY = jax.random.PRNGKey(0)
_PCOUNT = [0]


def _rand(shape, fan_in, dtype=MXU_DTYPE):
    _PCOUNT[0] += 1
    k = jax.random.fold_in(_ROOT_KEY, _PCOUNT[0])
    std = math.sqrt(2.0 / fan_in)                       # kaiming_normal_('relu')
    return (std * jax.random.normal(k, shape, jnp.float32)).astype(dtype)


def _zeros(*shape):
    return jnp.zeros(shape, jnp.float32)


def _ones(*shape):
    return jnp.ones(shape, jnp.float32)


def make_gmat(C, groups=8):
    cg = C // groups
    gid = np.arange(C) // cg
    return jnp.asarray((gid[:, None] == gid[None, :]).astype(np.float32) / cg)


def make_resnet_params(cin, cout, tdim, groups=8):
    return dict(
        conv1_w=_rand((3, cin, cout), cin * 3), conv1_b=_zeros(1, cout),
        gn1_w=_ones(1, cout), gn1_b=_zeros(1, cout),
        mlp_w=_rand((tdim, cout), tdim), mlp_b=_zeros(1, cout),
        conv2_w=_rand((3, cout, cout), cout * 3), conv2_b=_zeros(1, cout),
        gn2_w=_ones(1, cout), gn2_b=_zeros(1, cout),
        res_w=_rand((cin, cout), cin), res_b=_zeros(1, cout),
        gmat=make_gmat(cout, groups))


def make_transformer_params(dim, heads, hd):
    ffi = dim * 4
    return dict(
        n1_w=_ones(1, dim), n1_b=_zeros(1, dim),
        wq=_rand((heads, dim, hd), dim), wk=_rand((heads, dim, hd), dim),
        wv=_rand((heads, dim, hd), dim),
        wo=_rand((heads, hd, dim), heads * hd), out_b=_zeros(1, dim),
        n3_w=_ones(1, dim), n3_b=_zeros(1, dim),
        ff_in_w=_rand((dim, ffi), dim), ff_in_b=_zeros(1, ffi),
        ff_alpha=_ones(1, ffi),                                  # exp(0)
        ff_rbeta=jnp.full((1, ffi), 1.0 / (1.0 + 1e-9), jnp.float32),
        ff_out_w=_rand((ffi, dim), ffi), ff_out_b=_zeros(1, dim))


def make_transpose_conv_params(c):
    # PyTorch ConvTranspose1d(c, c, 4, stride=2, padding=1) weight (Cin, Cout, 4),
    # repacked polyphase into one K=3 conv producing [even | odd] phases on lanes.
    wt = _rand((c, c, 4), c * 4, dtype=jnp.float32)
    zeros = jnp.zeros((c, c), jnp.float32)
    wc = jnp.stack([
        jnp.concatenate([wt[:, :, 3], zeros], axis=-1),          # window row j-1
        jnp.concatenate([wt[:, :, 1], wt[:, :, 2]], axis=-1),    # window row j
        jnp.concatenate([zeros, wt[:, :, 0]], axis=-1),          # window row j+1
    ], axis=0).astype(MXU_DTYPE)                                  # (3, C, 2C)
    b = _zeros(1, c)
    bc = jnp.concatenate([b, b], axis=-1)                         # (1, 2C)
    return wc, bc


def make_decoder_params(in_channels, out_channels, channels=(32, 32),
                        attention_head_dim=16, n_blocks=1, num_mid_blocks=1,
                        num_heads=2):
    channels = tuple(channels)
    tdim = channels[0] * 4
    p = dict(in_channels=in_channels, out_channels=out_channels,
             time_mlp=dict(w1=_rand((in_channels, tdim), in_channels),
                           b1=_zeros(1, tdim),
                           w2=_rand((tdim, tdim), tdim), b2=_zeros(1, tdim)))

    down = []
    out_ch = in_channels
    for i, ch in enumerate(channels):
        in_ch, out_ch = out_ch, ch
        is_last = i == len(channels) - 1
        down.append(dict(
            resnet=make_resnet_params(in_ch, out_ch, tdim),
            transformers=[make_transformer_params(out_ch, num_heads,
                                                  attention_head_dim)
                          for _ in range(n_blocks)],
            downsample_type=('conv' if is_last else 'down'),
            down_w=_rand((3, out_ch, out_ch), out_ch * 3),
            down_b=_zeros(1, out_ch)))
    p['down_blocks'] = down

    mid = []
    for _ in range(num_mid_blocks):
        mid.append(dict(
            resnet=make_resnet_params(channels[-1], out_ch, tdim),
            transformers=[make_transformer_params(out_ch, num_heads,
                                                  attention_head_dim)
                          for _ in range(n_blocks)]))
    p['mid_blocks'] = mid

    rch = channels[::-1] + (channels[0],)
    up = []
    for i in range(len(rch) - 1):
        in_ch = rch[i] * 2
        out_ch_u = rch[i + 1]
        is_last = i == len(rch) - 2
        blk = dict(resnet=make_resnet_params(in_ch, out_ch_u, tdim),
                   transformers=[make_transformer_params(out_ch_u, num_heads,
                                                         attention_head_dim)
                                 for _ in range(n_blocks)],
                   upsample_type=('conv' if is_last else 'transpose'))
        if is_last:
            blk['up_w'] = _rand((3, out_ch_u, out_ch_u), out_ch_u * 3)
            blk['up_b'] = _zeros(1, out_ch_u)
        else:
            blk['up_w'], blk['up_b'] = make_transpose_conv_params(out_ch_u)
        up.append(blk)
    p['up_blocks'] = up

    p['final'] = dict(conv_w=_rand((3, rch[-1], rch[-1]), rch[-1] * 3),
                      conv_b=_zeros(1, rch[-1]),
                      gn_w=_ones(1, rch[-1]), gn_b=_zeros(1, rch[-1]),
                      gmat=make_gmat(rch[-1]),
                      proj_w=_rand((rch[-1], out_channels), rch[-1]),
                      proj_b=_zeros(1, out_channels))
    return p


# ----------------------------------------------------------------------------
# ConditionalDecoder.forward
# ----------------------------------------------------------------------------

def conditional_decoder_forward(params, x, mask, mu, t, spks=None, cond=None):
    B, F, T = x.shape

    # time embedding: sinusoidal (trig glue) -> fused MLP kernel (silu + mish fused)
    emb = sinusoidal_pos_emb(t, params['in_channels'])
    temb = time_mlp(params['time_mlp'], emb)[:, None, :]          # (B, 1, Td)

    # pack inputs along the channel axis, channels-last layout (B, T, C)
    parts = [x.transpose(0, 2, 1), mu.transpose(0, 2, 1)]
    if spks is not None:
        parts.append(jnp.broadcast_to(spks[:, None, :], (B, T, spks.shape[-1])))
    if cond is not None:
        parts.append(cond.transpose(0, 2, 1))
    h = jnp.concatenate(parts, axis=-1)

    mc = mask.transpose(0, 2, 1)                                  # (B, T, 1)
    mr = mask                                                     # (B, 1, T)
    hiddens = []
    mask_stack = [(mc, mr)]

    # ---- down path ----
    for blk in params['down_blocks']:
        mc, mr = mask_stack[-1]
        h = resnet_block(blk['resnet'], h, mc, temb)
        for tp in blk['transformers']:
            h = transformer_block(tp, h, mc, mr)
        hiddens.append(h)
        hc = conv1d_block(h, mc, blk['down_w'], blk['down_b'])
        if blk['downsample_type'] == 'down':
            hc = hc[:, ::2, :]                                    # stride-2 downsample
        h = hc
        mask_stack.append((mc[:, ::2, :], mr[:, :, ::2]))
    mask_stack = mask_stack[:-1]

    # ---- mid path ----
    mc, mr = mask_stack[-1]
    for blk in params['mid_blocks']:
        h = resnet_block(blk['resnet'], h, mc, temb)
        for tp in blk['transformers']:
            h = transformer_block(tp, h, mc, mr)

    # ---- up path ----
    for blk in params['up_blocks']:
        mc, mr = mask_stack.pop()
        skip = hiddens.pop()
        h = jnp.concatenate([h[:, :skip.shape[1], :], skip], axis=-1)
        h = resnet_block(blk['resnet'], h, mc, temb)
        for tp in blk['transformers']:
            h = transformer_block(tp, h, mc, mr)
        if blk['upsample_type'] == 'transpose':
            y = conv1d_block(h, mc, blk['up_w'], blk['up_b'])     # [even|odd] phases
            Bh, Th, CC = y.shape
            C2 = CC // 2
            h = y.reshape(Bh, Th, 2, C2).reshape(Bh, Th * 2, C2)  # interleave phases
        else:
            h = conv1d_block(h, mc, blk['up_w'], blk['up_b'])

    out = final_block(params['final'], h, mc)                     # (B, T, out_ch)
    return out.transpose(0, 2, 1)                                 # (B, out_ch, T)


# ----------------------------------------------------------------------------
# Main
# ----------------------------------------------------------------------------

if __name__ == "__main__":
    key = jax.random.PRNGKey(0)
    kx, kmu, kspk, kt = jax.random.split(key, 4)

    B, F, T, SPK = 2, 8, 16, 8       # batch, mel-channels, time, speaker-emb dim
    x = jax.random.normal(kx, (B, F, T), jnp.float32)
    mu = jax.random.normal(kmu, (B, F, T), jnp.float32)
    spks = jax.random.normal(kspk, (B, SPK), jnp.float32)
    t = jax.random.uniform(kt, (B,), jnp.float32)
    mask = jnp.ones((B, 1, T), jnp.float32).at[1, 0, 12:].set(0.0)

    params = make_decoder_params(in_channels=2 * F + SPK, out_channels=F,
                                 channels=(32, 32), attention_head_dim=16,
                                 n_blocks=1, num_mid_blocks=1, num_heads=2)

    fwd = jax.jit(functools.partial(conditional_decoder_forward, params))
    out = jax.block_until_ready(fwd(x, mask, mu, t, spks))

    assert out.shape == (B, F, T), out.shape
    assert bool(jnp.all(jnp.isfinite(out)))
    print("KERNEL_OK")
</pallas_src>

<mosaic_0001>
module attributes {stable_mosaic.version = 11 : i64} {
  func.func @_time_mlp_kernel(%arg0: i32, %arg1: memref<2x24xf32, #tpu.memory_space<vmem>>, %arg2: memref<24x128xbf16, #tpu.memory_space<vmem>>, %arg3: memref<1x128xf32, #tpu.memory_space<vmem>>, %arg4: memref<128x128xbf16, #tpu.memory_space<vmem>>, %arg5: memref<1x128xf32, #tpu.memory_space<vmem>>, %arg6: memref<2x128xf32, #tpu.memory_space<vmem>>) attributes {dimension_semantics = [#tpu.dimension_semantics<arbitrary>], iteration_bounds = array<i64: 1>, scalar_prefetch = 0 : i64, scratch_operands = 0 : i64, tpu.core_type = #tpu.core_type<tc>, window_params = [{pipeline_mode = #tpu.pipeline_mode<synchronous>, transform_indices = @transform_0, window_bounds = array<i64: 2, 24>}, {pipeline_mode = #tpu.pipeline_mode<synchronous>, transform_indices = @transform_1, window_bounds = array<i64: 24, 128>}, {pipeline_mode = #tpu.pipeline_mode<synchronous>, transform_indices = @transform_2, window_bounds = array<i64: 1, 128>}, {pipeline_mode = #tpu.pipeline_mode<synchronous>, transform_indices = @transform_3, window_bounds = array<i64: 128, 128>}, {pipeline_mode = #tpu.pipeline_mode<synchronous>, transform_indices = @transform_4, window_bounds = array<i64: 1, 128>}, {pipeline_mode = #tpu.pipeline_mode<synchronous>, transform_indices = @transform_5, window_bounds = array<i64: 2, 128>}]} {
    %c0 = arith.constant 0 : index
    %c0_0 = arith.constant 0 : index
    %0 = vector.load %arg1[%c0, %c0_0] : memref<2x24xf32, #tpu.memory_space<vmem>>, vector<2x24xf32>
    %1 = arith.truncf %0 : vector<2x24xf32> to vector<2x24xbf16>
    %c0_1 = arith.constant 0 : index
    %c0_2 = arith.constant 0 : index
    %2 = vector.load %arg2[%c0_1, %c0_2] : memref<24x128xbf16, #tpu.memory_space<vmem>>, vector<24x128xbf16>
    %cst = arith.constant dense<0.000000e+00> : vector<2x128xf32>
    %3 = tpu.matmul %1, %2, %cst {dimension_numbers = #tpu.dot_dimension_numbers<[1], [0], [0], [1], [0, 0, 1, 1], [], []>} : vector<2x24xbf16>, vector<24x128xbf16>, vector<2x128xf32> -> vector<2x128xf32>
    %c0_3 = arith.constant 0 : index
    %c0_4 = arith.constant 0 : index
    %4 = vector.load %arg3[%c0_3, %c0_4] : memref<1x128xf32, #tpu.memory_space<vmem>>, vector<1x128xf32>
    %5 = vector.broadcast %4 : vector<1x128xf32> to vector<2x128xf32>
    %6 = arith.addf %3, %5 : vector<2x128xf32>
    %cst_5 = arith.constant 0.000000e+00 : f32
    %7 = vector.broadcast %cst_5 : f32 to vector<2x128xf32>
    %8 = arith.subf %7, %6 : vector<2x128xf32>
    %9 = math.exp %8 : vector<2x128xf32>
    %cst_6 = arith.constant 1.000000e+00 : f32
    %10 = vector.broadcast %cst_6 : f32 to vector<2x128xf32>
    %11 = arith.addf %10, %9 : vector<2x128xf32>
    %12 = arith.divf %6, %11 : vector<2x128xf32>
    %13 = arith.truncf %12 : vector<2x128xf32> to vector<2x128xbf16>
    %c0_7 = arith.constant 0 : index
    %c0_8 = arith.constant 0 : index
    %14 = vector.load %arg4[%c0_7, %c0_8] : memref<128x128xbf16, #tpu.memory_space<vmem>>, vector<128x128xbf16>
    %cst_9 = arith.constant dense<0.000000e+00> : vector<2x128xf32>
    %15 = tpu.matmul %13, %14, %cst_9 {dimension_numbers = #tpu.dot_dimension_numbers<[1], [0], [0], [1], [0, 0, 1, 1], [], []>} : vector<2x128xbf16>, vector<128x128xbf16>, vector<2x128xf32> -> vector<2x128xf32>
    %c0_10 = arith.constant 0 : index
    %c0_11 = arith.constant 0 : index
    %16 = vector.load %arg5[%c0_10, %c0_11] : memref<1x128xf32, #tpu.memory_space<vmem>>, vector<1x128xf32>
    %17 = vector.broadcast %16 : vector<1x128xf32> to vector<2x128xf32>
    %18 = arith.addf %15, %17 : vector<2x128xf32>
    %cst_12 = arith.constant 3.000000e+01 : f32
    %19 = vector.broadcast %cst_12 : f32 to vector<2x128xf32>
    %20 = arith.minimumf %18, %19 : vector<2x128xf32>
    %21 = math.exp %20 : vector<2x128xf32>
    %cst_13 = arith.constant 2.000000e+00 : f32
    %22 = vector.broadcast %cst_13 : f32 to vector<2x128xf32>
    %23 = arith.addf %21, %22 : vector<2x128xf32>
    %24 = arith.mulf %21, %23 : vector<2x128xf32>
    %25 = arith.mulf %18, %24 : vector<2x128xf32>
    %cst_14 = arith.constant 2.000000e+00 : f32
    %26 = vector.broadcast %cst_14 : f32 to vector<2x128xf32>
    %27 = arith.addf %24, %26 : vector<2x128xf32>
    %28 = arith.divf %25, %27 : vector<2x128xf32>
    %c0_15 = arith.constant 0 : index
    %c0_16 = arith.constant 0 : index
    %29 = vector.load %arg6[%c0_15, %c0_16] : memref<2x128xf32, #tpu.memory_space<vmem>>, vector<2x128xf32>
    tpu.vector_store %arg6[%c0_15, %c0_16], %28 {strides = array<i32>} : memref<2x128xf32, #tpu.memory_space<vmem>>, vector<2x128xf32>,
    return
  }
  func.func @transform_0(%arg0: i32) -> (i32, i32) {
    %c0_i32 = arith.constant 0 : i32
    %c0_i32_0 = arith.constant 0 : i32
    %c0_i32_1 = arith.constant 0 : i32
    return %c0_i32, %c0_i32_0 : i32, i32
  }
  func.func @transform_1(%arg0: i32) -> (i32, i32) {
    %c0_i32 = arith.constant 0 : i32
    %c0_i32_0 = arith.constant 0 : i32
    %c0_i32_1 = arith.constant 0 : i32
    return %c0_i32, %c0_i32_0 : i32, i32
  }
  func.func @transform_2(%arg0: i32) -> (i32, i32) {
    %c0_i32 = arith.constant 0 : i32
    %c0_i32_0 = arith.constant 0 : i32
    %c0_i32_1 = arith.constant 0 : i32
    return %c0_i32, %c0_i32_0 : i32, i32
  }
  func.func @transform_3(%arg0: i32) -> (i32, i32) {
    %c0_i32 = arith.constant 0 : i32
    %c0_i32_0 = arith.constant 0 : i32
    %c0_i32_1 = arith.constant 0 : i32
    return %c0_i32, %c0_i32_0 : i32, i32
  }
  func.func @transform_4(%arg0: i32) -> (i32, i32) {
    %c0_i32 = arith.constant 0 : i32
    %c0_i32_0 = arith.constant 0 : i32
    %c0_i32_1 = arith.constant 0 : i32
    return %c0_i32, %c0_i32_0 : i32, i32
  }
  func.func @transform_5(%arg0: i32) -> (i32, i32) {
    %c0_i32 = arith.constant 0 : i32
    %c0_i32_0 = arith.constant 0 : i32
    %c0_i32_1 = arith.constant 0 : i32
    return %c0_i32, %c0_i32_0 : i32, i32
  }
}

module attributes {stable_mosaic.version = 11 : i64} {
  func.func @_conv_kernel(%arg0: i32, %arg1: memref<1x16x32xf32, #tpu.memory_space<vmem>>, %arg2: memref<1x16x1xf32, #tpu.memory_space<vmem>>, %arg3: memref<3x32x32xbf16, #tpu.memory_space<vmem>>, %arg4: memref<1x32xf32, #tpu.memory_space<vmem>>, %arg5: memref<1x16x32xf32, #tpu.memory_space<vmem>>, %arg6: memref<18x32xf32, #tpu.memory_space<vmem>>) attributes {dimension_semantics = [#tpu.dimension_semantics<parallel>], iteration_bounds = array<i64: 2>, scalar_prefetch = 0 : i64, scratch_operands = 1 : i64, tpu.core_type = #tpu.core_type<tc>, window_params = [{transform_indices = @transform_0, window_bounds = array<i64: 1, 16, 32>}, {transform_indices = @transform_1, window_bounds = array<i64: 1, 16, 1>}, {pipeline_mode = #tpu.pipeline_mode<synchronous>, transform_indices = @transform_2, window_bounds = array<i64: 3, 32, 32>}, {pipeline_mode = #tpu.pipeline_mode<synchronous>, transform_indices = @transform_3, window_bounds = array<i64: 1, 32>}, {transform_indices = @transform_4, window_bounds = array<i64: 1, 16, 32>}]} {
    %c0 = arith.constant 0 : index
    %c0_0 = arith.constant 0 : index
    %c0_1 = arith.constant 0 : index
    %0 = vector.load %arg1[%c0, %c0_0, %c0_1] : memref<1x16x32xf32, #tpu.memory_space<vmem>>, vector<1x16x32xf32>
    %1 = vector.shape_cast %0 : vector<1x16x32xf32> to vector<16x32xf32>
    %c0_2 = arith.constant 0 : index
    %c0_3 = arith.constant 0 : index
    %c0_4 = arith.constant 0 : index
    %2 = vector.load %arg2[%c0_2, %c0_3, %c0_4] : memref<1x16x1xf32, #tpu.memory_space<vmem>>, vector<1x16x1xf32>
    %3 = vector.shape_cast %2 : vector<1x16x1xf32> to vector<16x1xf32>
    %4 = vector.broadcast %3 : vector<16x1xf32> to vector<16x32xf32>
    %5 = arith.mulf %1, %4 : vector<16x32xf32>
    %cst = arith.constant 0.000000e+00 : f32
    %6 = vector.broadcast %cst : f32 to vector<18x32xf32>
    %c0_5 = arith.constant 0 : index
    %c0_6 = arith.constant 0 : index
    %7 = vector.load %arg6[%c0_5, %c0_6] : memref<18x32xf32, #tpu.memory_space<vmem>>, vector<18x32xf32>
    tpu.vector_store %arg6[%c0_5, %c0_6], %6 {strides = array<i32>} : memref<18x32xf32, #tpu.memory_space<vmem>>, vector<18x32xf32>,
    %c1 = arith.constant 1 : index
    %c0_7 = arith.constant 0 : index
    %8 = vector.load %arg6[%c1, %c0_7] : memref<18x32xf32, #tpu.memory_space<vmem>>, vector<16x32xf32>
    tpu.vector_store %arg6[%c1, %c0_7], %5 {strides = array<i32>} : memref<18x32xf32, #tpu.memory_space<vmem>>, vector<16x32xf32>,
    %c0_8 = arith.constant 0 : index
    %c0_9 = arith.constant 0 : index
    %9 = vector.load %arg6[%c0_8, %c0_9] : memref<18x32xf32, #tpu.memory_space<vmem>>, vector<16x32xf32>
    %10 = arith.truncf %9 : vector<16x32xf32> to vector<16x32xbf16>
    %c0_10 = arith.constant 0 : index
    %c0_11 = arith.constant 0 : index
    %c0_12 = arith.constant 0 : index
    %11 = vector.load %arg3[%c0_10, %c0_11, %c0_12] : memref<3x32x32xbf16, #tpu.memory_space<vmem>>, vector<1x32x32xbf16>
    %12 = vector.shape_cast %11 : vector<1x32x32xbf16> to vector<32x32xbf16>
    %cst_13 = arith.constant dense<0.000000e+00> : vector<16x32xf32>
    %13 = tpu.matmul %10, %12, %cst_13 {dimension_numbers = #tpu.dot_dimension_numbers<[1], [0], [0], [1], [0, 0, 1, 1], [], []>} : vector<16x32xbf16>, vector<32x32xbf16>, vector<16x32xf32> -> vector<16x32xf32>
    %c1_14 = arith.constant 1 : index
    %c0_15 = arith.constant 0 : index
    %14 = vector.load %arg6[%c1_14, %c0_15] : memref<18x32xf32, #tpu.memory_space<vmem>>, vector<16x32xf32>
    %15 = arith.truncf %14 : vector<16x32xf32> to vector<16x32xbf16>
    %c1_16 = arith.constant 1 : index
    %c0_17 = arith.constant 0 : index
    %c0_18 = arith.constant 0 : index
    %16 = vector.load %arg3[%c1_16, %c0_17, %c0_18] : memref<3x32x32xbf16, #tpu.memory_space<vmem>>, vector<1x32x32xbf16>
    %17 = vector.shape_cast %16 : vector<1x32x32xbf16> to vector<32x32xbf16>
    %cst_19 = arith.constant dense<0.000000e+00> : vector<16x32xf32>
    %18 = tpu.matmul %15, %17, %cst_19 {dimension_numbers = #tpu.dot_dimension_numbers<[1], [0], [0], [1], [0, 0, 1, 1], [], []>} : vector<16x32xbf16>, vector<32x32xbf16>, vector<16x32xf32> -> vector<16x32xf32>
    %19 = arith.addf %13, %18 : vector<16x32xf32>
    %c2 = arith.constant 2 : index
    %c0_20 = arith.constant 0 : index
    %20 = vector.load %arg6[%c2, %c0_20] : memref<18x32xf32, #tpu.memory_space<vmem>>, vector<16x32xf32>
    %21 = arith.truncf %20 : vector<16x32xf32> to vector<16x32xbf16>
    %c2_21 = arith.constant 2 : index
    %c0_22 = arith.constant 0 : index
    %c0_23 = arith.constant 0 : index
    %22 = vector.load %arg3[%c2_21, %c0_22, %c0_23] : memref<3x32x32xbf16, #tpu.memory_space<vmem>>, vector<1x32x32xbf16>
    %23 = vector.shape_cast %22 : vector<1x32x32xbf16> to vector<32x32xbf16>
    %cst_24 = arith.constant dense<0.000000e+00> : vector<16x32xf32>
    %24 = tpu.matmul %21, %23, %cst_24 {dimension_numbers = #tpu.dot_dimension_numbers<[1], [0], [0], [1], [0, 0, 1, 1], [], []>} : vector<16x32xbf16>, vector<32x32xbf16>, vector<16x32xf32> -> vector<16x32xf32>
    %25 = arith.addf %19, %24 : vector<16x32xf32>
    %c0_25 = arith.constant 0 : index
    %c0_26 = arith.constant 0 : index
    %26 = vector.load %arg4[%c0_25, %c0_26] : memref<1x32xf32, #tpu.memory_space<vmem>>, vector<1x32xf32>
    %27 = vector.broadcast %26 : vector<1x32xf32> to vector<16x32xf32>
    %28 = arith.addf %25, %27 : vector<16x32xf32>
    %c0_27 = arith.constant 0 : index
    %c0_28 = arith.constant 0 : index
    %c0_29 = arith.constant 0 : index
    %29 = vector.load %arg5[%c0_27, %c0_28, %c0_29] : memref<1x16x32xf32, #tpu.memory_space<vmem>>, vector<1x16x32xf32>
    %30 = vector.shape_cast %29 : vector<1x16x32xf32> to vector<16x32xf32>
    %31 = vector.shape_cast %28 : vector<16x32xf32> to vector<1x16x32xf32>
    tpu.vector_store %arg5[%c0_27, %c0_28, %c0_29], %31 {strides = array<i32>} : memref<1x16x32xf32, #tpu.memory_space<vmem>>, vector<1x16x32xf32>,
    return
  }
  func.func @transform_0(%arg0: i32) -> (i32, i32, i32) {
    %c0_i32 = arith.constant 0 : i32
    %c0_i32_0 = arith.constant 0 : i32
    %c0_i32_1 = arith.constant 0 : i32
    return %arg0, %c0_i32, %c0_i32_0 : i32, i32, i32
  }
  func.func @transform_1(%arg0: i32) -> (i32, i32, i32) {
    %c0_i32 = arith.constant 0 : i32
    %c0_i32_0 = arith.constant 0 : i32
    %c0_i32_1 = arith.constant 0 : i32
    return %arg0, %c0_i32, %c0_i32_0 : i32, i32, i32
  }
  func.func @transform_2(%arg0: i32) -> (i32, i32, i32) {
    %c0_i32 = arith.constant 0 : i32
    %c0_i32_0 = arith.constant 0 : i32
    %c0_i32_1 = arith.constant 0 : i32
    %c0_i32_2 = arith.constant 0 : i32
    return %c0_i32, %c0_i32_0, %c0_i32_1 : i32, i32, i32
  }
  func.func @transform_3(%arg0: i32) -> (i32, i32) {
    %c0_i32 = arith.constant 0 : i32
    %c0_i32_0 = arith.constant 0 : i32
    %c0_i32_1 = arith.constant 0 : i32
    return %c0_i32, %c0_i32_0 : i32, i32
  }
  func.func @transform_4(%arg0: i32) -> (i32, i32, i32) {
    %c0_i32 = arith.constant 0 : i32
    %c0_i32_0 = arith.constant 0 : i32
    %c0_i32_1 = arith.constant 0 : i32
    return %arg0, %c0_i32, %c0_i32_0 : i32, i32, i32
  }
}

module attributes {stable_mosaic.version = 11 : i64} {
  func.func @_transformer_kernel(%arg0: i32, %arg1: memref<1x16x32xf32, #tpu.memory_space<vmem>>, %arg2: memref<1x16x1xf32, #tpu.memory_space<vmem>>, %arg3: memref<1x1x16xf32, #tpu.memory_space<vmem>>, %arg4: memref<1x32xf32, #tpu.memory_space<vmem>>, %arg5: memref<1x32xf32, #tpu.memory_space<vmem>>, %arg6: memref<2x32x16xbf16, #tpu.memory_space<vmem>>, %arg7: memref<2x32x16xbf16, #tpu.memory_space<vmem>>, %arg8: memref<2x32x16xbf16, #tpu.memory_space<vmem>>, %arg9: memref<2x16x32xbf16, #tpu.memory_space<vmem>>, %arg10: memref<1x32xf32, #tpu.memory_space<vmem>>, %arg11: memref<1x32xf32, #tpu.memory_space<vmem>>, %arg12: memref<1x32xf32, #tpu.memory_space<vmem>>, %arg13: memref<32x128xbf16, #tpu.memory_space<vmem>>, %arg14: memref<1x128xf32, #tpu.memory_space<vmem>>, %arg15: memref<1x128xf32, #tpu.memory_space<vmem>>, %arg16: memref<1x128xf32, #tpu.memory_space<vmem>>, %arg17: memref<128x32xbf16, #tpu.memory_space<vmem>>, %arg18: memref<1x32xf32, #tpu.memory_space<vmem>>, %arg19: memref<1x16x32xf32, #tpu.memory_space<vmem>>) attributes {dimension_semantics = [#tpu.dimension_semantics<parallel>], iteration_bounds = array<i64: 2>, scalar_prefetch = 0 : i64, scratch_operands = 0 : i64, tpu.core_type = #tpu.core_type<tc>, window_params = [{transform_indices = @transform_0, window_bounds = array<i64: 1, 16, 32>}, {transform_indices = @transform_1, window_bounds = array<i64: 1, 16, 1>}, {transform_indices = @transform_2, window_bounds = array<i64: 1, 1, 16>}, {pipeline_mode = #tpu.pipeline_mode<synchronous>, transform_indices = @transform_3, window_bounds = array<i64: 1, 32>}, {pipeline_mode = #tpu.pipeline_mode<synchronous>, transform_indices = @transform_4, window_bounds = array<i64: 1, 32>}, {pipeline_mode = #tpu.pipeline_mode<synchronous>, transform_indices = @transform_5, window_bounds = array<i64: 2, 32, 16>}, {pipeline_mode = #tpu.pipeline_mode<synchronous>, transform_indices = @transform_6, window_bounds = array<i64: 2, 32, 16>}, {pipeline_mode = #tpu.pipeline_mode<synchronous>, transform_indices = @transform_7, window_bounds = array<i64: 2, 32, 16>}, {pipeline_mode = #tpu.pipeline_mode<synchronous>, transform_indices = @transform_8, window_bounds = array<i64: 2, 16, 32>}, {pipeline_mode = #tpu.pipeline_mode<synchronous>, transform_indices = @transform_9, window_bounds = array<i64: 1, 32>}, {pipeline_mode = #tpu.pipeline_mode<synchronous>, transform_indices = @transform_10, window_bounds = array<i64: 1, 32>}, {pipeline_mode = #tpu.pipeline_mode<synchronous>, transform_indices = @transform_11, window_bounds = array<i64: 1, 32>}, {pipeline_mode = #tpu.pipeline_mode<synchronous>, transform_indices = @transform_12, window_bounds = array<i64: 32, 128>}, {pipeline_mode = #tpu.pipeline_mode<synchronous>, transform_indices = @transform_13, window_bounds = array<i64: 1, 128>}, {pipeline_mode = #tpu.pipeline_mode<synchronous>, transform_indices = @transform_14, window_bounds = array<i64: 1, 128>}, {pipeline_mode = #tpu.pipeline_mode<synchronous>, transform_indices = @transform_15, window_bounds = array<i64: 1, 128>}, {pipeline_mode = #tpu.pipeline_mode<synchronous>, transform_indices = @transform_16, window_bounds = array<i64: 128, 32>}, {pipeline_mode = #tpu.pipeline_mode<synchronous>, transform_indices = @transform_17, window_bounds = array<i64: 1, 32>}, {transform_indices = @transform_18, window_bounds = array<i64: 1, 16, 32>}]} {
    %c0 = arith.constant 0 : index
    %c0_0 = arith.constant 0 : index
    %c0_1 = arith.constant 0 : index
    %0 = vector.load %arg1[%c0, %c0_0, %c0_1] : memref<1x16x32xf32, #tpu.memory_space<vmem>>, vector<1x16x32xf32>
    %1 = vector.shape_cast %0 : vector<1x16x32xf32> to vector<16x32xf32>
    %c0_2 = arith.constant 0 : index
    %c0_3 = arith.constant 0 : index
    %c0_4 = arith.constant 0 : index
    %2 = vector.load %arg2[%c0_2, %c0_3, %c0_4] : memref<1x16x1xf32, #tpu.memory_space<vmem>>, vector<1x16x1xf32>
    %3 = vector.shape_cast %2 : vector<1x16x1xf32> to vector<16x1xf32>
    %c0_5 = arith.constant 0 : index
    %c0_6 = arith.constant 0 : index
    %c0_7 = arith.constant 0 : index
    %4 = vector.load %arg3[%c0_5, %c0_6, %c0_7] : memref<1x1x16xf32, #tpu.memory_space<vmem>>, vector<1x1x16xf32>
    %5 = vector.shape_cast %4 : vector<1x1x16xf32> to vector<1x16xf32>
    %6 = vector.broadcast %3 : vector<16x1xf32> to vector<16x16xf32>
    %7 = vector.broadcast %5 : vector<1x16xf32> to vector<16x16xf32>
    %8 = arith.mulf %6, %7 : vector<16x16xf32>
    %c0_8 = arith.constant 0 : index
    %c0_9 = arith.constant 0 : index
    %9 = vector.load %arg4[%c0_8, %c0_9] : memref<1x32xf32, #tpu.memory_space<vmem>>, vector<1x32xf32>
    %c0_10 = arith.constant 0 : index
    %c0_11 = arith.constant 0 : index
    %10 = vector.load %arg5[%c0_10, %c0_11] : memref<1x32xf32, #tpu.memory_space<vmem>>, vector<1x32xf32>
    %cst = arith.constant dense<0.000000e+00> : vector<16xf32>
    %11 = vector.multi_reduction <add>, %1, %cst [1] : vector<16x32xf32> to vector<16xf32>
    %12 = vector.shape_cast %11 : vector<16xf32> to vector<16x1xf32>
    %cst_12 = arith.constant 3.200000e+01 : f32
    %13 = vector.broadcast %cst_12 : f32 to vector<16x1xf32>
    %14 = arith.divf %12, %13 : vector<16x1xf32>
    %15 = vector.broadcast %14 : vector<16x1xf32> to vector<16x32xf32>
    %16 = arith.subf %1, %15 : vector<16x32xf32>
    %17 = arith.mulf %16, %16 : vector<16x32xf32>
    %cst_13 = arith.constant dense<0.000000e+00> : vector<16xf32>
    %18 = vector.multi_reduction <add>, %17, %cst_13 [1] : vector<16x32xf32> to vector<16xf32>
    %19 = vector.shape_cast %18 : vector<16xf32> to vector<16x1xf32>
    %cst_14 = arith.constant 3.200000e+01 : f32
    %20 = vector.broadcast %cst_14 : f32 to vector<16x1xf32>
    %21 = arith.divf %19, %20 : vector<16x1xf32>
    %22 = vector.broadcast %14 : vector<16x1xf32> to vector<16x32xf32>
    %23 = arith.subf %1, %22 : vector<16x32xf32>
    %cst_15 = arith.constant 9.99999974E-6 : f32
    %24 = vector.broadcast %cst_15 : f32 to vector<16x1xf32>
    %25 = arith.addf %21, %24 : vector<16x1xf32>
    %26 = math.rsqrt %25 : vector<16x1xf32>
    %27 = vector.broadcast %26 : vector<16x1xf32> to vector<16x32xf32>
    %28 = arith.mulf %23, %27 : vector<16x32xf32>
    %29 = vector.broadcast %9 : vector<1x32xf32> to vector<16x32xf32>
    %30 = arith.mulf %28, %29 : vector<16x32xf32>
    %31 = vector.broadcast %10 : vector<1x32xf32> to vector<16x32xf32>
    %32 = arith.addf %30, %31 : vector<16x32xf32>
    %33 = arith.truncf %32 : vector<16x32xf32> to vector<16x32xbf16>
    %c0_16 = arith.constant 0 : index
    %c0_17 = arith.constant 0 : index
    %c0_18 = arith.constant 0 : index
    %34 = vector.load %arg6[%c0_16, %c0_17, %c0_18] : memref<2x32x16xbf16, #tpu.memory_space<vmem>>, vector<1x32x16xbf16>
    %35 = vector.shape_cast %34 : vector<1x32x16xbf16> to vector<32x16xbf16>
    %cst_19 = arith.constant dense<0.000000e+00> : vector<16x16xf32>
    %36 = tpu.matmul %33, %35, %cst_19 {dimension_numbers = #tpu.dot_dimension_numbers<[1], [0], [0], [1], [0, 0, 1, 1], [], []>} : vector<16x32xbf16>, vector<32x16xbf16>, vector<16x16xf32> -> vector<16x16xf32>
    %cst_20 = arith.constant 2.500000e-01 : f32
    %37 = vector.broadcast %cst_20 : f32 to vector<16x16xf32>
    %38 = arith.mulf %36, %37 : vector<16x16xf32>
    %c0_21 = arith.constant 0 : index
    %c0_22 = arith.constant 0 : index
    %c0_23 = arith.constant 0 : index
    %39 = vector.load %arg7[%c0_21, %c0_22, %c0_23] : memref<2x32x16xbf16, #tpu.memory_space<vmem>>, vector<1x32x16xbf16>
    %40 = vector.shape_cast %39 : vector<1x32x16xbf16> to vector<32x16xbf16>
    %cst_24 = arith.constant dense<0.000000e+00> : vector<16x16xf32>
    %41 = tpu.matmul %33, %40, %cst_24 {dimension_numbers = #tpu.dot_dimension_numbers<[1], [0], [0], [1], [0, 0, 1, 1], [], []>} : vector<16x32xbf16>, vector<32x16xbf16>, vector<16x16xf32> -> vector<16x16xf32>
    %c0_25 = arith.constant 0 : index
    %c0_26 = arith.constant 0 : index
    %c0_27 = arith.constant 0 : index
    %42 = vector.load %arg8[%c0_25, %c0_26, %c0_27] : memref<2x32x16xbf16, #tpu.memory_space<vmem>>, vector<1x32x16xbf16>
    %43 = vector.shape_cast %42 : vector<1x32x16xbf16> to vector<32x16xbf16>
    %cst_28 = arith.constant dense<0.000000e+00> : vector<16x16xf32>
    %44 = tpu.matmul %33, %43, %cst_28 {dimension_numbers = #tpu.dot_dimension_numbers<[1], [0], [0], [1], [0, 0, 1, 1], [], []>} : vector<16x32xbf16>, vector<32x16xbf16>, vector<16x16xf32> -> vector<16x16xf32>
    %45 = arith.truncf %38 : vector<16x16xf32> to vector<16x16xbf16>
    %46 = arith.truncf %41 : vector<16x16xf32> to vector<16x16xbf16>
    %cst_29 = arith.constant dense<0.000000e+00> : vector<16x16xf32>
    %47 = tpu.matmul %45, %46, %cst_29 {dimension_numbers = #tpu.dot_dimension_numbers<[1], [1], [0], [0], [0, 0, 1, 0], [], []>} : vector<16x16xbf16>, vector<16x16xbf16>, vector<16x16xf32> -> vector<16x16xf32>
    %48 = arith.addf %8, %47 : vector<16x16xf32>
    %cst_30 = arith.constant dense<0xFF800000> : vector<16xf32>
    %49 = vector.multi_reduction <maximumf>, %48, %cst_30 [1] : vector<16x16xf32> to vector<16xf32>
    %50 = vector.shape_cast %49 : vector<16xf32> to vector<16x1xf32>
    %51 = vector.broadcast %50 : vector<16x1xf32> to vector<16x16xf32>
    %52 = arith.subf %48, %51 : vector<16x16xf32>
    %53 = math.exp %52 : vector<16x16xf32>
    %cst_31 = arith.constant dense<0.000000e+00> : vector<16xf32>
    %54 = vector.multi_reduction <add>, %53, %cst_31 [1] : vector<16x16xf32> to vector<16xf32>
    %55 = vector.shape_cast %54 : vector<16xf32> to vector<16x1xf32>
    %56 = vector.broadcast %55 : vector<16x1xf32> to vector<16x16xf32>
    %57 = arith.divf %53, %56 : vector<16x16xf32>
    %58 = arith.truncf %57 : vector<16x16xf32> to vector<16x16xbf16>
    %59 = arith.truncf %44 : vector<16x16xf32> to vector<16x16xbf16>
    %cst_32 = arith.constant dense<0.000000e+00> : vector<16x16xf32>
    %60 = tpu.matmul %58, %59, %cst_32 {dimension_numbers = #tpu.dot_dimension_numbers<[1], [0], [0], [1], [0, 0, 1, 1], [], []>} : vector<16x16xbf16>, vector<16x16xbf16>, vector<16x16xf32> -> vector<16x16xf32>
    %61 = arith.truncf %60 : vector<16x16xf32> to vector<16x16xbf16>
    %c0_33 = arith.constant 0 : index
    %c0_34 = arith.constant 0 : index
    %c0_35 = arith.constant 0 : index
    %62 = vector.load %arg9[%c0_33, %c0_34, %c0_35] : memref<2x16x32xbf16, #tpu.memory_space<vmem>>, vector<1x16x32xbf16>
    %63 = vector.shape_cast %62 : vector<1x16x32xbf16> to vector<16x32xbf16>
    %cst_36 = arith.constant dense<0.000000e+00> : vector<16x32xf32>
    %64 = tpu.matmul %61, %63, %cst_36 {dimension_numbers = #tpu.dot_dimension_numbers<[1], [0], [0], [1], [0, 0, 1, 1], [], []>} : vector<16x16xbf16>, vector<16x32xbf16>, vector<16x32xf32> -> vector<16x32xf32>
    %c1 = arith.constant 1 : index
    %c0_37 = arith.constant 0 : index
    %c0_38 = arith.constant 0 : index
    %65 = vector.load %arg6[%c1, %c0_37, %c0_38] : memref<2x32x16xbf16, #tpu.memory_space<vmem>>, vector<1x32x16xbf16>
    %66 = vector.shape_cast %65 : vector<1x32x16xbf16> to vector<32x16xbf16>
    %cst_39 = arith.constant dense<0.000000e+00> : vector<16x16xf32>
    %67 = tpu.matmul %33, %66, %cst_39 {dimension_numbers = #tpu.dot_dimension_numbers<[1], [0], [0], [1], [0, 0, 1, 1], [], []>} : vector<16x32xbf16>, vector<32x16xbf16>, vector<16x16xf32> -> vector<16x16xf32>
    %cst_40 = arith.constant 2.500000e-01 : f32
    %68 = vector.broadcast %cst_40 : f32 to vector<16x16xf32>
    %69 = arith.mulf %67, %68 : vector<16x16xf32>
    %c1_41 = arith.constant 1 : index
    %c0_42 = arith.constant 0 : index
    %c0_43 = arith.constant 0 : index
    %70 = vector.load %arg7[%c1_41, %c0_42, %c0_43] : memref<2x32x16xbf16, #tpu.memory_space<vmem>>, vector<1x32x16xbf16>
    %71 = vector.shape_cast %70 : vector<1x32x16xbf16> to vector<32x16xbf16>
    %cst_44 = arith.constant dense<0.000000e+00> : vector<16x16xf32>
    %72 = tpu.matmul %33, %71, %cst_44 {dimension_numbers = #tpu.dot_dimension_numbers<[1], [0], [0], [1], [0, 0, 1, 1], [], []>} : vector<16x32xbf16>, vector<32x16xbf16>, vector<16x16xf32> -> vector<16x16xf32>
    %c1_45 = arith.constant 1 : index
    %c0_46 = arith.constant 0 : index
    %c0_47 = arith.constant 0 : index
    %73 = vector.load %arg8[%c1_45, %c0_46, %c0_47] : memref<2x32x16xbf16, #tpu.memory_space<vmem>>, vector<1x32x16xbf16>
    %74 = vector.shape_cast %73 : vector<1x32x16xbf16> to vector<32x16xbf16>
    %cst_48 = arith.constant dense<0.000000e+00> : vector<16x16xf32>
    %75 = tpu.matmul %33, %74, %cst_48 {dimension_numbers = #tpu.dot_dimension_numbers<[1], [0], [0], [1], [0, 0, 1, 1], [], []>} : vector<16x32xbf16>, vector<32x16xbf16>, vector<16x16xf32> -> vector<16x16xf32>
    %76 = arith.truncf %69 : vector<16x16xf32> to vector<16x16xbf16>
    %77 = arith.truncf %72 : vector<16x16xf32> to vector<16x16xbf16>
    %cst_49 = arith.constant dense<0.000000e+00> : vector<16x16xf32>
    %78 = tpu.matmul %76, %77, %cst_49 {dimension_numbers = #tpu.dot_dimension_numbers<[1], [1], [0], [0], [0, 0, 1, 0], [], []>} : vector<16x16xbf16>, vector<16x16xbf16>, vector<16x16xf32> -> vector<16x16xf32>
    %79 = arith.addf %8, %78 : vector<16x16xf32>
    %cst_50 = arith.constant dense<0xFF800000> : vector<16xf32>
    %80 = vector.multi_reduction <maximumf>, %79, %cst_50 [1] : vector<16x16xf32> to vector<16xf32>
    %81 = vector.shape_cast %80 : vector<16xf32> to vector<16x1xf32>
    %82 = vector.broadcast %81 : vector<16x1xf32> to vector<16x16xf32>
    %83 = arith.subf %79, %82 : vector<16x16xf32>
    %84 = math.exp %83 : vector<16x16xf32>
    %cst_51 = arith.constant dense<0.000000e+00> : vector<16xf32>
    %85 = vector.multi_reduction <add>, %84, %cst_51 [1] : vector<16x16xf32> to vector<16xf32>
    %86 = vector.shape_cast %85 : vector<16xf32> to vector<16x1xf32>
    %87 = vector.broadcast %86 : vector<16x1xf32> to vector<16x16xf32>
    %88 = arith.divf %84, %87 : vector<16x16xf32>
    %89 = arith.truncf %88 : vector<16x16xf32> to vector<16x16xbf16>
    %90 = arith.truncf %75 : vector<16x16xf32> to vector<16x16xbf16>
    %cst_52 = arith.constant dense<0.000000e+00> : vector<16x16xf32>
    %91 = tpu.matmul %89, %90, %cst_52 {dimension_numbers = #tpu.dot_dimension_numbers<[1], [0], [0], [1], [0, 0, 1, 1], [], []>} : vector<16x16xbf16>, vector<16x16xbf16>, vector<16x16xf32> -> vector<16x16xf32>
    %92 = arith.truncf %91 : vector<16x16xf32> to vector<16x16xbf16>
    %c1_53 = arith.constant 1 : index
    %c0_54 = arith.constant 0 : index
    %c0_55 = arith.constant 0 : index
    %93 = vector.load %arg9[%c1_53, %c0_54, %c0_55] : memref<2x16x32xbf16, #tpu.memory_space<vmem>>, vector<1x16x32xbf16>
    %94 = vector.shape_cast %93 : vector<1x16x32xbf16> to vector<16x32xbf16>
    %cst_56 = arith.constant dense<0.000000e+00> : vector<16x32xf32>
    %95 = tpu.matmul %92, %94, %cst_56 {dimension_numbers = #tpu.dot_dimension_numbers<[1], [0], [0], [1], [0, 0, 1, 1], [], []>} : vector<16x16xbf16>, vector<16x32xbf16>, vector<16x32xf32> -> vector<16x32xf32>
    %96 = arith.addf %64, %95 : vector<16x32xf32>
    %97 = arith.addf %1, %96 : vector<16x32xf32>
    %c0_57 = arith.constant 0 : index
    %c0_58 = arith.constant 0 : index
    %98 = vector.load %arg10[%c0_57, %c0_58] : memref<1x32xf32, #tpu.memory_space<vmem>>, vector<1x32xf32>
    %99 = vector.broadcast %98 : vector<1x32xf32> to vector<16x32xf32>
    %100 = arith.addf %97, %99 : vector<16x32xf32>
    %c0_59 = arith.constant 0 : index
    %c0_60 = arith.constant 0 : index
    %101 = vector.load %arg11[%c0_59, %c0_60] : memref<1x32xf32, #tpu.memory_space<vmem>>, vector<1x32xf32>
    %c0_61 = arith.constant 0 : index
    %c0_62 = arith.constant 0 : index
    %102 = vector.load %arg12[%c0_61, %c0_62] : memref<1x32xf32, #tpu.memory_space<vmem>>, vector<1x32xf32>
    %cst_63 = arith.constant dense<0.000000e+00> : vector<16xf32>
    %103 = vector.multi_reduction <add>, %100, %cst_63 [1] : vector<16x32xf32> to vector<16xf32>
    %104 = vector.shape_cast %103 : vector<16xf32> to vector<16x1xf32>
    %cst_64 = arith.constant 3.200000e+01 : f32
    %105 = vector.broadcast %cst_64 : f32 to vector<16x1xf32>
    %106 = arith.divf %104, %105 : vector<16x1xf32>
    %107 = vector.broadcast %106 : vector<16x1xf32> to vector<16x32xf32>
    %108 = arith.subf %100, %107 : vector<16x32xf32>
    %109 = arith.mulf %108, %108 : vector<16x32xf32>
    %cst_65 = arith.constant dense<0.000000e+00> : vector<16xf32>
    %110 = vector.multi_reduction <add>, %109, %cst_65 [1] : vector<16x32xf32> to vector<16xf32>
    %111 = vector.shape_cast %110 : vector<16xf32> to vector<16x1xf32>
    %cst_66 = arith.constant 3.200000e+01 : f32
    %112 = vector.broadcast %cst_66 : f32 to vector<16x1xf32>
    %113 = arith.divf %111, %112 : vector<16x1xf32>
    %114 = vector.broadcast %106 : vector<16x1xf32> to vector<16x32xf32>
    %115 = arith.subf %100, %114 : vector<16x32xf32>
    %cst_67 = arith.constant 9.99999974E-6 : f32
    %116 = vector.broadcast %cst_67 : f32 to vector<16x1xf32>
    %117 = arith.addf %113, %116 : vector<16x1xf32>
    %118 = math.rsqrt %117 : vector<16x1xf32>
    %119 = vector.broadcast %118 : vector<16x1xf32> to vector<16x32xf32>
    %120 = arith.mulf %115, %119 : vector<16x32xf32>
    %121 = vector.broadcast %101 : vector<1x32xf32> to vector<16x32xf32>
    %122 = arith.mulf %120, %121 : vector<16x32xf32>
    %123 = vector.broadcast %102 : vector<1x32xf32> to vector<16x32xf32>
    %124 = arith.addf %122, %123 : vector<16x32xf32>
    %125 = arith.truncf %124 : vector<16x32xf32> to vector<16x32xbf16>
    %c0_68 = arith.constant 0 : index
    %c0_69 = arith.constant 0 : index
    %126 = vector.load %arg13[%c0_68, %c0_69] : memref<32x128xbf16, #tpu.memory_space<vmem>>, vector<32x128xbf16>
    %cst_70 = arith.constant dense<0.000000e+00> : vector<16x128xf32>
    %127 = tpu.matmul %125, %126, %cst_70 {dimension_numbers = #tpu.dot_dimension_numbers<[1], [0], [0], [1], [0, 0, 1, 1], [], []>} : vector<16x32xbf16>, vector<32x128xbf16>, vector<16x128xf32> -> vector<16x128xf32>
    %c0_71 = arith.constant 0 : index
    %c0_72 = arith.constant 0 : index
    %128 = vector.load %arg14[%c0_71, %c0_72] : memref<1x128xf32, #tpu.memory_space<vmem>>, vector<1x128xf32>
    %129 = vector.broadcast %128 : vector<1x128xf32> to vector<16x128xf32>
    %130 = arith.addf %127, %129 : vector<16x128xf32>
    %c0_73 = arith.constant 0 : index
    %c0_74 = arith.constant 0 : index
    %131 = vector.load %arg16[%c0_73, %c0_74] : memref<1x128xf32, #tpu.memory_space<vmem>>, vector<1x128xf32>
    %c0_75 = arith.constant 0 : index
    %c0_76 = arith.constant 0 : index
    %132 = vector.load %arg15[%c0_75, %c0_76] : memref<1x128xf32, #tpu.memory_space<vmem>>, vector<1x128xf32>
    %133 = vector.broadcast %132 : vector<1x128xf32> to vector<16x128xf32>
    %134 = arith.mulf %130, %133 : vector<16x128xf32>
    %135 = math.sin %134 : vector<16x128xf32>
    %136 = arith.mulf %135, %135 : vector<16x128xf32>
    %137 = vector.broadcast %131 : vector<1x128xf32> to vector<16x128xf32>
    %138 = arith.mulf %137, %136 : vector<16x128xf32>
    %139 = arith.addf %130, %138 : vector<16x128xf32>
    %140 = arith.truncf %139 : vector<16x128xf32> to vector<16x128xbf16>
    %c0_77 = arith.constant 0 : index
    %c0_78 = arith.constant 0 : index
    %141 = vector.load %arg17[%c0_77, %c0_78] : memref<128x32xbf16, #tpu.memory_space<vmem>>, vector<128x32xbf16>
    %cst_79 = arith.constant dense<0.000000e+00> : vector<16x32xf32>
    %142 = tpu.matmul %140, %141, %cst_79 {dimension_numbers = #tpu.dot_dimension_numbers<[1], [0], [0], [1], [0, 0, 1, 1], [], []>} : vector<16x128xbf16>, vector<128x32xbf16>, vector<16x32xf32> -> vector<16x32xf32>
    %c0_80 = arith.constant 0 : index
    %c0_81 = arith.constant 0 : index
    %143 = vector.load %arg18[%c0_80, %c0_81] : memref<1x32xf32, #tpu.memory_space<vmem>>, vector<1x32xf32>
    %144 = vector.broadcast %143 : vector<1x32xf32> to vector<16x32xf32>
    %145 = arith.addf %142, %144 : vector<16x32xf32>
    %146 = arith.addf %100, %145 : vector<16x32xf32>
    %c0_82 = arith.constant 0 : index
    %c0_83 = arith.constant 0 : index
    %c0_84 = arith.constant 0 : index
    %147 = vector.load %arg19[%c0_82, %c0_83, %c0_84] : memref<1x16x32xf32, #tpu.memory_space<vmem>>, vector<1x16x32xf32>
    %148 = vector.shape_cast %147 : vector<1x16x32xf32> to vector<16x32xf32>
    %149 = vector.shape_cast %146 : vector<16x32xf32> to vector<1x16x32xf32>
    tpu.vector_store %arg19[%c0_82, %c0_83, %c0_84], %149 {strides = array<i32>} : memref<1x16x32xf32, #tpu.memory_space<vmem>>, vector<1x16x32xf32>,
    return
  }
  func.func @transform_0(%arg0: i32) -> (i32, i32, i32) {
    %c0_i32 = arith.constant 0 : i32
    %c0_i32_0 = arith.constant 0 : i32
    %c0_i32_1 = arith.constant 0 : i32
    return %arg0, %c0_i32, %c0_i32_0 : i32, i32, i32
  }
  func.func @transform_1(%arg0: i32) -> (i32, i32, i32) {
    %c0_i32 = arith.constant 0 : i32
    %c0_i32_0 = arith.constant 0 : i32
    %c0_i32_1 = arith.constant 0 : i32
    return %arg0, %c0_i32, %c0_i32_0 : i32, i32, i32
  }
  func.func @transform_2(%arg0: i32) -> (i32, i32, i32) {
    %c0_i32 = arith.constant 0 : i32
    %c0_i32_0 = arith.constant 0 : i32
    %c0_i32_1 = arith.constant 0 : i32
    return %arg0, %c0_i32, %c0_i32_0 : i32, i32, i32
  }
  func.func @transform_3(%arg0: i32) -> (i32, i32) {
    %c0_i32 = arith.constant 0 : i32
    %c0_i32_0 = arith.constant 0 : i32
    %c0_i32_1 = arith.constant 0 : i32
    return %c0_i32, %c0_i32_0 : i32, i32
  }
  func.func @transform_4(%arg0: i32) -> (i32, i32) {
    %c0_i32 = arith.constant 0 : i32
    %c0_i32_0 = arith.constant 0 : i32
    %c0_i32_1 = arith.constant 0 : i32
    return %c0_i32, %c0_i32_0 : i32, i32
  }
  func.func @transform_5(%arg0: i32) -> (i32, i32, i32) {
    %c0_i32 = arith.constant 0 : i32
    %c0_i32_0 = arith.constant 0 : i32
    %c0_i32_1 = arith.constant 0 : i32
    %c0_i32_2 = arith.constant 0 : i32
    return %c0_i32, %c0_i32_0, %c0_i32_1 : i32, i32, i32
  }
  func.func @transform_6(%arg0: i32) -> (i32, i32, i32) {
    %c0_i32 = arith.constant 0 : i32
    %c0_i32_0 = arith.constant 0 : i32
    %c0_i32_1 = arith.constant 0 : i32
    %c0_i32_2 = arith.constant 0 : i32
    return %c0_i32, %c0_i32_0, %c0_i32_1 : i32, i32, i32
  }
  func.func @transform_7(%arg0: i32) -> (i32, i32, i32) {
    %c0_i32 = arith.constant 0 : i32
    %c0_i32_0 = arith.constant 0 : i32
    %c0_i32_1 = arith.constant 0 : i32
    %c0_i32_2 = arith.constant 0 : i32
    return %c0_i32, %c0_i32_0, %c0_i32_1 : i32, i32, i32
  }
  func.func @transform_8(%arg0: i32) -> (i32, i32, i32) {
    %c0_i32 = arith.constant 0 : i32
    %c0_i32_0 = arith.constant 0 : i32
    %c0_i32_1 = arith.constant 0 : i32
    %c0_i32_2 = arith.constant 0 : i32
    return %c0_i32, %c0_i32_0, %c0_i32_1 : i32, i32, i32
  }
  func.func @transform_9(%arg0: i32) -> (i32, i32) {
    %c0_i32 = arith.constant 0 : i32
    %c0_i32_0 = arith.constant 0 : i32
    %c0_i32_1 = arith.constant 0 : i32
    return %c0_i32, %c0_i32_0 : i32, i32
  }
  func.func @transform_10(%arg0: i32) -> (i32, i32) {
    %c0_i32 = arith.constant 0 : i32
    %c0_i32_0 = arith.constant 0 : i32
    %c0_i32_1 = arith.constant 0 : i32
    return %c0_i32, %c0_i32_0 : i32, i32
  }
  func.func @transform_11(%arg0: i32) -> (i32, i32) {
    %c0_i32 = arith.constant 0 : i32
    %c0_i32_0 = arith.constant 0 : i32
    %c0_i32_1 = arith.constant 0 : i32
    return %c0_i32, %c0_i32_0 : i32, i32
  }
  func.func @transform_12(%arg0: i32) -> (i32, i32) {
    %c0_i32 = arith.constant 0 : i32
    %c0_i32_0 = arith.constant 0 : i32
    %c0_i32_1 = arith.constant 0 : i32
    return %c0_i32, %c0_i32_0 : i32, i32
  }
  func.func @transform_13(%arg0: i32) -> (i32, i32) {
    %c0_i32 = arith.constant 0 : i32
    %c0_i32_0 = arith.constant 0 : i32
    %c0_i32_1 = arith.constant 0 : i32
    return %c0_i32, %c0_i32_0 : i32, i32
  }
  func.func @transform_14(%arg0: i32) -> (i32, i32) {
    %c0_i32 = arith.constant 0 : i32
    %c0_i32_0 = arith.constant 0 : i32
    %c0_i32_1 = arith.constant 0 : i32
    return %c0_i32, %c0_i32_0 : i32, i32
  }
  func.func @transform_15(%arg0: i32) -> (i32, i32) {
    %c0_i32 = arith.constant 0 : i32
    %c0_i32_0 = arith.constant 0 : i32
    %c0_i32_1 = arith.constant 0 : i32
    return %c0_i32, %c0_i32_0 : i32, i32
  }
  func.func @transform_16(%arg0: i32) -> (i32, i32) {
    %c0_i32 = arith.constant 0 : i32
    %c0_i32_0 = arith.constant 0 : i32
    %c0_i32_1 = arith.constant 0 : i32
    return %c0_i32, %c0_i32_0 : i32, i32
  }
  func.func @transform_17(%arg0: i32) -> (i32, i32) {
    %c0_i32 = arith.constant 0 : i32
    %c0_i32_0 = arith.constant 0 : i32
    %c0_i32_1 = arith.constant 0 : i32
    return %c0_i32, %c0_i32_0 : i32, i32
  }
  func.func @transform_18(%arg0: i32) -> (i32, i32, i32) {
    %c0_i32 = arith.constant 0 : i32
    %c0_i32_0 = arith.constant 0 : i32
    %c0_i32_1 = arith.constant 0 : i32
    return %arg0, %c0_i32, %c0_i32_0 : i32, i32, i32
  }
}

module attributes {stable_mosaic.version = 11 : i64} {
  func.func @_resnet_kernel(%arg0: i32, %arg1: memref<1x16x24xf32, #tpu.memory_space<vmem>>, %arg2: memref<1x16x1xf32, #tpu.memory_space<vmem>>, %arg3: memref<1x1x128xf32, #tpu.memory_space<vmem>>, %arg4: memref<3x24x32xbf16, #tpu.memory_space<vmem>>, %arg5: memref<1x32xf32, #tpu.memory_space<vmem>>, %arg6: memref<1x32xf32, #tpu.memory_space<vmem>>, %arg7: memref<1x32xf32, #tpu.memory_space<vmem>>, %arg8: memref<128x32xbf16, #tpu.memory_space<vmem>>, %arg9: memref<1x32xf32, #tpu.memory_space<vmem>>, %arg10: memref<3x32x32xbf16, #tpu.memory_space<vmem>>, %arg11: memref<1x32xf32, #tpu.memory_space<vmem>>, %arg12: memref<1x32xf32, #tpu.memory_space<vmem>>, %arg13: memref<1x32xf32, #tpu.memory_space<vmem>>, %arg14: memref<24x32xbf16, #tpu.memory_space<vmem>>, %arg15: memref<1x32xf32, #tpu.memory_space<vmem>>, %arg16: memref<32x32xf32, #tpu.memory_space<vmem>>, %arg17: memref<1x16x32xf32, #tpu.memory_space<vmem>>, %arg18: memref<18x24xf32, #tpu.memory_space<vmem>>, %arg19: memref<18x32xf32, #tpu.memory_space<vmem>>) attributes {dimension_semantics = [#tpu.dimension_semantics<parallel>], iteration_bounds = array<i64: 2>, scalar_prefetch = 0 : i64, scratch_operands = 2 : i64, tpu.core_type = #tpu.core_type<tc>, window_params = [{transform_indices = @transform_0, window_bounds = array<i64: 1, 16, 24>}, {transform_indices = @transform_1, window_bounds = array<i64: 1, 16, 1>}, {transform_indices = @transform_2, window_bounds = array<i64: 1, 1, 128>}, {pipeline_mode = #tpu.pipeline_mode<synchronous>, transform_indices = @transform_3, window_bounds = array<i64: 3, 24, 32>}, {pipeline_mode = #tpu.pipeline_mode<synchronous>, transform_indices = @transform_4, window_bounds = array<i64: 1, 32>}, {pipeline_mode = #tpu.pipeline_mode<synchronous>, transform_indices = @transform_5, window_bounds = array<i64: 1, 32>}, {pipeline_mode = #tpu.pipeline_mode<synchronous>, transform_indices = @transform_6, window_bounds = array<i64: 1, 32>}, {pipeline_mode = #tpu.pipeline_mode<synchronous>, transform_indices = @transform_7, window_bounds = array<i64: 128, 32>}, {pipeline_mode = #tpu.pipeline_mode<synchronous>, transform_indices = @transform_8, window_bounds = array<i64: 1, 32>}, {pipeline_mode = #tpu.pipeline_mode<synchronous>, transform_indices = @transform_9, window_bounds = array<i64: 3, 32, 32>}, {pipeline_mode = #tpu.pipeline_mode<synchronous>, transform_indices = @transform_10, window_bounds = array<i64: 1, 32>}, {pipeline_mode = #tpu.pipeline_mode<synchronous>, transform_indices = @transform_11, window_bounds = array<i64: 1, 32>}, {pipeline_mode = #tpu.pipeline_mode<synchronous>, transform_indices = @transform_12, window_bounds = array<i64: 1, 32>}, {pipeline_mode = #tpu.pipeline_mode<synchronous>, transform_indices = @transform_13, window_bounds = array<i64: 24, 32>}, {pipeline_mode = #tpu.pipeline_mode<synchronous>, transform_indices = @transform_14, window_bounds = array<i64: 1, 32>}, {pipeline_mode = #tpu.pipeline_mode<synchronous>, transform_indices = @transform_15, window_bounds = array<i64: 32, 32>}, {transform_indices = @transform_16, window_bounds = array<i64: 1, 16, 32>}]} {
    %c0 = arith.constant 0 : index
    %c0_0 = arith.constant 0 : index
    %c0_1 = arith.constant 0 : index
    %0 = vector.load %arg1[%c0, %c0_0, %c0_1] : memref<1x16x24xf32, #tpu.memory_space<vmem>>, vector<1x16x24xf32>
    %1 = vector.shape_cast %0 : vector<1x16x24xf32> to vector<16x24xf32>
    %c0_2 = arith.constant 0 : index
    %c0_3 = arith.constant 0 : index
    %c0_4 = arith.constant 0 : index
    %2 = vector.load %arg2[%c0_2, %c0_3, %c0_4] : memref<1x16x1xf32, #tpu.memory_space<vmem>>, vector<1x16x1xf32>
    %3 = vector.shape_cast %2 : vector<1x16x1xf32> to vector<16x1xf32>
    %4 = vector.broadcast %3 : vector<16x1xf32> to vector<16x24xf32>
    %5 = arith.mulf %1, %4 : vector<16x24xf32>
    %c0_5 = arith.constant 0 : index
    %c0_6 = arith.constant 0 : index
    %6 = vector.load %arg16[%c0_5, %c0_6] : memref<32x32xf32, #tpu.memory_space<vmem>>, vector<32x32xf32>
    %cst = arith.constant 0.000000e+00 : f32
    %7 = vector.broadcast %cst : f32 to vector<18x24xf32>
    %c0_7 = arith.constant 0 : index
    %c0_8 = arith.constant 0 : index
    %8 = vector.load %arg18[%c0_7, %c0_8] : memref<18x24xf32, #tpu.memory_space<vmem>>, vector<18x24xf32>
    tpu.vector_store %arg18[%c0_7, %c0_8], %7 {strides = array<i32>} : memref<18x24xf32, #tpu.memory_space<vmem>>, vector<18x24xf32>,
    %c1 = arith.constant 1 : index
    %c0_9 = arith.constant 0 : index
    %9 = vector.load %arg18[%c1, %c0_9] : memref<18x24xf32, #tpu.memory_space<vmem>>, vector<16x24xf32>
    tpu.vector_store %arg18[%c1, %c0_9], %5 {strides = array<i32>} : memref<18x24xf32, #tpu.memory_space<vmem>>, vector<16x24xf32>,
    %c0_10 = arith.constant 0 : index
    %c0_11 = arith.constant 0 : index
    %10 = vector.load %arg18[%c0_10, %c0_11] : memref<18x24xf32, #tpu.memory_space<vmem>>, vector<16x24xf32>
    %11 = arith.truncf %10 : vector<16x24xf32> to vector<16x24xbf16>
    %c0_12 = arith.constant 0 : index
    %c0_13 = arith.constant 0 : index
    %c0_14 = arith.constant 0 : index
    %12 = vector.load %arg4[%c0_12, %c0_13, %c0_14] : memref<3x24x32xbf16, #tpu.memory_space<vmem>>, vector<1x24x32xbf16>
    %13 = vector.shape_cast %12 : vector<1x24x32xbf16> to vector<24x32xbf16>
    %cst_15 = arith.constant dense<0.000000e+00> : vector<16x32xf32>
    %14 = tpu.matmul %11, %13, %cst_15 {dimension_numbers = #tpu.dot_dimension_numbers<[1], [0], [0], [1], [0, 0, 1, 1], [], []>} : vector<16x24xbf16>, vector<24x32xbf16>, vector<16x32xf32> -> vector<16x32xf32>
    %c1_16 = arith.constant 1 : index
    %c0_17 = arith.constant 0 : index
    %15 = vector.load %arg18[%c1_16, %c0_17] : memref<18x24xf32, #tpu.memory_space<vmem>>, vector<16x24xf32>
    %16 = arith.truncf %15 : vector<16x24xf32> to vector<16x24xbf16>
    %c1_18 = arith.constant 1 : index
    %c0_19 = arith.constant 0 : index
    %c0_20 = arith.constant 0 : index
    %17 = vector.load %arg4[%c1_18, %c0_19, %c0_20] : memref<3x24x32xbf16, #tpu.memory_space<vmem>>, vector<1x24x32xbf16>
    %18 = vector.shape_cast %17 : vector<1x24x32xbf16> to vector<24x32xbf16>
    %cst_21 = arith.constant dense<0.000000e+00> : vector<16x32xf32>
    %19 = tpu.matmul %16, %18, %cst_21 {dimension_numbers = #tpu.dot_dimension_numbers<[1], [0], [0], [1], [0, 0, 1, 1], [], []>} : vector<16x24xbf16>, vector<24x32xbf16>, vector<16x32xf32> -> vector<16x32xf32>
    %20 = arith.addf %14, %19 : vector<16x32xf32>
    %c2 = arith.constant 2 : index
    %c0_22 = arith.constant 0 : index
    %21 = vector.load %arg18[%c2, %c0_22] : memref<18x24xf32, #tpu.memory_space<vmem>>, vector<16x24xf32>
    %22 = arith.truncf %21 : vector<16x24xf32> to vector<16x24xbf16>
    %c2_23 = arith.constant 2 : index
    %c0_24 = arith.constant 0 : index
    %c0_25 = arith.constant 0 : index
    %23 = vector.load %arg4[%c2_23, %c0_24, %c0_25] : memref<3x24x32xbf16, #tpu.memory_space<vmem>>, vector<1x24x32xbf16>
    %24 = vector.shape_cast %23 : vector<1x24x32xbf16> to vector<24x32xbf16>
    %cst_26 = arith.constant dense<0.000000e+00> : vector<16x32xf32>
    %25 = tpu.matmul %22, %24, %cst_26 {dimension_numbers = #tpu.dot_dimension_numbers<[1], [0], [0], [1], [0, 0, 1, 1], [], []>} : vector<16x24xbf16>, vector<24x32xbf16>, vector<16x32xf32> -> vector<16x32xf32>
    %26 = arith.addf %20, %25 : vector<16x32xf32>
    %c0_27 = arith.constant 0 : index
    %c0_28 = arith.constant 0 : index
    %27 = vector.load %arg5[%c0_27, %c0_28] : memref<1x32xf32, #tpu.memory_space<vmem>>, vector<1x32xf32>
    %28 = vector.broadcast %27 : vector<1x32xf32> to vector<16x32xf32>
    %29 = arith.addf %26, %28 : vector<16x32xf32>
    %c0_29 = arith.constant 0 : index
    %c0_30 = arith.constant 0 : index
    %30 = vector.load %arg6[%c0_29, %c0_30] : memref<1x32xf32, #tpu.memory_space<vmem>>, vector<1x32xf32>
    %c0_31 = arith.constant 0 : index
    %c0_32 = arith.constant 0 : index
    %31 = vector.load %arg7[%c0_31, %c0_32] : memref<1x32xf32, #tpu.memory_space<vmem>>, vector<1x32xf32>
    %cst_33 = arith.constant dense<0.000000e+00> : vector<32xf32>
    %32 = vector.multi_reduction <add>, %29, %cst_33 [0] : vector<16x32xf32> to vector<32xf32>
    %33 = vector.shape_cast %32 : vector<32xf32> to vector<1x32xf32>
    %cst_34 = arith.constant 1.600000e+01 : f32
    %34 = vector.broadcast %cst_34 : f32 to vector<1x32xf32>
    %35 = arith.divf %33, %34 : vector<1x32xf32>
    %36 = arith.mulf %29, %29 : vector<16x32xf32>
    %cst_35 = arith.constant dense<0.000000e+00> : vector<32xf32>
    %37 = vector.multi_reduction <add>, %36, %cst_35 [0] : vector<16x32xf32> to vector<32xf32>
    %38 = vector.shape_cast %37 : vector<32xf32> to vector<1x32xf32>
    %cst_36 = arith.constant 1.600000e+01 : f32
    %39 = vector.broadcast %cst_36 : f32 to vector<1x32xf32>
    %40 = arith.divf %38, %39 : vector<1x32xf32>
    %cst_37 = arith.constant dense<0.000000e+00> : vector<1x32xf32>
    %41 = tpu.matmul %35, %6, %cst_37 {dimension_numbers = #tpu.dot_dimension_numbers<[1], [0], [0], [1], [0, 0, 1, 1], [], []>} : vector<1x32xf32>, vector<32x32xf32>, vector<1x32xf32> -> vector<1x32xf32>
    %cst_38 = arith.constant dense<0.000000e+00> : vector<1x32xf32>
    %42 = tpu.matmul %40, %6, %cst_38 {dimension_numbers = #tpu.dot_dimension_numbers<[1], [0], [0], [1], [0, 0, 1, 1], [], []>} : vector<1x32xf32>, vector<32x32xf32>, vector<1x32xf32> -> vector<1x32xf32>
    %43 = arith.mulf %41, %41 : vector<1x32xf32>
    %44 = arith.subf %42, %43 : vector<1x32xf32>
    %45 = vector.broadcast %41 : vector<1x32xf32> to vector<16x32xf32>
    %46 = arith.subf %29, %45 : vector<16x32xf32>
    %cst_39 = arith.constant 9.99999974E-6 : f32
    %47 = vector.broadcast %cst_39 : f32 to vector<1x32xf32>
    %48 = arith.addf %44, %47 : vector<1x32xf32>
    %49 = math.rsqrt %48 : vector<1x32xf32>
    %50 = vector.broadcast %49 : vector<1x32xf32> to vector<16x32xf32>
    %51 = arith.mulf %46, %50 : vector<16x32xf32>
    %52 = vector.broadcast %30 : vector<1x32xf32> to vector<16x32xf32>
    %53 = arith.mulf %51, %52 : vector<16x32xf32>
    %54 = vector.broadcast %31 : vector<1x32xf32> to vector<16x32xf32>
    %55 = arith.addf %53, %54 : vector<16x32xf32>
    %cst_40 = arith.constant 3.000000e+01 : f32
    %56 = vector.broadcast %cst_40 : f32 to vector<16x32xf32>
    %57 = arith.minimumf %55, %56 : vector<16x32xf32>
    %58 = math.exp %57 : vector<16x32xf32>
    %cst_41 = arith.constant 2.000000e+00 : f32
    %59 = vector.broadcast %cst_41 : f32 to vector<16x32xf32>
    %60 = arith.addf %58, %59 : vector<16x32xf32>
    %61 = arith.mulf %58, %60 : vector<16x32xf32>
    %62 = arith.mulf %55, %61 : vector<16x32xf32>
    %cst_42 = arith.constant 2.000000e+00 : f32
    %63 = vector.broadcast %cst_42 : f32 to vector<16x32xf32>
    %64 = arith.addf %61, %63 : vector<16x32xf32>
    %65 = arith.divf %62, %64 : vector<16x32xf32>
    %66 = vector.broadcast %3 : vector<16x1xf32> to vector<16x32xf32>
    %67 = arith.mulf %65, %66 : vector<16x32xf32>
    %c0_43 = arith.constant 0 : index
    %c0_44 = arith.constant 0 : index
    %c0_45 = arith.constant 0 : index
    %68 = vector.load %arg3[%c0_43, %c0_44, %c0_45] : memref<1x1x128xf32, #tpu.memory_space<vmem>>, vector<1x1x128xf32>
    %69 = vector.shape_cast %68 : vector<1x1x128xf32> to vector<1x128xf32>
    %70 = arith.truncf %69 : vector<1x128xf32> to vector<1x128xbf16>
    %c0_46 = arith.constant 0 : index
    %c0_47 = arith.constant 0 : index
    %71 = vector.load %arg8[%c0_46, %c0_47] : memref<128x32xbf16, #tpu.memory_space<vmem>>, vector<128x32xbf16>
    %cst_48 = arith.constant dense<0.000000e+00> : vector<1x32xf32>
    %72 = tpu.matmul %70, %71, %cst_48 {dimension_numbers = #tpu.dot_dimension_numbers<[1], [0], [0], [1], [0, 0, 1, 1], [], []>} : vector<1x128xbf16>, vector<128x32xbf16>, vector<1x32xf32> -> vector<1x32xf32>
    %c0_49 = arith.constant 0 : index
    %c0_50 = arith.constant 0 : index
    %73 = vector.load %arg9[%c0_49, %c0_50] : memref<1x32xf32, #tpu.memory_space<vmem>>, vector<1x32xf32>
    %74 = arith.addf %72, %73 : vector<1x32xf32>
    %75 = vector.broadcast %74 : vector<1x32xf32> to vector<16x32xf32>
    %76 = arith.addf %67, %75 : vector<16x32xf32>
    %77 = vector.broadcast %3 : vector<16x1xf32> to vector<16x32xf32>
    %78 = arith.mulf %76, %77 : vector<16x32xf32>
    %cst_51 = arith.constant 0.000000e+00 : f32
    %79 = vector.broadcast %cst_51 : f32 to vector<18x32xf32>
    %c0_52 = arith.constant 0 : index
    %c0_53 = arith.constant 0 : index
    %80 = vector.load %arg19[%c0_52, %c0_53] : memref<18x32xf32, #tpu.memory_space<vmem>>, vector<18x32xf32>
    tpu.vector_store %arg19[%c0_52, %c0_53], %79 {strides = array<i32>} : memref<18x32xf32, #tpu.memory_space<vmem>>, vector<18x32xf32>,
    %c1_54 = arith.constant 1 : index
    %c0_55 = arith.constant 0 : index
    %81 = vector.load %arg19[%c1_54, %c0_55] : memref<18x32xf32, #tpu.memory_space<vmem>>, vector<16x32xf32>
    tpu.vector_store %arg19[%c1_54, %c0_55], %78 {strides = array<i32>} : memref<18x32xf32, #tpu.memory_space<vmem>>, vector<16x32xf32>,
    %c0_56 = arith.constant 0 : index
    %c0_57 = arith.constant 0 : index
    %82 = vector.load %arg19[%c0_56, %c0_57] : memref<18x32xf32, #tpu.memory_space<vmem>>, vector<16x32xf32>
    %83 = arith.truncf %82 : vector<16x32xf32> to vector<16x32xbf16>
    %c0_58 = arith.constant 0 : index
    %c0_59 = arith.constant 0 : index
    %c0_60 = arith.constant 0 : index
    %84 = vector.load %arg10[%c0_58, %c0_59, %c0_60] : memref<3x32x32xbf16, #tpu.memory_space<vmem>>, vector<1x32x32xbf16>
    %85 = vector.shape_cast %84 : vector<1x32x32xbf16> to vector<32x32xbf16>
    %cst_61 = arith.constant dense<0.000000e+00> : vector<16x32xf32>
    %86 = tpu.matmul %83, %85, %cst_61 {dimension_numbers = #tpu.dot_dimension_numbers<[1], [0], [0], [1], [0, 0, 1, 1], [], []>} : vector<16x32xbf16>, vector<32x32xbf16>, vector<16x32xf32> -> vector<16x32xf32>
    %c1_62 = arith.constant 1 : index
    %c0_63 = arith.constant 0 : index
    %87 = vector.load %arg19[%c1_62, %c0_63] : memref<18x32xf32, #tpu.memory_space<vmem>>, vector<16x32xf32>
    %88 = arith.truncf %87 : vector<16x32xf32> to vector<16x32xbf16>
    %c1_64 = arith.constant 1 : index
    %c0_65 = arith.constant 0 : index
    %c0_66 = arith.constant 0 : index
    %89 = vector.load %arg10[%c1_64, %c0_65, %c0_66] : memref<3x32x32xbf16, #tpu.memory_space<vmem>>, vector<1x32x32xbf16>
    %90 = vector.shape_cast %89 : vector<1x32x32xbf16> to vector<32x32xbf16>
    %cst_67 = arith.constant dense<0.000000e+00> : vector<16x32xf32>
    %91 = tpu.matmul %88, %90, %cst_67 {dimension_numbers = #tpu.dot_dimension_numbers<[1], [0], [0], [1], [0, 0, 1, 1], [], []>} : vector<16x32xbf16>, vector<32x32xbf16>, vector<16x32xf32> -> vector<16x32xf32>
    %92 = arith.addf %86, %91 : vector<16x32xf32>
    %c2_68 = arith.constant 2 : index
    %c0_69 = arith.constant 0 : index
    %93 = vector.load %arg19[%c2_68, %c0_69] : memref<18x32xf32, #tpu.memory_space<vmem>>, vector<16x32xf32>
    %94 = arith.truncf %93 : vector<16x32xf32> to vector<16x32xbf16>
    %c2_70 = arith.constant 2 : index
    %c0_71 = arith.constant 0 : index
    %c0_72 = arith.constant 0 : index
    %95 = vector.load %arg10[%c2_70, %c0_71, %c0_72] : memref<3x32x32xbf16, #tpu.memory_space<vmem>>, vector<1x32x32xbf16>
    %96 = vector.shape_cast %95 : vector<1x32x32xbf16> to vector<32x32xbf16>
    %cst_73 = arith.constant dense<0.000000e+00> : vector<16x32xf32>
    %97 = tpu.matmul %94, %96, %cst_73 {dimension_numbers = #tpu.dot_dimension_numbers<[1], [0], [0], [1], [0, 0, 1, 1], [], []>} : vector<16x32xbf16>, vector<32x32xbf16>, vector<16x32xf32> -> vector<16x32xf32>
    %98 = arith.addf %92, %97 : vector<16x32xf32>
    %c0_74 = arith.constant 0 : index
    %c0_75 = arith.constant 0 : index
    %99 = vector.load %arg11[%c0_74, %c0_75] : memref<1x32xf32, #tpu.memory_space<vmem>>, vector<1x32xf32>
    %100 = vector.broadcast %99 : vector<1x32xf32> to vector<16x32xf32>
    %101 = arith.addf %98, %100 : vector<16x32xf32>
    %c0_76 = arith.constant 0 : index
    %c0_77 = arith.constant 0 : index
    %102 = vector.load %arg12[%c0_76, %c0_77] : memref<1x32xf32, #tpu.memory_space<vmem>>, vector<1x32xf32>
    %c0_78 = arith.constant 0 : index
    %c0_79 = arith.constant 0 : index
    %103 = vector.load %arg13[%c0_78, %c0_79] : memref<1x32xf32, #tpu.memory_space<vmem>>, vector<1x32xf32>
    %cst_80 = arith.constant dense<0.000000e+00> : vector<32xf32>
    %104 = vector.multi_reduction <add>, %101, %cst_80 [0] : vector<16x32xf32> to vector<32xf32>
    %105 = vector.shape_cast %104 : vector<32xf32> to vector<1x32xf32>
    %cst_81 = arith.constant 1.600000e+01 : f32
    %106 = vector.broadcast %cst_81 : f32 to vector<1x32xf32>
    %107 = arith.divf %105, %106 : vector<1x32xf32>
    %108 = arith.mulf %101, %101 : vector<16x32xf32>
    %cst_82 = arith.constant dense<0.000000e+00> : vector<32xf32>
    %109 = vector.multi_reduction <add>, %108, %cst_82 [0] : vector<16x32xf32> to vector<32xf32>
    %110 = vector.shape_cast %109 : vector<32xf32> to vector<1x32xf32>
    %cst_83 = arith.constant 1.600000e+01 : f32
    %111 = vector.broadcast %cst_83 : f32 to vector<1x32xf32>
    %112 = arith.divf %110, %111 : vector<1x32xf32>
    %cst_84 = arith.constant dense<0.000000e+00> : vector<1x32xf32>
    %113 = tpu.matmul %107, %6, %cst_84 {dimension_numbers = #tpu.dot_dimension_numbers<[1], [0], [0], [1], [0, 0, 1, 1], [], []>} : vector<1x32xf32>, vector<32x32xf32>, vector<1x32xf32> -> vector<1x32xf32>
    %cst_85 = arith.constant dense<0.000000e+00> : vector<1x32xf32>
    %114 = tpu.matmul %112, %6, %cst_85 {dimension_numbers = #tpu.dot_dimension_numbers<[1], [0], [0], [1], [0, 0, 1, 1], [], []>} : vector<1x32xf32>, vector<32x32xf32>, vector<1x32xf32> -> vector<1x32xf32>
    %115 = arith.mulf %113, %113 : vector<1x32xf32>
    %116 = arith.subf %114, %115 : vector<1x32xf32>
    %117 = vector.broadcast %113 : vector<1x32xf32> to vector<16x32xf32>
    %118 = arith.subf %101, %117 : vector<16x32xf32>
    %cst_86 = arith.constant 9.99999974E-6 : f32
    %119 = vector.broadcast %cst_86 : f32 to vector<1x32xf32>
    %120 = arith.addf %116, %119 : vector<1x32xf32>
    %121 = math.rsqrt %120 : vector<1x32xf32>
    %122 = vector.broadcast %121 : vector<1x32xf32> to vector<16x32xf32>
    %123 = arith.mulf %118, %122 : vector<16x32xf32>
    %124 = vector.broadcast %102 : vector<1x32xf32> to vector<16x32xf32>
    %125 = arith.mulf %123, %124 : vector<16x32xf32>
    %126 = vector.broadcast %103 : vector<1x32xf32> to vector<16x32xf32>
    %127 = arith.addf %125, %126 : vector<16x32xf32>
    %cst_87 = arith.constant 3.000000e+01 : f32
    %128 = vector.broadcast %cst_87 : f32 to vector<16x32xf32>
    %129 = arith.minimumf %127, %128 : vector<16x32xf32>
    %130 = math.exp %129 : vector<16x32xf32>
    %cst_88 = arith.constant 2.000000e+00 : f32
    %131 = vector.broadcast %cst_88 : f32 to vector<16x32xf32>
    %132 = arith.addf %130, %131 : vector<16x32xf32>
    %133 = arith.mulf %130, %132 : vector<16x32xf32>
    %134 = arith.mulf %127, %133 : vector<16x32xf32>
    %cst_89 = arith.constant 2.000000e+00 : f32
    %135 = vector.broadcast %cst_89 : f32 to vector<16x32xf32>
    %136 = arith.addf %133, %135 : vector<16x32xf32>
    %137 = arith.divf %134, %136 : vector<16x32xf32>
    %138 = vector.broadcast %3 : vector<16x1xf32> to vector<16x32xf32>
    %139 = arith.mulf %137, %138 : vector<16x32xf32>
    %140 = arith.truncf %5 : vector<16x24xf32> to vector<16x24xbf16>
    %c0_90 = arith.constant 0 : index
    %c0_91 = arith.constant 0 : index
    %141 = vector.load %arg14[%c0_90, %c0_91] : memref<24x32xbf16, #tpu.memory_space<vmem>>, vector<24x32xbf16>
    %cst_92 = arith.constant dense<0.000000e+00> : vector<16x32xf32>
    %142 = tpu.matmul %140, %141, %cst_92 {dimension_numbers = #tpu.dot_dimension_numbers<[1], [0], [0], [1], [0, 0, 1, 1], [], []>} : vector<16x24xbf16>, vector<24x32xbf16>, vector<16x32xf32> -> vector<16x32xf32>
    %c0_93 = arith.constant 0 : index
    %c0_94 = arith.constant 0 : index
    %143 = vector.load %arg15[%c0_93, %c0_94] : memref<1x32xf32, #tpu.memory_space<vmem>>, vector<1x32xf32>
    %144 = vector.broadcast %143 : vector<1x32xf32> to vector<16x32xf32>
    %145 = arith.addf %142, %144 : vector<16x32xf32>
    %146 = arith.addf %139, %145 : vector<16x32xf32>
    %c0_95 = arith.constant 0 : index
    %c0_96 = arith.constant 0 : index
    %c0_97 = arith.constant 0 : index
    %147 = vector.load %arg17[%c0_95, %c0_96, %c0_97] : memref<1x16x32xf32, #tpu.memory_space<vmem>>, vector<1x16x32xf32>
    %148 = vector.shape_cast %147 : vector<1x16x32xf32> to vector<16x32xf32>
    %149 = vector.shape_cast %146 : vector<16x32xf32> to vector<1x16x32xf32>
    tpu.vector_store %arg17[%c0_95, %c0_96, %c0_97], %149 {strides = array<i32>} : memref<1x16x32xf32, #tpu.memory_space<vmem>>, vector<1x16x32xf32>,
    return
  }
  func.func @transform_0(%arg0: i32) -> (i32, i32, i32) {
    %c0_i32 = arith.constant 0 : i32
    %c0_i32_0 = arith.constant 0 : i32
    %c0_i32_1 = arith.constant 0 : i32
    return %arg0, %c0_i32, %c0_i32_0 : i32, i32, i32
  }
  func.func @transform_1(%arg0: i32) -> (i32, i32, i32) {
    %c0_i32 = arith.constant 0 : i32
    %c0_i32_0 = arith.constant 0 : i32
    %c0_i32_1 = arith.constant 0 : i32
    return %arg0, %c0_i32, %c0_i32_0 : i32, i32, i32
  }
  func.func @transform_2(%arg0: i32) -> (i32, i32, i32) {
    %c0_i32 = arith.constant 0 : i32
    %c0_i32_0 = arith.constant 0 : i32
    %c0_i32_1 = arith.constant 0 : i32
    return %arg0, %c0_i32, %c0_i32_0 : i32, i32, i32
  }
  func.func @transform_3(%arg0: i32) -> (i32, i32, i32) {
    %c0_i32 = arith.constant 0 : i32
    %c0_i32_0 = arith.constant 0 : i32
    %c0_i32_1 = arith.constant 0 : i32
    %c0_i32_2 = arith.constant 0 : i32
    return %c0_i32, %c0_i32_0, %c0_i32_1 : i32, i32, i32
  }
  func.func @transform_4(%arg0: i32) -> (i32, i32) {
    %c0_i32 = arith.constant 0 : i32
    %c0_i32_0 = arith.constant 0 : i32
    %c0_i32_1 = arith.constant 0 : i32
    return %c0_i32, %c0_i32_0 : i32, i32
  }
  func.func @transform_5(%arg0: i32) -> (i32, i32) {
    %c0_i32 = arith.constant 0 : i32
    %c0_i32_0 = arith.constant 0 : i32
    %c0_i32_1 = arith.constant 0 : i32
    return %c0_i32, %c0_i32_0 : i32, i32
  }
  func.func @transform_6(%arg0: i32) -> (i32, i32) {
    %c0_i32 = arith.constant 0 : i32
    %c0_i32_0 = arith.constant 0 : i32
    %c0_i32_1 = arith.constant 0 : i32
    return %c0_i32, %c0_i32_0 : i32, i32
  }
  func.func @transform_7(%arg0: i32) -> (i32, i32) {
    %c0_i32 = arith.constant 0 : i32
    %c0_i32_0 = arith.constant 0 : i32
    %c0_i32_1 = arith.constant 0 : i32
    return %c0_i32, %c0_i32_0 : i32, i32
  }
  func.func @transform_8(%arg0: i32) -> (i32, i32) {
    %c0_i32 = arith.constant 0 : i32
    %c0_i32_0 = arith.constant 0 : i32
    %c0_i32_1 = arith.constant 0 : i32
    return %c0_i32, %c0_i32_0 : i32, i32
  }
  func.func @transform_9(%arg0: i32) -> (i32, i32, i32) {
    %c0_i32 = arith.constant 0 : i32
    %c0_i32_0 = arith.constant 0 : i32
    %c0_i32_1 = arith.constant 0 : i32
    %c0_i32_2 = arith.constant 0 : i32
    return %c0_i32, %c0_i32_0, %c0_i32_1 : i32, i32, i32
  }
  func.func @transform_10(%arg0: i32) -> (i32, i32) {
    %c0_i32 = arith.constant 0 : i32
    %c0_i32_0 = arith.constant 0 : i32
    %c0_i32_1 = arith.constant 0 : i32
    return %c0_i32, %c0_i32_0 : i32, i32
  }
  func.func @transform_11(%arg0: i32) -> (i32, i32) {
    %c0_i32 = arith.constant 0 : i32
    %c0_i32_0 = arith.constant 0 : i32
    %c0_i32_1 = arith.constant 0 : i32
    return %c0_i32, %c0_i32_0 : i32, i32
  }
  func.func @transform_12(%arg0: i32) -> (i32, i32) {
    %c0_i32 = arith.constant 0 : i32
    %c0_i32_0 = arith.constant 0 : i32
    %c0_i32_1 = arith.constant 0 : i32
    return %c0_i32, %c0_i32_0 : i32, i32
  }
  func.func @transform_13(%arg0: i32) -> (i32, i32) {
    %c0_i32 = arith.constant 0 : i32
    %c0_i32_0 = arith.constant 0 : i32
    %c0_i32_1 = arith.constant 0 : i32
    return %c0_i32, %c0_i32_0 : i32, i32
  }
  func.func @transform_14(%arg0: i32) -> (i32, i32) {
    %c0_i32 = arith.constant 0 : i32
    %c0_i32_0 = arith.constant 0 : i32
    %c0_i32_1 = arith.constant 0 : i32
    return %c0_i32, %c0_i32_0 : i32, i32
  }
  func.func @transform_15(%arg0: i32) -> (i32, i32) {
    %c0_i32 = arith.constant 0 : i32
    %c0_i32_0 = arith.constant 0 : i32
    %c0_i32_1 = arith.constant 0 : i32
    return %c0_i32, %c0_i32_0 : i32, i32
  }
  func.func @transform_16(%arg0: i32) -> (i32, i32, i32) {
    %c0_i32 = arith.constant 0 : i32
    %c0_i32_0 = arith.constant 0 : i32
    %c0_i32_1 = arith.constant 0 : i32
    return %arg0, %c0_i32, %c0_i32_0 : i32, i32, i32
  }
}

module attributes {stable_mosaic.version = 11 : i64} {
  func.func @_resnet_kernel(%arg0: i32, %arg1: memref<1x8x32xf32, #tpu.memory_space<vmem>>, %arg2: memref<1x8x1xf32, #tpu.memory_space<vmem>>, %arg3: memref<1x1x128xf32, #tpu.memory_space<vmem>>, %arg4: memref<3x32x32xbf16, #tpu.memory_space<vmem>>, %arg5: memref<1x32xf32, #tpu.memory_space<vmem>>, %arg6: memref<1x32xf32, #tpu.memory_space<vmem>>, %arg7: memref<1x32xf32, #tpu.memory_space<vmem>>, %arg8: memref<128x32xbf16, #tpu.memory_space<vmem>>, %arg9: memref<1x32xf32, #tpu.memory_space<vmem>>, %arg10: memref<3x32x32xbf16, #tpu.memory_space<vmem>>, %arg11: memref<1x32xf32, #tpu.memory_space<vmem>>, %arg12: memref<1x32xf32, #tpu.memory_space<vmem>>, %arg13: memref<1x32xf32, #tpu.memory_space<vmem>>, %arg14: memref<32x32xbf16, #tpu.memory_space<vmem>>, %arg15: memref<1x32xf32, #tpu.memory_space<vmem>>, %arg16: memref<32x32xf32, #tpu.memory_space<vmem>>, %arg17: memref<1x8x32xf32, #tpu.memory_space<vmem>>, %arg18: memref<10x32xf32, #tpu.memory_space<vmem>>, %arg19: memref<10x32xf32, #tpu.memory_space<vmem>>) attributes {dimension_semantics = [#tpu.dimension_semantics<parallel>], iteration_bounds = array<i64: 2>, scalar_prefetch = 0 : i64, scratch_operands = 2 : i64, tpu.core_type = #tpu.core_type<tc>, window_params = [{transform_indices = @transform_0, window_bounds = array<i64: 1, 8, 32>}, {transform_indices = @transform_1, window_bounds = array<i64: 1, 8, 1>}, {transform_indices = @transform_2, window_bounds = array<i64: 1, 1, 128>}, {pipeline_mode = #tpu.pipeline_mode<synchronous>, transform_indices = @transform_3, window_bounds = array<i64: 3, 32, 32>}, {pipeline_mode = #tpu.pipeline_mode<synchronous>, transform_indices = @transform_4, window_bounds = array<i64: 1, 32>}, {pipeline_mode = #tpu.pipeline_mode<synchronous>, transform_indices = @transform_5, window_bounds = array<i64: 1, 32>}, {pipeline_mode = #tpu.pipeline_mode<synchronous>, transform_indices = @transform_6, window_bounds = array<i64: 1, 32>}, {pipeline_mode = #tpu.pipeline_mode<synchronous>, transform_indices = @transform_7, window_bounds = array<i64: 128, 32>}, {pipeline_mode = #tpu.pipeline_mode<synchronous>, transform_indices = @transform_8, window_bounds = array<i64: 1, 32>}, {pipeline_mode = #tpu.pipeline_mode<synchronous>, transform_indices = @transform_9, window_bounds = array<i64: 3, 32, 32>}, {pipeline_mode = #tpu.pipeline_mode<synchronous>, transform_indices = @transform_10, window_bounds = array<i64: 1, 32>}, {pipeline_mode = #tpu.pipeline_mode<synchronous>, transform_indices = @transform_11, window_bounds = array<i64: 1, 32>}, {pipeline_mode = #tpu.pipeline_mode<synchronous>, transform_indices = @transform_12, window_bounds = array<i64: 1, 32>}, {pipeline_mode = #tpu.pipeline_mode<synchronous>, transform_indices = @transform_13, window_bounds = array<i64: 32, 32>}, {pipeline_mode = #tpu.pipeline_mode<synchronous>, transform_indices = @transform_14, window_bounds = array<i64: 1, 32>}, {pipeline_mode = #tpu.pipeline_mode<synchronous>, transform_indices = @transform_15, window_bounds = array<i64: 32, 32>}, {transform_indices = @transform_16, window_bounds = array<i64: 1, 8, 32>}]} {
    %c0 = arith.constant 0 : index
    %c0_0 = arith.constant 0 : index
    %c0_1 = arith.constant 0 : index
    %0 = vector.load %arg1[%c0, %c0_0, %c0_1] : memref<1x8x32xf32, #tpu.memory_space<vmem>>, vector<1x8x32xf32>
    %1 = vector.shape_cast %0 : vector<1x8x32xf32> to vector<8x32xf32>
    %c0_2 = arith.constant 0 : index
    %c0_3 = arith.constant 0 : index
    %c0_4 = arith.constant 0 : index
    %2 = vector.load %arg2[%c0_2, %c0_3, %c0_4] : memref<1x8x1xf32, #tpu.memory_space<vmem>>, vector<1x8x1xf32>
    %3 = vector.shape_cast %2 : vector<1x8x1xf32> to vector<8x1xf32>
    %4 = vector.broadcast %3 : vector<8x1xf32> to vector<8x32xf32>
    %5 = arith.mulf %1, %4 : vector<8x32xf32>
    %c0_5 = arith.constant 0 : index
    %c0_6 = arith.constant 0 : index
    %6 = vector.load %arg16[%c0_5, %c0_6] : memref<32x32xf32, #tpu.memory_space<vmem>>, vector<32x32xf32>
    %cst = arith.constant 0.000000e+00 : f32
    %7 = vector.broadcast %cst : f32 to vector<10x32xf32>
    %c0_7 = arith.constant 0 : index
    %c0_8 = arith.constant 0 : index
    %8 = vector.load %arg18[%c0_7, %c0_8] : memref<10x32xf32, #tpu.memory_space<vmem>>, vector<10x32xf32>
    tpu.vector_store %arg18[%c0_7, %c0_8], %7 {strides = array<i32>} : memref<10x32xf32, #tpu.memory_space<vmem>>, vector<10x32xf32>,
    %c1 = arith.constant 1 : index
    %c0_9 = arith.constant 0 : index
    %9 = vector.load %arg18[%c1, %c0_9] : memref<10x32xf32, #tpu.memory_space<vmem>>, vector<8x32xf32>
    tpu.vector_store %arg18[%c1, %c0_9], %5 {strides = array<i32>} : memref<10x32xf32, #tpu.memory_space<vmem>>, vector<8x32xf32>,
    %c0_10 = arith.constant 0 : index
    %c0_11 = arith.constant 0 : index
    %10 = vector.load %arg18[%c0_10, %c0_11] : memref<10x32xf32, #tpu.memory_space<vmem>>, vector<8x32xf32>
    %11 = arith.truncf %10 : vector<8x32xf32> to vector<8x32xbf16>
    %c0_12 = arith.constant 0 : index
    %c0_13 = arith.constant 0 : index
    %c0_14 = arith.constant 0 : index
    %12 = vector.load %arg4[%c0_12, %c0_13, %c0_14] : memref<3x32x32xbf16, #tpu.memory_space<vmem>>, vector<1x32x32xbf16>
    %13 = vector.shape_cast %12 : vector<1x32x32xbf16> to vector<32x32xbf16>
    %cst_15 = arith.constant dense<0.000000e+00> : vector<8x32xf32>
    %14 = tpu.matmul %11, %13, %cst_15 {dimension_numbers = #tpu.dot_dimension_numbers<[1], [0], [0], [1], [0, 0, 1, 1], [], []>} : vector<8x32xbf16>, vector<32x32xbf16>, vector<8x32xf32> -> vector<8x32xf32>
    %c1_16 = arith.constant 1 : index
    %c0_17 = arith.constant 0 : index
    %15 = vector.load %arg18[%c1_16, %c0_17] : memref<10x32xf32, #tpu.memory_space<vmem>>, vector<8x32xf32>
    %16 = arith.truncf %15 : vector<8x32xf32> to vector<8x32xbf16>
    %c1_18 = arith.constant 1 : index
    %c0_19 = arith.constant 0 : index
    %c0_20 = arith.constant 0 : index
    %17 = vector.load %arg4[%c1_18, %c0_19, %c0_20] : memref<3x32x32xbf16, #tpu.memory_space<vmem>>, vector<1x32x32xbf16>
    %18 = vector.shape_cast %17 : vector<1x32x32xbf16> to vector<32x32xbf16>
    %cst_21 = arith.constant dense<0.000000e+00> : vector<8x32xf32>
    %19 = tpu.matmul %16, %18, %cst_21 {dimension_numbers = #tpu.dot_dimension_numbers<[1], [0], [0], [1], [0, 0, 1, 1], [], []>} : vector<8x32xbf16>, vector<32x32xbf16>, vector<8x32xf32> -> vector<8x32xf32>
    %20 = arith.addf %14, %19 : vector<8x32xf32>
    %c2 = arith.constant 2 : index
    %c0_22 = arith.constant 0 : index
    %21 = vector.load %arg18[%c2, %c0_22] : memref<10x32xf32, #tpu.memory_space<vmem>>, vector<8x32xf32>
    %22 = arith.truncf %21 : vector<8x32xf32> to vector<8x32xbf16>
    %c2_23 = arith.constant 2 : index
    %c0_24 = arith.constant 0 : index
    %c0_25 = arith.constant 0 : index
    %23 = vector.load %arg4[%c2_23, %c0_24, %c0_25] : memref<3x32x32xbf16, #tpu.memory_space<vmem>>, vector<1x32x32xbf16>
    %24 = vector.shape_cast %23 : vector<1x32x32xbf16> to vector<32x32xbf16>
    %cst_26 = arith.constant dense<0.000000e+00> : vector<8x32xf32>
    %25 = tpu.matmul %22, %24, %cst_26 {dimension_numbers = #tpu.dot_dimension_numbers<[1], [0], [0], [1], [0, 0, 1, 1], [], []>} : vector<8x32xbf16>, vector<32x32xbf16>, vector<8x32xf32> -> vector<8x32xf32>
    %26 = arith.addf %20, %25 : vector<8x32xf32>
    %c0_27 = arith.constant 0 : index
    %c0_28 = arith.constant 0 : index
    %27 = vector.load %arg5[%c0_27, %c0_28] : memref<1x32xf32, #tpu.memory_space<vmem>>, vector<1x32xf32>
    %28 = vector.broadcast %27 : vector<1x32xf32> to vector<8x32xf32>
    %29 = arith.addf %26, %28 : vector<8x32xf32>
    %c0_29 = arith.constant 0 : index
    %c0_30 = arith.constant 0 : index
    %30 = vector.load %arg6[%c0_29, %c0_30] : memref<1x32xf32, #tpu.memory_space<vmem>>, vector<1x32xf32>
    %c0_31 = arith.constant 0 : index
    %c0_32 = arith.constant 0 : index
    %31 = vector.load %arg7[%c0_31, %c0_32] : memref<1x32xf32, #tpu.memory_space<vmem>>, vector<1x32xf32>
    %cst_33 = arith.constant dense<0.000000e+00> : vector<32xf32>
    %32 = vector.multi_reduction <add>, %29, %cst_33 [0] : vector<8x32xf32> to vector<32xf32>
    %33 = vector.shape_cast %32 : vector<32xf32> to vector<1x32xf32>
    %cst_34 = arith.constant 8.000000e+00 : f32
    %34 = vector.broadcast %cst_34 : f32 to vector<1x32xf32>
    %35 = arith.divf %33, %34 : vector<1x32xf32>
    %36 = arith.mulf %29, %29 : vector<8x32xf32>
    %cst_35 = arith.constant dense<0.000000e+00> : vector<32xf32>
    %37 = vector.multi_reduction <add>, %36, %cst_35 [0] : vector<8x32xf32> to vector<32xf32>
    %38 = vector.shape_cast %37 : vector<32xf32> to vector<1x32xf32>
    %cst_36 = arith.constant 8.000000e+00 : f32
    %39 = vector.broadcast %cst_36 : f32 to vector<1x32xf32>
    %40 = arith.divf %38, %39 : vector<1x32xf32>
    %cst_37 = arith.constant dense<0.000000e+00> : vector<1x32xf32>
    %41 = tpu.matmul %35, %6, %cst_37 {dimension_numbers = #tpu.dot_dimension_numbers<[1], [0], [0], [1], [0, 0, 1, 1], [], []>} : vector<1x32xf32>, vector<32x32xf32>, vector<1x32xf32> -> vector<1x32xf32>
    %cst_38 = arith.constant dense<0.000000e+00> : vector<1x32xf32>
    %42 = tpu.matmul %40, %6, %cst_38 {dimension_numbers = #tpu.dot_dimension_numbers<[1], [0], [0], [1], [0, 0, 1, 1], [], []>} : vector<1x32xf32>, vector<32x32xf32>, vector<1x32xf32> -> vector<1x32xf32>
    %43 = arith.mulf %41, %41 : vector<1x32xf32>
    %44 = arith.subf %42, %43 : vector<1x32xf32>
    %45 = vector.broadcast %41 : vector<1x32xf32> to vector<8x32xf32>
    %46 = arith.subf %29, %45 : vector<8x32xf32>
    %cst_39 = arith.constant 9.99999974E-6 : f32
    %47 = vector.broadcast %cst_39 : f32 to vector<1x32xf32>
    %48 = arith.addf %44, %47 : vector<1x32xf32>
    %49 = math.rsqrt %48 : vector<1x32xf32>
    %50 = vector.broadcast %49 : vector<1x32xf32> to vector<8x32xf32>
    %51 = arith.mulf %46, %50 : vector<8x32xf32>
    %52 = vector.broadcast %30 : vector<1x32xf32> to vector<8x32xf32>
    %53 = arith.mulf %51, %52 : vector<8x32xf32>
    %54 = vector.broadcast %31 : vector<1x32xf32> to vector<8x32xf32>
    %55 = arith.addf %53, %54 : vector<8x32xf32>
    %cst_40 = arith.constant 3.000000e+01 : f32
    %56 = vector.broadcast %cst_40 : f32 to vector<8x32xf32>
    %57 = arith.minimumf %55, %56 : vector<8x32xf32>
    %58 = math.exp %57 : vector<8x32xf32>
    %cst_41 = arith.constant 2.000000e+00 : f32
    %59 = vector.broadcast %cst_41 : f32 to vector<8x32xf32>
    %60 = arith.addf %58, %59 : vector<8x32xf32>
    %61 = arith.mulf %58, %60 : vector<8x32xf32>
    %62 = arith.mulf %55, %61 : vector<8x32xf32>
    %cst_42 = arith.constant 2.000000e+00 : f32
    %63 = vector.broadcast %cst_42 : f32 to vector<8x32xf32>
    %64 = arith.addf %61, %63 : vector<8x32xf32>
    %65 = arith.divf %62, %64 : vector<8x32xf32>
    %66 = vector.broadcast %3 : vector<8x1xf32> to vector<8x32xf32>
    %67 = arith.mulf %65, %66 : vector<8x32xf32>
    %c0_43 = arith.constant 0 : index
    %c0_44 = arith.constant 0 : index
    %c0_45 = arith.constant 0 : index
    %68 = vector.load %arg3[%c0_43, %c0_44, %c0_45] : memref<1x1x128xf32, #tpu.memory_space<vmem>>, vector<1x1x128xf32>
    %69 = vector.shape_cast %68 : vector<1x1x128xf32> to vector<1x128xf32>
    %70 = arith.truncf %69 : vector<1x128xf32> to vector<1x128xbf16>
    %c0_46 = arith.constant 0 : index
    %c0_47 = arith.constant 0 : index
    %71 = vector.load %arg8[%c0_46, %c0_47] : memref<128x32xbf16, #tpu.memory_space<vmem>>, vector<128x32xbf16>
    %cst_48 = arith.constant dense<0.000000e+00> : vector<1x32xf32>
    %72 = tpu.matmul %70, %71, %cst_48 {dimension_numbers = #tpu.dot_dimension_numbers<[1], [0], [0], [1], [0, 0, 1, 1], [], []>} : vector<1x128xbf16>, vector<128x32xbf16>, vector<1x32xf32> -> vector<1x32xf32>
    %c0_49 = arith.constant 0 : index
    %c0_50 = arith.constant 0 : index
    %73 = vector.load %arg9[%c0_49, %c0_50] : memref<1x32xf32, #tpu.memory_space<vmem>>, vector<1x32xf32>
    %74 = arith.addf %72, %73 : vector<1x32xf32>
    %75 = vector.broadcast %74 : vector<1x32xf32> to vector<8x32xf32>
    %76 = arith.addf %67, %75 : vector<8x32xf32>
    %77 = vector.broadcast %3 : vector<8x1xf32> to vector<8x32xf32>
    %78 = arith.mulf %76, %77 : vector<8x32xf32>
    %cst_51 = arith.constant 0.000000e+00 : f32
    %79 = vector.broadcast %cst_51 : f32 to vector<10x32xf32>
    %c0_52 = arith.constant 0 : index
    %c0_53 = arith.constant 0 : index
    %80 = vector.load %arg19[%c0_52, %c0_53] : memref<10x32xf32, #tpu.memory_space<vmem>>, vector<10x32xf32>
    tpu.vector_store %arg19[%c0_52, %c0_53], %79 {strides = array<i32>} : memref<10x32xf32, #tpu.memory_space<vmem>>, vector<10x32xf32>,
    %c1_54 = arith.constant 1 : index
    %c0_55 = arith.constant 0 : index
    %81 = vector.load %arg19[%c1_54, %c0_55] : memref<10x32xf32, #tpu.memory_space<vmem>>, vector<8x32xf32>
    tpu.vector_store %arg19[%c1_54, %c0_55], %78 {strides = array<i32>} : memref<10x32xf32, #tpu.memory_space<vmem>>, vector<8x32xf32>,
    %c0_56 = arith.constant 0 : index
    %c0_57 = arith.constant 0 : index
    %82 = vector.load %arg19[%c0_56, %c0_57] : memref<10x32xf32, #tpu.memory_space<vmem>>, vector<8x32xf32>
    %83 = arith.truncf %82 : vector<8x32xf32> to vector<8x32xbf16>
    %c0_58 = arith.constant 0 : index
    %c0_59 = arith.constant 0 : index
    %c0_60 = arith.constant 0 : index
    %84 = vector.load %arg10[%c0_58, %c0_59, %c0_60] : memref<3x32x32xbf16, #tpu.memory_space<vmem>>, vector<1x32x32xbf16>
    %85 = vector.shape_cast %84 : vector<1x32x32xbf16> to vector<32x32xbf16>
    %cst_61 = arith.constant dense<0.000000e+00> : vector<8x32xf32>
    %86 = tpu.matmul %83, %85, %cst_61 {dimension_numbers = #tpu.dot_dimension_numbers<[1], [0], [0], [1], [0, 0, 1, 1], [], []>} : vector<8x32xbf16>, vector<32x32xbf16>, vector<8x32xf32> -> vector<8x32xf32>
    %c1_62 = arith.constant 1 : index
    %c0_63 = arith.constant 0 : index
    %87 = vector.load %arg19[%c1_62, %c0_63] : memref<10x32xf32, #tpu.memory_space<vmem>>, vector<8x32xf32>
    %88 = arith.truncf %87 : vector<8x32xf32> to vector<8x32xbf16>
    %c1_64 = arith.constant 1 : index
    %c0_65 = arith.constant 0 : index
    %c0_66 = arith.constant 0 : index
    %89 = vector.load %arg10[%c1_64, %c0_65, %c0_66] : memref<3x32x32xbf16, #tpu.memory_space<vmem>>, vector<1x32x32xbf16>
    %90 = vector.shape_cast %89 : vector<1x32x32xbf16> to vector<32x32xbf16>
    %cst_67 = arith.constant dense<0.000000e+00> : vector<8x32xf32>
    %91 = tpu.matmul %88, %90, %cst_67 {dimension_numbers = #tpu.dot_dimension_numbers<[1], [0], [0], [1], [0, 0, 1, 1], [], []>} : vector<8x32xbf16>, vector<32x32xbf16>, vector<8x32xf32> -> vector<8x32xf32>
    %92 = arith.addf %86, %91 : vector<8x32xf32>
    %c2_68 = arith.constant 2 : index
    %c0_69 = arith.constant 0 : index
    %93 = vector.load %arg19[%c2_68, %c0_69] : memref<10x32xf32, #tpu.memory_space<vmem>>, vector<8x32xf32>
    %94 = arith.truncf %93 : vector<8x32xf32> to vector<8x32xbf16>
    %c2_70 = arith.constant 2 : index
    %c0_71 = arith.constant 0 : index
    %c0_72 = arith.constant 0 : index
    %95 = vector.load %arg10[%c2_70, %c0_71, %c0_72] : memref<3x32x32xbf16, #tpu.memory_space<vmem>>, vector<1x32x32xbf16>
    %96 = vector.shape_cast %95 : vector<1x32x32xbf16> to vector<32x32xbf16>
    %cst_73 = arith.constant dense<0.000000e+00> : vector<8x32xf32>
    %97 = tpu.matmul %94, %96, %cst_73 {dimension_numbers = #tpu.dot_dimension_numbers<[1], [0], [0], [1], [0, 0, 1, 1], [], []>} : vector<8x32xbf16>, vector<32x32xbf16>, vector<8x32xf32> -> vector<8x32xf32>
    %98 = arith.addf %92, %97 : vector<8x32xf32>
    %c0_74 = arith.constant 0 : index
    %c0_75 = arith.constant 0 : index
    %99 = vector.load %arg11[%c0_74, %c0_75] : memref<1x32xf32, #tpu.memory_space<vmem>>, vector<1x32xf32>
    %100 = vector.broadcast %99 : vector<1x32xf32> to vector<8x32xf32>
    %101 = arith.addf %98, %100 : vector<8x32xf32>
    %c0_76 = arith.constant 0 : index
    %c0_77 = arith.constant 0 : index
    %102 = vector.load %arg12[%c0_76, %c0_77] : memref<1x32xf32, #tpu.memory_space<vmem>>, vector<1x32xf32>
    %c0_78 = arith.constant 0 : index
    %c0_79 = arith.constant 0 : index
    %103 = vector.load %arg13[%c0_78, %c0_79] : memref<1x32xf32, #tpu.memory_space<vmem>>, vector<1x32xf32>
    %cst_80 = arith.constant dense<0.000000e+00> : vector<32xf32>
    %104 = vector.multi_reduction <add>, %101, %cst_80 [0] : vector<8x32xf32> to vector<32xf32>
    %105 = vector.shape_cast %104 : vector<32xf32> to vector<1x32xf32>
    %cst_81 = arith.constant 8.000000e+00 : f32
    %106 = vector.broadcast %cst_81 : f32 to vector<1x32xf32>
    %107 = arith.divf %105, %106 : vector<1x32xf32>
    %108 = arith.mulf %101, %101 : vector<8x32xf32>
    %cst_82 = arith.constant dense<0.000000e+00> : vector<32xf32>
    %109 = vector.multi_reduction <add>, %108, %cst_82 [0] : vector<8x32xf32> to vector<32xf32>
    %110 = vector.shape_cast %109 : vector<32xf32> to vector<1x32xf32>
    %cst_83 = arith.constant 8.000000e+00 : f32
    %111 = vector.broadcast %cst_83 : f32 to vector<1x32xf32>
    %112 = arith.divf %110, %111 : vector<1x32xf32>
    %cst_84 = arith.constant dense<0.000000e+00> : vector<1x32xf32>
    %113 = tpu.matmul %107, %6, %cst_84 {dimension_numbers = #tpu.dot_dimension_numbers<[1], [0], [0], [1], [0, 0, 1, 1], [], []>} : vector<1x32xf32>, vector<32x32xf32>, vector<1x32xf32> -> vector<1x32xf32>
    %cst_85 = arith.constant dense<0.000000e+00> : vector<1x32xf32>
    %114 = tpu.matmul %112, %6, %cst_85 {dimension_numbers = #tpu.dot_dimension_numbers<[1], [0], [0], [1], [0, 0, 1, 1], [], []>} : vector<1x32xf32>, vector<32x32xf32>, vector<1x32xf32> -> vector<1x32xf32>
    %115 = arith.mulf %113, %113 : vector<1x32xf32>
    %116 = arith.subf %114, %115 : vector<1x32xf32>
    %117 = vector.broadcast %113 : vector<1x32xf32> to vector<8x32xf32>
    %118 = arith.subf %101, %117 : vector<8x32xf32>
    %cst_86 = arith.constant 9.99999974E-6 : f32
    %119 = vector.broadcast %cst_86 : f32 to vector<1x32xf32>
    %120 = arith.addf %116, %119 : vector<1x32xf32>
    %121 = math.rsqrt %120 : vector<1x32xf32>
    %122 = vector.broadcast %121 : vector<1x32xf32> to vector<8x32xf32>
    %123 = arith.mulf %118, %122 : vector<8x32xf32>
    %124 = vector.broadcast %102 : vector<1x32xf32> to vector<8x32xf32>
    %125 = arith.mulf %123, %124 : vector<8x32xf32>
    %126 = vector.broadcast %103 : vector<1x32xf32> to vector<8x32xf32>
    %127 = arith.addf %125, %126 : vector<8x32xf32>
    %cst_87 = arith.constant 3.000000e+01 : f32
    %128 = vector.broadcast %cst_87 : f32 to vector<8x32xf32>
    %129 = arith.minimumf %127, %128 : vector<8x32xf32>
    %130 = math.exp %129 : vector<8x32xf32>
    %cst_88 = arith.constant 2.000000e+00 : f32
    %131 = vector.broadcast %cst_88 : f32 to vector<8x32xf32>
    %132 = arith.addf %130, %131 : vector<8x32xf32>
    %133 = arith.mulf %130, %132 : vector<8x32xf32>
    %134 = arith.mulf %127, %133 : vector<8x32xf32>
    %cst_89 = arith.constant 2.000000e+00 : f32
    %135 = vector.broadcast %cst_89 : f32 to vector<8x32xf32>
    %136 = arith.addf %133, %135 : vector<8x32xf32>
    %137 = arith.divf %134, %136 : vector<8x32xf32>
    %138 = vector.broadcast %3 : vector<8x1xf32> to vector<8x32xf32>
    %139 = arith.mulf %137, %138 : vector<8x32xf32>
    %140 = arith.truncf %5 : vector<8x32xf32> to vector<8x32xbf16>
    %c0_90 = arith.constant 0 : index
    %c0_91 = arith.constant 0 : index
    %141 = vector.load %arg14[%c0_90, %c0_91] : memref<32x32xbf16, #tpu.memory_space<vmem>>, vector<32x32xbf16>
    %cst_92 = arith.constant dense<0.000000e+00> : vector<8x32xf32>
    %142 = tpu.matmul %140, %141, %cst_92 {dimension_numbers = #tpu.dot_dimension_numbers<[1], [0], [0], [1], [0, 0, 1, 1], [], []>} : vector<8x32xbf16>, vector<32x32xbf16>, vector<8x32xf32> -> vector<8x32xf32>
    %c0_93 = arith.constant 0 : index
    %c0_94 = arith.constant 0 : index
    %143 = vector.load %arg15[%c0_93, %c0_94] : memref<1x32xf32, #tpu.memory_space<vmem>>, vector<1x32xf32>
    %144 = vector.broadcast %143 : vector<1x32xf32> to vector<8x32xf32>
    %145 = arith.addf %142, %144 : vector<8x32xf32>
    %146 = arith.addf %139, %145 : vector<8x32xf32>
    %c0_95 = arith.constant 0 : index
    %c0_96 = arith.constant 0 : index
    %c0_97 = arith.constant 0 : index
    %147 = vector.load %arg17[%c0_95, %c0_96, %c0_97] : memref<1x8x32xf32, #tpu.memory_space<vmem>>, vector<1x8x32xf32>
    %148 = vector.shape_cast %147 : vector<1x8x32xf32> to vector<8x32xf32>
    %149 = vector.shape_cast %146 : vector<8x32xf32> to vector<1x8x32xf32>
    tpu.vector_store %arg17[%c0_95, %c0_96, %c0_97], %149 {strides = array<i32>} : memref<1x8x32xf32, #tpu.memory_space<vmem>>, vector<1x8x32xf32>,
    return
  }
  func.func @transform_0(%arg0: i32) -> (i32, i32, i32) {
    %c0_i32 = arith.constant 0 : i32
    %c0_i32_0 = arith.constant 0 : i32
    %c0_i32_1 = arith.constant 0 : i32
    return %arg0, %c0_i32, %c0_i32_0 : i32, i32, i32
  }
  func.func @transform_1(%arg0: i32) -> (i32, i32, i32) {
    %c0_i32 = arith.constant 0 : i32
    %c0_i32_0 = arith.constant 0 : i32
    %c0_i32_1 = arith.constant 0 : i32
    return %arg0, %c0_i32, %c0_i32_0 : i32, i32, i32
  }
  func.func @transform_2(%arg0: i32) -> (i32, i32, i32) {
    %c0_i32 = arith.constant 0 : i32
    %c0_i32_0 = arith.constant 0 : i32
    %c0_i32_1 = arith.constant 0 : i32
    return %arg0, %c0_i32, %c0_i32_0 : i32, i32, i32
  }
  func.func @transform_3(%arg0: i32) -> (i32, i32, i32) {
    %c0_i32 = arith.constant 0 : i32
    %c0_i32_0 = arith.constant 0 : i32
    %c0_i32_1 = arith.constant 0 : i32
    %c0_i32_2 = arith.constant 0 : i32
    return %c0_i32, %c0_i32_0, %c0_i32_1 : i32, i32, i32
  }
  func.func @transform_4(%arg0: i32) -> (i32, i32) {
    %c0_i32 = arith.constant 0 : i32
    %c0_i32_0 = arith.constant 0 : i32
    %c0_i32_1 = arith.constant 0 : i32
    return %c0_i32, %c0_i32_0 : i32, i32
  }
  func.func @transform_5(%arg0: i32) -> (i32, i32) {
    %c0_i32 = arith.constant 0 : i32
    %c0_i32_0 = arith.constant 0 : i32
    %c0_i32_1 = arith.constant 0 : i32
    return %c0_i32, %c0_i32_0 : i32, i32
  }
  func.func @transform_6(%arg0: i32) -> (i32, i32) {
    %c0_i32 = arith.constant 0 : i32
    %c0_i32_0 = arith.constant 0 : i32
    %c0_i32_1 = arith.constant 0 : i32
    return %c0_i32, %c0_i32_0 : i32, i32
  }
  func.func @transform_7(%arg0: i32) -> (i32, i32) {
    %c0_i32 = arith.constant 0 : i32
    %c0_i32_0 = arith.constant 0 : i32
    %c0_i32_1 = arith.constant 0 : i32
    return %c0_i32, %c0_i32_0 : i32, i32
  }
  func.func @transform_8(%arg0: i32) -> (i32, i32) {
    %c0_i32 = arith.constant 0 : i32
    %c0_i32_0 = arith.constant 0 : i32
    %c0_i32_1 = arith.constant 0 : i32
    return %c0_i32, %c0_i32_0 : i32, i32
  }
  func.func @transform_9(%arg0: i32) -> (i32, i32, i32) {
    %c0_i32 = arith.constant 0 : i32
    %c0_i32_0 = arith.constant 0 : i32
    %c0_i32_1 = arith.constant 0 : i32
    %c0_i32_2 = arith.constant 0 : i32
    return %c0_i32, %c0_i32_0, %c0_i32_1 : i32, i32, i32
  }
  func.func @transform_10(%arg0: i32) -> (i32, i32) {
    %c0_i32 = arith.constant 0 : i32
    %c0_i32_0 = arith.constant 0 : i32
    %c0_i32_1 = arith.constant 0 : i32
    return %c0_i32, %c0_i32_0 : i32, i32
  }
  func.func @transform_11(%arg0: i32) -> (i32, i32) {
    %c0_i32 = arith.constant 0 : i32
    %c0_i32_0 = arith.constant 0 : i32
    %c0_i32_1 = arith.constant 0 : i32
    return %c0_i32, %c0_i32_0 : i32, i32
  }
  func.func @transform_12(%arg0: i32) -> (i32, i32) {
    %c0_i32 = arith.constant 0 : i32
    %c0_i32_0 = arith.constant 0 : i32
    %c0_i32_1 = arith.constant 0 : i32
    return %c0_i32, %c0_i32_0 : i32, i32
  }
  func.func @transform_13(%arg0: i32) -> (i32, i32) {
    %c0_i32 = arith.constant 0 : i32
    %c0_i32_0 = arith.constant 0 : i32
    %c0_i32_1 = arith.constant 0 : i32
    return %c0_i32, %c0_i32_0 : i32, i32
  }
  func.func @transform_14(%arg0: i32) -> (i32, i32) {
    %c0_i32 = arith.constant 0 : i32
    %c0_i32_0 = arith.constant 0 : i32
    %c0_i32_1 = arith.constant 0 : i32
    return %c0_i32, %c0_i32_0 : i32, i32
  }
  func.func @transform_15(%arg0: i32) -> (i32, i32) {
    %c0_i32 = arith.constant 0 : i32
    %c0_i32_0 = arith.constant 0 : i32
    %c0_i32_1 = arith.constant 0 : i32
    return %c0_i32, %c0_i32_0 : i32, i32
  }
  func.func @transform_16(%arg0: i32) -> (i32, i32, i32) {
    %c0_i32 = arith.constant 0 : i32
    %c0_i32_0 = arith.constant 0 : i32
    %c0_i32_1 = arith.constant 0 : i32
    return %arg0, %c0_i32, %c0_i32_0 : i32, i32, i32
  }
}

module attributes {stable_mosaic.version = 11 : i64} {
  func.func @_transformer_kernel(%arg0: i32, %arg1: memref<1x8x32xf32, #tpu.memory_space<vmem>>, %arg2: memref<1x8x1xf32, #tpu.memory_space<vmem>>, %arg3: memref<1x1x8xf32, #tpu.memory_space<vmem>>, %arg4: memref<1x32xf32, #tpu.memory_space<vmem>>, %arg5: memref<1x32xf32, #tpu.memory_space<vmem>>, %arg6: memref<2x32x16xbf16, #tpu.memory_space<vmem>>, %arg7: memref<2x32x16xbf16, #tpu.memory_space<vmem>>, %arg8: memref<2x32x16xbf16, #tpu.memory_space<vmem>>, %arg9: memref<2x16x32xbf16, #tpu.memory_space<vmem>>, %arg10: memref<1x32xf32, #tpu.memory_space<vmem>>, %arg11: memref<1x32xf32, #tpu.memory_space<vmem>>, %arg12: memref<1x32xf32, #tpu.memory_space<vmem>>, %arg13: memref<32x128xbf16, #tpu.memory_space<vmem>>, %arg14: memref<1x128xf32, #tpu.memory_space<vmem>>, %arg15: memref<1x128xf32, #tpu.memory_space<vmem>>, %arg16: memref<1x128xf32, #tpu.memory_space<vmem>>, %arg17: memref<128x32xbf16, #tpu.memory_space<vmem>>, %arg18: memref<1x32xf32, #tpu.memory_space<vmem>>, %arg19: memref<1x8x32xf32, #tpu.memory_space<vmem>>) attributes {dimension_semantics = [#tpu.dimension_semantics<parallel>], iteration_bounds = array<i64: 2>, scalar_prefetch = 0 : i64, scratch_operands = 0 : i64, tpu.core_type = #tpu.core_type<tc>, window_params = [{transform_indices = @transform_0, window_bounds = array<i64: 1, 8, 32>}, {transform_indices = @transform_1, window_bounds = array<i64: 1, 8, 1>}, {transform_indices = @transform_2, window_bounds = array<i64: 1, 1, 8>}, {pipeline_mode = #tpu.pipeline_mode<synchronous>, transform_indices = @transform_3, window_bounds = array<i64: 1, 32>}, {pipeline_mode = #tpu.pipeline_mode<synchronous>, transform_indices = @transform_4, window_bounds = array<i64: 1, 32>}, {pipeline_mode = #tpu.pipeline_mode<synchronous>, transform_indices = @transform_5, window_bounds = array<i64: 2, 32, 16>}, {pipeline_mode = #tpu.pipeline_mode<synchronous>, transform_indices = @transform_6, window_bounds = array<i64: 2, 32, 16>}, {pipeline_mode = #tpu.pipeline_mode<synchronous>, transform_indices = @transform_7, window_bounds = array<i64: 2, 32, 16>}, {pipeline_mode = #tpu.pipeline_mode<synchronous>, transform_indices = @transform_8, window_bounds = array<i64: 2, 16, 32>}, {pipeline_mode = #tpu.pipeline_mode<synchronous>, transform_indices = @transform_9, window_bounds = array<i64: 1, 32>}, {pipeline_mode = #tpu.pipeline_mode<synchronous>, transform_indices = @transform_10, window_bounds = array<i64: 1, 32>}, {pipeline_mode = #tpu.pipeline_mode<synchronous>, transform_indices = @transform_11, window_bounds = array<i64: 1, 32>}, {pipeline_mode = #tpu.pipeline_mode<synchronous>, transform_indices = @transform_12, window_bounds = array<i64: 32, 128>}, {pipeline_mode = #tpu.pipeline_mode<synchronous>, transform_indices = @transform_13, window_bounds = array<i64: 1, 128>}, {pipeline_mode = #tpu.pipeline_mode<synchronous>, transform_indices = @transform_14, window_bounds = array<i64: 1, 128>}, {pipeline_mode = #tpu.pipeline_mode<synchronous>, transform_indices = @transform_15, window_bounds = array<i64: 1, 128>}, {pipeline_mode = #tpu.pipeline_mode<synchronous>, transform_indices = @transform_16, window_bounds = array<i64: 128, 32>}, {pipeline_mode = #tpu.pipeline_mode<synchronous>, transform_indices = @transform_17, window_bounds = array<i64: 1, 32>}, {transform_indices = @transform_18, window_bounds = array<i64: 1, 8, 32>}]} {
    %c0 = arith.constant 0 : index
    %c0_0 = arith.constant 0 : index
    %c0_1 = arith.constant 0 : index
    %0 = vector.load %arg1[%c0, %c0_0, %c0_1] : memref<1x8x32xf32, #tpu.memory_space<vmem>>, vector<1x8x32xf32>
    %1 = vector.shape_cast %0 : vector<1x8x32xf32> to vector<8x32xf32>
    %c0_2 = arith.constant 0 : index
    %c0_3 = arith.constant 0 : index
    %c0_4 = arith.constant 0 : index
    %2 = vector.load %arg2[%c0_2, %c0_3, %c0_4] : memref<1x8x1xf32, #tpu.memory_space<vmem>>, vector<1x8x1xf32>
    %3 = vector.shape_cast %2 : vector<1x8x1xf32> to vector<8x1xf32>
    %c0_5 = arith.constant 0 : index
    %c0_6 = arith.constant 0 : index
    %c0_7 = arith.constant 0 : index
    %4 = vector.load %arg3[%c0_5, %c0_6, %c0_7] : memref<1x1x8xf32, #tpu.memory_space<vmem>>, vector<1x1x8xf32>
    %5 = vector.shape_cast %4 : vector<1x1x8xf32> to vector<1x8xf32>
    %6 = vector.broadcast %3 : vector<8x1xf32> to vector<8x8xf32>
    %7 = vector.broadcast %5 : vector<1x8xf32> to vector<8x8xf32>
    %8 = arith.mulf %6, %7 : vector<8x8xf32>
    %c0_8 = arith.constant 0 : index
    %c0_9 = arith.constant 0 : index
    %9 = vector.load %arg4[%c0_8, %c0_9] : memref<1x32xf32, #tpu.memory_space<vmem>>, vector<1x32xf32>
    %c0_10 = arith.constant 0 : index
    %c0_11 = arith.constant 0 : index
    %10 = vector.load %arg5[%c0_10, %c0_11] : memref<1x32xf32, #tpu.memory_space<vmem>>, vector<1x32xf32>
    %cst = arith.constant dense<0.000000e+00> : vector<8xf32>
    %11 = vector.multi_reduction <add>, %1, %cst [1] : vector<8x32xf32> to vector<8xf32>
    %12 = vector.shape_cast %11 : vector<8xf32> to vector<8x1xf32>
    %cst_12 = arith.constant 3.200000e+01 : f32
    %13 = vector.broadcast %cst_12 : f32 to vector<8x1xf32>
    %14 = arith.divf %12, %13 : vector<8x1xf32>
    %15 = vector.broadcast %14 : vector<8x1xf32> to vector<8x32xf32>
    %16 = arith.subf %1, %15 : vector<8x32xf32>
    %17 = arith.mulf %16, %16 : vector<8x32xf32>
    %cst_13 = arith.constant dense<0.000000e+00> : vector<8xf32>
    %18 = vector.multi_reduction <add>, %17, %cst_13 [1] : vector<8x32xf32> to vector<8xf32>
    %19 = vector.shape_cast %18 : vector<8xf32> to vector<8x1xf32>
    %cst_14 = arith.constant 3.200000e+01 : f32
    %20 = vector.broadcast %cst_14 : f32 to vector<8x1xf32>
    %21 = arith.divf %19, %20 : vector<8x1xf32>
    %22 = vector.broadcast %14 : vector<8x1xf32> to vector<8x32xf32>
    %23 = arith.subf %1, %22 : vector<8x32xf32>
    %cst_15 = arith.constant 9.99999974E-6 : f32
    %24 = vector.broadcast %cst_15 : f32 to vector<8x1xf32>
    %25 = arith.addf %21, %24 : vector<8x1xf32>
    %26 = math.rsqrt %25 : vector<8x1xf32>
    %27 = vector.broadcast %26 : vector<8x1xf32> to vector<8x32xf32>
    %28 = arith.mulf %23, %27 : vector<8x32xf32>
    %29 = vector.broadcast %9 : vector<1x32xf32> to vector<8x32xf32>
    %30 = arith.mulf %28, %29 : vector<8x32xf32>
    %31 = vector.broadcast %10 : vector<1x32xf32> to vector<8x32xf32>
    %32 = arith.addf %30, %31 : vector<8x32xf32>
    %33 = arith.truncf %32 : vector<8x32xf32> to vector<8x32xbf16>
    %c0_16 = arith.constant 0 : index
    %c0_17 = arith.constant 0 : index
    %c0_18 = arith.constant 0 : index
    %34 = vector.load %arg6[%c0_16, %c0_17, %c0_18] : memref<2x32x16xbf16, #tpu.memory_space<vmem>>, vector<1x32x16xbf16>
    %35 = vector.shape_cast %34 : vector<1x32x16xbf16> to vector<32x16xbf16>
    %cst_19 = arith.constant dense<0.000000e+00> : vector<8x16xf32>
    %36 = tpu.matmul %33, %35, %cst_19 {dimension_numbers = #tpu.dot_dimension_numbers<[1], [0], [0], [1], [0, 0, 1, 1], [], []>} : vector<8x32xbf16>, vector<32x16xbf16>, vector<8x16xf32> -> vector<8x16xf32>
    %cst_20 = arith.constant 2.500000e-01 : f32
    %37 = vector.broadcast %cst_20 : f32 to vector<8x16xf32>
    %38 = arith.mulf %36, %37 : vector<8x16xf32>
    %c0_21 = arith.constant 0 : index
    %c0_22 = arith.constant 0 : index
    %c0_23 = arith.constant 0 : index
    %39 = vector.load %arg7[%c0_21, %c0_22, %c0_23] : memref<2x32x16xbf16, #tpu.memory_space<vmem>>, vector<1x32x16xbf16>
    %40 = vector.shape_cast %39 : vector<1x32x16xbf16> to vector<32x16xbf16>
    %cst_24 = arith.constant dense<0.000000e+00> : vector<8x16xf32>
    %41 = tpu.matmul %33, %40, %cst_24 {dimension_numbers = #tpu.dot_dimension_numbers<[1], [0], [0], [1], [0, 0, 1, 1], [], []>} : vector<8x32xbf16>, vector<32x16xbf16>, vector<8x16xf32> -> vector<8x16xf32>
    %c0_25 = arith.constant 0 : index
    %c0_26 = arith.constant 0 : index
    %c0_27 = arith.constant 0 : index
    %42 = vector.load %arg8[%c0_25, %c0_26, %c0_27] : memref<2x32x16xbf16, #tpu.memory_space<vmem>>, vector<1x32x16xbf16>
    %43 = vector.shape_cast %42 : vector<1x32x16xbf16> to vector<32x16xbf16>
    %cst_28 = arith.constant dense<0.000000e+00> : vector<8x16xf32>
    %44 = tpu.matmul %33, %43, %cst_28 {dimension_numbers = #tpu.dot_dimension_numbers<[1], [0], [0], [1], [0, 0, 1, 1], [], []>} : vector<8x32xbf16>, vector<32x16xbf16>, vector<8x16xf32> -> vector<8x16xf32>
    %45 = arith.truncf %38 : vector<8x16xf32> to vector<8x16xbf16>
    %46 = arith.truncf %41 : vector<8x16xf32> to vector<8x16xbf16>
    %cst_29 = arith.constant dense<0.000000e+00> : vector<8x8xf32>
    %47 = tpu.matmul %45, %46, %cst_29 {dimension_numbers = #tpu.dot_dimension_numbers<[1], [1], [0], [0], [0, 0, 1, 0], [], []>} : vector<8x16xbf16>, vector<8x16xbf16>, vector<8x8xf32> -> vector<8x8xf32>
    %48 = arith.addf %8, %47 : vector<8x8xf32>
    %cst_30 = arith.constant dense<0xFF800000> : vector<8xf32>
    %49 = vector.multi_reduction <maximumf>, %48, %cst_30 [1] : vector<8x8xf32> to vector<8xf32>
    %50 = vector.shape_cast %49 : vector<8xf32> to vector<8x1xf32>
    %51 = vector.broadcast %50 : vector<8x1xf32> to vector<8x8xf32>
    %52 = arith.subf %48, %51 : vector<8x8xf32>
    %53 = math.exp %52 : vector<8x8xf32>
    %cst_31 = arith.constant dense<0.000000e+00> : vector<8xf32>
    %54 = vector.multi_reduction <add>, %53, %cst_31 [1] : vector<8x8xf32> to vector<8xf32>
    %55 = vector.shape_cast %54 : vector<8xf32> to vector<8x1xf32>
    %56 = vector.broadcast %55 : vector<8x1xf32> to vector<8x8xf32>
    %57 = arith.divf %53, %56 : vector<8x8xf32>
    %58 = arith.truncf %57 : vector<8x8xf32> to vector<8x8xbf16>
    %59 = arith.truncf %44 : vector<8x16xf32> to vector<8x16xbf16>
    %cst_32 = arith.constant dense<0.000000e+00> : vector<8x16xf32>
    %60 = tpu.matmul %58, %59, %cst_32 {dimension_numbers = #tpu.dot_dimension_numbers<[1], [0], [0], [1], [0, 0, 1, 1], [], []>} : vector<8x8xbf16>, vector<8x16xbf16>, vector<8x16xf32> -> vector<8x16xf32>
    %61 = arith.truncf %60 : vector<8x16xf32> to vector<8x16xbf16>
    %c0_33 = arith.constant 0 : index
    %c0_34 = arith.constant 0 : index
    %c0_35 = arith.constant 0 : index
    %62 = vector.load %arg9[%c0_33, %c0_34, %c0_35] : memref<2x16x32xbf16, #tpu.memory_space<vmem>>, vector<1x16x32xbf16>
    %63 = vector.shape_cast %62 : vector<1x16x32xbf16> to vector<16x32xbf16>
    %cst_36 = arith.constant dense<0.000000e+00> : vector<8x32xf32>
    %64 = tpu.matmul %61, %63, %cst_36 {dimension_numbers = #tpu.dot_dimension_numbers<[1], [0], [0], [1], [0, 0, 1, 1], [], []>} : vector<8x16xbf16>, vector<16x32xbf16>, vector<8x32xf32> -> vector<8x32xf32>
    %c1 = arith.constant 1 : index
    %c0_37 = arith.constant 0 : index
    %c0_38 = arith.constant 0 : index
    %65 = vector.load %arg6[%c1, %c0_37, %c0_38] : memref<2x32x16xbf16, #tpu.memory_space<vmem>>, vector<1x32x16xbf16>
    %66 = vector.shape_cast %65 : vector<1x32x16xbf16> to vector<32x16xbf16>
    %cst_39 = arith.constant dense<0.000000e+00> : vector<8x16xf32>
    %67 = tpu.matmul %33, %66, %cst_39 {dimension_numbers = #tpu.dot_dimension_numbers<[1], [0], [0], [1], [0, 0, 1, 1], [], []>} : vector<8x32xbf16>, vector<32x16xbf16>, vector<8x16xf32> -> vector<8x16xf32>
    %cst_40 = arith.constant 2.500000e-01 : f32
    %68 = vector.broadcast %cst_40 : f32 to vector<8x16xf32>
    %69 = arith.mulf %67, %68 : vector<8x16xf32>
    %c1_41 = arith.constant 1 : index
    %c0_42 = arith.constant 0 : index
    %c0_43 = arith.constant 0 : index
    %70 = vector.load %arg7[%c1_41, %c0_42, %c0_43] : memref<2x32x16xbf16, #tpu.memory_space<vmem>>, vector<1x32x16xbf16>
    %71 = vector.shape_cast %70 : vector<1x32x16xbf16> to vector<32x16xbf16>
    %cst_44 = arith.constant dense<0.000000e+00> : vector<8x16xf32>
    %72 = tpu.matmul %33, %71, %cst_44 {dimension_numbers = #tpu.dot_dimension_numbers<[1], [0], [0], [1], [0, 0, 1, 1], [], []>} : vector<8x32xbf16>, vector<32x16xbf16>, vector<8x16xf32> -> vector<8x16xf32>
    %c1_45 = arith.constant 1 : index
    %c0_46 = arith.constant 0 : index
    %c0_47 = arith.constant 0 : index
    %73 = vector.load %arg8[%c1_45, %c0_46, %c0_47] : memref<2x32x16xbf16, #tpu.memory_space<vmem>>, vector<1x32x16xbf16>
    %74 = vector.shape_cast %73 : vector<1x32x16xbf16> to vector<32x16xbf16>
    %cst_48 = arith.constant dense<0.000000e+00> : vector<8x16xf32>
    %75 = tpu.matmul %33, %74, %cst_48 {dimension_numbers = #tpu.dot_dimension_numbers<[1], [0], [0], [1], [0, 0, 1, 1], [], []>} : vector<8x32xbf16>, vector<32x16xbf16>, vector<8x16xf32> -> vector<8x16xf32>
    %76 = arith.truncf %69 : vector<8x16xf32> to vector<8x16xbf16>
    %77 = arith.truncf %72 : vector<8x16xf32> to vector<8x16xbf16>
    %cst_49 = arith.constant dense<0.000000e+00> : vector<8x8xf32>
    %78 = tpu.matmul %76, %77, %cst_49 {dimension_numbers = #tpu.dot_dimension_numbers<[1], [1], [0], [0], [0, 0, 1, 0], [], []>} : vector<8x16xbf16>, vector<8x16xbf16>, vector<8x8xf32> -> vector<8x8xf32>
    %79 = arith.addf %8, %78 : vector<8x8xf32>
    %cst_50 = arith.constant dense<0xFF800000> : vector<8xf32>
    %80 = vector.multi_reduction <maximumf>, %79, %cst_50 [1] : vector<8x8xf32> to vector<8xf32>
    %81 = vector.shape_cast %80 : vector<8xf32> to vector<8x1xf32>
    %82 = vector.broadcast %81 : vector<8x1xf32> to vector<8x8xf32>
    %83 = arith.subf %79, %82 : vector<8x8xf32>
    %84 = math.exp %83 : vector<8x8xf32>
    %cst_51 = arith.constant dense<0.000000e+00> : vector<8xf32>
    %85 = vector.multi_reduction <add>, %84, %cst_51 [1] : vector<8x8xf32> to vector<8xf32>
    %86 = vector.shape_cast %85 : vector<8xf32> to vector<8x1xf32>
    %87 = vector.broadcast %86 : vector<8x1xf32> to vector<8x8xf32>
    %88 = arith.divf %84, %87 : vector<8x8xf32>
    %89 = arith.truncf %88 : vector<8x8xf32> to vector<8x8xbf16>
    %90 = arith.truncf %75 : vector<8x16xf32> to vector<8x16xbf16>
    %cst_52 = arith.constant dense<0.000000e+00> : vector<8x16xf32>
    %91 = tpu.matmul %89, %90, %cst_52 {dimension_numbers = #tpu.dot_dimension_numbers<[1], [0], [0], [1], [0, 0, 1, 1], [], []>} : vector<8x8xbf16>, vector<8x16xbf16>, vector<8x16xf32> -> vector<8x16xf32>
    %92 = arith.truncf %91 : vector<8x16xf32> to vector<8x16xbf16>
    %c1_53 = arith.constant 1 : index
    %c0_54 = arith.constant 0 : index
    %c0_55 = arith.constant 0 : index
    %93 = vector.load %arg9[%c1_53, %c0_54, %c0_55] : memref<2x16x32xbf16, #tpu.memory_space<vmem>>, vector<1x16x32xbf16>
    %94 = vector.shape_cast %93 : vector<1x16x32xbf16> to vector<16x32xbf16>
    %cst_56 = arith.constant dense<0.000000e+00> : vector<8x32xf32>
    %95 = tpu.matmul %92, %94, %cst_56 {dimension_numbers = #tpu.dot_dimension_numbers<[1], [0], [0], [1], [0, 0, 1, 1], [], []>} : vector<8x16xbf16>, vector<16x32xbf16>, vector<8x32xf32> -> vector<8x32xf32>
    %96 = arith.addf %64, %95 : vector<8x32xf32>
    %97 = arith.addf %1, %96 : vector<8x32xf32>
    %c0_57 = arith.constant 0 : index
    %c0_58 = arith.constant 0 : index
    %98 = vector.load %arg10[%c0_57, %c0_58] : memref<1x32xf32, #tpu.memory_space<vmem>>, vector<1x32xf32>
    %99 = vector.broadcast %98 : vector<1x32xf32> to vector<8x32xf32>
    %100 = arith.addf %97, %99 : vector<8x32xf32>
    %c0_59 = arith.constant 0 : index
    %c0_60 = arith.constant 0 : index
    %101 = vector.load %arg11[%c0_59, %c0_60] : memref<1x32xf32, #tpu.memory_space<vmem>>, vector<1x32xf32>
    %c0_61 = arith.constant 0 : index
    %c0_62 = arith.constant 0 : index
    %102 = vector.load %arg12[%c0_61, %c0_62] : memref<1x32xf32, #tpu.memory_space<vmem>>, vector<1x32xf32>
    %cst_63 = arith.constant dense<0.000000e+00> : vector<8xf32>
    %103 = vector.multi_reduction <add>, %100, %cst_63 [1] : vector<8x32xf32> to vector<8xf32>
    %104 = vector.shape_cast %103 : vector<8xf32> to vector<8x1xf32>
    %cst_64 = arith.constant 3.200000e+01 : f32
    %105 = vector.broadcast %cst_64 : f32 to vector<8x1xf32>
    %106 = arith.divf %104, %105 : vector<8x1xf32>
    %107 = vector.broadcast %106 : vector<8x1xf32> to vector<8x32xf32>
    %108 = arith.subf %100, %107 : vector<8x32xf32>
    %109 = arith.mulf %108, %108 : vector<8x32xf32>
    %cst_65 = arith.constant dense<0.000000e+00> : vector<8xf32>
    %110 = vector.multi_reduction <add>, %109, %cst_65 [1] : vector<8x32xf32> to vector<8xf32>
    %111 = vector.shape_cast %110 : vector<8xf32> to vector<8x1xf32>
    %cst_66 = arith.constant 3.200000e+01 : f32
    %112 = vector.broadcast %cst_66 : f32 to vector<8x1xf32>
    %113 = arith.divf %111, %112 : vector<8x1xf32>
    %114 = vector.broadcast %106 : vector<8x1xf32> to vector<8x32xf32>
    %115 = arith.subf %100, %114 : vector<8x32xf32>
    %cst_67 = arith.constant 9.99999974E-6 : f32
    %116 = vector.broadcast %cst_67 : f32 to vector<8x1xf32>
    %117 = arith.addf %113, %116 : vector<8x1xf32>
    %118 = math.rsqrt %117 : vector<8x1xf32>
    %119 = vector.broadcast %118 : vector<8x1xf32> to vector<8x32xf32>
    %120 = arith.mulf %115, %119 : vector<8x32xf32>
    %121 = vector.broadcast %101 : vector<1x32xf32> to vector<8x32xf32>
    %122 = arith.mulf %120, %121 : vector<8x32xf32>
    %123 = vector.broadcast %102 : vector<1x32xf32> to vector<8x32xf32>
    %124 = arith.addf %122, %123 : vector<8x32xf32>
    %125 = arith.truncf %124 : vector<8x32xf32> to vector<8x32xbf16>
    %c0_68 = arith.constant 0 : index
    %c0_69 = arith.constant 0 : index
    %126 = vector.load %arg13[%c0_68, %c0_69] : memref<32x128xbf16, #tpu.memory_space<vmem>>, vector<32x128xbf16>
    %cst_70 = arith.constant dense<0.000000e+00> : vector<8x128xf32>
    %127 = tpu.matmul %125, %126, %cst_70 {dimension_numbers = #tpu.dot_dimension_numbers<[1], [0], [0], [1], [0, 0, 1, 1], [], []>} : vector<8x32xbf16>, vector<32x128xbf16>, vector<8x128xf32> -> vector<8x128xf32>
    %c0_71 = arith.constant 0 : index
    %c0_72 = arith.constant 0 : index
    %128 = vector.load %arg14[%c0_71, %c0_72] : memref<1x128xf32, #tpu.memory_space<vmem>>, vector<1x128xf32>
    %129 = vector.broadcast %128 : vector<1x128xf32> to vector<8x128xf32>
    %130 = arith.addf %127, %129 : vector<8x128xf32>
    %c0_73 = arith.constant 0 : index
    %c0_74 = arith.constant 0 : index
    %131 = vector.load %arg16[%c0_73, %c0_74] : memref<1x128xf32, #tpu.memory_space<vmem>>, vector<1x128xf32>
    %c0_75 = arith.constant 0 : index
    %c0_76 = arith.constant 0 : index
    %132 = vector.load %arg15[%c0_75, %c0_76] : memref<1x128xf32, #tpu.memory_space<vmem>>, vector<1x128xf32>
    %133 = vector.broadcast %132 : vector<1x128xf32> to vector<8x128xf32>
    %134 = arith.mulf %130, %133 : vector<8x128xf32>
    %135 = math.sin %134 : vector<8x128xf32>
    %136 = arith.mulf %135, %135 : vector<8x128xf32>
    %137 = vector.broadcast %131 : vector<1x128xf32> to vector<8x128xf32>
    %138 = arith.mulf %137, %136 : vector<8x128xf32>
    %139 = arith.addf %130, %138 : vector<8x128xf32>
    %140 = arith.truncf %139 : vector<8x128xf32> to vector<8x128xbf16>
    %c0_77 = arith.constant 0 : index
    %c0_78 = arith.constant 0 : index
    %141 = vector.load %arg17[%c0_77, %c0_78] : memref<128x32xbf16, #tpu.memory_space<vmem>>, vector<128x32xbf16>
    %cst_79 = arith.constant dense<0.000000e+00> : vector<8x32xf32>
    %142 = tpu.matmul %140, %141, %cst_79 {dimension_numbers = #tpu.dot_dimension_numbers<[1], [0], [0], [1], [0, 0, 1, 1], [], []>} : vector<8x128xbf16>, vector<128x32xbf16>, vector<8x32xf32> -> vector<8x32xf32>
    %c0_80 = arith.constant 0 : index
    %c0_81 = arith.constant 0 : index
    %143 = vector.load %arg18[%c0_80, %c0_81] : memref<1x32xf32, #tpu.memory_space<vmem>>, vector<1x32xf32>
    %144 = vector.broadcast %143 : vector<1x32xf32> to vector<8x32xf32>
    %145 = arith.addf %142, %144 : vector<8x32xf32>
    %146 = arith.addf %100, %145 : vector<8x32xf32>
    %c0_82 = arith.constant 0 : index
    %c0_83 = arith.constant 0 : index
    %c0_84 = arith.constant 0 : index
    %147 = vector.load %arg19[%c0_82, %c0_83, %c0_84] : memref<1x8x32xf32, #tpu.memory_space<vmem>>, vector<1x8x32xf32>
    %148 = vector.shape_cast %147 : vector<1x8x32xf32> to vector<8x32xf32>
    %149 = vector.shape_cast %146 : vector<8x32xf32> to vector<1x8x32xf32>
    tpu.vector_store %arg19[%c0_82, %c0_83, %c0_84], %149 {strides = array<i32>} : memref<1x8x32xf32, #tpu.memory_space<vmem>>, vector<1x8x32xf32>,
    return
  }
  func.func @transform_0(%arg0: i32) -> (i32, i32, i32) {
    %c0_i32 = arith.constant 0 : i32
    %c0_i32_0 = arith.constant 0 : i32
    %c0_i32_1 = arith.constant 0 : i32
    return %arg0, %c0_i32, %c0_i32_0 : i32, i32, i32
  }
  func.func @transform_1(%arg0: i32) -> (i32, i32, i32) {
    %c0_i32 = arith.constant 0 : i32
    %c0_i32_0 = arith.constant 0 : i32
    %c0_i32_1 = arith.constant 0 : i32
    return %arg0, %c0_i32, %c0_i32_0 : i32, i32, i32
  }
  func.func @transform_2(%arg0: i32) -> (i32, i32, i32) {
    %c0_i32 = arith.constant 0 : i32
    %c0_i32_0 = arith.constant 0 : i32
    %c0_i32_1 = arith.constant 0 : i32
    return %arg0, %c0_i32, %c0_i32_0 : i32, i32, i32
  }
  func.func @transform_3(%arg0: i32) -> (i32, i32) {
    %c0_i32 = arith.constant 0 : i32
    %c0_i32_0 = arith.constant 0 : i32
    %c0_i32_1 = arith.constant 0 : i32
    return %c0_i32, %c0_i32_0 : i32, i32
  }
  func.func @transform_4(%arg0: i32) -> (i32, i32) {
    %c0_i32 = arith.constant 0 : i32
    %c0_i32_0 = arith.constant 0 : i32
    %c0_i32_1 = arith.constant 0 : i32
    return %c0_i32, %c0_i32_0 : i32, i32
  }
  func.func @transform_5(%arg0: i32) -> (i32, i32, i32) {
    %c0_i32 = arith.constant 0 : i32
    %c0_i32_0 = arith.constant 0 : i32
    %c0_i32_1 = arith.constant 0 : i32
    %c0_i32_2 = arith.constant 0 : i32
    return %c0_i32, %c0_i32_0, %c0_i32_1 : i32, i32, i32
  }
  func.func @transform_6(%arg0: i32) -> (i32, i32, i32) {
    %c0_i32 = arith.constant 0 : i32
    %c0_i32_0 = arith.constant 0 : i32
    %c0_i32_1 = arith.constant 0 : i32
    %c0_i32_2 = arith.constant 0 : i32
    return %c0_i32, %c0_i32_0, %c0_i32_1 : i32, i32, i32
  }
  func.func @transform_7(%arg0: i32) -> (i32, i32, i32) {
    %c0_i32 = arith.constant 0 : i32
    %c0_i32_0 = arith.constant 0 : i32
    %c0_i32_1 = arith.constant 0 : i32
    %c0_i32_2 = arith.constant 0 : i32
    return %c0_i32, %c0_i32_0, %c0_i32_1 : i32, i32, i32
  }
  func.func @transform_8(%arg0: i32) -> (i32, i32, i32) {
    %c0_i32 = arith.constant 0 : i32
    %c0_i32_0 = arith.constant 0 : i32
    %c0_i32_1 = arith.constant 0 : i32
    %c0_i32_2 = arith.constant 0 : i32
    return %c0_i32, %c0_i32_0, %c0_i32_1 : i32, i32, i32
  }
  func.func @transform_9(%arg0: i32) -> (i32, i32) {
    %c0_i32 = arith.constant 0 : i32
    %c0_i32_0 = arith.constant 0 : i32
    %c0_i32_1 = arith.constant 0 : i32
    return %c0_i32, %c0_i32_0 : i32, i32
  }
  func.func @transform_10(%arg0: i32) -> (i32, i32) {
    %c0_i32 = arith.constant 0 : i32
    %c0_i32_0 = arith.constant 0 : i32
    %c0_i32_1 = arith.constant 0 : i32
    return %c0_i32, %c0_i32_0 : i32, i32
  }
  func.func @transform_11(%arg0: i32) -> (i32, i32) {
    %c0_i32 = arith.constant 0 : i32
    %c0_i32_0 = arith.constant 0 : i32
    %c0_i32_1 = arith.constant 0 : i32
    return %c0_i32, %c0_i32_0 : i32, i32
  }
  func.func @transform_12(%arg0: i32) -> (i32, i32) {
    %c0_i32 = arith.constant 0 : i32
    %c0_i32_0 = arith.constant 0 : i32
    %c0_i32_1 = arith.constant 0 : i32
    return %c0_i32, %c0_i32_0 : i32, i32
  }
  func.func @transform_13(%arg0: i32) -> (i32, i32) {
    %c0_i32 = arith.constant 0 : i32
    %c0_i32_0 = arith.constant 0 : i32
    %c0_i32_1 = arith.constant 0 : i32
    return %c0_i32, %c0_i32_0 : i32, i32
  }
  func.func @transform_14(%arg0: i32) -> (i32, i32) {
    %c0_i32 = arith.constant 0 : i32
    %c0_i32_0 = arith.constant 0 : i32
    %c0_i32_1 = arith.constant 0 : i32
    return %c0_i32, %c0_i32_0 : i32, i32
  }
  func.func @transform_15(%arg0: i32) -> (i32, i32) {
    %c0_i32 = arith.constant 0 : i32
    %c0_i32_0 = arith.constant 0 : i32
    %c0_i32_1 = arith.constant 0 : i32
    return %c0_i32, %c0_i32_0 : i32, i32
  }
  func.func @transform_16(%arg0: i32) -> (i32, i32) {
    %c0_i32 = arith.constant 0 : i32
    %c0_i32_0 = arith.constant 0 : i32
    %c0_i32_1 = arith.constant 0 : i32
    return %c0_i32, %c0_i32_0 : i32, i32
  }
  func.func @transform_17(%arg0: i32) -> (i32, i32) {
    %c0_i32 = arith.constant 0 : i32
    %c0_i32_0 = arith.constant 0 : i32
    %c0_i32_1 = arith.constant 0 : i32
    return %c0_i32, %c0_i32_0 : i32, i32
  }
  func.func @transform_18(%arg0: i32) -> (i32, i32, i32) {
    %c0_i32 = arith.constant 0 : i32
    %c0_i32_0 = arith.constant 0 : i32
    %c0_i32_1 = arith.constant 0 : i32
    return %arg0, %c0_i32, %c0_i32_0 : i32, i32, i32
  }
}

module attributes {stable_mosaic.version = 11 : i64} {
  func.func @_conv_kernel(%arg0: i32, %arg1: memref<1x8x32xf32, #tpu.memory_space<vmem>>, %arg2: memref<1x8x1xf32, #tpu.memory_space<vmem>>, %arg3: memref<3x32x32xbf16, #tpu.memory_space<vmem>>, %arg4: memref<1x32xf32, #tpu.memory_space<vmem>>, %arg5: memref<1x8x32xf32, #tpu.memory_space<vmem>>, %arg6: memref<10x32xf32, #tpu.memory_space<vmem>>) attributes {dimension_semantics = [#tpu.dimension_semantics<parallel>], iteration_bounds = array<i64: 2>, scalar_prefetch = 0 : i64, scratch_operands = 1 : i64, tpu.core_type = #tpu.core_type<tc>, window_params = [{transform_indices = @transform_0, window_bounds = array<i64: 1, 8, 32>}, {transform_indices = @transform_1, window_bounds = array<i64: 1, 8, 1>}, {pipeline_mode = #tpu.pipeline_mode<synchronous>, transform_indices = @transform_2, window_bounds = array<i64: 3, 32, 32>}, {pipeline_mode = #tpu.pipeline_mode<synchronous>, transform_indices = @transform_3, window_bounds = array<i64: 1, 32>}, {transform_indices = @transform_4, window_bounds = array<i64: 1, 8, 32>}]} {
    %c0 = arith.constant 0 : index
    %c0_0 = arith.constant 0 : index
    %c0_1 = arith.constant 0 : index
    %0 = vector.load %arg1[%c0, %c0_0, %c0_1] : memref<1x8x32xf32, #tpu.memory_space<vmem>>, vector<1x8x32xf32>
    %1 = vector.shape_cast %0 : vector<1x8x32xf32> to vector<8x32xf32>
    %c0_2 = arith.constant 0 : index
    %c0_3 = arith.constant 0 : index
    %c0_4 = arith.constant 0 : index
    %2 = vector.load %arg2[%c0_2, %c0_3, %c0_4] : memref<1x8x1xf32, #tpu.memory_space<vmem>>, vector<1x8x1xf32>
    %3 = vector.shape_cast %2 : vector<1x8x1xf32> to vector<8x1xf32>
    %4 = vector.broadcast %3 : vector<8x1xf32> to vector<8x32xf32>
    %5 = arith.mulf %1, %4 : vector<8x32xf32>
    %cst = arith.constant 0.000000e+00 : f32
    %6 = vector.broadcast %cst : f32 to vector<10x32xf32>
    %c0_5 = arith.constant 0 : index
    %c0_6 = arith.constant 0 : index
    %7 = vector.load %arg6[%c0_5, %c0_6] : memref<10x32xf32, #tpu.memory_space<vmem>>, vector<10x32xf32>
    tpu.vector_store %arg6[%c0_5, %c0_6], %6 {strides = array<i32>} : memref<10x32xf32, #tpu.memory_space<vmem>>, vector<10x32xf32>,
    %c1 = arith.constant 1 : index
    %c0_7 = arith.constant 0 : index
    %8 = vector.load %arg6[%c1, %c0_7] : memref<10x32xf32, #tpu.memory_space<vmem>>, vector<8x32xf32>
    tpu.vector_store %arg6[%c1, %c0_7], %5 {strides = array<i32>} : memref<10x32xf32, #tpu.memory_space<vmem>>, vector<8x32xf32>,
    %c0_8 = arith.constant 0 : index
    %c0_9 = arith.constant 0 : index
    %9 = vector.load %arg6[%c0_8, %c0_9] : memref<10x32xf32, #tpu.memory_space<vmem>>, vector<8x32xf32>
    %10 = arith.truncf %9 : vector<8x32xf32> to vector<8x32xbf16>
    %c0_10 = arith.constant 0 : index
    %c0_11 = arith.constant 0 : index
    %c0_12 = arith.constant 0 : index
    %11 = vector.load %arg3[%c0_10, %c0_11, %c0_12] : memref<3x32x32xbf16, #tpu.memory_space<vmem>>, vector<1x32x32xbf16>
    %12 = vector.shape_cast %11 : vector<1x32x32xbf16> to vector<32x32xbf16>
    %cst_13 = arith.constant dense<0.000000e+00> : vector<8x32xf32>
    %13 = tpu.matmul %10, %12, %cst_13 {dimension_numbers = #tpu.dot_dimension_numbers<[1], [0], [0], [1], [0, 0, 1, 1], [], []>} : vector<8x32xbf16>, vector<32x32xbf16>, vector<8x32xf32> -> vector<8x32xf32>
    %c1_14 = arith.constant 1 : index
    %c0_15 = arith.constant 0 : index
    %14 = vector.load %arg6[%c1_14, %c0_15] : memref<10x32xf32, #tpu.memory_space<vmem>>, vector<8x32xf32>
    %15 = arith.truncf %14 : vector<8x32xf32> to vector<8x32xbf16>
    %c1_16 = arith.constant 1 : index
    %c0_17 = arith.constant 0 : index
    %c0_18 = arith.constant 0 : index
    %16 = vector.load %arg3[%c1_16, %c0_17, %c0_18] : memref<3x32x32xbf16, #tpu.memory_space<vmem>>, vector<1x32x32xbf16>
    %17 = vector.shape_cast %16 : vector<1x32x32xbf16> to vector<32x32xbf16>
    %cst_19 = arith.constant dense<0.000000e+00> : vector<8x32xf32>
    %18 = tpu.matmul %15, %17, %cst_19 {dimension_numbers = #tpu.dot_dimension_numbers<[1], [0], [0], [1], [0, 0, 1, 1], [], []>} : vector<8x32xbf16>, vector<32x32xbf16>, vector<8x32xf32> -> vector<8x32xf32>
    %19 = arith.addf %13, %18 : vector<8x32xf32>
    %c2 = arith.constant 2 : index
    %c0_20 = arith.constant 0 : index
    %20 = vector.load %arg6[%c2, %c0_20] : memref<10x32xf32, #tpu.memory_space<vmem>>, vector<8x32xf32>
    %21 = arith.truncf %20 : vector<8x32xf32> to vector<8x32xbf16>
    %c2_21 = arith.constant 2 : index
    %c0_22 = arith.constant 0 : index
    %c0_23 = arith.constant 0 : index
    %22 = vector.load %arg3[%c2_21, %c0_22, %c0_23] : memref<3x32x32xbf16, #tpu.memory_space<vmem>>, vector<1x32x32xbf16>
    %23 = vector.shape_cast %22 : vector<1x32x32xbf16> to vector<32x32xbf16>
    %cst_24 = arith.constant dense<0.000000e+00> : vector<8x32xf32>
    %24 = tpu.matmul %21, %23, %cst_24 {dimension_numbers = #tpu.dot_dimension_numbers<[1], [0], [0], [1], [0, 0, 1, 1], [], []>} : vector<8x32xbf16>, vector<32x32xbf16>, vector<8x32xf32> -> vector<8x32xf32>
    %25 = arith.addf %19, %24 : vector<8x32xf32>
    %c0_25 = arith.constant 0 : index
    %c0_26 = arith.constant 0 : index
    %26 = vector.load %arg4[%c0_25, %c0_26] : memref<1x32xf32, #tpu.memory_space<vmem>>, vector<1x32xf32>
    %27 = vector.broadcast %26 : vector<1x32xf32> to vector<8x32xf32>
    %28 = arith.addf %25, %27 : vector<8x32xf32>
    %c0_27 = arith.constant 0 : index
    %c0_28 = arith.constant 0 : index
    %c0_29 = arith.constant 0 : index
    %29 = vector.load %arg5[%c0_27, %c0_28, %c0_29] : memref<1x8x32xf32, #tpu.memory_space<vmem>>, vector<1x8x32xf32>
    %30 = vector.shape_cast %29 : vector<1x8x32xf32> to vector<8x32xf32>
    %31 = vector.shape_cast %28 : vector<8x32xf32> to vector<1x8x32xf32>
    tpu.vector_store %arg5[%c0_27, %c0_28, %c0_29], %31 {strides = array<i32>} : memref<1x8x32xf32, #tpu.memory_space<vmem>>, vector<1x8x32xf32>,
    return
  }
  func.func @transform_0(%arg0: i32) -> (i32, i32, i32) {
    %c0_i32 = arith.constant 0 : i32
    %c0_i32_0 = arith.constant 0 : i32
    %c0_i32_1 = arith.constant 0 : i32
    return %arg0, %c0_i32, %c0_i32_0 : i32, i32, i32
  }
  func.func @transform_1(%arg0: i32) -> (i32, i32, i32) {
    %c0_i32 = arith.constant 0 : i32
    %c0_i32_0 = arith.constant 0 : i32
    %c0_i32_1 = arith.constant 0 : i32
    return %arg0, %c0_i32, %c0_i32_0 : i32, i32, i32
  }
  func.func @transform_2(%arg0: i32) -> (i32, i32, i32) {
    %c0_i32 = arith.constant 0 : i32
    %c0_i32_0 = arith.constant 0 : i32
    %c0_i32_1 = arith.constant 0 : i32
    %c0_i32_2 = arith.constant 0 : i32
    return %c0_i32, %c0_i32_0, %c0_i32_1 : i32, i32, i32
  }
  func.func @transform_3(%arg0: i32) -> (i32, i32) {
    %c0_i32 = arith.constant 0 : i32
    %c0_i32_0 = arith.constant 0 : i32
    %c0_i32_1 = arith.constant 0 : i32
    return %c0_i32, %c0_i32_0 : i32, i32
  }
  func.func @transform_4(%arg0: i32) -> (i32, i32, i32) {
    %c0_i32 = arith.constant 0 : i32
    %c0_i32_0 = arith.constant 0 : i32
    %c0_i32_1 = arith.constant 0 : i32
    return %arg0, %c0_i32, %c0_i32_0 : i32, i32, i32
  }
}

module attributes {stable_mosaic.version = 11 : i64} {
  func.func @_resnet_kernel(%arg0: i32, %arg1: memref<1x8x64xf32, #tpu.memory_space<vmem>>, %arg2: memref<1x8x1xf32, #tpu.memory_space<vmem>>, %arg3: memref<1x1x128xf32, #tpu.memory_space<vmem>>, %arg4: memref<3x64x32xbf16, #tpu.memory_space<vmem>>, %arg5: memref<1x32xf32, #tpu.memory_space<vmem>>, %arg6: memref<1x32xf32, #tpu.memory_space<vmem>>, %arg7: memref<1x32xf32, #tpu.memory_space<vmem>>, %arg8: memref<128x32xbf16, #tpu.memory_space<vmem>>, %arg9: memref<1x32xf32, #tpu.memory_space<vmem>>, %arg10: memref<3x32x32xbf16, #tpu.memory_space<vmem>>, %arg11: memref<1x32xf32, #tpu.memory_space<vmem>>, %arg12: memref<1x32xf32, #tpu.memory_space<vmem>>, %arg13: memref<1x32xf32, #tpu.memory_space<vmem>>, %arg14: memref<64x32xbf16, #tpu.memory_space<vmem>>, %arg15: memref<1x32xf32, #tpu.memory_space<vmem>>, %arg16: memref<32x32xf32, #tpu.memory_space<vmem>>, %arg17: memref<1x8x32xf32, #tpu.memory_space<vmem>>, %arg18: memref<10x64xf32, #tpu.memory_space<vmem>>, %arg19: memref<10x32xf32, #tpu.memory_space<vmem>>) attributes {dimension_semantics = [#tpu.dimension_semantics<parallel>], iteration_bounds = array<i64: 2>, scalar_prefetch = 0 : i64, scratch_operands = 2 : i64, tpu.core_type = #tpu.core_type<tc>, window_params = [{transform_indices = @transform_0, window_bounds = array<i64: 1, 8, 64>}, {transform_indices = @transform_1, window_bounds = array<i64: 1, 8, 1>}, {transform_indices = @transform_2, window_bounds = array<i64: 1, 1, 128>}, {pipeline_mode = #tpu.pipeline_mode<synchronous>, transform_indices = @transform_3, window_bounds = array<i64: 3, 64, 32>}, {pipeline_mode = #tpu.pipeline_mode<synchronous>, transform_indices = @transform_4, window_bounds = array<i64: 1, 32>}, {pipeline_mode = #tpu.pipeline_mode<synchronous>, transform_indices = @transform_5, window_bounds = array<i64: 1, 32>}, {pipeline_mode = #tpu.pipeline_mode<synchronous>, transform_indices = @transform_6, window_bounds = array<i64: 1, 32>}, {pipeline_mode = #tpu.pipeline_mode<synchronous>, transform_indices = @transform_7, window_bounds = array<i64: 128, 32>}, {pipeline_mode = #tpu.pipeline_mode<synchronous>, transform_indices = @transform_8, window_bounds = array<i64: 1, 32>}, {pipeline_mode = #tpu.pipeline_mode<synchronous>, transform_indices = @transform_9, window_bounds = array<i64: 3, 32, 32>}, {pipeline_mode = #tpu.pipeline_mode<synchronous>, transform_indices = @transform_10, window_bounds = array<i64: 1, 32>}, {pipeline_mode = #tpu.pipeline_mode<synchronous>, transform_indices = @transform_11, window_bounds = array<i64: 1, 32>}, {pipeline_mode = #tpu.pipeline_mode<synchronous>, transform_indices = @transform_12, window_bounds = array<i64: 1, 32>}, {pipeline_mode = #tpu.pipeline_mode<synchronous>, transform_indices = @transform_13, window_bounds = array<i64: 64, 32>}, {pipeline_mode = #tpu.pipeline_mode<synchronous>, transform_indices = @transform_14, window_bounds = array<i64: 1, 32>}, {pipeline_mode = #tpu.pipeline_mode<synchronous>, transform_indices = @transform_15, window_bounds = array<i64: 32, 32>}, {transform_indices = @transform_16, window_bounds = array<i64: 1, 8, 32>}]} {
    %c0 = arith.constant 0 : index
    %c0_0 = arith.constant 0 : index
    %c0_1 = arith.constant 0 : index
    %0 = vector.load %arg1[%c0, %c0_0, %c0_1] : memref<1x8x64xf32, #tpu.memory_space<vmem>>, vector<1x8x64xf32>
    %1 = vector.shape_cast %0 : vector<1x8x64xf32> to vector<8x64xf32>
    %c0_2 = arith.constant 0 : index
    %c0_3 = arith.constant 0 : index
    %c0_4 = arith.constant 0 : index
    %2 = vector.load %arg2[%c0_2, %c0_3, %c0_4] : memref<1x8x1xf32, #tpu.memory_space<vmem>>, vector<1x8x1xf32>
    %3 = vector.shape_cast %2 : vector<1x8x1xf32> to vector<8x1xf32>
    %4 = vector.broadcast %3 : vector<8x1xf32> to vector<8x64xf32>
    %5 = arith.mulf %1, %4 : vector<8x64xf32>
    %c0_5 = arith.constant 0 : index
    %c0_6 = arith.constant 0 : index
    %6 = vector.load %arg16[%c0_5, %c0_6] : memref<32x32xf32, #tpu.memory_space<vmem>>, vector<32x32xf32>
    %cst = arith.constant 0.000000e+00 : f32
    %7 = vector.broadcast %cst : f32 to vector<10x64xf32>
    %c0_7 = arith.constant 0 : index
    %c0_8 = arith.constant 0 : index
    %8 = vector.load %arg18[%c0_7, %c0_8] : memref<10x64xf32, #tpu.memory_space<vmem>>, vector<10x64xf32>
    tpu.vector_store %arg18[%c0_7, %c0_8], %7 {strides = array<i32>} : memref<10x64xf32, #tpu.memory_space<vmem>>, vector<10x64xf32>,
    %c1 = arith.constant 1 : index
    %c0_9 = arith.constant 0 : index
    %9 = vector.load %arg18[%c1, %c0_9] : memref<10x64xf32, #tpu.memory_space<vmem>>, vector<8x64xf32>
    tpu.vector_store %arg18[%c1, %c0_9], %5 {strides = array<i32>} : memref<10x64xf32, #tpu.memory_space<vmem>>, vector<8x64xf32>,
    %c0_10 = arith.constant 0 : index
    %c0_11 = arith.constant 0 : index
    %10 = vector.load %arg18[%c0_10, %c0_11] : memref<10x64xf32, #tpu.memory_space<vmem>>, vector<8x64xf32>
    %11 = arith.truncf %10 : vector<8x64xf32> to vector<8x64xbf16>
    %c0_12 = arith.constant 0 : index
    %c0_13 = arith.constant 0 : index
    %c0_14 = arith.constant 0 : index
    %12 = vector.load %arg4[%c0_12, %c0_13, %c0_14] : memref<3x64x32xbf16, #tpu.memory_space<vmem>>, vector<1x64x32xbf16>
    %13 = vector.shape_cast %12 : vector<1x64x32xbf16> to vector<64x32xbf16>
    %cst_15 = arith.constant dense<0.000000e+00> : vector<8x32xf32>
    %14 = tpu.matmul %11, %13, %cst_15 {dimension_numbers = #tpu.dot_dimension_numbers<[1], [0], [0], [1], [0, 0, 1, 1], [], []>} : vector<8x64xbf16>, vector<64x32xbf16>, vector<8x32xf32> -> vector<8x32xf32>
    %c1_16 = arith.constant 1 : index
    %c0_17 = arith.constant 0 : index
    %15 = vector.load %arg18[%c1_16, %c0_17] : memref<10x64xf32, #tpu.memory_space<vmem>>, vector<8x64xf32>
    %16 = arith.truncf %15 : vector<8x64xf32> to vector<8x64xbf16>
    %c1_18 = arith.constant 1 : index
    %c0_19 = arith.constant 0 : index
    %c0_20 = arith.constant 0 : index
    %17 = vector.load %arg4[%c1_18, %c0_19, %c0_20] : memref<3x64x32xbf16, #tpu.memory_space<vmem>>, vector<1x64x32xbf16>
    %18 = vector.shape_cast %17 : vector<1x64x32xbf16> to vector<64x32xbf16>
    %cst_21 = arith.constant dense<0.000000e+00> : vector<8x32xf32>
    %19 = tpu.matmul %16, %18, %cst_21 {dimension_numbers = #tpu.dot_dimension_numbers<[1], [0], [0], [1], [0, 0, 1, 1], [], []>} : vector<8x64xbf16>, vector<64x32xbf16>, vector<8x32xf32> -> vector<8x32xf32>
    %20 = arith.addf %14, %19 : vector<8x32xf32>
    %c2 = arith.constant 2 : index
    %c0_22 = arith.constant 0 : index
    %21 = vector.load %arg18[%c2, %c0_22] : memref<10x64xf32, #tpu.memory_space<vmem>>, vector<8x64xf32>
    %22 = arith.truncf %21 : vector<8x64xf32> to vector<8x64xbf16>
    %c2_23 = arith.constant 2 : index
    %c0_24 = arith.constant 0 : index
    %c0_25 = arith.constant 0 : index
    %23 = vector.load %arg4[%c2_23, %c0_24, %c0_25] : memref<3x64x32xbf16, #tpu.memory_space<vmem>>, vector<1x64x32xbf16>
    %24 = vector.shape_cast %23 : vector<1x64x32xbf16> to vector<64x32xbf16>
    %cst_26 = arith.constant dense<0.000000e+00> : vector<8x32xf32>
    %25 = tpu.matmul %22, %24, %cst_26 {dimension_numbers = #tpu.dot_dimension_numbers<[1], [0], [0], [1], [0, 0, 1, 1], [], []>} : vector<8x64xbf16>, vector<64x32xbf16>, vector<8x32xf32> -> vector<8x32xf32>
    %26 = arith.addf %20, %25 : vector<8x32xf32>
    %c0_27 = arith.constant 0 : index
    %c0_28 = arith.constant 0 : index
    %27 = vector.load %arg5[%c0_27, %c0_28] : memref<1x32xf32, #tpu.memory_space<vmem>>, vector<1x32xf32>
    %28 = vector.broadcast %27 : vector<1x32xf32> to vector<8x32xf32>
    %29 = arith.addf %26, %28 : vector<8x32xf32>
    %c0_29 = arith.constant 0 : index
    %c0_30 = arith.constant 0 : index
    %30 = vector.load %arg6[%c0_29, %c0_30] : memref<1x32xf32, #tpu.memory_space<vmem>>, vector<1x32xf32>
    %c0_31 = arith.constant 0 : index
    %c0_32 = arith.constant 0 : index
    %31 = vector.load %arg7[%c0_31, %c0_32] : memref<1x32xf32, #tpu.memory_space<vmem>>, vector<1x32xf32>
    %cst_33 = arith.constant dense<0.000000e+00> : vector<32xf32>
    %32 = vector.multi_reduction <add>, %29, %cst_33 [0] : vector<8x32xf32> to vector<32xf32>
    %33 = vector.shape_cast %32 : vector<32xf32> to vector<1x32xf32>
    %cst_34 = arith.constant 8.000000e+00 : f32
    %34 = vector.broadcast %cst_34 : f32 to vector<1x32xf32>
    %35 = arith.divf %33, %34 : vector<1x32xf32>
    %36 = arith.mulf %29, %29 : vector<8x32xf32>
    %cst_35 = arith.constant dense<0.000000e+00> : vector<32xf32>
    %37 = vector.multi_reduction <add>, %36, %cst_35 [0] : vector<8x32xf32> to vector<32xf32>
    %38 = vector.shape_cast %37 : vector<32xf32> to vector<1x32xf32>
    %cst_36 = arith.constant 8.000000e+00 : f32
    %39 = vector.broadcast %cst_36 : f32 to vector<1x32xf32>
    %40 = arith.divf %38, %39 : vector<1x32xf32>
    %cst_37 = arith.constant dense<0.000000e+00> : vector<1x32xf32>
    %41 = tpu.matmul %35, %6, %cst_37 {dimension_numbers = #tpu.dot_dimension_numbers<[1], [0], [0], [1], [0, 0, 1, 1], [], []>} : vector<1x32xf32>, vector<32x32xf32>, vector<1x32xf32> -> vector<1x32xf32>
    %cst_38 = arith.constant dense<0.000000e+00> : vector<1x32xf32>
    %42 = tpu.matmul %40, %6, %cst_38 {dimension_numbers = #tpu.dot_dimension_numbers<[1], [0], [0], [1], [0, 0, 1, 1], [], []>} : vector<1x32xf32>, vector<32x32xf32>, vector<1x32xf32> -> vector<1x32xf32>
    %43 = arith.mulf %41, %41 : vector<1x32xf32>
    %44 = arith.subf %42, %43 : vector<1x32xf32>
    %45 = vector.broadcast %41 : vector<1x32xf32> to vector<8x32xf32>
    %46 = arith.subf %29, %45 : vector<8x32xf32>
    %cst_39 = arith.constant 9.99999974E-6 : f32
    %47 = vector.broadcast %cst_39 : f32 to vector<1x32xf32>
    %48 = arith.addf %44, %47 : vector<1x32xf32>
    %49 = math.rsqrt %48 : vector<1x32xf32>
    %50 = vector.broadcast %49 : vector<1x32xf32> to vector<8x32xf32>
    %51 = arith.mulf %46, %50 : vector<8x32xf32>
    %52 = vector.broadcast %30 : vector<1x32xf32> to vector<8x32xf32>
    %53 = arith.mulf %51, %52 : vector<8x32xf32>
    %54 = vector.broadcast %31 : vector<1x32xf32> to vector<8x32xf32>
    %55 = arith.addf %53, %54 : vector<8x32xf32>
    %cst_40 = arith.constant 3.000000e+01 : f32
    %56 = vector.broadcast %cst_40 : f32 to vector<8x32xf32>
    %57 = arith.minimumf %55, %56 : vector<8x32xf32>
    %58 = math.exp %57 : vector<8x32xf32>
    %cst_41 = arith.constant 2.000000e+00 : f32
    %59 = vector.broadcast %cst_41 : f32 to vector<8x32xf32>
    %60 = arith.addf %58, %59 : vector<8x32xf32>
    %61 = arith.mulf %58, %60 : vector<8x32xf32>
    %62 = arith.mulf %55, %61 : vector<8x32xf32>
    %cst_42 = arith.constant 2.000000e+00 : f32
    %63 = vector.broadcast %cst_42 : f32 to vector<8x32xf32>
    %64 = arith.addf %61, %63 : vector<8x32xf32>
    %65 = arith.divf %62, %64 : vector<8x32xf32>
    %66 = vector.broadcast %3 : vector<8x1xf32> to vector<8x32xf32>
    %67 = arith.mulf %65, %66 : vector<8x32xf32>
    %c0_43 = arith.constant 0 : index
    %c0_44 = arith.constant 0 : index
    %c0_45 = arith.constant 0 : index
    %68 = vector.load %arg3[%c0_43, %c0_44, %c0_45] : memref<1x1x128xf32, #tpu.memory_space<vmem>>, vector<1x1x128xf32>
    %69 = vector.shape_cast %68 : vector<1x1x128xf32> to vector<1x128xf32>
    %70 = arith.truncf %69 : vector<1x128xf32> to vector<1x128xbf16>
    %c0_46 = arith.constant 0 : index
    %c0_47 = arith.constant 0 : index
    %71 = vector.load %arg8[%c0_46, %c0_47] : memref<128x32xbf16, #tpu.memory_space<vmem>>, vector<128x32xbf16>
    %cst_48 = arith.constant dense<0.000000e+00> : vector<1x32xf32>
    %72 = tpu.matmul %70, %71, %cst_48 {dimension_numbers = #tpu.dot_dimension_numbers<[1], [0], [0], [1], [0, 0, 1, 1], [], []>} : vector<1x128xbf16>, vector<128x32xbf16>, vector<1x32xf32> -> vector<1x32xf32>
    %c0_49 = arith.constant 0 : index
    %c0_50 = arith.constant 0 : index
    %73 = vector.load %arg9[%c0_49, %c0_50] : memref<1x32xf32, #tpu.memory_space<vmem>>, vector<1x32xf32>
    %74 = arith.addf %72, %73 : vector<1x32xf32>
    %75 = vector.broadcast %74 : vector<1x32xf32> to vector<8x32xf32>
    %76 = arith.addf %67, %75 : vector<8x32xf32>
    %77 = vector.broadcast %3 : vector<8x1xf32> to vector<8x32xf32>
    %78 = arith.mulf %76, %77 : vector<8x32xf32>
    %cst_51 = arith.constant 0.000000e+00 : f32
    %79 = vector.broadcast %cst_51 : f32 to vector<10x32xf32>
    %c0_52 = arith.constant 0 : index
    %c0_53 = arith.constant 0 : index
    %80 = vector.load %arg19[%c0_52, %c0_53] : memref<10x32xf32, #tpu.memory_space<vmem>>, vector<10x32xf32>
    tpu.vector_store %arg19[%c0_52, %c0_53], %79 {strides = array<i32>} : memref<10x32xf32, #tpu.memory_space<vmem>>, vector<10x32xf32>,
    %c1_54 = arith.constant 1 : index
    %c0_55 = arith.constant 0 : index
    %81 = vector.load %arg19[%c1_54, %c0_55] : memref<10x32xf32, #tpu.memory_space<vmem>>, vector<8x32xf32>
    tpu.vector_store %arg19[%c1_54, %c0_55], %78 {strides = array<i32>} : memref<10x32xf32, #tpu.memory_space<vmem>>, vector<8x32xf32>,
    %c0_56 = arith.constant 0 : index
    %c0_57 = arith.constant 0 : index
    %82 = vector.load %arg19[%c0_56, %c0_57] : memref<10x32xf32, #tpu.memory_space<vmem>>, vector<8x32xf32>
    %83 = arith.truncf %82 : vector<8x32xf32> to vector<8x32xbf16>
    %c0_58 = arith.constant 0 : index
    %c0_59 = arith.constant 0 : index
    %c0_60 = arith.constant 0 : index
    %84 = vector.load %arg10[%c0_58, %c0_59, %c0_60] : memref<3x32x32xbf16, #tpu.memory_space<vmem>>, vector<1x32x32xbf16>
    %85 = vector.shape_cast %84 : vector<1x32x32xbf16> to vector<32x32xbf16>
    %cst_61 = arith.constant dense<0.000000e+00> : vector<8x32xf32>
    %86 = tpu.matmul %83, %85, %cst_61 {dimension_numbers = #tpu.dot_dimension_numbers<[1], [0], [0], [1], [0, 0, 1, 1], [], []>} : vector<8x32xbf16>, vector<32x32xbf16>, vector<8x32xf32> -> vector<8x32xf32>
    %c1_62 = arith.constant 1 : index
    %c0_63 = arith.constant 0 : index
    %87 = vector.load %arg19[%c1_62, %c0_63] : memref<10x32xf32, #tpu.memory_space<vmem>>, vector<8x32xf32>
    %88 = arith.truncf %87 : vector<8x32xf32> to vector<8x32xbf16>
    %c1_64 = arith.constant 1 : index
    %c0_65 = arith.constant 0 : index
    %c0_66 = arith.constant 0 : index
    %89 = vector.load %arg10[%c1_64, %c0_65, %c0_66] : memref<3x32x32xbf16, #tpu.memory_space<vmem>>, vector<1x32x32xbf16>
    %90 = vector.shape_cast %89 : vector<1x32x32xbf16> to vector<32x32xbf16>
    %cst_67 = arith.constant dense<0.000000e+00> : vector<8x32xf32>
    %91 = tpu.matmul %88, %90, %cst_67 {dimension_numbers = #tpu.dot_dimension_numbers<[1], [0], [0], [1], [0, 0, 1, 1], [], []>} : vector<8x32xbf16>, vector<32x32xbf16>, vector<8x32xf32> -> vector<8x32xf32>
    %92 = arith.addf %86, %91 : vector<8x32xf32>
    %c2_68 = arith.constant 2 : index
    %c0_69 = arith.constant 0 : index
    %93 = vector.load %arg19[%c2_68, %c0_69] : memref<10x32xf32, #tpu.memory_space<vmem>>, vector<8x32xf32>
    %94 = arith.truncf %93 : vector<8x32xf32> to vector<8x32xbf16>
    %c2_70 = arith.constant 2 : index
    %c0_71 = arith.constant 0 : index
    %c0_72 = arith.constant 0 : index
    %95 = vector.load %arg10[%c2_70, %c0_71, %c0_72] : memref<3x32x32xbf16, #tpu.memory_space<vmem>>, vector<1x32x32xbf16>
    %96 = vector.shape_cast %95 : vector<1x32x32xbf16> to vector<32x32xbf16>
    %cst_73 = arith.constant dense<0.000000e+00> : vector<8x32xf32>
    %97 = tpu.matmul %94, %96, %cst_73 {dimension_numbers = #tpu.dot_dimension_numbers<[1], [0], [0], [1], [0, 0, 1, 1], [], []>} : vector<8x32xbf16>, vector<32x32xbf16>, vector<8x32xf32> -> vector<8x32xf32>
    %98 = arith.addf %92, %97 : vector<8x32xf32>
    %c0_74 = arith.constant 0 : index
    %c0_75 = arith.constant 0 : index
    %99 = vector.load %arg11[%c0_74, %c0_75] : memref<1x32xf32, #tpu.memory_space<vmem>>, vector<1x32xf32>
    %100 = vector.broadcast %99 : vector<1x32xf32> to vector<8x32xf32>
    %101 = arith.addf %98, %100 : vector<8x32xf32>
    %c0_76 = arith.constant 0 : index
    %c0_77 = arith.constant 0 : index
    %102 = vector.load %arg12[%c0_76, %c0_77] : memref<1x32xf32, #tpu.memory_space<vmem>>, vector<1x32xf32>
    %c0_78 = arith.constant 0 : index
    %c0_79 = arith.constant 0 : index
    %103 = vector.load %arg13[%c0_78, %c0_79] : memref<1x32xf32, #tpu.memory_space<vmem>>, vector<1x32xf32>
    %cst_80 = arith.constant dense<0.000000e+00> : vector<32xf32>
    %104 = vector.multi_reduction <add>, %101, %cst_80 [0] : vector<8x32xf32> to vector<32xf32>
    %105 = vector.shape_cast %104 : vector<32xf32> to vector<1x32xf32>
    %cst_81 = arith.constant 8.000000e+00 : f32
    %106 = vector.broadcast %cst_81 : f32 to vector<1x32xf32>
    %107 = arith.divf %105, %106 : vector<1x32xf32>
    %108 = arith.mulf %101, %101 : vector<8x32xf32>
    %cst_82 = arith.constant dense<0.000000e+00> : vector<32xf32>
    %109 = vector.multi_reduction <add>, %108, %cst_82 [0] : vector<8x32xf32> to vector<32xf32>
    %110 = vector.shape_cast %109 : vector<32xf32> to vector<1x32xf32>
    %cst_83 = arith.constant 8.000000e+00 : f32
    %111 = vector.broadcast %cst_83 : f32 to vector<1x32xf32>
    %112 = arith.divf %110, %111 : vector<1x32xf32>
    %cst_84 = arith.constant dense<0.000000e+00> : vector<1x32xf32>
    %113 = tpu.matmul %107, %6, %cst_84 {dimension_numbers = #tpu.dot_dimension_numbers<[1], [0], [0], [1], [0, 0, 1, 1], [], []>} : vector<1x32xf32>, vector<32x32xf32>, vector<1x32xf32> -> vector<1x32xf32>
    %cst_85 = arith.constant dense<0.000000e+00> : vector<1x32xf32>
    %114 = tpu.matmul %112, %6, %cst_85 {dimension_numbers = #tpu.dot_dimension_numbers<[1], [0], [0], [1], [0, 0, 1, 1], [], []>} : vector<1x32xf32>, vector<32x32xf32>, vector<1x32xf32> -> vector<1x32xf32>
    %115 = arith.mulf %113, %113 : vector<1x32xf32>
    %116 = arith.subf %114, %115 : vector<1x32xf32>
    %117 = vector.broadcast %113 : vector<1x32xf32> to vector<8x32xf32>
    %118 = arith.subf %101, %117 : vector<8x32xf32>
    %cst_86 = arith.constant 9.99999974E-6 : f32
    %119 = vector.broadcast %cst_86 : f32 to vector<1x32xf32>
    %120 = arith.addf %116, %119 : vector<1x32xf32>
    %121 = math.rsqrt %120 : vector<1x32xf32>
    %122 = vector.broadcast %121 : vector<1x32xf32> to vector<8x32xf32>
    %123 = arith.mulf %118, %122 : vector<8x32xf32>
    %124 = vector.broadcast %102 : vector<1x32xf32> to vector<8x32xf32>
    %125 = arith.mulf %123, %124 : vector<8x32xf32>
    %126 = vector.broadcast %103 : vector<1x32xf32> to vector<8x32xf32>
    %127 = arith.addf %125, %126 : vector<8x32xf32>
    %cst_87 = arith.constant 3.000000e+01 : f32
    %128 = vector.broadcast %cst_87 : f32 to vector<8x32xf32>
    %129 = arith.minimumf %127, %128 : vector<8x32xf32>
    %130 = math.exp %129 : vector<8x32xf32>
    %cst_88 = arith.constant 2.000000e+00 : f32
    %131 = vector.broadcast %cst_88 : f32 to vector<8x32xf32>
    %132 = arith.addf %130, %131 : vector<8x32xf32>
    %133 = arith.mulf %130, %132 : vector<8x32xf32>
    %134 = arith.mulf %127, %133 : vector<8x32xf32>
    %cst_89 = arith.constant 2.000000e+00 : f32
    %135 = vector.broadcast %cst_89 : f32 to vector<8x32xf32>
    %136 = arith.addf %133, %135 : vector<8x32xf32>
    %137 = arith.divf %134, %136 : vector<8x32xf32>
    %138 = vector.broadcast %3 : vector<8x1xf32> to vector<8x32xf32>
    %139 = arith.mulf %137, %138 : vector<8x32xf32>
    %140 = arith.truncf %5 : vector<8x64xf32> to vector<8x64xbf16>
    %c0_90 = arith.constant 0 : index
    %c0_91 = arith.constant 0 : index
    %141 = vector.load %arg14[%c0_90, %c0_91] : memref<64x32xbf16, #tpu.memory_space<vmem>>, vector<64x32xbf16>
    %cst_92 = arith.constant dense<0.000000e+00> : vector<8x32xf32>
    %142 = tpu.matmul %140, %141, %cst_92 {dimension_numbers = #tpu.dot_dimension_numbers<[1], [0], [0], [1], [0, 0, 1, 1], [], []>} : vector<8x64xbf16>, vector<64x32xbf16>, vector<8x32xf32> -> vector<8x32xf32>
    %c0_93 = arith.constant 0 : index
    %c0_94 = arith.constant 0 : index
    %143 = vector.load %arg15[%c0_93, %c0_94] : memref<1x32xf32, #tpu.memory_space<vmem>>, vector<1x32xf32>
    %144 = vector.broadcast %143 : vector<1x32xf32> to vector<8x32xf32>
    %145 = arith.addf %142, %144 : vector<8x32xf32>
    %146 = arith.addf %139, %145 : vector<8x32xf32>
    %c0_95 = arith.constant 0 : index
    %c0_96 = arith.constant 0 : index
    %c0_97 = arith.constant 0 : index
    %147 = vector.load %arg17[%c0_95, %c0_96, %c0_97] : memref<1x8x32xf32, #tpu.memory_space<vmem>>, vector<1x8x32xf32>
    %148 = vector.shape_cast %147 : vector<1x8x32xf32> to vector<8x32xf32>
    %149 = vector.shape_cast %146 : vector<8x32xf32> to vector<1x8x32xf32>
    tpu.vector_store %arg17[%c0_95, %c0_96, %c0_97], %149 {strides = array<i32>} : memref<1x8x32xf32, #tpu.memory_space<vmem>>, vector<1x8x32xf32>,
    return
  }
  func.func @transform_0(%arg0: i32) -> (i32, i32, i32) {
    %c0_i32 = arith.constant 0 : i32
    %c0_i32_0 = arith.constant 0 : i32
    %c0_i32_1 = arith.constant 0 : i32
    return %arg0, %c0_i32, %c0_i32_0 : i32, i32, i32
  }
  func.func @transform_1(%arg0: i32) -> (i32, i32, i32) {
    %c0_i32 = arith.constant 0 : i32
    %c0_i32_0 = arith.constant 0 : i32
    %c0_i32_1 = arith.constant 0 : i32
    return %arg0, %c0_i32, %c0_i32_0 : i32, i32, i32
  }
  func.func @transform_2(%arg0: i32) -> (i32, i32, i32) {
    %c0_i32 = arith.constant 0 : i32
    %c0_i32_0 = arith.constant 0 : i32
    %c0_i32_1 = arith.constant 0 : i32
    return %arg0, %c0_i32, %c0_i32_0 : i32, i32, i32
  }
  func.func @transform_3(%arg0: i32) -> (i32, i32, i32) {
    %c0_i32 = arith.constant 0 : i32
    %c0_i32_0 = arith.constant 0 : i32
    %c0_i32_1 = arith.constant 0 : i32
    %c0_i32_2 = arith.constant 0 : i32
    return %c0_i32, %c0_i32_0, %c0_i32_1 : i32, i32, i32
  }
  func.func @transform_4(%arg0: i32) -> (i32, i32) {
    %c0_i32 = arith.constant 0 : i32
    %c0_i32_0 = arith.constant 0 : i32
    %c0_i32_1 = arith.constant 0 : i32
    return %c0_i32, %c0_i32_0 : i32, i32
  }
  func.func @transform_5(%arg0: i32) -> (i32, i32) {
    %c0_i32 = arith.constant 0 : i32
    %c0_i32_0 = arith.constant 0 : i32
    %c0_i32_1 = arith.constant 0 : i32
    return %c0_i32, %c0_i32_0 : i32, i32
  }
  func.func @transform_6(%arg0: i32) -> (i32, i32) {
    %c0_i32 = arith.constant 0 : i32
    %c0_i32_0 = arith.constant 0 : i32
    %c0_i32_1 = arith.constant 0 : i32
    return %c0_i32, %c0_i32_0 : i32, i32
  }
  func.func @transform_7(%arg0: i32) -> (i32, i32) {
    %c0_i32 = arith.constant 0 : i32
    %c0_i32_0 = arith.constant 0 : i32
    %c0_i32_1 = arith.constant 0 : i32
    return %c0_i32, %c0_i32_0 : i32, i32
  }
  func.func @transform_8(%arg0: i32) -> (i32, i32) {
    %c0_i32 = arith.constant 0 : i32
    %c0_i32_0 = arith.constant 0 : i32
    %c0_i32_1 = arith.constant 0 : i32
    return %c0_i32, %c0_i32_0 : i32, i32
  }
  func.func @transform_9(%arg0: i32) -> (i32, i32, i32) {
    %c0_i32 = arith.constant 0 : i32
    %c0_i32_0 = arith.constant 0 : i32
    %c0_i32_1 = arith.constant 0 : i32
    %c0_i32_2 = arith.constant 0 : i32
    return %c0_i32, %c0_i32_0, %c0_i32_1 : i32, i32, i32
  }
  func.func @transform_10(%arg0: i32) -> (i32, i32) {
    %c0_i32 = arith.constant 0 : i32
    %c0_i32_0 = arith.constant 0 : i32
    %c0_i32_1 = arith.constant 0 : i32
    return %c0_i32, %c0_i32_0 : i32, i32
  }
  func.func @transform_11(%arg0: i32) -> (i32, i32) {
    %c0_i32 = arith.constant 0 : i32
    %c0_i32_0 = arith.constant 0 : i32
    %c0_i32_1 = arith.constant 0 : i32
    return %c0_i32, %c0_i32_0 : i32, i32
  }
  func.func @transform_12(%arg0: i32) -> (i32, i32) {
    %c0_i32 = arith.constant 0 : i32
    %c0_i32_0 = arith.constant 0 : i32
    %c0_i32_1 = arith.constant 0 : i32
    return %c0_i32, %c0_i32_0 : i32, i32
  }
  func.func @transform_13(%arg0: i32) -> (i32, i32) {
    %c0_i32 = arith.constant 0 : i32
    %c0_i32_0 = arith.constant 0 : i32
    %c0_i32_1 = arith.constant 0 : i32
    return %c0_i32, %c0_i32_0 : i32, i32
  }
  func.func @transform_14(%arg0: i32) -> (i32, i32) {
    %c0_i32 = arith.constant 0 : i32
    %c0_i32_0 = arith.constant 0 : i32
    %c0_i32_1 = arith.constant 0 : i32
    return %c0_i32, %c0_i32_0 : i32, i32
  }
  func.func @transform_15(%arg0: i32) -> (i32, i32) {
    %c0_i32 = arith.constant 0 : i32
    %c0_i32_0 = arith.constant 0 : i32
    %c0_i32_1 = arith.constant 0 : i32
    return %c0_i32, %c0_i32_0 : i32, i32
  }
  func.func @transform_16(%arg0: i32) -> (i32, i32, i32) {
    %c0_i32 = arith.constant 0 : i32
    %c0_i32_0 = arith.constant 0 : i32
    %c0_i32_1 = arith.constant 0 : i32
    return %arg0, %c0_i32, %c0_i32_0 : i32, i32, i32
  }
}

module attributes {stable_mosaic.version = 11 : i64} {
  func.func @_conv_kernel(%arg0: i32, %arg1: memref<1x8x32xf32, #tpu.memory_space<vmem>>, %arg2: memref<1x8x1xf32, #tpu.memory_space<vmem>>, %arg3: memref<3x32x64xbf16, #tpu.memory_space<vmem>>, %arg4: memref<1x64xf32, #tpu.memory_space<vmem>>, %arg5: memref<1x8x64xf32, #tpu.memory_space<vmem>>, %arg6: memref<10x32xf32, #tpu.memory_space<vmem>>) attributes {dimension_semantics = [#tpu.dimension_semantics<parallel>], iteration_bounds = array<i64: 2>, scalar_prefetch = 0 : i64, scratch_operands = 1 : i64, tpu.core_type = #tpu.core_type<tc>, window_params = [{transform_indices = @transform_0, window_bounds = array<i64: 1, 8, 32>}, {transform_indices = @transform_1, window_bounds = array<i64: 1, 8, 1>}, {pipeline_mode = #tpu.pipeline_mode<synchronous>, transform_indices = @transform_2, window_bounds = array<i64: 3, 32, 64>}, {pipeline_mode = #tpu.pipeline_mode<synchronous>, transform_indices = @transform_3, window_bounds = array<i64: 1, 64>}, {transform_indices = @transform_4, window_bounds = array<i64: 1, 8, 64>}]} {
    %c0 = arith.constant 0 : index
    %c0_0 = arith.constant 0 : index
    %c0_1 = arith.constant 0 : index
    %0 = vector.load %arg1[%c0, %c0_0, %c0_1] : memref<1x8x32xf32, #tpu.memory_space<vmem>>, vector<1x8x32xf32>
    %1 = vector.shape_cast %0 : vector<1x8x32xf32> to vector<8x32xf32>
    %c0_2 = arith.constant 0 : index
    %c0_3 = arith.constant 0 : index
    %c0_4 = arith.constant 0 : index
    %2 = vector.load %arg2[%c0_2, %c0_3, %c0_4] : memref<1x8x1xf32, #tpu.memory_space<vmem>>, vector<1x8x1xf32>
    %3 = vector.shape_cast %2 : vector<1x8x1xf32> to vector<8x1xf32>
    %4 = vector.broadcast %3 : vector<8x1xf32> to vector<8x32xf32>
    %5 = arith.mulf %1, %4 : vector<8x32xf32>
    %cst = arith.constant 0.000000e+00 : f32
    %6 = vector.broadcast %cst : f32 to vector<10x32xf32>
    %c0_5 = arith.constant 0 : index
    %c0_6 = arith.constant 0 : index
    %7 = vector.load %arg6[%c0_5, %c0_6] : memref<10x32xf32, #tpu.memory_space<vmem>>, vector<10x32xf32>
    tpu.vector_store %arg6[%c0_5, %c0_6], %6 {strides = array<i32>} : memref<10x32xf32, #tpu.memory_space<vmem>>, vector<10x32xf32>,
    %c1 = arith.constant 1 : index
    %c0_7 = arith.constant 0 : index
    %8 = vector.load %arg6[%c1, %c0_7] : memref<10x32xf32, #tpu.memory_space<vmem>>, vector<8x32xf32>
    tpu.vector_store %arg6[%c1, %c0_7], %5 {strides = array<i32>} : memref<10x32xf32, #tpu.memory_space<vmem>>, vector<8x32xf32>,
    %c0_8 = arith.constant 0 : index
    %c0_9 = arith.constant 0 : index
    %9 = vector.load %arg6[%c0_8, %c0_9] : memref<10x32xf32, #tpu.memory_space<vmem>>, vector<8x32xf32>
    %10 = arith.truncf %9 : vector<8x32xf32> to vector<8x32xbf16>
    %c0_10 = arith.constant 0 : index
    %c0_11 = arith.constant 0 : index
    %c0_12 = arith.constant 0 : index
    %11 = vector.load %arg3[%c0_10, %c0_11, %c0_12] : memref<3x32x64xbf16, #tpu.memory_space<vmem>>, vector<1x32x64xbf16>
    %12 = vector.shape_cast %11 : vector<1x32x64xbf16> to vector<32x64xbf16>
    %cst_13 = arith.constant dense<0.000000e+00> : vector<8x64xf32>
    %13 = tpu.matmul %10, %12, %cst_13 {dimension_numbers = #tpu.dot_dimension_numbers<[1], [0], [0], [1], [0, 0, 1, 1], [], []>} : vector<8x32xbf16>, vector<32x64xbf16>, vector<8x64xf32> -> vector<8x64xf32>
    %c1_14 = arith.constant 1 : index
    %c0_15 = arith.constant 0 : index
    %14 = vector.load %arg6[%c1_14, %c0_15] : memref<10x32xf32, #tpu.memory_space<vmem>>, vector<8x32xf32>
    %15 = arith.truncf %14 : vector<8x32xf32> to vector<8x32xbf16>
    %c1_16 = arith.constant 1 : index
    %c0_17 = arith.constant 0 : index
    %c0_18 = arith.constant 0 : index
    %16 = vector.load %arg3[%c1_16, %c0_17, %c0_18] : memref<3x32x64xbf16, #tpu.memory_space<vmem>>, vector<1x32x64xbf16>
    %17 = vector.shape_cast %16 : vector<1x32x64xbf16> to vector<32x64xbf16>
    %cst_19 = arith.constant dense<0.000000e+00> : vector<8x64xf32>
    %18 = tpu.matmul %15, %17, %cst_19 {dimension_numbers = #tpu.dot_dimension_numbers<[1], [0], [0], [1], [0, 0, 1, 1], [], []>} : vector<8x32xbf16>, vector<32x64xbf16>, vector<8x64xf32> -> vector<8x64xf32>
    %19 = arith.addf %13, %18 : vector<8x64xf32>
    %c2 = arith.constant 2 : index
    %c0_20 = arith.constant 0 : index
    %20 = vector.load %arg6[%c2, %c0_20] : memref<10x32xf32, #tpu.memory_space<vmem>>, vector<8x32xf32>
    %21 = arith.truncf %20 : vector<8x32xf32> to vector<8x32xbf16>
    %c2_21 = arith.constant 2 : index
    %c0_22 = arith.constant 0 : index
    %c0_23 = arith.constant 0 : index
    %22 = vector.load %arg3[%c2_21, %c0_22, %c0_23] : memref<3x32x64xbf16, #tpu.memory_space<vmem>>, vector<1x32x64xbf16>
    %23 = vector.shape_cast %22 : vector<1x32x64xbf16> to vector<32x64xbf16>
    %cst_24 = arith.constant dense<0.000000e+00> : vector<8x64xf32>
    %24 = tpu.matmul %21, %23, %cst_24 {dimension_numbers = #tpu.dot_dimension_numbers<[1], [0], [0], [1], [0, 0, 1, 1], [], []>} : vector<8x32xbf16>, vector<32x64xbf16>, vector<8x64xf32> -> vector<8x64xf32>
    %25 = arith.addf %19, %24 : vector<8x64xf32>
    %c0_25 = arith.constant 0 : index
    %c0_26 = arith.constant 0 : index
    %26 = vector.load %arg4[%c0_25, %c0_26] : memref<1x64xf32, #tpu.memory_space<vmem>>, vector<1x64xf32>
    %27 = vector.broadcast %26 : vector<1x64xf32> to vector<8x64xf32>
    %28 = arith.addf %25, %27 : vector<8x64xf32>
    %c0_27 = arith.constant 0 : index
    %c0_28 = arith.constant 0 : index
    %c0_29 = arith.constant 0 : index
    %29 = vector.load %arg5[%c0_27, %c0_28, %c0_29] : memref<1x8x64xf32, #tpu.memory_space<vmem>>, vector<1x8x64xf32>
    %30 = vector.shape_cast %29 : vector<1x8x64xf32> to vector<8x64xf32>
    %31 = vector.shape_cast %28 : vector<8x64xf32> to vector<1x8x64xf32>
    tpu.vector_store %arg5[%c0_27, %c0_28, %c0_29], %31 {strides = array<i32>} : memref<1x8x64xf32, #tpu.memory_space<vmem>>, vector<1x8x64xf32>,
    return
  }
  func.func @transform_0(%arg0: i32) -> (i32, i32, i32) {
    %c0_i32 = arith.constant 0 : i32
    %c0_i32_0 = arith.constant 0 : i32
    %c0_i32_1 = arith.constant 0 : i32
    return %arg0, %c0_i32, %c0_i32_0 : i32, i32, i32
  }
  func.func @transform_1(%arg0: i32) -> (i32, i32, i32) {
    %c0_i32 = arith.constant 0 : i32
    %c0_i32_0 = arith.constant 0 : i32
    %c0_i32_1 = arith.constant 0 : i32
    return %arg0, %c0_i32, %c0_i32_0 : i32, i32, i32
  }
  func.func @transform_2(%arg0: i32) -> (i32, i32, i32) {
    %c0_i32 = arith.constant 0 : i32
    %c0_i32_0 = arith.constant 0 : i32
    %c0_i32_1 = arith.constant 0 : i32
    %c0_i32_2 = arith.constant 0 : i32
    return %c0_i32, %c0_i32_0, %c0_i32_1 : i32, i32, i32
  }
  func.func @transform_3(%arg0: i32) -> (i32, i32) {
    %c0_i32 = arith.constant 0 : i32
    %c0_i32_0 = arith.constant 0 : i32
    %c0_i32_1 = arith.constant 0 : i32
    return %c0_i32, %c0_i32_0 : i32, i32
  }
  func.func @transform_4(%arg0: i32) -> (i32, i32, i32) {
    %c0_i32 = arith.constant 0 : i32
    %c0_i32_0 = arith.constant 0 : i32
    %c0_i32_1 = arith.constant 0 : i32
    return %arg0, %c0_i32, %c0_i32_0 : i32, i32, i32
  }
}

module attributes {stable_mosaic.version = 11 : i64} {
  func.func @_resnet_kernel(%arg0: i32, %arg1: memref<1x16x64xf32, #tpu.memory_space<vmem>>, %arg2: memref<1x16x1xf32, #tpu.memory_space<vmem>>, %arg3: memref<1x1x128xf32, #tpu.memory_space<vmem>>, %arg4: memref<3x64x32xbf16, #tpu.memory_space<vmem>>, %arg5: memref<1x32xf32, #tpu.memory_space<vmem>>, %arg6: memref<1x32xf32, #tpu.memory_space<vmem>>, %arg7: memref<1x32xf32, #tpu.memory_space<vmem>>, %arg8: memref<128x32xbf16, #tpu.memory_space<vmem>>, %arg9: memref<1x32xf32, #tpu.memory_space<vmem>>, %arg10: memref<3x32x32xbf16, #tpu.memory_space<vmem>>, %arg11: memref<1x32xf32, #tpu.memory_space<vmem>>, %arg12: memref<1x32xf32, #tpu.memory_space<vmem>>, %arg13: memref<1x32xf32, #tpu.memory_space<vmem>>, %arg14: memref<64x32xbf16, #tpu.memory_space<vmem>>, %arg15: memref<1x32xf32, #tpu.memory_space<vmem>>, %arg16: memref<32x32xf32, #tpu.memory_space<vmem>>, %arg17: memref<1x16x32xf32, #tpu.memory_space<vmem>>, %arg18: memref<18x64xf32, #tpu.memory_space<vmem>>, %arg19: memref<18x32xf32, #tpu.memory_space<vmem>>) attributes {dimension_semantics = [#tpu.dimension_semantics<parallel>], iteration_bounds = array<i64: 2>, scalar_prefetch = 0 : i64, scratch_operands = 2 : i64, tpu.core_type = #tpu.core_type<tc>, window_params = [{transform_indices = @transform_0, window_bounds = array<i64: 1, 16, 64>}, {transform_indices = @transform_1, window_bounds = array<i64: 1, 16, 1>}, {transform_indices = @transform_2, window_bounds = array<i64: 1, 1, 128>}, {pipeline_mode = #tpu.pipeline_mode<synchronous>, transform_indices = @transform_3, window_bounds = array<i64: 3, 64, 32>}, {pipeline_mode = #tpu.pipeline_mode<synchronous>, transform_indices = @transform_4, window_bounds = array<i64: 1, 32>}, {pipeline_mode = #tpu.pipeline_mode<synchronous>, transform_indices = @transform_5, window_bounds = array<i64: 1, 32>}, {pipeline_mode = #tpu.pipeline_mode<synchronous>, transform_indices = @transform_6, window_bounds = array<i64: 1, 32>}, {pipeline_mode = #tpu.pipeline_mode<synchronous>, transform_indices = @transform_7, window_bounds = array<i64: 128, 32>}, {pipeline_mode = #tpu.pipeline_mode<synchronous>, transform_indices = @transform_8, window_bounds = array<i64: 1, 32>}, {pipeline_mode = #tpu.pipeline_mode<synchronous>, transform_indices = @transform_9, window_bounds = array<i64: 3, 32, 32>}, {pipeline_mode = #tpu.pipeline_mode<synchronous>, transform_indices = @transform_10, window_bounds = array<i64: 1, 32>}, {pipeline_mode = #tpu.pipeline_mode<synchronous>, transform_indices = @transform_11, window_bounds = array<i64: 1, 32>}, {pipeline_mode = #tpu.pipeline_mode<synchronous>, transform_indices = @transform_12, window_bounds = array<i64: 1, 32>}, {pipeline_mode = #tpu.pipeline_mode<synchronous>, transform_indices = @transform_13, window_bounds = array<i64: 64, 32>}, {pipeline_mode = #tpu.pipeline_mode<synchronous>, transform_indices = @transform_14, window_bounds = array<i64: 1, 32>}, {pipeline_mode = #tpu.pipeline_mode<synchronous>, transform_indices = @transform_15, window_bounds = array<i64: 32, 32>}, {transform_indices = @transform_16, window_bounds = array<i64: 1, 16, 32>}]} {
    %c0 = arith.constant 0 : index
    %c0_0 = arith.constant 0 : index
    %c0_1 = arith.constant 0 : index
    %0 = vector.load %arg1[%c0, %c0_0, %c0_1] : memref<1x16x64xf32, #tpu.memory_space<vmem>>, vector<1x16x64xf32>
    %1 = vector.shape_cast %0 : vector<1x16x64xf32> to vector<16x64xf32>
    %c0_2 = arith.constant 0 : index
    %c0_3 = arith.constant 0 : index
    %c0_4 = arith.constant 0 : index
    %2 = vector.load %arg2[%c0_2, %c0_3, %c0_4] : memref<1x16x1xf32, #tpu.memory_space<vmem>>, vector<1x16x1xf32>
    %3 = vector.shape_cast %2 : vector<1x16x1xf32> to vector<16x1xf32>
    %4 = vector.broadcast %3 : vector<16x1xf32> to vector<16x64xf32>
    %5 = arith.mulf %1, %4 : vector<16x64xf32>
    %c0_5 = arith.constant 0 : index
    %c0_6 = arith.constant 0 : index
    %6 = vector.load %arg16[%c0_5, %c0_6] : memref<32x32xf32, #tpu.memory_space<vmem>>, vector<32x32xf32>
    %cst = arith.constant 0.000000e+00 : f32
    %7 = vector.broadcast %cst : f32 to vector<18x64xf32>
    %c0_7 = arith.constant 0 : index
    %c0_8 = arith.constant 0 : index
    %8 = vector.load %arg18[%c0_7, %c0_8] : memref<18x64xf32, #tpu.memory_space<vmem>>, vector<18x64xf32>
    tpu.vector_store %arg18[%c0_7, %c0_8], %7 {strides = array<i32>} : memref<18x64xf32, #tpu.memory_space<vmem>>, vector<18x64xf32>,
    %c1 = arith.constant 1 : index
    %c0_9 = arith.constant 0 : index
    %9 = vector.load %arg18[%c1, %c0_9] : memref<18x64xf32, #tpu.memory_space<vmem>>, vector<16x64xf32>
    tpu.vector_store %arg18[%c1, %c0_9], %5 {strides = array<i32>} : memref<18x64xf32, #tpu.memory_space<vmem>>, vector<16x64xf32>,
    %c0_10 = arith.constant 0 : index
    %c0_11 = arith.constant 0 : index
    %10 = vector.load %arg18[%c0_10, %c0_11] : memref<18x64xf32, #tpu.memory_space<vmem>>, vector<16x64xf32>
    %11 = arith.truncf %10 : vector<16x64xf32> to vector<16x64xbf16>
    %c0_12 = arith.constant 0 : index
    %c0_13 = arith.constant 0 : index
    %c0_14 = arith.constant 0 : index
    %12 = vector.load %arg4[%c0_12, %c0_13, %c0_14] : memref<3x64x32xbf16, #tpu.memory_space<vmem>>, vector<1x64x32xbf16>
    %13 = vector.shape_cast %12 : vector<1x64x32xbf16> to vector<64x32xbf16>
    %cst_15 = arith.constant dense<0.000000e+00> : vector<16x32xf32>
    %14 = tpu.matmul %11, %13, %cst_15 {dimension_numbers = #tpu.dot_dimension_numbers<[1], [0], [0], [1], [0, 0, 1, 1], [], []>} : vector<16x64xbf16>, vector<64x32xbf16>, vector<16x32xf32> -> vector<16x32xf32>
    %c1_16 = arith.constant 1 : index
    %c0_17 = arith.constant 0 : index
    %15 = vector.load %arg18[%c1_16, %c0_17] : memref<18x64xf32, #tpu.memory_space<vmem>>, vector<16x64xf32>
    %16 = arith.truncf %15 : vector<16x64xf32> to vector<16x64xbf16>
    %c1_18 = arith.constant 1 : index
    %c0_19 = arith.constant 0 : index
    %c0_20 = arith.constant 0 : index
    %17 = vector.load %arg4[%c1_18, %c0_19, %c0_20] : memref<3x64x32xbf16, #tpu.memory_space<vmem>>, vector<1x64x32xbf16>
    %18 = vector.shape_cast %17 : vector<1x64x32xbf16> to vector<64x32xbf16>
    %cst_21 = arith.constant dense<0.000000e+00> : vector<16x32xf32>
    %19 = tpu.matmul %16, %18, %cst_21 {dimension_numbers = #tpu.dot_dimension_numbers<[1], [0], [0], [1], [0, 0, 1, 1], [], []>} : vector<16x64xbf16>, vector<64x32xbf16>, vector<16x32xf32> -> vector<16x32xf32>
    %20 = arith.addf %14, %19 : vector<16x32xf32>
    %c2 = arith.constant 2 : index
    %c0_22 = arith.constant 0 : index
    %21 = vector.load %arg18[%c2, %c0_22] : memref<18x64xf32, #tpu.memory_space<vmem>>, vector<16x64xf32>
    %22 = arith.truncf %21 : vector<16x64xf32> to vector<16x64xbf16>
    %c2_23 = arith.constant 2 : index
    %c0_24 = arith.constant 0 : index
    %c0_25 = arith.constant 0 : index
    %23 = vector.load %arg4[%c2_23, %c0_24, %c0_25] : memref<3x64x32xbf16, #tpu.memory_space<vmem>>, vector<1x64x32xbf16>
    %24 = vector.shape_cast %23 : vector<1x64x32xbf16> to vector<64x32xbf16>
    %cst_26 = arith.constant dense<0.000000e+00> : vector<16x32xf32>
    %25 = tpu.matmul %22, %24, %cst_26 {dimension_numbers = #tpu.dot_dimension_numbers<[1], [0], [0], [1], [0, 0, 1, 1], [], []>} : vector<16x64xbf16>, vector<64x32xbf16>, vector<16x32xf32> -> vector<16x32xf32>
    %26 = arith.addf %20, %25 : vector<16x32xf32>
    %c0_27 = arith.constant 0 : index
    %c0_28 = arith.constant 0 : index
    %27 = vector.load %arg5[%c0_27, %c0_28] : memref<1x32xf32, #tpu.memory_space<vmem>>, vector<1x32xf32>
    %28 = vector.broadcast %27 : vector<1x32xf32> to vector<16x32xf32>
    %29 = arith.addf %26, %28 : vector<16x32xf32>
    %c0_29 = arith.constant 0 : index
    %c0_30 = arith.constant 0 : index
    %30 = vector.load %arg6[%c0_29, %c0_30] : memref<1x32xf32, #tpu.memory_space<vmem>>, vector<1x32xf32>
    %c0_31 = arith.constant 0 : index
    %c0_32 = arith.constant 0 : index
    %31 = vector.load %arg7[%c0_31, %c0_32] : memref<1x32xf32, #tpu.memory_space<vmem>>, vector<1x32xf32>
    %cst_33 = arith.constant dense<0.000000e+00> : vector<32xf32>
    %32 = vector.multi_reduction <add>, %29, %cst_33 [0] : vector<16x32xf32> to vector<32xf32>
    %33 = vector.shape_cast %32 : vector<32xf32> to vector<1x32xf32>
    %cst_34 = arith.constant 1.600000e+01 : f32
    %34 = vector.broadcast %cst_34 : f32 to vector<1x32xf32>
    %35 = arith.divf %33, %34 : vector<1x32xf32>
    %36 = arith.mulf %29, %29 : vector<16x32xf32>
    %cst_35 = arith.constant dense<0.000000e+00> : vector<32xf32>
    %37 = vector.multi_reduction <add>, %36, %cst_35 [0] : vector<16x32xf32> to vector<32xf32>
    %38 = vector.shape_cast %37 : vector<32xf32> to vector<1x32xf32>
    %cst_36 = arith.constant 1.600000e+01 : f32
    %39 = vector.broadcast %cst_36 : f32 to vector<1x32xf32>
    %40 = arith.divf %38, %39 : vector<1x32xf32>
    %cst_37 = arith.constant dense<0.000000e+00> : vector<1x32xf32>
    %41 = tpu.matmul %35, %6, %cst_37 {dimension_numbers = #tpu.dot_dimension_numbers<[1], [0], [0], [1], [0, 0, 1, 1], [], []>} : vector<1x32xf32>, vector<32x32xf32>, vector<1x32xf32> -> vector<1x32xf32>
    %cst_38 = arith.constant dense<0.000000e+00> : vector<1x32xf32>
    %42 = tpu.matmul %40, %6, %cst_38 {dimension_numbers = #tpu.dot_dimension_numbers<[1], [0], [0], [1], [0, 0, 1, 1], [], []>} : vector<1x32xf32>, vector<32x32xf32>, vector<1x32xf32> -> vector<1x32xf32>
    %43 = arith.mulf %41, %41 : vector<1x32xf32>
    %44 = arith.subf %42, %43 : vector<1x32xf32>
    %45 = vector.broadcast %41 : vector<1x32xf32> to vector<16x32xf32>
    %46 = arith.subf %29, %45 : vector<16x32xf32>
    %cst_39 = arith.constant 9.99999974E-6 : f32
    %47 = vector.broadcast %cst_39 : f32 to vector<1x32xf32>
    %48 = arith.addf %44, %47 : vector<1x32xf32>
    %49 = math.rsqrt %48 : vector<1x32xf32>
    %50 = vector.broadcast %49 : vector<1x32xf32> to vector<16x32xf32>
    %51 = arith.mulf %46, %50 : vector<16x32xf32>
    %52 = vector.broadcast %30 : vector<1x32xf32> to vector<16x32xf32>
    %53 = arith.mulf %51, %52 : vector<16x32xf32>
    %54 = vector.broadcast %31 : vector<1x32xf32> to vector<16x32xf32>
    %55 = arith.addf %53, %54 : vector<16x32xf32>
    %cst_40 = arith.constant 3.000000e+01 : f32
    %56 = vector.broadcast %cst_40 : f32 to vector<16x32xf32>
    %57 = arith.minimumf %55, %56 : vector<16x32xf32>
    %58 = math.exp %57 : vector<16x32xf32>
    %cst_41 = arith.constant 2.000000e+00 : f32
    %59 = vector.broadcast %cst_41 : f32 to vector<16x32xf32>
    %60 = arith.addf %58, %59 : vector<16x32xf32>
    %61 = arith.mulf %58, %60 : vector<16x32xf32>
    %62 = arith.mulf %55, %61 : vector<16x32xf32>
    %cst_42 = arith.constant 2.000000e+00 : f32
    %63 = vector.broadcast %cst_42 : f32 to vector<16x32xf32>
    %64 = arith.addf %61, %63 : vector<16x32xf32>
    %65 = arith.divf %62, %64 : vector<16x32xf32>
    %66 = vector.broadcast %3 : vector<16x1xf32> to vector<16x32xf32>
    %67 = arith.mulf %65, %66 : vector<16x32xf32>
    %c0_43 = arith.constant 0 : index
    %c0_44 = arith.constant 0 : index
    %c0_45 = arith.constant 0 : index
    %68 = vector.load %arg3[%c0_43, %c0_44, %c0_45] : memref<1x1x128xf32, #tpu.memory_space<vmem>>, vector<1x1x128xf32>
    %69 = vector.shape_cast %68 : vector<1x1x128xf32> to vector<1x128xf32>
    %70 = arith.truncf %69 : vector<1x128xf32> to vector<1x128xbf16>
    %c0_46 = arith.constant 0 : index
    %c0_47 = arith.constant 0 : index
    %71 = vector.load %arg8[%c0_46, %c0_47] : memref<128x32xbf16, #tpu.memory_space<vmem>>, vector<128x32xbf16>
    %cst_48 = arith.constant dense<0.000000e+00> : vector<1x32xf32>
    %72 = tpu.matmul %70, %71, %cst_48 {dimension_numbers = #tpu.dot_dimension_numbers<[1], [0], [0], [1], [0, 0, 1, 1], [], []>} : vector<1x128xbf16>, vector<128x32xbf16>, vector<1x32xf32> -> vector<1x32xf32>
    %c0_49 = arith.constant 0 : index
    %c0_50 = arith.constant 0 : index
    %73 = vector.load %arg9[%c0_49, %c0_50] : memref<1x32xf32, #tpu.memory_space<vmem>>, vector<1x32xf32>
    %74 = arith.addf %72, %73 : vector<1x32xf32>
    %75 = vector.broadcast %74 : vector<1x32xf32> to vector<16x32xf32>
    %76 = arith.addf %67, %75 : vector<16x32xf32>
    %77 = vector.broadcast %3 : vector<16x1xf32> to vector<16x32xf32>
    %78 = arith.mulf %76, %77 : vector<16x32xf32>
    %cst_51 = arith.constant 0.000000e+00 : f32
    %79 = vector.broadcast %cst_51 : f32 to vector<18x32xf32>
    %c0_52 = arith.constant 0 : index
    %c0_53 = arith.constant 0 : index
    %80 = vector.load %arg19[%c0_52, %c0_53] : memref<18x32xf32, #tpu.memory_space<vmem>>, vector<18x32xf32>
    tpu.vector_store %arg19[%c0_52, %c0_53], %79 {strides = array<i32>} : memref<18x32xf32, #tpu.memory_space<vmem>>, vector<18x32xf32>,
    %c1_54 = arith.constant 1 : index
    %c0_55 = arith.constant 0 : index
    %81 = vector.load %arg19[%c1_54, %c0_55] : memref<18x32xf32, #tpu.memory_space<vmem>>, vector<16x32xf32>
    tpu.vector_store %arg19[%c1_54, %c0_55], %78 {strides = array<i32>} : memref<18x32xf32, #tpu.memory_space<vmem>>, vector<16x32xf32>,
    %c0_56 = arith.constant 0 : index
    %c0_57 = arith.constant 0 : index
    %82 = vector.load %arg19[%c0_56, %c0_57] : memref<18x32xf32, #tpu.memory_space<vmem>>, vector<16x32xf32>
    %83 = arith.truncf %82 : vector<16x32xf32> to vector<16x32xbf16>
    %c0_58 = arith.constant 0 : index
    %c0_59 = arith.constant 0 : index
    %c0_60 = arith.constant 0 : index
    %84 = vector.load %arg10[%c0_58, %c0_59, %c0_60] : memref<3x32x32xbf16, #tpu.memory_space<vmem>>, vector<1x32x32xbf16>
    %85 = vector.shape_cast %84 : vector<1x32x32xbf16> to vector<32x32xbf16>
    %cst_61 = arith.constant dense<0.000000e+00> : vector<16x32xf32>
    %86 = tpu.matmul %83, %85, %cst_61 {dimension_numbers = #tpu.dot_dimension_numbers<[1], [0], [0], [1], [0, 0, 1, 1], [], []>} : vector<16x32xbf16>, vector<32x32xbf16>, vector<16x32xf32> -> vector<16x32xf32>
    %c1_62 = arith.constant 1 : index
    %c0_63 = arith.constant 0 : index
    %87 = vector.load %arg19[%c1_62, %c0_63] : memref<18x32xf32, #tpu.memory_space<vmem>>, vector<16x32xf32>
    %88 = arith.truncf %87 : vector<16x32xf32> to vector<16x32xbf16>
    %c1_64 = arith.constant 1 : index
    %c0_65 = arith.constant 0 : index
    %c0_66 = arith.constant 0 : index
    %89 = vector.load %arg10[%c1_64, %c0_65, %c0_66] : memref<3x32x32xbf16, #tpu.memory_space<vmem>>, vector<1x32x32xbf16>
    %90 = vector.shape_cast %89 : vector<1x32x32xbf16> to vector<32x32xbf16>
    %cst_67 = arith.constant dense<0.000000e+00> : vector<16x32xf32>
    %91 = tpu.matmul %88, %90, %cst_67 {dimension_numbers = #tpu.dot_dimension_numbers<[1], [0], [0], [1], [0, 0, 1, 1], [], []>} : vector<16x32xbf16>, vector<32x32xbf16>, vector<16x32xf32> -> vector<16x32xf32>
    %92 = arith.addf %86, %91 : vector<16x32xf32>
    %c2_68 = arith.constant 2 : index
    %c0_69 = arith.constant 0 : index
    %93 = vector.load %arg19[%c2_68, %c0_69] : memref<18x32xf32, #tpu.memory_space<vmem>>, vector<16x32xf32>
    %94 = arith.truncf %93 : vector<16x32xf32> to vector<16x32xbf16>
    %c2_70 = arith.constant 2 : index
    %c0_71 = arith.constant 0 : index
    %c0_72 = arith.constant 0 : index
    %95 = vector.load %arg10[%c2_70, %c0_71, %c0_72] : memref<3x32x32xbf16, #tpu.memory_space<vmem>>, vector<1x32x32xbf16>
    %96 = vector.shape_cast %95 : vector<1x32x32xbf16> to vector<32x32xbf16>
    %cst_73 = arith.constant dense<0.000000e+00> : vector<16x32xf32>
    %97 = tpu.matmul %94, %96, %cst_73 {dimension_numbers = #tpu.dot_dimension_numbers<[1], [0], [0], [1], [0, 0, 1, 1], [], []>} : vector<16x32xbf16>, vector<32x32xbf16>, vector<16x32xf32> -> vector<16x32xf32>
    %98 = arith.addf %92, %97 : vector<16x32xf32>
    %c0_74 = arith.constant 0 : index
    %c0_75 = arith.constant 0 : index
    %99 = vector.load %arg11[%c0_74, %c0_75] : memref<1x32xf32, #tpu.memory_space<vmem>>, vector<1x32xf32>
    %100 = vector.broadcast %99 : vector<1x32xf32> to vector<16x32xf32>
    %101 = arith.addf %98, %100 : vector<16x32xf32>
    %c0_76 = arith.constant 0 : index
    %c0_77 = arith.constant 0 : index
    %102 = vector.load %arg12[%c0_76, %c0_77] : memref<1x32xf32, #tpu.memory_space<vmem>>, vector<1x32xf32>
    %c0_78 = arith.constant 0 : index
    %c0_79 = arith.constant 0 : index
    %103 = vector.load %arg13[%c0_78, %c0_79] : memref<1x32xf32, #tpu.memory_space<vmem>>, vector<1x32xf32>
    %cst_80 = arith.constant dense<0.000000e+00> : vector<32xf32>
    %104 = vector.multi_reduction <add>, %101, %cst_80 [0] : vector<16x32xf32> to vector<32xf32>
    %105 = vector.shape_cast %104 : vector<32xf32> to vector<1x32xf32>
    %cst_81 = arith.constant 1.600000e+01 : f32
    %106 = vector.broadcast %cst_81 : f32 to vector<1x32xf32>
    %107 = arith.divf %105, %106 : vector<1x32xf32>
    %108 = arith.mulf %101, %101 : vector<16x32xf32>
    %cst_82 = arith.constant dense<0.000000e+00> : vector<32xf32>
    %109 = vector.multi_reduction <add>, %108, %cst_82 [0] : vector<16x32xf32> to vector<32xf32>
    %110 = vector.shape_cast %109 : vector<32xf32> to vector<1x32xf32>
    %cst_83 = arith.constant 1.600000e+01 : f32
    %111 = vector.broadcast %cst_83 : f32 to vector<1x32xf32>
    %112 = arith.divf %110, %111 : vector<1x32xf32>
    %cst_84 = arith.constant dense<0.000000e+00> : vector<1x32xf32>
    %113 = tpu.matmul %107, %6, %cst_84 {dimension_numbers = #tpu.dot_dimension_numbers<[1], [0], [0], [1], [0, 0, 1, 1], [], []>} : vector<1x32xf32>, vector<32x32xf32>, vector<1x32xf32> -> vector<1x32xf32>
    %cst_85 = arith.constant dense<0.000000e+00> : vector<1x32xf32>
    %114 = tpu.matmul %112, %6, %cst_85 {dimension_numbers = #tpu.dot_dimension_numbers<[1], [0], [0], [1], [0, 0, 1, 1], [], []>} : vector<1x32xf32>, vector<32x32xf32>, vector<1x32xf32> -> vector<1x32xf32>
    %115 = arith.mulf %113, %113 : vector<1x32xf32>
    %116 = arith.subf %114, %115 : vector<1x32xf32>
    %117 = vector.broadcast %113 : vector<1x32xf32> to vector<16x32xf32>
    %118 = arith.subf %101, %117 : vector<16x32xf32>
    %cst_86 = arith.constant 9.99999974E-6 : f32
    %119 = vector.broadcast %cst_86 : f32 to vector<1x32xf32>
    %120 = arith.addf %116, %119 : vector<1x32xf32>
    %121 = math.rsqrt %120 : vector<1x32xf32>
    %122 = vector.broadcast %121 : vector<1x32xf32> to vector<16x32xf32>
    %123 = arith.mulf %118, %122 : vector<16x32xf32>
    %124 = vector.broadcast %102 : vector<1x32xf32> to vector<16x32xf32>
    %125 = arith.mulf %123, %124 : vector<16x32xf32>
    %126 = vector.broadcast %103 : vector<1x32xf32> to vector<16x32xf32>
    %127 = arith.addf %125, %126 : vector<16x32xf32>
    %cst_87 = arith.constant 3.000000e+01 : f32
    %128 = vector.broadcast %cst_87 : f32 to vector<16x32xf32>
    %129 = arith.minimumf %127, %128 : vector<16x32xf32>
    %130 = math.exp %129 : vector<16x32xf32>
    %cst_88 = arith.constant 2.000000e+00 : f32
    %131 = vector.broadcast %cst_88 : f32 to vector<16x32xf32>
    %132 = arith.addf %130, %131 : vector<16x32xf32>
    %133 = arith.mulf %130, %132 : vector<16x32xf32>
    %134 = arith.mulf %127, %133 : vector<16x32xf32>
    %cst_89 = arith.constant 2.000000e+00 : f32
    %135 = vector.broadcast %cst_89 : f32 to vector<16x32xf32>
    %136 = arith.addf %133, %135 : vector<16x32xf32>
    %137 = arith.divf %134, %136 : vector<16x32xf32>
    %138 = vector.broadcast %3 : vector<16x1xf32> to vector<16x32xf32>
    %139 = arith.mulf %137, %138 : vector<16x32xf32>
    %140 = arith.truncf %5 : vector<16x64xf32> to vector<16x64xbf16>
    %c0_90 = arith.constant 0 : index
    %c0_91 = arith.constant 0 : index
    %141 = vector.load %arg14[%c0_90, %c0_91] : memref<64x32xbf16, #tpu.memory_space<vmem>>, vector<64x32xbf16>
    %cst_92 = arith.constant dense<0.000000e+00> : vector<16x32xf32>
    %142 = tpu.matmul %140, %141, %cst_92 {dimension_numbers = #tpu.dot_dimension_numbers<[1], [0], [0], [1], [0, 0, 1, 1], [], []>} : vector<16x64xbf16>, vector<64x32xbf16>, vector<16x32xf32> -> vector<16x32xf32>
    %c0_93 = arith.constant 0 : index
    %c0_94 = arith.constant 0 : index
    %143 = vector.load %arg15[%c0_93, %c0_94] : memref<1x32xf32, #tpu.memory_space<vmem>>, vector<1x32xf32>
    %144 = vector.broadcast %143 : vector<1x32xf32> to vector<16x32xf32>
    %145 = arith.addf %142, %144 : vector<16x32xf32>
    %146 = arith.addf %139, %145 : vector<16x32xf32>
    %c0_95 = arith.constant 0 : index
    %c0_96 = arith.constant 0 : index
    %c0_97 = arith.constant 0 : index
    %147 = vector.load %arg17[%c0_95, %c0_96, %c0_97] : memref<1x16x32xf32, #tpu.memory_space<vmem>>, vector<1x16x32xf32>
    %148 = vector.shape_cast %147 : vector<1x16x32xf32> to vector<16x32xf32>
    %149 = vector.shape_cast %146 : vector<16x32xf32> to vector<1x16x32xf32>
    tpu.vector_store %arg17[%c0_95, %c0_96, %c0_97], %149 {strides = array<i32>} : memref<1x16x32xf32, #tpu.memory_space<vmem>>, vector<1x16x32xf32>,
    return
  }
  func.func @transform_0(%arg0: i32) -> (i32, i32, i32) {
    %c0_i32 = arith.constant 0 : i32
    %c0_i32_0 = arith.constant 0 : i32
    %c0_i32_1 = arith.constant 0 : i32
    return %arg0, %c0_i32, %c0_i32_0 : i32, i32, i32
  }
  func.func @transform_1(%arg0: i32) -> (i32, i32, i32) {
    %c0_i32 = arith.constant 0 : i32
    %c0_i32_0 = arith.constant 0 : i32
    %c0_i32_1 = arith.constant 0 : i32
    return %arg0, %c0_i32, %c0_i32_0 : i32, i32, i32
  }
  func.func @transform_2(%arg0: i32) -> (i32, i32, i32) {
    %c0_i32 = arith.constant 0 : i32
    %c0_i32_0 = arith.constant 0 : i32
    %c0_i32_1 = arith.constant 0 : i32
    return %arg0, %c0_i32, %c0_i32_0 : i32, i32, i32
  }
  func.func @transform_3(%arg0: i32) -> (i32, i32, i32) {
    %c0_i32 = arith.constant 0 : i32
    %c0_i32_0 = arith.constant 0 : i32
    %c0_i32_1 = arith.constant 0 : i32
    %c0_i32_2 = arith.constant 0 : i32
    return %c0_i32, %c0_i32_0, %c0_i32_1 : i32, i32, i32
  }
  func.func @transform_4(%arg0: i32) -> (i32, i32) {
    %c0_i32 = arith.constant 0 : i32
    %c0_i32_0 = arith.constant 0 : i32
    %c0_i32_1 = arith.constant 0 : i32
    return %c0_i32, %c0_i32_0 : i32, i32
  }
  func.func @transform_5(%arg0: i32) -> (i32, i32) {
    %c0_i32 = arith.constant 0 : i32
    %c0_i32_0 = arith.constant 0 : i32
    %c0_i32_1 = arith.constant 0 : i32
    return %c0_i32, %c0_i32_0 : i32, i32
  }
  func.func @transform_6(%arg0: i32) -> (i32, i32) {
    %c0_i32 = arith.constant 0 : i32
    %c0_i32_0 = arith.constant 0 : i32
    %c0_i32_1 = arith.constant 0 : i32
    return %c0_i32, %c0_i32_0 : i32, i32
  }
  func.func @transform_7(%arg0: i32) -> (i32, i32) {
    %c0_i32 = arith.constant 0 : i32
    %c0_i32_0 = arith.constant 0 : i32
    %c0_i32_1 = arith.constant 0 : i32
    return %c0_i32, %c0_i32_0 : i32, i32
  }
  func.func @transform_8(%arg0: i32) -> (i32, i32) {
    %c0_i32 = arith.constant 0 : i32
    %c0_i32_0 = arith.constant 0 : i32
    %c0_i32_1 = arith.constant 0 : i32
    return %c0_i32, %c0_i32_0 : i32, i32
  }
  func.func @transform_9(%arg0: i32) -> (i32, i32, i32) {
    %c0_i32 = arith.constant 0 : i32
    %c0_i32_0 = arith.constant 0 : i32
    %c0_i32_1 = arith.constant 0 : i32
    %c0_i32_2 = arith.constant 0 : i32
    return %c0_i32, %c0_i32_0, %c0_i32_1 : i32, i32, i32
  }
  func.func @transform_10(%arg0: i32) -> (i32, i32) {
    %c0_i32 = arith.constant 0 : i32
    %c0_i32_0 = arith.constant 0 : i32
    %c0_i32_1 = arith.constant 0 : i32
    return %c0_i32, %c0_i32_0 : i32, i32
  }
  func.func @transform_11(%arg0: i32) -> (i32, i32) {
    %c0_i32 = arith.constant 0 : i32
    %c0_i32_0 = arith.constant 0 : i32
    %c0_i32_1 = arith.constant 0 : i32
    return %c0_i32, %c0_i32_0 : i32, i32
  }
  func.func @transform_12(%arg0: i32) -> (i32, i32) {
    %c0_i32 = arith.constant 0 : i32
    %c0_i32_0 = arith.constant 0 : i32
    %c0_i32_1 = arith.constant 0 : i32
    return %c0_i32, %c0_i32_0 : i32, i32
  }
  func.func @transform_13(%arg0: i32) -> (i32, i32) {
    %c0_i32 = arith.constant 0 : i32
    %c0_i32_0 = arith.constant 0 : i32
    %c0_i32_1 = arith.constant 0 : i32
    return %c0_i32, %c0_i32_0 : i32, i32
  }
  func.func @transform_14(%arg0: i32) -> (i32, i32) {
    %c0_i32 = arith.constant 0 : i32
    %c0_i32_0 = arith.constant 0 : i32
    %c0_i32_1 = arith.constant 0 : i32
    return %c0_i32, %c0_i32_0 : i32, i32
  }
  func.func @transform_15(%arg0: i32) -> (i32, i32) {
    %c0_i32 = arith.constant 0 : i32
    %c0_i32_0 = arith.constant 0 : i32
    %c0_i32_1 = arith.constant 0 : i32
    return %c0_i32, %c0_i32_0 : i32, i32
  }
  func.func @transform_16(%arg0: i32) -> (i32, i32, i32) {
    %c0_i32 = arith.constant 0 : i32
    %c0_i32_0 = arith.constant 0 : i32
    %c0_i32_1 = arith.constant 0 : i32
    return %arg0, %c0_i32, %c0_i32_0 : i32, i32, i32
  }
}

module attributes {stable_mosaic.version = 11 : i64} {
  func.func @_final_kernel(%arg0: i32, %arg1: memref<1x16x32xf32, #tpu.memory_space<vmem>>, %arg2: memref<1x16x1xf32, #tpu.memory_space<vmem>>, %arg3: memref<3x32x32xbf16, #tpu.memory_space<vmem>>, %arg4: memref<1x32xf32, #tpu.memory_space<vmem>>, %arg5: memref<1x32xf32, #tpu.memory_space<vmem>>, %arg6: memref<1x32xf32, #tpu.memory_space<vmem>>, %arg7: memref<32x32xf32, #tpu.memory_space<vmem>>, %arg8: memref<32x8xbf16, #tpu.memory_space<vmem>>, %arg9: memref<1x8xf32, #tpu.memory_space<vmem>>, %arg10: memref<1x16x8xf32, #tpu.memory_space<vmem>>, %arg11: memref<18x32xf32, #tpu.memory_space<vmem>>) attributes {dimension_semantics = [#tpu.dimension_semantics<parallel>], iteration_bounds = array<i64: 2>, scalar_prefetch = 0 : i64, scratch_operands = 1 : i64, tpu.core_type = #tpu.core_type<tc>, window_params = [{transform_indices = @transform_0, window_bounds = array<i64: 1, 16, 32>}, {transform_indices = @transform_1, window_bounds = array<i64: 1, 16, 1>}, {pipeline_mode = #tpu.pipeline_mode<synchronous>, transform_indices = @transform_2, window_bounds = array<i64: 3, 32, 32>}, {pipeline_mode = #tpu.pipeline_mode<synchronous>, transform_indices = @transform_3, window_bounds = array<i64: 1, 32>}, {pipeline_mode = #tpu.pipeline_mode<synchronous>, transform_indices = @transform_4, window_bounds = array<i64: 1, 32>}, {pipeline_mode = #tpu.pipeline_mode<synchronous>, transform_indices = @transform_5, window_bounds = array<i64: 1, 32>}, {pipeline_mode = #tpu.pipeline_mode<synchronous>, transform_indices = @transform_6, window_bounds = array<i64: 32, 32>}, {pipeline_mode = #tpu.pipeline_mode<synchronous>, transform_indices = @transform_7, window_bounds = array<i64: 32, 8>}, {pipeline_mode = #tpu.pipeline_mode<synchronous>, transform_indices = @transform_8, window_bounds = array<i64: 1, 8>}, {transform_indices = @transform_9, window_bounds = array<i64: 1, 16, 8>}]} {
    %c0 = arith.constant 0 : index
    %c0_0 = arith.constant 0 : index
    %c0_1 = arith.constant 0 : index
    %0 = vector.load %arg2[%c0, %c0_0, %c0_1] : memref<1x16x1xf32, #tpu.memory_space<vmem>>, vector<1x16x1xf32>
    %1 = vector.shape_cast %0 : vector<1x16x1xf32> to vector<16x1xf32>
    %c0_2 = arith.constant 0 : index
    %c0_3 = arith.constant 0 : index
    %c0_4 = arith.constant 0 : index
    %2 = vector.load %arg1[%c0_2, %c0_3, %c0_4] : memref<1x16x32xf32, #tpu.memory_space<vmem>>, vector<1x16x32xf32>
    %3 = vector.shape_cast %2 : vector<1x16x32xf32> to vector<16x32xf32>
    %4 = vector.broadcast %1 : vector<16x1xf32> to vector<16x32xf32>
    %5 = arith.mulf %3, %4 : vector<16x32xf32>
    %cst = arith.constant 0.000000e+00 : f32
    %6 = vector.broadcast %cst : f32 to vector<18x32xf32>
    %c0_5 = arith.constant 0 : index
    %c0_6 = arith.constant 0 : index
    %7 = vector.load %arg11[%c0_5, %c0_6] : memref<18x32xf32, #tpu.memory_space<vmem>>, vector<18x32xf32>
    tpu.vector_store %arg11[%c0_5, %c0_6], %6 {strides = array<i32>} : memref<18x32xf32, #tpu.memory_space<vmem>>, vector<18x32xf32>,
    %c1 = arith.constant 1 : index
    %c0_7 = arith.constant 0 : index
    %8 = vector.load %arg11[%c1, %c0_7] : memref<18x32xf32, #tpu.memory_space<vmem>>, vector<16x32xf32>
    tpu.vector_store %arg11[%c1, %c0_7], %5 {strides = array<i32>} : memref<18x32xf32, #tpu.memory_space<vmem>>, vector<16x32xf32>,
    %c0_8 = arith.constant 0 : index
    %c0_9 = arith.constant 0 : index
    %9 = vector.load %arg11[%c0_8, %c0_9] : memref<18x32xf32, #tpu.memory_space<vmem>>, vector<16x32xf32>
    %10 = arith.truncf %9 : vector<16x32xf32> to vector<16x32xbf16>
    %c0_10 = arith.constant 0 : index
    %c0_11 = arith.constant 0 : index
    %c0_12 = arith.constant 0 : index
    %11 = vector.load %arg3[%c0_10, %c0_11, %c0_12] : memref<3x32x32xbf16, #tpu.memory_space<vmem>>, vector<1x32x32xbf16>
    %12 = vector.shape_cast %11 : vector<1x32x32xbf16> to vector<32x32xbf16>
    %cst_13 = arith.constant dense<0.000000e+00> : vector<16x32xf32>
    %13 = tpu.matmul %10, %12, %cst_13 {dimension_numbers = #tpu.dot_dimension_numbers<[1], [0], [0], [1], [0, 0, 1, 1], [], []>} : vector<16x32xbf16>, vector<32x32xbf16>, vector<16x32xf32> -> vector<16x32xf32>
    %c1_14 = arith.constant 1 : index
    %c0_15 = arith.constant 0 : index
    %14 = vector.load %arg11[%c1_14, %c0_15] : memref<18x32xf32, #tpu.memory_space<vmem>>, vector<16x32xf32>
    %15 = arith.truncf %14 : vector<16x32xf32> to vector<16x32xbf16>
    %c1_16 = arith.constant 1 : index
    %c0_17 = arith.constant 0 : index
    %c0_18 = arith.constant 0 : index
    %16 = vector.load %arg3[%c1_16, %c0_17, %c0_18] : memref<3x32x32xbf16, #tpu.memory_space<vmem>>, vector<1x32x32xbf16>
    %17 = vector.shape_cast %16 : vector<1x32x32xbf16> to vector<32x32xbf16>
    %cst_19 = arith.constant dense<0.000000e+00> : vector<16x32xf32>
    %18 = tpu.matmul %15, %17, %cst_19 {dimension_numbers = #tpu.dot_dimension_numbers<[1], [0], [0], [1], [0, 0, 1, 1], [], []>} : vector<16x32xbf16>, vector<32x32xbf16>, vector<16x32xf32> -> vector<16x32xf32>
    %19 = arith.addf %13, %18 : vector<16x32xf32>
    %c2 = arith.constant 2 : index
    %c0_20 = arith.constant 0 : index
    %20 = vector.load %arg11[%c2, %c0_20] : memref<18x32xf32, #tpu.memory_space<vmem>>, vector<16x32xf32>
    %21 = arith.truncf %20 : vector<16x32xf32> to vector<16x32xbf16>
    %c2_21 = arith.constant 2 : index
    %c0_22 = arith.constant 0 : index
    %c0_23 = arith.constant 0 : index
    %22 = vector.load %arg3[%c2_21, %c0_22, %c0_23] : memref<3x32x32xbf16, #tpu.memory_space<vmem>>, vector<1x32x32xbf16>
    %23 = vector.shape_cast %22 : vector<1x32x32xbf16> to vector<32x32xbf16>
    %cst_24 = arith.constant dense<0.000000e+00> : vector<16x32xf32>
    %24 = tpu.matmul %21, %23, %cst_24 {dimension_numbers = #tpu.dot_dimension_numbers<[1], [0], [0], [1], [0, 0, 1, 1], [], []>} : vector<16x32xbf16>, vector<32x32xbf16>, vector<16x32xf32> -> vector<16x32xf32>
    %25 = arith.addf %19, %24 : vector<16x32xf32>
    %c0_25 = arith.constant 0 : index
    %c0_26 = arith.constant 0 : index
    %26 = vector.load %arg4[%c0_25, %c0_26] : memref<1x32xf32, #tpu.memory_space<vmem>>, vector<1x32xf32>
    %27 = vector.broadcast %26 : vector<1x32xf32> to vector<16x32xf32>
    %28 = arith.addf %25, %27 : vector<16x32xf32>
    %c0_27 = arith.constant 0 : index
    %c0_28 = arith.constant 0 : index
    %29 = vector.load %arg7[%c0_27, %c0_28] : memref<32x32xf32, #tpu.memory_space<vmem>>, vector<32x32xf32>
    %c0_29 = arith.constant 0 : index
    %c0_30 = arith.constant 0 : index
    %30 = vector.load %arg5[%c0_29, %c0_30] : memref<1x32xf32, #tpu.memory_space<vmem>>, vector<1x32xf32>
    %c0_31 = arith.constant 0 : index
    %c0_32 = arith.constant 0 : index
    %31 = vector.load %arg6[%c0_31, %c0_32] : memref<1x32xf32, #tpu.memory_space<vmem>>, vector<1x32xf32>
    %cst_33 = arith.constant dense<0.000000e+00> : vector<32xf32>
    %32 = vector.multi_reduction <add>, %28, %cst_33 [0] : vector<16x32xf32> to vector<32xf32>
    %33 = vector.shape_cast %32 : vector<32xf32> to vector<1x32xf32>
    %cst_34 = arith.constant 1.600000e+01 : f32
    %34 = vector.broadcast %cst_34 : f32 to vector<1x32xf32>
    %35 = arith.divf %33, %34 : vector<1x32xf32>
    %36 = arith.mulf %28, %28 : vector<16x32xf32>
    %cst_35 = arith.constant dense<0.000000e+00> : vector<32xf32>
    %37 = vector.multi_reduction <add>, %36, %cst_35 [0] : vector<16x32xf32> to vector<32xf32>
    %38 = vector.shape_cast %37 : vector<32xf32> to vector<1x32xf32>
    %cst_36 = arith.constant 1.600000e+01 : f32
    %39 = vector.broadcast %cst_36 : f32 to vector<1x32xf32>
    %40 = arith.divf %38, %39 : vector<1x32xf32>
    %cst_37 = arith.constant dense<0.000000e+00> : vector<1x32xf32>
    %41 = tpu.matmul %35, %29, %cst_37 {dimension_numbers = #tpu.dot_dimension_numbers<[1], [0], [0], [1], [0, 0, 1, 1], [], []>} : vector<1x32xf32>, vector<32x32xf32>, vector<1x32xf32> -> vector<1x32xf32>
    %cst_38 = arith.constant dense<0.000000e+00> : vector<1x32xf32>
    %42 = tpu.matmul %40, %29, %cst_38 {dimension_numbers = #tpu.dot_dimension_numbers<[1], [0], [0], [1], [0, 0, 1, 1], [], []>} : vector<1x32xf32>, vector<32x32xf32>, vector<1x32xf32> -> vector<1x32xf32>
    %43 = arith.mulf %41, %41 : vector<1x32xf32>
    %44 = arith.subf %42, %43 : vector<1x32xf32>
    %45 = vector.broadcast %41 : vector<1x32xf32> to vector<16x32xf32>
    %46 = arith.subf %28, %45 : vector<16x32xf32>
    %cst_39 = arith.constant 9.99999974E-6 : f32
    %47 = vector.broadcast %cst_39 : f32 to vector<1x32xf32>
    %48 = arith.addf %44, %47 : vector<1x32xf32>
    %49 = math.rsqrt %48 : vector<1x32xf32>
    %50 = vector.broadcast %49 : vector<1x32xf32> to vector<16x32xf32>
    %51 = arith.mulf %46, %50 : vector<16x32xf32>
    %52 = vector.broadcast %30 : vector<1x32xf32> to vector<16x32xf32>
    %53 = arith.mulf %51, %52 : vector<16x32xf32>
    %54 = vector.broadcast %31 : vector<1x32xf32> to vector<16x32xf32>
    %55 = arith.addf %53, %54 : vector<16x32xf32>
    %cst_40 = arith.constant 3.000000e+01 : f32
    %56 = vector.broadcast %cst_40 : f32 to vector<16x32xf32>
    %57 = arith.minimumf %55, %56 : vector<16x32xf32>
    %58 = math.exp %57 : vector<16x32xf32>
    %cst_41 = arith.constant 2.000000e+00 : f32
    %59 = vector.broadcast %cst_41 : f32 to vector<16x32xf32>
    %60 = arith.addf %58, %59 : vector<16x32xf32>
    %61 = arith.mulf %58, %60 : vector<16x32xf32>
    %62 = arith.mulf %55, %61 : vector<16x32xf32>
    %cst_42 = arith.constant 2.000000e+00 : f32
    %63 = vector.broadcast %cst_42 : f32 to vector<16x32xf32>
    %64 = arith.addf %61, %63 : vector<16x32xf32>
    %65 = arith.divf %62, %64 : vector<16x32xf32>
    %66 = vector.broadcast %1 : vector<16x1xf32> to vector<16x32xf32>
    %67 = arith.mulf %65, %66 : vector<16x32xf32>
    %68 = arith.truncf %67 : vector<16x32xf32> to vector<16x32xbf16>
    %c0_43 = arith.constant 0 : index
    %c0_44 = arith.constant 0 : index
    %69 = vector.load %arg8[%c0_43, %c0_44] : memref<32x8xbf16, #tpu.memory_space<vmem>>, vector<32x8xbf16>
    %cst_45 = arith.constant dense<0.000000e+00> : vector<16x8xf32>
    %70 = tpu.matmul %68, %69, %cst_45 {dimension_numbers = #tpu.dot_dimension_numbers<[1], [0], [0], [1], [0, 0, 1, 1], [], []>} : vector<16x32xbf16>, vector<32x8xbf16>, vector<16x8xf32> -> vector<16x8xf32>
    %c0_46 = arith.constant 0 : index
    %c0_47 = arith.constant 0 : index
    %71 = vector.load %arg9[%c0_46, %c0_47] : memref<1x8xf32, #tpu.memory_space<vmem>>, vector<1x8xf32>
    %72 = vector.broadcast %71 : vector<1x8xf32> to vector<16x8xf32>
    %73 = arith.addf %70, %72 : vector<16x8xf32>
    %74 = vector.broadcast %1 : vector<16x1xf32> to vector<16x8xf32>
    %75 = arith.mulf %73, %74 : vector<16x8xf32>
    %c0_48 = arith.constant 0 : index
    %c0_49 = arith.constant 0 : index
    %c0_50 = arith.constant 0 : index
    %76 = vector.load %arg10[%c0_48, %c0_49, %c0_50] : memref<1x16x8xf32, #tpu.memory_space<vmem>>, vector<1x16x8xf32>
    %77 = vector.shape_cast %76 : vector<1x16x8xf32> to vector<16x8xf32>
    %78 = vector.shape_cast %75 : vector<16x8xf32> to vector<1x16x8xf32>
    tpu.vector_store %arg10[%c0_48, %c0_49, %c0_50], %78 {strides = array<i32>} : memref<1x16x8xf32, #tpu.memory_space<vmem>>, vector<1x16x8xf32>,
    return
  }
  func.func @transform_0(%arg0: i32) -> (i32, i32, i32) {
    %c0_i32 = arith.constant 0 : i32
    %c0_i32_0 = arith.constant 0 : i32
    %c0_i32_1 = arith.constant 0 : i32
    return %arg0, %c0_i32, %c0_i32_0 : i32, i32, i32
  }
  func.func @transform_1(%arg0: i32) -> (i32, i32, i32) {
    %c0_i32 = arith.constant 0 : i32
    %c0_i32_0 = arith.constant 0 : i32
    %c0_i32_1 = arith.constant 0 : i32
    return %arg0, %c0_i32, %c0_i32_0 : i32, i32, i32
  }
  func.func @transform_2(%arg0: i32) -> (i32, i32, i32) {
    %c0_i32 = arith.constant 0 : i32
    %c0_i32_0 = arith.constant 0 : i32
    %c0_i32_1 = arith.constant 0 : i32
    %c0_i32_2 = arith.constant 0 : i32
    return %c0_i32, %c0_i32_0, %c0_i32_1 : i32, i32, i32
  }
  func.func @transform_3(%arg0: i32) -> (i32, i32) {
    %c0_i32 = arith.constant 0 : i32
    %c0_i32_0 = arith.constant 0 : i32
    %c0_i32_1 = arith.constant 0 : i32
    return %c0_i32, %c0_i32_0 : i32, i32
  }
  func.func @transform_4(%arg0: i32) -> (i32, i32) {
    %c0_i32 = arith.constant 0 : i32
    %c0_i32_0 = arith.constant 0 : i32
    %c0_i32_1 = arith.constant 0 : i32
    return %c0_i32, %c0_i32_0 : i32, i32
  }
  func.func @transform_5(%arg0: i32) -> (i32, i32) {
    %c0_i32 = arith.constant 0 : i32
    %c0_i32_0 = arith.constant 0 : i32
    %c0_i32_1 = arith.constant 0 : i32
    return %c0_i32, %c0_i32_0 : i32, i32
  }
  func.func @transform_6(%arg0: i32) -> (i32, i32) {
    %c0_i32 = arith.constant 0 : i32
    %c0_i32_0 = arith.constant 0 : i32
    %c0_i32_1 = arith.constant 0 : i32
    return %c0_i32, %c0_i32_0 : i32, i32
  }
  func.func @transform_7(%arg0: i32) -> (i32, i32) {
    %c0_i32 = arith.constant 0 : i32
    %c0_i32_0 = arith.constant 0 : i32
    %c0_i32_1 = arith.constant 0 : i32
    return %c0_i32, %c0_i32_0 : i32, i32
  }
  func.func @transform_8(%arg0: i32) -> (i32, i32) {
    %c0_i32 = arith.constant 0 : i32
    %c0_i32_0 = arith.constant 0 : i32
    %c0_i32_1 = arith.constant 0 : i32
    return %c0_i32, %c0_i32_0 : i32, i32
  }
  func.func @transform_9(%arg0: i32) -> (i32, i32, i32) {
    %c0_i32 = arith.constant 0 : i32
    %c0_i32_0 = arith.constant 0 : i32
    %c0_i32_1 = arith.constant 0 : i32
    return %arg0, %c0_i32, %c0_i32_0 : i32, i32, i32
  }
}

</mosaic_0001>

<bundles_post_ra>
// kernel: conditional_decoder_forward.19
= control target key start
LH: loop header
LB: loop body
LE: loop exit
PB: predicated region body
PF: predicated region fallthrough
CT: control target
= control target key end

     0   :  { %s634_s15 = smov 0   ;;  %s692_s0 = inlined_call_operand.vmem [shape: f32[2,16,32], index: 0, kind: input, shape index: {}]   ;;  %s693_s1 = inlined_call_operand.vmem [shape: f32[2,16,1], index: 1, kind: input, shape index: {}]   ;;  %s694_s2 = inlined_call_operand.vmem [shape: bf16[3,32,32], index: 2, kind: input, shape index: {}]   ;;  %s695_s3 = inlined_call_operand.vmem [shape: f32[1,32], index: 3, kind: input, shape index: {}]   ;;  %s696_s4 = inlined_call_operand.vmem [shape: f32[2,16,32], index: 4, kind: output, shape index: {}]  }
   0x1 LB: > { %s513_s16 = sadd.s32 4294967295, %s604_s15   ;;  %p517_p0 = scmp.ge.s32.totalorder %s604_s15, 1  ;;  %s604_s15 = sphi %s634_s15, %s14_s15  }
   0x2   : > { %p172_p1 = scmp.lt.s32.totalorder %s604_s15, 3 }
   0x4   : > { %p173_p2 = pnand %p517_p0, %p172_p1 }
   0x5   : > { %p203_p3 = scmp.lt.s32.totalorder (!%p173_p2), %s513_s16, 1  ;;  %vm235_vm0 = vcmask (!%p173_p2), 261120   ;;  %v606_v0 = vmov (!%p173_p2), 0   ;;  %v607_v1 = vmov (!%p173_p2), 0.0   ;;  %vm238_vm1 = vcmask (!%p173_p2), 254976   ;;  %v592_v4 = vld [vmem:[%s694_s2 + $0x10] sm:$0xff] (!%p173_p2)  }
   0x6   : > { %176 = sbr.rel (%p173_p2) target bundleno = 388 (0x184), region = 36  ;;  %591 = vset.pattern.permute.xlu0 (!%p173_p2), %v606_v0  ;;  %236 = vst.msk [vmem:[#allocation2] sm:$0xff] (!%p173_p2), %vm235_vm0, %v607_v1  ;;  %237 = vst.msk [vmem:[#allocation2 + $0x8] sm:$0xff] (!%p173_p2), %vm235_vm0, %v607_v1  ;;  %556 = vmatprep.subr.bf16.mxu0 (!%p173_p2), %v607_v1  ;;  %v593_v5 = vld [vmem:[%s694_s2] sm:$0xff] (!%p173_p2)   ;;  %vm608_vm2 = vmmov (!%p173_p2), 0   ;;  %v594_v6 = vld [vmem:[%s694_s2 + $0x18] sm:$0xff] (!%p173_p2)  }
   0x7   : > { %564 = vmatprep.subr.bf16.mxu1 (!%p173_p2), %v607_v1  ;;  %239 = vst.msk [vmem:[#allocation2 + $0x10] sm:$0x3] (!%p173_p2), %vm238_vm1, %v607_v1  ;;  %560 = vmatprep.mubr.msk.bf16.mxu0 (!%p173_p2), %vm608_vm2, %v607_v1  ;;  %v595_v7 = vld [vmem:[%s694_s2 + $0x8] sm:$0xff] (!%p173_p2)   ;;  %v596_v15 = vld [vmem:[%s694_s2 + $0x20] sm:$0xff] (!%p173_p2)  }
   0x8   : > { %568 = vmatprep.mubr.msk.bf16.mxu1 (!%p173_p2), %vm608_vm2, %v607_v1  ;;  %557 = vmatpush3.bf16.msra.mxu0 (!%p173_p2), %v592_v4  ;;  %v597_v21 = vld [vmem:[%s694_s2 + $0x28] sm:$0xff] (!%p173_p2)   ;;  %v541_v36 = vld [vmem:[%s695_s3] ss:$0 sm:$0xff] (!%p173_p2) }
   0x9   : > { %565 = vmatpush3.bf16.msra.mxu1 (!%p173_p2), %v593_v5  ;;  %558 = vmatprep.subr.bf16.mxu0 (!%p173_p2), %v607_v1 }
   0xa   : > { %566 = vmatprep.subr.bf16.mxu1 (!%p173_p2), %v607_v1 }
   0xc   : > { %559 = vmatpush3.bf16.msra.mxu0 (!%p173_p2), %v594_v6 }
   0xd   : > { %s698_s16 = smov (!%p203_p3, %s513_s16), 1  ;;  %567 = vmatpush3.bf16.msra.mxu1 %v595_v7  ;;  %572 = vmatprep.subr.bf16.mxu0 %v607_v1 }
   0xe   : > { %s644_s17 = sshll.u32 %s698_s16, 4 }
   0xf   : > { %s212_s20 = scalar_lea.vmem %s693_s1, %s644_s17  ;;  %s207_s5 = scalar_lea.vmem %s692_s0, %s644_s17 }
  0x10   : > { %v221_v2 = vld [vmem:[%s212_s20] sm:$0xff]  ;;  %v222_v3 = vld [vmem:[%s212_s20 + $0x8] sm:$0xff]  ;;  %s217_s14 = scalar_lea.vmem %s696_s4, %s644_s17 }
  0x11   : > { %225 = vperm.xlu0 %591, %v221_v2   ;;  %v219_v8 = vld [vmem:[%s207_s5] sm:$0xff]  ;;  %v220_v11 = vld [vmem:[%s207_s5 + $0x8] sm:$0xff] }
  0x15   : > { %230 = vperm.xlu0 %591, %v222_v3  }
  0x90   : > { %v226_v9 = vpop.permute.xlu0 %225 }
  0x91   : > { %v233_v10 = vmul.f32 %v226_v9, %v219_v8 }
  0x93   : > { %240 = vst.msk [vmem:[#allocation2 + $0x1] sm:$0xff] %vm235_vm0, %v233_v10 }
  0x94   : > { %v231_v12 = vpop.permute.xlu0 %230 }
  0x95   : > { %v234_v13 = vmul.f32 %v231_v12, %v220_v11 }
  0x97   : > { %241 = vst.msk [vmem:[#allocation2 + $0x9] sm:$0xff] %vm235_vm0, %v234_v13 }
  0x9a   : > { %v249_v14 = vld [vmem:[#allocation2 + $0x1] sm:$0xff] }
  0x9b   : > { %v242_v17 = vld [vmem:[#allocation2] sm:$0xff] }
  0x9e   : > { %v250_v16 = vld [vmem:[#allocation2 + $0x9] sm:$0xff] }
  0x9f   : > { %v243_v18 = vld [vmem:[#allocation2 + $0x8] sm:$0xff]  ;;  %v251_v19 = vpack.c.bf16 %v250_v16, %v249_v14 }
  0xa0   : > { %v244_v20 = vpack.c.bf16 %v243_v18, %v242_v17  ;;  %v369_v22 = vld [vmem:[#allocation2 + $0x2] sm:$0xff]  ;;  %v370_v23 = vld [vmem:[#allocation2 + $0xa] sm:$0xff] }
  0xa1   : > { %561 = vmatmul.mubr.msk.bf16.vlgmr.msra.gmra.mrb[0].mxu0 %vm235_vm0, %v251_v19  ;;  %v371_v24 = vpack.c.bf16 %v370_v23, %v369_v22 }
  0xa2   : > { %569 = vmatmul.mubr.msk.bf16.vlgmr.msra.gmra.mrb[0].mxu1 %vm235_vm0, %v244_v20  ;;  %573 = vmatpush3.bf16.msra.mxu0 %v596_v15 }
  0xa3   : > { %576 = vmatprep.mubr.msk.bf16.mxu0 %vm608_vm2, %v607_v1  ;;  %574 = vmatprep.subr.bf16.mxu0 %v607_v1 }
  0xa6   : > { %575 = vmatpush3.bf16.msra.mxu0 %v597_v21 }
  0xa9   : > { %577 = vmatmul.mubr.msk.bf16.vlgmr.msra.gmra.mrb[4].mxu0 %vm235_vm0, %v371_v24 }
 0x174   : > { %v306_v25 = vpop.f32.mrb[0].mxu0 }
 0x175   : > { %v362_v26 = vpop.f32.mrb[0].mxu1  ;;  %v562_v28 = vpop.f32.mrb[1].mxu0 }
 0x176   : > { %v363_v27 = vadd.f32 %v362_v26, %v306_v25  ;;  %v570_v29 = vpop.f32.mrb[1].mxu1  ;;  %v309_v30 = vpop.f32.mrb[2].mxu0 }
 0x177   : > { %v365_v31 = vpop.f32.mrb[2].mxu1  ;;  %v563_v33 = vpop.f32.mrb[3].mxu0 }
 0x178   : > { %v366_v32 = vadd.f32 %v365_v31, %v309_v30  ;;  %v571_v34 = vpop.f32.mrb[3].mxu1 }
 0x17c   : > { %v426_v35 = vpop.f32.mrb[4].mxu0 }
 0x17d   : > { %v433_v37 = vadd.f32 %v426_v35, %v363_v27  ;;  %v578_v38 = vpop.f32.mrb[5].mxu0 }
 0x17e   : > { %v429_v39 = vpop.f32.mrb[6].mxu0 }
 0x17f   : > { %v442_v40 = vadd.f32 %v541_v36, %v433_v37  ;;  %v434_v41 = vadd.f32 %v429_v39, %v366_v32  ;;  %v579_v42 = vpop.f32.mrb[7].mxu0 }
 0x181   : > { %444 = vst.msk [vmem:[%s217_s14] sm:$0xff] %vm235_vm0, %v442_v40  ;;  %v443_v43 = vadd.f32 %v541_v36, %v434_v41 }
 0x183   : > { %445 = vst.msk [vmem:[%s217_s14 + $0x8] sm:$0xff] %vm235_vm0, %v443_v43 }
 0x184 PF: > { %s14_s15 = sadd.s32 1, %s604_s15  }
 0x185   : > { %p11_p4 = scmp.ge.s32.totalorder %s14_s15, 4  }
 0x187   :  { %13 = sbr.rel (!%p11_p4) target bundleno = 1 (0x1), region = 71 }

// kernel: conditional_decoder_forward.16
= control target key start
LH: loop header
LB: loop body
LE: loop exit
PB: predicated region body
PF: predicated region fallthrough
CT: control target
= control target key end

     0   :  { %v295_v0 = vmov 0.0   ;;  %vm46_vm0 = vcmask 1043456   ;;  %vm296_vm1 = vmmov 0   ;;  %vm42_vm2 = vcmask 195584   ;;  %s369_s1 = inlined_call_operand.vmem [shape: bf16[24,128], index: 1, kind: input, shape index: {}]   ;;  %s370_s0 = inlined_call_operand.vmem [shape: f32[2,24], index: 0, kind: input, shape index: {}]   ;;  %s371_s3 = inlined_call_operand.vmem [shape: bf16[128,128], index: 3, kind: input, shape index: {}]   ;;  %s372_s2 = inlined_call_operand.vmem [shape: f32[1,128], index: 2, kind: input, shape index: {}, may-alias: {2,4}]   ;;  %s373_s4 = inlined_call_operand.vmem [shape: f32[1,128], index: 4, kind: input, shape index: {}, may-alias: {2,4}]   ;;  %s374_s5 = inlined_call_operand.vmem [shape: f32[2,128], index: 5, kind: output, shape index: {}]  }
   0x1   :  { %247 = vmatprep.subr.bf16.mxu0 %v295_v0  ;;  %v277_v1 = vld [vmem:[%s369_s1] sm:$0xff]   ;;  %251 = vmatprep.mubr.msk.bf16.mxu0 %vm296_vm1, %v295_v0  ;;  %v278_v2 = vld [vmem:[%s369_s1 + $0x8] ss:$0 sps:$4 sm:$0xff]   ;;  %v281_v8 = vld [vmem:[%s371_s3 + $0x10] sm:$0xff]  }
   0x2   :  { %255 = vmatprep.subr.bf16.mxu1 %v295_v0  ;;  %271 = vmatprep.mubr.msk.bf16.mxu1 %vm296_vm1, %v295_v0  ;;  %v21_v3 = vld [vmem:[%s370_s0] sm:$0x3]  ;;  %v48_v4 = vsel %vm46_vm0, %v278_v2, 0  ;;  %v280_v7 = vld [vmem:[%s371_s3 + $0x8] sm:$0xff]   ;;  %v282_v9 = vld [vmem:[%s371_s3 + $0x18] sm:$0xff]  }
   0x3   :  { %248 = vmatpush3.bf16.msra.mxu0 %v277_v1  ;;  %v22_v5 = vpack.c.bf16 %v21_v3, %v21_v3  ;;  %v279_v6 = vld [vmem:[%s371_s3] sm:$0xff]   ;;  %v284_v11 = vld [vmem:[%s371_s3 + $0x28] sm:$0xff]   ;;  %v285_v12 = vld [vmem:[%s371_s3 + $0x30] sm:$0xff]  }
   0x4   :  { %249 = vmatprep.subr.bf16.mxu0 %v295_v0  ;;  %256 = vmatpush3.bf16.msra.mxu1 %v279_v6  ;;  %v283_v10 = vld [vmem:[%s371_s3 + $0x20] sm:$0xff]   ;;  %v286_v13 = vld [vmem:[%s371_s3 + $0x38] sm:$0xff]  }
   0x5   :  { %257 = vmatprep.subr.bf16.mxu1 %v295_v0  ;;  %v222_v14 = vld [vmem:[%s372_s2] ss:$0 sm:$0xff] }
   0x6   :  { %v226_v27 = vld [vmem:[%s373_s4] ss:$0 sm:$0xff] }
   0x7   :  { %250 = vmatpush3.bf16.msra.mxu0 %v48_v4 }
   0x8   :  { %258 = vmatpush3.bf16.msra.mxu1 %v280_v7 }
   0x9   :  { %259 = vmatprep.subr.bf16.mxu1 %v295_v0 }
   0xa   :  { %252 = vmatmul.mubr.msk.bf16.vlgmr.msra.gmra.mrb[0].mxu0 %vm42_vm2, %v22_v5 }
   0xc   :  { %260 = vmatpush3.bf16.msra.mxu1 %v281_v8 }
   0xd   :  { %261 = vmatprep.subr.bf16.mxu1 %v295_v0 }
  0x10   :  { %262 = vmatpush3.bf16.msra.mxu1 %v282_v9 }
  0x11   :  { %263 = vmatprep.subr.bf16.mxu1 %v295_v0 }
  0x14   :  { %264 = vmatpush3.bf16.msra.mxu1 %v283_v10 }
  0x15   :  { %265 = vmatprep.subr.bf16.mxu1 %v295_v0 }
  0x18   :  { %266 = vmatpush3.bf16.msra.mxu1 %v284_v11 }
  0x19   :  { %267 = vmatprep.subr.bf16.mxu1 %v295_v0 }
  0x1c   :  { %268 = vmatpush3.bf16.msra.mxu1 %v285_v12 }
  0x1d   :  { %269 = vmatprep.subr.bf16.mxu1 %v295_v0 }
  0x20   :  { %270 = vmatpush3.bf16.msra.mxu1 %v286_v13 }
  0xdd   :  { %v84_v15 = vpop.f32.mrb[0].mxu0 }
  0xde   :  { %v85_v16 = vadd.f32 %v222_v14, %v84_v15  ;;  %v253_v17 = vpop.f32.mrb[1].mxu0 }
  0xdf   :  { %v87_v18 = vpop.f32.mrb[2].mxu0 }
  0xe0   :  { %v90_v19 = vsub.f32 0.0, %v85_v16  ;;  %v254_v20 = vpop.f32.mrb[3].mxu0 }
  0xe2   :  { %v91_v21 = vmul.f32 1.442695, %v90_v19 }
  0xe4   :  { %287 = vpow2.f32 %v91_v21 }
  0xee   :  { %v288_v22 = vpop.eup %287 }
  0xef   :  { %v93_v23 = vadd.f32 1.0, %v288_v22 }
  0xf1   :  { %289 = vrcp.f32 %v93_v23 }
  0xfb   :  { %v290_v24 = vpop.eup %289 }
  0xfc   :  { %v95_v25 = vmul.f32 %v290_v24, %v85_v16 }
  0xfe   :  { %v96_v26 = vpack.c.bf16 %v95_v25, %v95_v25 }
 0x100   :  { %272 = vmatmul.mubr.bf16.vlgmr.msra.gmra.mrb[0].mxu1 %v96_v26 }
 0x1d3   :  { %v202_v28 = vpop.f32.mrb[0].mxu1 }
 0x1d4   :  { %v203_v29 = vadd.f32 %v226_v27, %v202_v28  ;;  %v273_v30 = vpop.f32.mrb[1].mxu1 }
 0x1d5   :  { %v205_v31 = vpop.f32.mrb[2].mxu1 }
 0x1d6   :  { %v208_v32 = vmin.f32 %v203_v29, 30.0  ;;  %v274_v33 = vpop.f32.mrb[3].mxu1 }
 0x1d8   :  { %v209_v34 = vmul.f32 1.442695, %v208_v32 }
 0x1da   :  { %291 = vpow2.f32 %v209_v34 }
 0x1e4   :  { %v292_v35 = vpop.eup %291 }
 0x1e5   :  { %v211_v36 = vadd.f32 2.0, %v292_v35 }
 0x1e7   :  { %v212_v37 = vmul.f32 %v292_v35, %v211_v36 }
 0x1e9   :  { %v214_v38 = vadd.f32 2.0, %v212_v37  ;;  %v213_v39 = vmul.f32 %v212_v37, %v203_v29 }
 0x1eb   :  { %293 = vrcp.f32 %v214_v38 }
 0x1f5   :  { %v294_v40 = vpop.eup %293 }
 0x1f6   :  { %v216_v41 = vmul.f32 %v294_v40, %v213_v39 }
 0x1f8   :  { %217 = vst [vmem:[%s374_s5] sm:$0x3] %v216_v41 }

// kernel: conditional_decoder_forward.18
= control target key start
LH: loop header
LB: loop body
LE: loop exit
PB: predicated region body
PF: predicated region fallthrough
CT: control target
= control target key end

     0   :  { %s2359_s27 = smov 0   ;;  %s2692_s0 = inlined_call_operand.vmem [shape: f32[2,16,32], index: 0, kind: input, shape index: {}]   ;;  %s2693_s1 = inlined_call_operand.vmem [shape: f32[2,16,1], index: 1, kind: input, shape index: {}]   ;;  %s2694_s2 = inlined_call_operand.vmem [shape: f32[2,1,16], index: 2, kind: input, shape index: {}]   ;;  %s2695_s3 = inlined_call_operand.vmem [shape: f32[1,32], index: 3, kind: input, shape index: {}, may-alias: {3,10}]   ;;  %s2696_s4 = inlined_call_operand.vmem [shape: f32[1,32], index: 4, kind: input, shape index: {}, may-alias: {4,9,11,17}]   ;;  %s2697_s5 = inlined_call_operand.vmem [shape: bf16[2,32,16], index: 5, kind: input, shape index: {}]   ;;  %s2698_s6 = inlined_call_operand.vmem [shape: bf16[2,32,16], index: 6, kind: input, shape index: {}]   ;;  %s2699_s7 = inlined_call_operand.vmem [shape: bf16[2,32,16], index: 7, kind: input, shape index: {}]   ;;  %s2700_s8 = inlined_call_operand.vmem [shape: bf16[2,16,32], index: 8, kind: input, shape index: {}]   ;;  %s2701_s9 = inlined_call_operand.vmem [shape: f32[1,32], index: 9, kind: input, shape index: {}, may-alias: {4,9,11,17}]   ;;  %s2702_s10 = inlined_call_operand.vmem [shape: f32[1,32], index: 10, kind: input, shape index: {}, may-alias: {3,10}]   ;;  %s2703_s11 = inlined_call_operand.vmem [shape: f32[1,32], index: 11, kind: input, shape index: {}, may-alias: {4,9,11,17}]   ;;  %s2704_s12 = inlined_call_operand.vmem [shape: bf16[32,128], index: 12, kind: input, shape index: {}]   ;;  %s2705_s13 = inlined_call_operand.vmem [shape: f32[1,128], index: 13, kind: input, shape index: {}]   ;;  %s2706_s14 = inlined_call_operand.vmem [shape: f32[1,128], index: 14, kind: input, shape index: {}, may-alias: {14,15}]   ;;  %s2707_s15 = inlined_call_operand.vmem [shape: f32[1,128], index: 15, kind: input, shape index: {}, may-alias: {14,15}]   ;;  %s2708_s16 = inlined_call_operand.vmem [shape: bf16[128,32], index: 16, kind: input, shape index: {}]   ;;  %s2709_s17 = inlined_call_operand.vmem [shape: f32[1,32], index: 17, kind: input, shape index: {}, may-alias: {4,9,11,17}]   ;;  %s2710_s18 = inlined_call_operand.vmem [shape: f32[2,16,32], index: 18, kind: output, shape index: {}]  }
   0x1   :  { %2711 = sst [smem:[#allocation2_spill]] %s2692_s0 }
   0x2   :  { %2712 = sst [smem:[#allocation3_spill]] %s2693_s1 }
   0x3   :  { %2713 = sst [smem:[#allocation4_spill]] %s2694_s2 }
   0x4 LB: > { %s1925_s28 = sadd.s32 4294967295, %s2253_s27   ;;  %p1929_p0 = scmp.ge.s32.totalorder %s2253_s27, 1  ;;  %s2253_s27 = sphi %s2359_s27, %s28_s27  }
   0x5   : > { %p530_p1 = scmp.lt.s32.totalorder %s2253_s27, 3 }
   0x7   : > { %p531_p2 = pnand %p1929_p0, %p530_p1 }
   0x8   : > { %p592_p3 = scmp.lt.s32.totalorder (!%p531_p2), %s1925_s28, 1  ;;  %vm636_vm0 = vcmask (!%p531_p2), 261120   ;;  %s2714_s19 = sld [smem:[#allocation2_spill]] (!%p531_p2)  ;;  %v2191_v14 = vld [vmem:[%s2697_s5] sm:$0xff] (!%p531_p2)   ;;  %v2255_v15 = vmov (!%p531_p2), 0.0   ;;  %v2192_v16 = vld [vmem:[%s2697_s5 + $0x8] sm:$0xff] (!%p531_p2)  }
   0x9   : > { %534 = sbr.rel (%p531_p2) target bundleno = 3154 (0xc52), region = 92  ;;  %2052 = vmatprep.subr.bf16.mxu0 (!%p531_p2), %v2255_v15  ;;  %2076 = vmatprep.subr.bf16.mxu1 (!%p531_p2), %v2255_v15  ;;  %vm2256_vm1 = vmmov (!%p531_p2), 0   ;;  %v1937_v25 = vld [vmem:[%s2695_s3] ss:$0 sm:$0xff] (!%p531_p2)  ;;  %v2194_v35 = vld [vmem:[%s2698_s6 + $0x8] sm:$0xff] (!%p531_p2)   ;;  %s2715_s25 = sld [smem:[#allocation3_spill]] (!%p531_p2) }
   0xa   : > { %2053 = vmatpush3.bf16.msra.mxu0 (!%p531_p2), %v2191_v14  ;;  %2056 = vmatprep.mubr.msk.bf16.mxu0 (!%p531_p2), %vm2256_vm1, %v2255_v15  ;;  %v1938_v29 = vld [vmem:[%s2696_s4] ss:$0 sm:$0xff] (!%p531_p2)  ;;  %v2196_v37 = vld [vmem:[%s2699_s7 + $0x8] sm:$0xff] (!%p531_p2)   ;;  %v2257_v38 = vmov (!%p531_p2), 0   ;;  %vm859_vm2 = vcmask (!%p531_p2), 130048   ;;  %v2197_v57 = vld [vmem:[%s2697_s5 + $0x10] sm:$0xff] (!%p531_p2)  }
   0xb   : > { %2054 = vmatprep.subr.bf16.mxu0 (!%p531_p2), %v2255_v15  ;;  %2078 = vmatprep.mubr.msk.bf16.mxu1 (!%p531_p2), %vm2256_vm1, %v2255_v15  ;;  %v2193_v33 = vld [vmem:[%s2698_s6] sm:$0xff] (!%p531_p2)   ;;  %v2198_v60 = vld [vmem:[%s2697_s5 + $0x18] sm:$0xff] (!%p531_p2)   ;;  %v2199_v61 = vld [vmem:[%s2699_s7 + $0x10] sm:$0xff] (!%p531_p2)  }
   0xc   : > { %v2195_v36 = vld [vmem:[%s2699_s7] sm:$0xff] (!%p531_p2)   ;;  %2189 = vset.pattern.permute.xlu0 (!%p531_p2), %v2257_v38  ;;  %2190 = vset.pattern.permute.xlu1 (!%p531_p2), %v2257_v38  ;;  %v2200_v62 = vld [vmem:[%s2699_s7 + $0x18] sm:$0xff] (!%p531_p2)  }
   0xe   : > { %2055 = vmatpush3.bf16.msra.mxu0 (!%p531_p2), %v2192_v16 }
   0xf   : > { %2060 = vmatprep.subr.bf16.mxu0 (!%p531_p2), %v2255_v15 }
  0x10   : > { %s2720_s28 = smov (!%p592_p3, %s1925_s28), 1 }
  0x11   : > { %s2370_s29 = sshll.u32 %s2720_s28, 4 }
  0x12   : > { %s596_s1 = scalar_lea.vmem %s2714_s19, %s2370_s29  ;;  %s601_s26 = scalar_lea.vmem %s2715_s25, %s2370_s29 }
  0x13   : > { %v2376_v0 = vld [vmem:[%s596_s1] sm:$0xff]  ;;  %v2378_v1 = vld [vmem:[%s596_s1 + $0x8] sm:$0xff]  ;;  %s2716_s25 = sld [smem:[#allocation4_spill]]  ;;  %s609_s20 = scalar_lea.vmem %s2710_s18, %s2370_s29 }
  0x14   : > { %v637_v2 = vsel %vm636_vm0, %v2376_v0, 0.0  ;;  %v640_v3 = vsel %vm636_vm0, %v2378_v1, 0.0  ;;  %v613_v39 = vld [vmem:[%s601_s26] sm:$0xff]  ;;  %v614_v40 = vld [vmem:[%s601_s26 + $0x8] sm:$0xff] }
  0x15   : > { %638 = vadd.xlane.f32.xlu0 %v637_v2 }
  0x19   : > { %641 = vadd.xlane.f32.xlu0 %v640_v3  ;;  %s604_s26 = scalar_lea.vmem %s2716_s25, %s2720_s28 }
  0x1a   : > { %v1936_v63 = vld [vmem:[%s604_s26] ss:$0 sm:$0xff] }
  0x2f   : > { %618 = vperm.xlu0 %2189, %v613_v39  }
  0xa2   : > { %v639_v4 = vpop.xlane.xlu0 %638 }
  0xa3   : > { %v644_v5 = vmul.f32 0.03125, %v639_v4 }
  0xa5   : > { %v646_v6 = vsub.f32 %v2376_v0, %v644_v5 }
  0xa6   : > { %v642_v7 = vpop.xlane.xlu0 %641 }
  0xa7   : > { %v645_v8 = vmul.f32 0.03125, %v642_v7  ;;  %v648_v9 = vmul.f32 %v646_v6, %v646_v6 }
  0xa9   : > { %v647_v10 = vsub.f32 %v2378_v1, %v645_v8  ;;  %v650_v11 = vsel %vm636_vm0, %v648_v9, 0.0 }
  0xaa   : > { %651 = vadd.xlane.f32.xlu1 %v650_v11 }
  0xab   : > { %v649_v12 = vmul.f32 %v647_v10, %v647_v10 }
  0xad   : > { %v653_v13 = vsel %vm636_vm0, %v649_v12, 0.0 }
  0xae   : > { %654 = vadd.xlane.f32.xlu1 %v653_v13  ;;  %v619_v2 = vpop.permute.xlu0 %618 }
  0xaf   : > { %v2476_v4 = vmul.f32 %v1936_v63, %v619_v2 }
  0xbf   : > { %623 = vperm.xlu1 %2190, %v614_v40  }
 0x137   : > { %v652_v17 = vpop.xlane.xlu1 %651 }
 0x138   : > { %v656_v18 = vmul.f32 0.03125, %v652_v17 }
 0x13a   : > { %v658_v19 = vadd.f32 1e-05, %v656_v18 }
 0x13b   : > { %v655_v20 = vpop.xlane.xlu1 %654 }
 0x13c   : > { %2215 = vrsqrt.f32 %v658_v19  ;;  %v657_v21 = vmul.f32 0.03125, %v655_v20 }
 0x13e   : > { %v659_v22 = vadd.f32 1e-05, %v657_v21 }
 0x13f   : > { %v624_v3 = vpop.permute.xlu1 %623 }
 0x140   : > { %2217 = vrsqrt.f32 %v659_v22  ;;  %v2478_v5 = vmul.f32 %v1936_v63, %v624_v3 }
 0x146   : > { %v2216_v23 = vpop.eup %2215 }
 0x147   : > { %v662_v24 = vmul.f32 %v2216_v23, %v646_v6 }
 0x149   : > { %v670_v27 = vmul.f32 %v1937_v25, %v662_v24 }
 0x14a   : > { %v2218_v26 = vpop.eup %2217 }
 0x14b   : > { %v663_v28 = vmul.f32 %v2218_v26, %v647_v10  ;;  %v678_v31 = vadd.f32 %v1938_v29, %v670_v27 }
 0x14d   : > { %v671_v30 = vmul.f32 %v1937_v25, %v663_v28 }
 0x14f   : > { %v679_v32 = vadd.f32 %v1938_v29, %v671_v30 }
 0x151   : > { %v2411_v34 = vpack.c.bf16 %v679_v32, %v678_v31 }
 0x153   : > { %2057 = vmatmul.mubr.msk.bf16.vlgmr.msra.gmra.mrb[0].mxu0 %vm636_vm0, %v2411_v34 }
 0x154   : > { %2061 = vmatpush3.bf16.msra.mxu0 %v2193_v33  ;;  %2064 = vmatprep.mubr.msk.bf16.mxu0 %vm2256_vm1, %v2255_v15 }
 0x155   : > { %2062 = vmatprep.subr.bf16.mxu0 %v2255_v15 }
 0x158   : > { %2063 = vmatpush3.bf16.msra.mxu0 %v2194_v35 }
 0x159   : > { %2068 = vmatprep.subr.bf16.mxu0 %v2255_v15 }
 0x15b   : > { %2065 = vmatmul.mubr.msk.bf16.vlgmr.msra.gmra.mrb[4].mxu0 %vm636_vm0, %v2411_v34 }
 0x15c   : > { %2069 = vmatpush3.bf16.msra.mxu0 %v2195_v36  ;;  %2072 = vmatprep.mubr.msk.bf16.mxu0 %vm2256_vm1, %v2255_v15 }
 0x15d   : > { %2070 = vmatprep.subr.bf16.mxu0 %v2255_v15 }
 0x160   : > { %2071 = vmatpush3.bf16.msra.mxu0 %v2196_v37 }
 0x161   : > { %2082 = vmatprep.subr.bf16.mxu0 %v2255_v15 }
 0x163   : > { %2073 = vmatmul.mubr.msk.bf16.vlgmr.msra.gmra.mrb[8].mxu0 %vm636_vm0, %v2411_v34 }
 0x164   : > { %2084 = vmatprep.mubr.msk.bf16.mxu0 %vm2256_vm1, %v2255_v15 }
 0x226   : > { %v734_v41 = vpop.f32.mrb[0].mxu0 }
 0x227   : > { %v2058_v42 = vpop.f32.mrb[1].mxu0  ;;  %v741_v44 = vmul.f32 0.25, %v734_v41 }
 0x228   : > { %v737_v43 = vpop.f32.mrb[2].mxu0 }
 0x229   : > { %v742_v45 = vmul.f32 0.25, %v737_v43  ;;  %v2059_v46 = vpop.f32.mrb[3].mxu0 }
 0x22a   : > { %v2202_v46 = vld [vmem:[%s2698_s6 + $0x18] sm:$0xff]  }
 0x22b   : > { %v857_v47 = vpack.c.bf16 %v742_v45, %v741_v44  ;;  %v2201_v44 = vld [vmem:[%s2698_s6 + $0x10] sm:$0xff]  }
 0x22e   : > { %v793_v48 = vpop.f32.mrb[4].mxu0 }
 0x22f   : > { %v2066_v49 = vpop.f32.mrb[5].mxu0 }
 0x230   : > { %v796_v50 = vpop.f32.mrb[6].mxu0 }
 0x231   : > { %v858_v51 = vpack.c.bf16 %v796_v50, %v793_v48  ;;  %v2067_v52 = vpop.f32.mrb[7].mxu0 }
 0x233   : > { %v864_v53 = vsel %vm859_vm2, %v858_v51, 0 }
 0x234   : > { %2077 = vmatpush3.bf16.xpose.msra.mxu1 %v864_v53 }
 0x235   : > { %2088 = vmatprep.subr.bf16.mxu1 %v2255_v15 }
 0x236   : > { %v850_v54 = vpop.f32.mrb[8].mxu0 }
 0x237   : > { %v2074_v55 = vpop.f32.mrb[9].mxu0 }
 0x238   : > { %v853_v56 = vpop.f32.mrb[10].mxu0 }
 0x239   : > { %v932_v58 = vpack.c.bf16 %v853_v56, %v850_v54  ;;  %v2075_v59 = vpop.f32.mrb[11].mxu0 }
 0x23b   : > { %2079 = vmatmul.mubr.msk.bf16.vlgmr.msra.gmra.mrb[0].mxu1 %vm859_vm2, %v857_v47  ;;  %2083 = vmatpush3.bf16.msra.mxu0 %v932_v58 }
 0x23c   : > { %2089 = vmatpush3.bf16.msra.mxu1 %v2197_v57  ;;  %2092 = vmatprep.mubr.msk.bf16.mxu1 %vm2256_vm1, %v2255_v15 }
 0x23d   : > { %2090 = vmatprep.subr.bf16.mxu1 %v2255_v15  ;;  %2096 = vmatprep.subr.bf16.mxu0 %v2255_v15 }
 0x240   : > { %2091 = vmatpush3.bf16.msra.mxu1 %v2198_v60 }
 0x241   : > { %2104 = vmatprep.subr.bf16.mxu1 %v2255_v15 }
 0x243   : > { %2093 = vmatmul.mubr.msk.bf16.vlgmr.msra.gmra.mrb[4].mxu1 %vm636_vm0, %v2411_v34 }
 0x244   : > { %2105 = vmatpush3.bf16.msra.mxu1 %v2199_v61  ;;  %2108 = vmatprep.mubr.msk.bf16.mxu1 %vm2256_vm1, %v2255_v15 }
 0x245   : > { %2106 = vmatprep.subr.bf16.mxu1 %v2255_v15 }
 0x248   : > { %2107 = vmatpush3.bf16.msra.mxu1 %v2200_v62 }
 0x249   : > { %2118 = vmatprep.subr.bf16.mxu1 %v2255_v15 }
 0x24b   : > { %2109 = vmatmul.mubr.msk.bf16.vlgmr.msra.gmra.mrb[8].mxu1 %vm636_vm0, %v2411_v34 }
 0x24c   : > { %2120 = vmatprep.mubr.msk.bf16.mxu1 %vm2256_vm1, %v2255_v15 }
 0x30e   : > { %v900_v6 = vpop.f32.mrb[0].mxu1 }
 0x30f   : > { %v907_v7 = vadd.f32 %v900_v6, %v2476_v4  ;;  %v2080_v8 = vpop.f32.mrb[1].mxu1 }
 0x310   : > { %v903_v9 = vpop.f32.mrb[2].mxu1 }
 0x311   : > { %v908_v10 = vadd.f32 %v903_v9, %v2478_v5  ;;  %v2081_v11 = vpop.f32.mrb[3].mxu1  ;;  %v909_v12 = vsel %vm859_vm2, %v907_v7, -inf }
 0x312   : > { %910 = vmax.xlane.f32.xlu1 %v909_v12 }
 0x313   : > { %v912_v13 = vsel %vm859_vm2, %v908_v10, -inf }
 0x314   : > { %913 = vmax.xlane.f32.xlu0 %v912_v13  ;;  %v2204_v13 = vld [vmem:[%s2700_s8 + $0x8] sm:$0xff]  }
 0x316   : > { %v1031_v14 = vpop.f32.mrb[4].mxu1 }
 0x317   : > { %v2094_v16 = vpop.f32.mrb[5].mxu1  ;;  %v1038_v18 = vmul.f32 0.25, %v1031_v14 }
 0x318   : > { %v1034_v17 = vpop.f32.mrb[6].mxu1 }
 0x319   : > { %v1039_v19 = vmul.f32 0.25, %v1034_v17  ;;  %v2095_v20 = vpop.f32.mrb[7].mxu1 }
 0x31b   : > { %v1156_v21 = vpack.c.bf16 %v1039_v19, %v1038_v18 }
 0x31e   : > { %v1149_v22 = vpop.f32.mrb[8].mxu1 }
 0x31f   : > { %v2110_v23 = vpop.f32.mrb[9].mxu1 }
 0x320   : > { %v1152_v24 = vpop.f32.mrb[10].mxu1 }
 0x321   : > { %v1230_v25 = vpack.c.bf16 %v1152_v24, %v1149_v22  ;;  %v2111_v26 = vpop.f32.mrb[11].mxu1 }
 0x323   : > { %2119 = vmatpush3.bf16.msra.mxu1 %v1230_v25 }
 0x324   : > { %2130 = vmatprep.subr.bf16.mxu1 %v2255_v15 }
 0x39f   : > { %v911_v27 = vpop.xlane.xlu1 %910 }
 0x3a0   : > { %v915_v28 = vsub.f32 %v907_v7, %v911_v27 }
 0x3a1   : > { %v914_v29 = vpop.xlane.xlu0 %913 }
 0x3a2   : > { %v917_v30 = vmul.f32 1.442695, %v915_v28  ;;  %v916_v31 = vsub.f32 %v908_v10, %v914_v29 }
 0x3a4   : > { %2219 = vpow2.f32 %v917_v30  ;;  %v919_v32 = vmul.f32 1.442695, %v916_v31 }
 0x3a6   : > { %2221 = vpow2.f32 %v919_v32 }
 0x3ae   : > { %v2220_v33 = vpop.eup %2219 }
 0x3af   : > { %v921_v35 = vsel %vm859_vm2, %v2220_v33, 0.0 }
 0x3b0   : > { %v2222_v36 = vpop.eup %2221  ;;  %922 = vadd.xlane.f32.xlu1 %v921_v35 }
 0x3b1   : > { %v924_v37 = vsel %vm859_vm2, %v2222_v36, 0.0 }
 0x3b4   : > { %925 = vadd.xlane.f32.xlu1 %v924_v37 }
 0x43d   : > { %v923_v38 = vpop.xlane.xlu1 %922 }
 0x43e   : > { %2223 = vrcp.f32 %v923_v38 }
 0x441   : > { %v926_v39 = vpop.xlane.xlu1 %925 }
 0x442   : > { %2225 = vrcp.f32 %v926_v39 }
 0x448   : > { %v2224_v40 = vpop.eup %2223 }
 0x449   : > { %v928_v42 = vmul.f32 %v2224_v40, %v2220_v33 }
 0x44c   : > { %v2226_v41 = vpop.eup %2225 }
 0x44d   : > { %v930_v43 = vmul.f32 %v2226_v41, %v2222_v36  ;;  %v1979_v36 = vld [vmem:[%s2701_s9] ss:$0 sm:$0xff] }
 0x44f   : > { %v931_v45 = vpack.c.bf16 %v930_v43, %v928_v42 }
 0x451   : > { %2085 = vmatmul.mubr.msk.bf16.vlgmr.msra.gmra.mrb[12].mxu0 %vm859_vm2, %v931_v45 }
 0x452   : > { %2097 = vmatpush3.bf16.msra.mxu0 %v2201_v44  ;;  %2100 = vmatprep.mubr.msk.bf16.mxu0 %vm2256_vm1, %v2255_v15 }
 0x453   : > { %2098 = vmatprep.subr.bf16.mxu0 %v2255_v15 }
 0x456   : > { %2099 = vmatpush3.bf16.msra.mxu0 %v2202_v46 }
 0x457   : > { %2112 = vmatprep.subr.bf16.mxu0 %v2255_v15 }
 0x459   : > { %2101 = vmatmul.mubr.msk.bf16.vlgmr.msra.gmra.mrb[16].mxu0 %vm636_vm0, %v2411_v34 }
 0x45a   : > { %2114 = vmatprep.mubr.msk.bf16.mxu0 %vm2256_vm1, %v2255_v15 }
 0x524   : > { %v970_v47 = vpop.f32.mrb[12].mxu0 }
 0x525   : > { %v2086_v48 = vpop.f32.mrb[13].mxu0 }
 0x526   : > { %v973_v49 = vpop.f32.mrb[14].mxu0 }
 0x527   : > { %v977_v50 = vpack.c.bf16 %v973_v49, %v970_v47  ;;  %v2087_v51 = vpop.f32.mrb[15].mxu0 }
 0x52c   : > { %v1091_v52 = vpop.f32.mrb[16].mxu0 }
 0x52d   : > { %v2102_v53 = vpop.f32.mrb[17].mxu0 }
 0x52e   : > { %v1094_v54 = vpop.f32.mrb[18].mxu0 }
 0x52f   : > { %v1157_v55 = vpack.c.bf16 %v1094_v54, %v1091_v52  ;;  %v2103_v56 = vpop.f32.mrb[19].mxu0  ;;  %v2205_v54 = vld [vmem:[%s2704_s12] sm:$0xff]  }
 0x531   : > { %v1162_v57 = vsel %vm859_vm2, %v1157_v55, 0  ;;  %v2206_v55 = vld [vmem:[%s2704_s12 + $0x8] sm:$0xff]  }
 0x532   : > { %2113 = vmatpush3.bf16.xpose.msra.mxu0 %v1162_v57 }
 0x533   : > { %2124 = vmatprep.subr.bf16.mxu0 %v2255_v15 }
 0x539   : > { %2115 = vmatmul.mubr.msk.bf16.vlgmr.msra.gmra.mrb[20].mxu0 %vm859_vm2, %v1156_v21  ;;  %v2203_v21 = vld [vmem:[%s2700_s8] sm:$0xff]  }
 0x53a   : > { %2126 = vmatprep.mubr.msk.bf16.mxu0 %vm2256_vm1, %v2255_v15  ;;  %2125 = vmatpush3.bf16.msra.mxu0 %v2204_v13  ;;  %v2210_v13 = vld [vmem:[%s2708_s16 + $0x18] sm:$0xff]  }
 0x53b   : > { %2136 = vmatprep.subr.bf16.mxu0 %v2255_v15 }
 0x60c   : > { %v1198_v34 = vpop.f32.mrb[20].mxu0 }
 0x60d   : > { %v1205_v58 = vadd.f32 %v1198_v34, %v2476_v4  ;;  %v2116_v59 = vpop.f32.mrb[21].mxu0 }
 0x60e   : > { %v1201_v60 = vpop.f32.mrb[22].mxu0 }
 0x60f   : > { %v1206_v61 = vadd.f32 %v1201_v60, %v2478_v5  ;;  %v2117_v62 = vpop.f32.mrb[23].mxu0  ;;  %v1207_v63 = vsel %vm859_vm2, %v1205_v58, -inf }
 0x610   : > { %1208 = vmax.xlane.f32.xlu1 %v1207_v63  ;;  %v1980_v62 = vld [vmem:[%s2702_s10] ss:$0 sm:$0xff] }
 0x611   : > { %v1210_v2 = vsel %vm859_vm2, %v1206_v61, -inf }
 0x614   : > { %1211 = vmax.xlane.f32.xlu1 %v1210_v2 }
 0x69d   : > { %v1209_v3 = vpop.xlane.xlu1 %1208 }
 0x69e   : > { %v1213_v6 = vsub.f32 %v1205_v58, %v1209_v3 }
 0x6a0   : > { %v1215_v7 = vmul.f32 1.442695, %v1213_v6 }
 0x6a1   : > { %v1212_v8 = vpop.xlane.xlu1 %1211 }
 0x6a2   : > { %2227 = vpow2.f32 %v1215_v7  ;;  %v1214_v9 = vsub.f32 %v1206_v61, %v1212_v8  ;;  %v1981_v7 = vld [vmem:[%s2703_s11] ss:$0 sm:$0xff] }
 0x6a4   : > { %v1217_v10 = vmul.f32 1.442695, %v1214_v9 }
 0x6a6   : > { %2229 = vpow2.f32 %v1217_v10 }
 0x6ac   : > { %v2228_v4 = vpop.eup %2227 }
 0x6ad   : > { %v1219_v11 = vsel %vm859_vm2, %v2228_v4, 0.0 }
 0x6ae   : > { %1220 = vadd.xlane.f32.xlu1 %v1219_v11  ;;  %v2207_v11 = vld [vmem:[%s2708_s16] sm:$0xff]  }
 0x6b0   : > { %v2230_v5 = vpop.eup %2229 }
 0x6b1   : > { %v1222_v12 = vsel %vm859_vm2, %v2230_v5, 0.0 }
 0x6b2   : > { %1223 = vadd.xlane.f32.xlu1 %v1222_v12  ;;  %v2209_v12 = vld [vmem:[%s2708_s16 + $0x10] sm:$0xff]  }
 0x73b   : > { %v1221_v14 = vpop.xlane.xlu1 %1220 }
 0x73c   : > { %2231 = vrcp.f32 %v1221_v14  ;;  %v2211_v14 = vld [vmem:[%s2708_s16 + $0x20] sm:$0xff]  }
 0x73f   : > { %v1224_v16 = vpop.xlane.xlu1 %1223 }
 0x740   : > { %2233 = vrcp.f32 %v1224_v16  ;;  %v2212_v16 = vld [vmem:[%s2708_s16 + $0x28] sm:$0xff]  }
 0x746   : > { %v2232_v17 = vpop.eup %2231 }
 0x747   : > { %v1226_v19 = vmul.f32 %v2232_v17, %v2228_v4  ;;  %v2213_v17 = vld [vmem:[%s2708_s16 + $0x30] sm:$0xff]  }
 0x74a   : > { %v2234_v18 = vpop.eup %2233 }
 0x74b   : > { %v1228_v20 = vmul.f32 %v2234_v18, %v2230_v5  ;;  %v2208_v5 = vld [vmem:[%s2708_s16 + $0x8] sm:$0xff]   ;;  %v2214_v18 = vld [vmem:[%s2708_s16 + $0x38] sm:$0xff]  }
 0x74d   : > { %v1229_v22 = vpack.c.bf16 %v1228_v20, %v1226_v19  ;;  %v1982_v19 = vld [vmem:[%s2705_s13] ss:$0 sm:$0xff] }
 0x74f   : > { %2121 = vmatmul.mubr.msk.bf16.vlgmr.msra.gmra.mrb[12].mxu1 %vm859_vm2, %v1229_v22 }
 0x750   : > { %2131 = vmatpush3.bf16.msra.mxu1 %v2203_v21  ;;  %2132 = vmatprep.mubr.msk.bf16.mxu1 %vm2256_vm1, %v2255_v15  ;;  %v1986_v21 = vld [vmem:[%s2706_s14] ss:$0 sm:$0xff] }
 0x751   : > { %2144 = vmatprep.subr.bf16.mxu1 %v2255_v15 }
 0x757   : > { %2133 = vmatmul.mubr.msk.bf16.vlgmr.msra.gmra.mrb[16].mxu1 %vm859_vm2, %v977_v50 }
 0x758   : > { %2160 = vmatprep.mubr.msk.bf16.mxu1 %vm2256_vm1, %v2255_v15  ;;  %2145 = vmatpush3.bf16.msra.mxu1 %v2207_v11 }
 0x759   : > { %2146 = vmatprep.subr.bf16.mxu1 %v2255_v15 }
 0x75c   : > { %2147 = vmatpush3.bf16.msra.mxu1 %v2208_v5 }
 0x75d   : > { %2148 = vmatprep.subr.bf16.mxu1 %v2255_v15 }
 0x760   : > { %2149 = vmatpush3.bf16.msra.mxu1 %v2209_v12 }
 0x761   : > { %2150 = vmatprep.subr.bf16.mxu1 %v2255_v15 }
 0x764   : > { %2151 = vmatpush3.bf16.msra.mxu1 %v2210_v13 }
 0x765   : > { %2152 = vmatprep.subr.bf16.mxu1 %v2255_v15 }
 0x768   : > { %2153 = vmatpush3.bf16.msra.mxu1 %v2211_v14 }
 0x769   : > { %2154 = vmatprep.subr.bf16.mxu1 %v2255_v15 }
 0x76c   : > { %2155 = vmatpush3.bf16.msra.mxu1 %v2212_v16 }
 0x76d   : > { %2156 = vmatprep.subr.bf16.mxu1 %v2255_v15 }
 0x770   : > { %2157 = vmatpush3.bf16.msra.mxu1 %v2213_v17 }
 0x771   : > { %2158 = vmatprep.subr.bf16.mxu1 %v2255_v15 }
 0x774   : > { %2159 = vmatpush3.bf16.msra.mxu1 %v2214_v18 }
 0x822   : > { %v1268_v23 = vpop.f32.mrb[12].mxu1 }
 0x823   : > { %v2122_v24 = vpop.f32.mrb[13].mxu1 }
 0x824   : > { %v1271_v25 = vpop.f32.mrb[14].mxu1 }
 0x825   : > { %v1275_v26 = vpack.c.bf16 %v1271_v25, %v1268_v23  ;;  %v2123_v27 = vpop.f32.mrb[15].mxu1 }
 0x827   : > { %2127 = vmatmul.mubr.msk.bf16.vlgmr.msra.gmra.mrb[24].mxu0 %vm859_vm2, %v1275_v26 }
 0x828   : > { %2140 = vmatprep.mubr.msk.bf16.mxu0 %vm2256_vm1, %v2255_v15  ;;  %2137 = vmatpush3.bf16.msra.mxu0 %v2205_v54  ;;  %v2261_v54 = vmov 2102212464  }
 0x829   : > { %2138 = vmatprep.subr.bf16.mxu0 %v2255_v15 }
 0x82a   : > { %v1372_v28 = vpop.f32.mrb[16].mxu1 }
 0x82b   : > { %v2134_v29 = vpop.f32.mrb[17].mxu1 }
 0x82c   : > { %v1375_v30 = vpop.f32.mrb[18].mxu1  ;;  %2139 = vmatpush3.bf16.msra.mxu0 %v2206_v55 }
 0x82d   : > { %v2135_v31 = vpop.f32.mrb[19].mxu1 }
 0x8fa   : > { %v1322_v32 = vpop.f32.mrb[24].mxu0 }
 0x8fb   : > { %v1373_v33 = vadd.f32 %v1372_v28, %v1322_v32  ;;  %v2128_v35 = vpop.f32.mrb[25].mxu0 }
 0x8fc   : > { %v1325_v37 = vpop.f32.mrb[26].mxu0 }
 0x8fd   : > { %v1379_v38 = vadd.f32 %v1373_v33, %v2376_v0  ;;  %v1376_v39 = vadd.f32 %v1375_v30, %v1325_v37  ;;  %v2129_v40 = vpop.f32.mrb[27].mxu0 }
 0x8ff   : > { %v2534_v41 = vadd.f32 %v1979_v36, %v1379_v38  ;;  %v1380_v42 = vadd.f32 %v1376_v39, %v2378_v1 }
 0x901   : > { %v2537_v43 = vadd.f32 %v1979_v36, %v1380_v42  ;;  %v1392_v44 = vsel %vm636_vm0, %v2534_v41, 0.0 }
 0x902   : > { %1393 = vadd.xlane.f32.xlu0 %v1392_v44 }
 0x903   : > { %v1395_v45 = vsel %vm636_vm0, %v2537_v43, 0.0 }
 0x904   : > { %1396 = vadd.xlane.f32.xlu1 %v1395_v45 }
 0x98f   : > { %v1394_v46 = vpop.xlane.xlu0 %1393 }
 0x990   : > { %v1398_v47 = vmul.f32 0.03125, %v1394_v46 }
 0x991   : > { %v1397_v48 = vpop.xlane.xlu1 %1396 }
 0x992   : > { %v1400_v0 = vsub.f32 %v2534_v41, %v1398_v47  ;;  %v1399_v49 = vmul.f32 0.03125, %v1397_v48 }
 0x994   : > { %v1401_v50 = vsub.f32 %v2537_v43, %v1399_v49  ;;  %v1402_v51 = vmul.f32 %v1400_v0, %v1400_v0 }
 0x996   : > { %v1404_v1 = vsel %vm636_vm0, %v1402_v51, 0.0  ;;  %v1403_v52 = vmul.f32 %v1401_v50, %v1401_v50  ;;  %v2259_v51 = vmov 2475754826  }
 0x997   : > { %1405 = vadd.xlane.f32.xlu0 %v1404_v1 }
 0x998   : > { %v1407_v53 = vsel %vm636_vm0, %v1403_v52, 0.0  ;;  %v2260_v52 = vmov 2131351028  }
 0x999   : > { %1408 = vadd.xlane.f32.xlu1 %v1407_v53 }
 0xa24   : > { %v1406_v56 = vpop.xlane.xlu0 %1405 }
 0xa25   : > { %v1410_v57 = vmul.f32 0.03125, %v1406_v56  ;;  %v2262_v56 = vmov 920167782  }
 0xa26   : > { %v1409_v34 = vpop.xlane.xlu1 %1408 }
 0xa27   : > { %v1412_v58 = vadd.f32 1e-05, %v1410_v57  ;;  %v1411_v59 = vmul.f32 0.03125, %v1409_v34 }
 0xa29   : > { %2235 = vrsqrt.f32 %v1412_v58  ;;  %v1413_v60 = vadd.f32 1e-05, %v1411_v59 }
 0xa2b   : > { %2237 = vrsqrt.f32 %v1413_v60 }
 0xa33   : > { %v2236_v61 = vpop.eup %2235 }
 0xa34   : > { %v1416_v63 = vmul.f32 %v2236_v61, %v1400_v0  ;;  %v2258_v0 = vmov 683565275  }
 0xa35   : > { %v2238_v2 = vpop.eup %2237 }
 0xa36   : > { %v1424_v3 = vmul.f32 %v1980_v62, %v1416_v63  ;;  %v1417_v6 = vmul.f32 %v2238_v2, %v1401_v50 }
 0xa38   : > { %v1425_v8 = vmul.f32 %v1980_v62, %v1417_v6  ;;  %v1432_v9 = vadd.f32 %v1981_v7, %v1424_v3  ;;  %v2263_v62 = vmov 1326507024  }
 0xa3a   : > { %v1433_v10 = vadd.f32 %v1981_v7, %v1425_v8 }
 0xa3c   : > { %v1434_v4 = vpack.c.bf16 %v1433_v10, %v1432_v9 }
 0xa3e   : > { %2141 = vmatmul.mubr.msk.bf16.vlgmr.msra.gmra.mrb[28].mxu0 %vm636_vm0, %v1434_v4 }
 0xb11   : > { %v1495_v20 = vpop.f32.mrb[28].mxu0 }
 0xb12   : > { %v2598_v22 = vadd.f32 %v1982_v19, %v1495_v20  ;;  %v2142_v23 = vpop.f32.mrb[29].mxu0 }
 0xb13   : > { %v1498_v24 = vpop.f32.mrb[30].mxu0 }
 0xb14   : > { %v2601_v15 = vmul.f32 %v1986_v21, %v2598_v22  ;;  %v2603_v25 = vadd.f32 %v1982_v19, %v1498_v24  ;;  %v2143_v26 = vpop.f32.mrb[31].mxu0 }
 0xb16   : > { %v1512_v27 = vand.u32 2147483647, %v2601_v15  ;;  %v1515_v28 = vand.u32 2139095040, %v2601_v15  ;;  %v2608_v29 = vmul.f32 %v1986_v21, %v2603_v25  ;;  %vm1514_vm2 = vcmp.lt.s32.totalorder %v2601_v15, 0 }
 0xb18   : > { %v1516_v30 = vshrl.u32 %v1515_v28, 23  ;;  %v1519_v31 = vand.u32 8388607, %v1512_v27  ;;  %v1619_v32 = vand.u32 2139095040, %v2608_v29  ;;  %v1616_v35 = vand.u32 2147483647, %v2608_v29 }
 0xb1a   : > { %v1987_v33 = vadd.s32 4294967169, %v1516_v30  ;;  %v1620_v36 = vshrl.u32 %v1619_v32, 23  ;;  %v1520_v38 = vor.u32 8388608, %v1519_v31  ;;  %v1623_v40 = vand.u32 8388607, %v1616_v35 }
 0xb1c   : > { %v1522_v37 = vadd.s32 1, %v1987_v33  ;;  %v1991_v39 = vadd.s32 4294967169, %v1620_v36  ;;  %v2616_v47 = vshll.u32 %v1520_v38, 8  ;;  %v1624_v50 = vor.u32 8388608, %v1623_v40 }
 0xb1e   : > { %vm1523_vm3 = vcmp.gt.s32.totalorder %v1522_v37, 0  ;;  %v1626_v44 = vadd.s32 1, %v1991_v39  ;;  %v1664_v20 = vshll.u32 %v1624_v50, 8 }
 0xb1f   : > { %v1524_v42 = vsel %vm1523_vm3, %v1522_v37, 0  ;;  %vm1513_vm3 = vcmp.le.f32.partialorder %v1512_v27, 0.7853982 }
 0xb20   : > { %v1525_v45 = vshrl.u32 %v1524_v42, 5  ;;  %v1526_v46 = vand.u32 31, %v1524_v42  ;;  %vm1627_vm4 = vcmp.gt.s32.totalorder %v1626_v44, 0 }
 0xb21   : > { %v1628_v7 = vsel %vm1627_vm4, %v1626_v44, 0  ;;  %vm1618_vm4 = vcmp.lt.s32.totalorder %v2608_v29, 0 }
 0xb22   : > { %v1527_v48 = vsub.s32 32, %v1526_v46  ;;  %v1529_v49 = vshll.u32 %v2258_v0, %v1526_v46  ;;  %v1532_v1 = vshll.u32 %v2259_v51, %v1526_v46  ;;  %v1535_v53 = vshll.u32 %v2260_v52, %v1526_v46 }
 0xb23   : > { %v1538_v55 = vshll.u32 %v2261_v54, %v1526_v46  ;;  %v1541_v57 = vshll.u32 %v2262_v56, %v1526_v46  ;;  %vm1544_vm5 = vcmp.lt.s32.totalorder %v1525_v45, 1  ;;  %vm1546_vm6 = vcmp.lt.s32.totalorder %v1525_v45, 3 }
 0xb24   : > { %v1530_v34 = vshrl.u32 %v2259_v51, %v1527_v48  ;;  %v1533_v58 = vshrl.u32 %v2260_v52, %v1527_v48  ;;  %v1536_v59 = vshrl.u32 %v2261_v54, %v1527_v48  ;;  %v1528_v60 = vshrl.u32 %v2258_v0, %v1527_v48 }
 0xb25   : > { %v1539_v61 = vshrl.u32 %v2262_v56, %v1527_v48  ;;  %v1542_v63 = vshrl.u32 %v2263_v62, %v1527_v48  ;;  %vm1547_vm7 = vcmp.lt.s32.totalorder %v1525_v45, 4  ;;  %v1630_v10 = vand.u32 31, %v1628_v7 }
 0xb26   : > { %v1531_v2 = vor.u32 %v1530_v34, %v1529_v49  ;;  %v1534_v3 = vor.u32 %v1533_v58, %v1532_v1  ;;  %v1537_v6 = vor.u32 %v1536_v59, %v1535_v53  ;;  %vm1545_vm8 = vcmp.lt.s32.totalorder %v1525_v45, 2 }
 0xb27   : > { %v1540_v8 = vor.u32 %v1539_v61, %v1538_v55  ;;  %v1543_v9 = vor.u32 %v1542_v63, %v1541_v57  ;;  %v1631_v17 = vsub.s32 32, %v1630_v10  ;;  %v1629_v26 = vshrl.u32 %v1628_v7, 5 }
 0xb28   : > { %v1548_v4 = vsel %vm1544_vm5, %v1528_v60, %v1531_v2  ;;  %v1549_v11 = vsel %vm1547_vm7, %v1537_v6, 2102212464  ;;  %v1552_v5 = vsel %vm1544_vm5, %v1531_v2, %v1534_v3  ;;  %v1556_v12 = vsel %vm1544_vm5, %v1534_v3, %v1537_v6 }
 0xb29   : > { %v1550_v13 = vsel %vm1546_vm6, %v1534_v3, %v1549_v11  ;;  %v1553_v14 = vsel %vm1547_vm7, %v1540_v8, 920167782  ;;  %v1557_v16 = vsel %vm1547_vm7, %v1543_v9, 1326507024  ;;  %v1633_v33 = vshll.u32 %v2258_v0, %v1630_v10 }
 0xb2a   : > { %v1554_v18 = vsel %vm1546_vm6, %v1537_v6, %v1553_v14  ;;  %v1558_v19 = vsel %vm1546_vm6, %v1540_v8, %v1557_v16  ;;  %v1551_v21 = vsel %vm1545_vm8, %v1548_v4, %v1550_v13  ;;  %v1634_v36 = vshrl.u32 %v2259_v51, %v1631_v17 }
 0xb2b   : > { %v1555_v23 = vsel %vm1545_vm8, %v1552_v5, %v1554_v18  ;;  %v1559_v24 = vsel %vm1545_vm8, %v1556_v12, %v1558_v19  ;;  %v1636_v37 = vshll.u32 %v2259_v51, %v1630_v10  ;;  %v1637_v38 = vshrl.u32 %v2260_v52, %v1631_v17 }
 0xb2c   : > { %v2628_v28 = vmul.u32.u64.low %v2616_v47, %v1559_v24  ;;  %v2629_v30 = vmul.u32.u64.high %v2616_v47, %v1559_v24, %v2628_v28  ;;  %v2632_v31 = vmul.u32.u64.low %v2616_v47, %v1555_v23  ;;  %v2633_v32 = vmul.u32.u64.high %v2616_v47, %v1555_v23, %v2632_v31 }
 0xb2d   : > { %v1639_v39 = vshll.u32 %v2260_v52, %v1630_v10  ;;  %v1640_v40 = vshrl.u32 %v2261_v54, %v1631_v17  ;;  %v1642_v42 = vshll.u32 %v2261_v54, %v1630_v10  ;;  %v1643_v44 = vshrl.u32 %v2262_v56, %v1631_v17 }
 0xb2e   : > { %v1635_v45 = vor.u32 %v1634_v36, %v1633_v33  ;;  %v1638_v46 = vor.u32 %v1637_v38, %v1636_v37  ;;  %v1645_v48 = vshll.u32 %v2262_v56, %v1630_v10  ;;  %v1646_v49 = vshrl.u32 %v2263_v62, %v1631_v17 }
 0xb2f   : > { %v1567_v50 = vmul.u32 %v2616_v47, %v1551_v21  ;;  %vm1569_vm9 = vc.u32 %v2629_v30, %v2632_v31  ;;  %v1570_v1 = vadd.s32 1, %v2633_v32  ;;  %v1641_v53 = vor.u32 %v1640_v40, %v1639_v39 }
 0xb30   : > { %v1632_v55 = vshrl.u32 %v2258_v0, %v1631_v17  ;;  %v1644_v51 = vor.u32 %v1643_v44, %v1642_v42  ;;  %v1647_v57 = vor.u32 %v1646_v49, %v1645_v48  ;;  %vm1648_vm10 = vcmp.lt.s32.totalorder %v1629_v26, 1 }
 0xb31   : > { %v1571_v52 = vsel %vm1569_vm9, %v1570_v1, %v2633_v32  ;;  %vm1650_vm11 = vcmp.lt.s32.totalorder %v1629_v26, 3  ;;  %vm1651_vm12 = vcmp.lt.s32.totalorder %v1629_v26, 4  ;;  %v1656_v54 = vsel %vm1648_vm10, %v1635_v45, %v1638_v46 }
 0xb32   : > { %v1572_v56 = vadd.s32 %v1571_v52, %v1567_v50  ;;  %v1653_v34 = vsel %vm1651_vm12, %v1641_v53, 2102212464  ;;  %v1657_v58 = vsel %vm1651_vm12, %v1644_v51, 920167782  ;;  %v1660_v47 = vsel %vm1648_vm10, %v1638_v46, %v1641_v53 }
 0xb33   : > { %vm1649_vm13 = vcmp.lt.s32.totalorder %v1629_v26, 2  ;;  %v1652_v59 = vsel %vm1648_vm10, %v1632_v55, %v1635_v45  ;;  %v1658_v60 = vsel %vm1650_vm11, %v1641_v53, %v1657_v58  ;;  %v1661_v61 = vsel %vm1651_vm12, %v1647_v57, 1326507024 }
 0xb34   : > { %v1573_v62 = vadd.s32 536870912, %v1572_v56  ;;  %v1654_v63 = vsel %vm1650_vm11, %v1638_v46, %v1653_v34  ;;  %v1659_v2 = vsel %vm1649_vm13, %v1656_v54, %v1658_v60  ;;  %v1662_v0 = vsel %vm1650_vm11, %v1644_v51, %v1661_v61 }
 0xb35   : > { %v1663_v3 = vsel %vm1649_vm13, %v1660_v47, %v1662_v0  ;;  %v2643_v6 = vmul.u32.u64.low %v1664_v20, %v1659_v2  ;;  %v2644_v7 = vmul.u32.u64.high %v1664_v20, %v1659_v2, %v2643_v6  ;;  %v1655_v4 = vsel %vm1649_vm13, %v1652_v59, %v1654_v63 }
 0xb36   : > { %v1574_v8 = vshrl.u32 %v1573_v62, 30  ;;  %v2646_v9 = vmul.u32.u64.low %v1664_v20, %v1663_v3  ;;  %v2647_v10 = vmul.u32.u64.high %v1664_v20, %v1663_v3, %v2646_v9  ;;  %v1671_v13 = vmul.u32 %v1664_v20, %v1655_v4 }
 0xb37   : > { %v1674_v5 = vadd.s32 1, %v2644_v7  ;;  %v1568_v33 = vadd.s32 %v2632_v31, %v2629_v30  ;;  %vm2662_vm5 = vcmp.le.f32.partialorder %v1616_v35, 0.7853982  ;;  %vm1604_vm9 = vweird.f32 %v2601_v15 }
 0xb38   : > { %v1575_v11 = vshll.u32 %v1574_v8, 30  ;;  %vm1673_vm14 = vc.u32 %v2647_v10, %v2643_v6  ;;  %v1672_v51 = vadd.s32 %v2643_v6, %v2647_v10  ;;  %v1598_v52 = vsub.s32 4, %v1574_v8 }
 0xb39   : > { %v1675_v14 = vsel %vm1673_vm14, %v1674_v5, %v2644_v7  ;;  %vm1708_vm13 = vweird.f32 %v2608_v29 }
 0xb3a   : > { %v1576_v12 = vsub.s32 %v1572_v56, %v1575_v11  ;;  %v1676_v17 = vadd.s32 %v1675_v14, %v1671_v13  ;;  %v1599_v61 = vsel %vm1514_vm2, %v1598_v52, %v1574_v8 }
 0xb3b   : > { %v1601_v63 = vsel %vm1513_vm3, 0, %v1599_v61 }
 0xb3c   : > { %v1578_v16 = vsub.s32 0, %v1576_v12  ;;  %v1677_v19 = vadd.s32 536870912, %v1676_v17  ;;  %v1605_v7 = vadd.s32 3, %v1601_v63 }
 0xb3e   : > { %v1988_v18 = vmin.u32 %v1578_v16, %v1576_v12  ;;  %v1678_v23 = vshrl.u32 %v1677_v19, 30  ;;  %v1606_v11 = vand.u32 3, %v1605_v7 }
 0xb40   : > { %v1580_v21 = vclz %v1988_v18  ;;  %v1679_v26 = vshll.u32 %v1678_v23, 30  ;;  %v1702_v6 = vsub.s32 4, %v1678_v23  ;;  %vm1608_vm6 = vcmp.eq.s32.totalorder %v1606_v11, 0 }
 0xb41   : > { %vm1611_vm7 = vcmp.eq.s32.totalorder %v1606_v11, 2  ;;  %vm1607_vm8 = vcmp.lt.s32.totalorder %v1606_v11, 2 }
 0xb42   : > { %v1989_v24 = vadd.s32 4294967294, %v1580_v21  ;;  %v1680_v32 = vsub.s32 %v1676_v17, %v1679_v26  ;;  %v1703_v8 = vsel %vm1618_vm4, %v1702_v6, %v1678_v23 }
 0xb43   : > { %v1705_v16 = vsel %vm2662_vm5, 0, %v1703_v8 }
 0xb44   : > { %vm1990_vm15 = vcmp.lt.s32.totalorder %v1989_v24, 0  ;;  %v1682_v37 = vsub.s32 0, %v1680_v32  ;;  %v1709_v18 = vadd.s32 3, %v1705_v16 }
 0xb45   : > { %v1583_v28 = vsel %vm1990_vm15, 0, %v1989_v24 }
 0xb46   : > { %v1584_v36 = vsub.s32 32, %v1583_v28  ;;  %v1588_v20 = vsub.s32 4294967266, %v1583_v28  ;;  %v1585_v38 = vshll.u32 %v1576_v12, %v1583_v28  ;;  %v1992_v42 = vmin.u32 %v1682_v37, %v1680_v32 }
 0xb47   : > { %v1710_v21 = vand.u32 3, %v1709_v18 }
 0xb48   : > { %v1586_v39 = vshrl.u32 %v1568_v33, %v1584_v36  ;;  %v1589_v40 = vadd.s32 127, %v1588_v20  ;;  %v1684_v46 = vclz %v1992_v42  ;;  %v1995_v20 = vld [vmem:[%s2707_s15] ss:$0 sm:$0xff] }
 0xb49   : > { %vm1715_vm10 = vcmp.eq.s32.totalorder %v1710_v21, 2  ;;  %vm1712_vm11 = vcmp.eq.s32.totalorder %v1710_v21, 0  ;;  %vm1711_vm12 = vcmp.lt.s32.totalorder %v1710_v21, 2 }
 0xb4a   : > { %v1587_v44 = vor.u32 %v1586_v39, %v1585_v38  ;;  %v1590_v45 = vshll.u32 %v1589_v40, 23  ;;  %v1993_v49 = vadd.s32 4294967294, %v1684_v46 }
 0xb4c   : > { %v1591_v48 = vor.u32 4788187, %v1590_v45  ;;  %v1594_v1 = vcvt.s32.f32 %v1587_v44  ;;  %vm1994_vm1 = vcmp.lt.s32.totalorder %v1993_v49, 0 }
 0xb4d   : > { %v1687_v55 = vsel %vm1994_vm1, 0, %v1993_v49 }
 0xb4e   : > { %v1592_v50 = vand.u32 2147483647, %v1591_v48  ;;  %v1688_v30 = vsub.s32 32, %v1687_v55  ;;  %v1692_v31 = vsub.s32 4294967266, %v1687_v55  ;;  %v1689_v54 = vshll.u32 %v1680_v32, %v1687_v55  ;;  %v1996_v48 = vld [vmem:[%s2709_s17] ss:$0 sm:$0xff] }
 0xb50   : > { %v1595_v53 = vmul.f32 %v1594_v1, %v1592_v50  ;;  %v1690_v56 = vshrl.u32 %v1672_v51, %v1688_v30  ;;  %v1693_v34 = vadd.s32 127, %v1692_v31 }
 0xb52   : > { %v1596_v57 = vxor.u32 2147483648, %v1595_v53  ;;  %v1691_v59 = vor.u32 %v1690_v56, %v1689_v54  ;;  %v1694_v60 = vshll.u32 %v1693_v34, 23 }
 0xb54   : > { %v1597_v58 = vsel %vm1514_vm2, %v1596_v57, %v1595_v53  ;;  %v1695_v62 = vor.u32 4788187, %v1694_v60  ;;  %v1698_v0 = vcvt.s32.f32 %v1691_v59 }
 0xb55   : > { %v1600_v47 = vsel %vm1513_vm3, %v2601_v15, %v1597_v58 }
 0xb56   : > { %2239 = vcosq.f32 %v1600_v47  ;;  %v1696_v2 = vand.u32 2147483647, %v1695_v62 }
 0xb57   : > { %2241 = vsinq.f32 %v1600_v47 }
 0xb58   : > { %v1699_v3 = vmul.f32 %v1698_v0, %v1696_v2 }
 0xb5a   : > { %v1700_v9 = vxor.u32 2147483648, %v1699_v3 }
 0xb5c   : > { %v1701_v10 = vsel %vm1618_vm4, %v1700_v9, %v1699_v3 }
 0xb5d   : > { %v1704_v5 = vsel %vm2662_vm5, %v2608_v29, %v1701_v10 }
 0xb5e   : > { %2243 = vcosq.f32 %v1704_v5 }
 0xb5f   : > { %2245 = vsinq.f32 %v1704_v5 }
 0xb60   : > { %v2240_v4 = vpop.eup %2239 }
 0xb61   : > { %v2242_v12 = vpop.eup %2241  ;;  %v1612_v13 = vxor.u32 2147483648, %v2240_v4 }
 0xb62   : > { %v1609_v14 = vxor.u32 2147483648, %v2242_v12 }
 0xb63   : > { %v1613_v17 = vsel %vm1611_vm7, %v1612_v13, %v2242_v12 }
 0xb64   : > { %v1610_v35 = vsel %vm1608_vm6, %v2240_v4, %v1609_v14 }
 0xb65   : > { %v1614_v19 = vsel %vm1607_vm8, %v1610_v35, %v1613_v17 }
 0xb66   : > { %v1615_v24 = vsel %vm1604_vm9, nan, %v1614_v19 }
 0xb67   : > { %v1720_v33 = vmul.f32 %v1615_v24, %v1615_v24 }
 0xb68   : > { %v2244_v23 = vpop.eup %2243 }
 0xb69   : > { %v2246_v26 = vpop.eup %2245  ;;  %v1716_v28 = vxor.u32 2147483648, %v2244_v23  ;;  %v1728_v39 = vmul.f32 %v1995_v20, %v1720_v33 }
 0xb6a   : > { %v1713_v32 = vxor.u32 2147483648, %v2246_v26 }
 0xb6b   : > { %v1717_v36 = vsel %vm1715_vm10, %v1716_v28, %v2246_v26  ;;  %v1730_v44 = vadd.f32 %v1728_v39, %v2598_v22 }
 0xb6c   : > { %v1714_v37 = vsel %vm1712_vm11, %v2244_v23, %v1713_v32 }
 0xb6d   : > { %v1718_v38 = vsel %vm1711_vm12, %v1714_v37, %v1717_v36 }
 0xb6e   : > { %v1719_v15 = vsel %vm1708_vm13, nan, %v1718_v38 }
 0xb6f   : > { %v1721_v40 = vmul.f32 %v1719_v15, %v1719_v15 }
 0xb71   : > { %v1729_v42 = vmul.f32 %v1995_v20, %v1721_v40 }
 0xb73   : > { %v1731_v45 = vadd.f32 %v1729_v42, %v2603_v25 }
 0xb75   : > { %v1732_v46 = vpack.c.bf16 %v1731_v45, %v1730_v44 }
 0xb77   : > { %2161 = vmatmul.mubr.bf16.vlgmr.msra.gmra.mrb[20].mxu1 %v1732_v46 }
 0xc4a   : > { %v1838_v49 = vpop.f32.mrb[20].mxu1 }
 0xc4b   : > { %v1839_v50 = vadd.f32 %v1996_v48, %v1838_v49  ;;  %v2162_v1 = vpop.f32.mrb[21].mxu1 }
 0xc4c   : > { %v1841_v29 = vpop.f32.mrb[22].mxu1 }
 0xc4d   : > { %v1845_v53 = vadd.f32 %v1839_v50, %v2534_v41  ;;  %v1842_v55 = vadd.f32 %v1996_v48, %v1841_v29  ;;  %v2163_v22 = vpop.f32.mrb[23].mxu1 }
 0xc4f   : > { %1847 = vst.msk [vmem:[%s609_s20] sm:$0xff] %vm636_vm0, %v1845_v53  ;;  %v1846_v25 = vadd.f32 %v1842_v55, %v2537_v43 }
 0xc51   : > { %1848 = vst.msk [vmem:[%s609_s20 + $0x8] sm:$0xff] %vm636_vm0, %v1846_v25 }
 0xc52 PF: > { %s28_s27 = sadd.s32 1, %s2253_s27  }
 0xc53   : > { %p25_p4 = scmp.ge.s32.totalorder %s28_s27, 4  }
 0xc55   :  { %27 = sbr.rel (!%p25_p4) target bundleno = 4 (0x4), region = 132 }

// kernel: conditional_decoder_forward.17
= control target key start
LH: loop header
LB: loop body
LE: loop exit
PB: predicated region body
PF: predicated region fallthrough
CT: control target
= control target key end

     0   :  { %s2116_s21 = smov 0   ;;  %s2397_s0 = inlined_call_operand.vmem [shape: f32[2,16,24], index: 0, kind: input, shape index: {}]   ;;  %s2398_s1 = inlined_call_operand.vmem [shape: f32[2,16,1], index: 1, kind: input, shape index: {}]   ;;  %s2399_s2 = inlined_call_operand.vmem [shape: f32[2,1,128], index: 2, kind: input, shape index: {}]   ;;  %s2400_s3 = inlined_call_operand.vmem [shape: bf16[3,24,32], index: 3, kind: input, shape index: {}]   ;;  %s2401_s4 = inlined_call_operand.vmem [shape: f32[1,32], index: 4, kind: input, shape index: {}, may-alias: {4,6,8,10,12,14}]   ;;  %s2402_s5 = inlined_call_operand.vmem [shape: f32[1,32], index: 5, kind: input, shape index: {}, may-alias: {5,11}]   ;;  %s2403_s6 = inlined_call_operand.vmem [shape: f32[1,32], index: 6, kind: input, shape index: {}, may-alias: {4,6,8,10,12,14}]   ;;  %s2404_s7 = inlined_call_operand.vmem [shape: bf16[128,32], index: 7, kind: input, shape index: {}]   ;;  %s2405_s8 = inlined_call_operand.vmem [shape: f32[1,32], index: 8, kind: input, shape index: {}, may-alias: {4,6,8,10,12,14}]   ;;  %s2406_s9 = inlined_call_operand.vmem [shape: bf16[3,32,32], index: 9, kind: input, shape index: {}]   ;;  %s2407_s10 = inlined_call_operand.vmem [shape: f32[1,32], index: 10, kind: input, shape index: {}, may-alias: {4,6,8,10,12,14}]   ;;  %s2408_s11 = inlined_call_operand.vmem [shape: f32[1,32], index: 11, kind: input, shape index: {}, may-alias: {5,11}]   ;;  %s2409_s12 = inlined_call_operand.vmem [shape: f32[1,32], index: 12, kind: input, shape index: {}, may-alias: {4,6,8,10,12,14}]   ;;  %s2410_s13 = inlined_call_operand.vmem [shape: bf16[24,32], index: 13, kind: input, shape index: {}]   ;;  %s2411_s14 = inlined_call_operand.vmem [shape: f32[1,32], index: 14, kind: input, shape index: {}, may-alias: {4,6,8,10,12,14}]   ;;  %s2412_s15 = inlined_call_operand.vmem [shape: f32[32,32], index: 15, kind: input, shape index: {}]   ;;  %s2413_s16 = inlined_call_operand.vmem [shape: f32[2,16,32], index: 16, kind: output, shape index: {}]  }
   0x1   :  { %2414 = sst [smem:[#allocation4_spill]] %s2397_s0 }
   0x2 LB: > { %s1700_s22 = sadd.s32 4294967295, %s2025_s21   ;;  %p1704_p0 = scmp.ge.s32.totalorder %s2025_s21, 1  ;;  %s2025_s21 = sphi %s2116_s21, %s26_s21  }
   0x3   : > { %p480_p1 = scmp.lt.s32.totalorder %s2025_s21, 3 }
   0x5   : > { %p481_p2 = pnand %p1704_p0, %p480_p1 }
   0x6   : > { %p538_p3 = scmp.lt.s32.totalorder (!%p481_p2), %s1700_s22, 1  ;;  %v2027_v0 = vmov (!%p481_p2), 0   ;;  %vm577_vm0 = vcmask (!%p481_p2), 195584   ;;  %vm580_vm1 = vcmask (!%p481_p2), 189440   ;;  %v2028_v3 = vmov (!%p481_p2), 0.0   ;;  %v1977_v4 = vld [vmem:[%s2400_s3 + $0xc] sm:$0xff] (!%p481_p2)  }
   0x7   : > { %484 = sbr.rel (%p481_p2) target bundleno = 1223 (0x4c7), region = 84  ;;  %1976 = vset.pattern.permute.xlu0 (!%p481_p2), %v2027_v0  ;;  %578 = vst.msk [vmem:[#allocation2] sm:$0xff] (!%p481_p2), %vm577_vm0, %v2028_v3  ;;  %579 = vst.msk [vmem:[#allocation2 + $0x8] sm:$0xff] (!%p481_p2), %vm577_vm0, %v2028_v3  ;;  %1820 = vmatprep.subr.bf16.mxu1 (!%p481_p2), %v2028_v3  ;;  %v1978_v5 = vld [vmem:[%s2400_s3 + $0x18] sm:$0xff] (!%p481_p2)   ;;  %v1979_v6 = vld [vmem:[%s2400_s3 + $0x14] ss:$0 sps:$4 sm:$0xff] (!%p481_p2)  }
   0x8   : > { %581 = vst.msk [vmem:[#allocation2 + $0x10] sm:$0x3] (!%p481_p2), %vm580_vm1, %v2028_v3  ;;  %1836 = vmatprep.subr.bf16.mxu0 (!%p481_p2), %v2028_v3  ;;  %vm609_vm2 = vcmask (!%p481_p2), 1043456   ;;  %v1980_v7 = vld [vmem:[%s2400_s3 + $0x20] ss:$0 sps:$4 sm:$0xff] (!%p481_p2)   ;;  %vm2029_vm3 = vmmov (!%p481_p2), 0   ;;  %1821 = vmatpush3.bf16.msra.mxu1 (!%p481_p2), %v1977_v4 }
   0x9   : > { %1824 = vmatprep.mubr.msk.bf16.mxu1 (!%p481_p2), %vm2029_vm3, %v2028_v3  ;;  %1840 = vmatprep.mubr.msk.bf16.mxu0 (!%p481_p2), %vm2029_vm3, %v2028_v3  ;;  %v611_v8 = vsel (!%p481_p2), %vm609_vm2, %v1979_v6, 0  ;;  %v730_v9 = vsel (!%p481_p2), %vm609_vm2, %v1980_v7, 0  ;;  %s2415_s25 = sld [smem:[#allocation4_spill]] (!%p481_p2)  ;;  %v1981_v18 = vld [vmem:[%s2400_s3] sm:$0xff] (!%p481_p2)   ;;  %v1982_v24 = vld [vmem:[%s2400_s3 + $0x8] ss:$0 sps:$4 sm:$0xff] (!%p481_p2)  }
   0xa   : > { %1837 = vmatpush3.bf16.msra.mxu0 (!%p481_p2), %v1978_v5  ;;  %1822 = vmatprep.subr.bf16.mxu1 (!%p481_p2), %v2028_v3  ;;  %v667_v25 = vsel (!%p481_p2), %vm609_vm2, %v1982_v24, 0  ;;  %vm786_vm4 = vcmask (!%p481_p2), 261120   ;;  %v573_v29 = vld [vmem:[%s2412_s15] sm:$0xff] (!%p481_p2)  ;;  %v574_v30 = vld [vmem:[%s2412_s15 + $0x8] sm:$0xff] (!%p481_p2)  ;;  %v575_v32 = vld [vmem:[%s2412_s15 + $0x10] sm:$0xff] (!%p481_p2)  ;;  %v2030_v34 = vmov (!%p481_p2), 0.0|0.0  }
   0xb   : > { %1838 = vmatprep.subr.bf16.mxu0 (!%p481_p2), %v2028_v3  ;;  %1123 = vst.msk [vmem:[#allocation3] sm:$0xff] (!%p481_p2), %vm786_vm4, %v2028_v3  ;;  %1124 = vst.msk [vmem:[#allocation3 + $0x8] sm:$0xff] (!%p481_p2), %vm786_vm4, %v2028_v3  ;;  %v2208_v31 = vpack.c.bf16 (!%p481_p2), %v574_v30, %v573_v29  ;;  %v576_v33 = vld [vmem:[%s2412_s15 + $0x18] sm:$0xff] (!%p481_p2)  ;;  %v1726_v47 = vld [vmem:[%s2401_s4] ss:$0 sm:$0xff] (!%p481_p2)  ;;  %vm1125_vm5 = vcmask (!%p481_p2), 254976  }
   0xc   : > { %1823 = vmatpush3.bf16.msra.mxu1 (!%p481_p2), %v611_v8  ;;  %v2220_v35 = vpack.c.bf16 (!%p481_p2), %v576_v33, %v575_v32  ;;  %v1988_v24 = vld [vmem:[%s2404_s7 + $0x28] sm:$0xff] (!%p481_p2)   ;;  %1126 = vst.msk [vmem:[#allocation3 + $0x10] sm:$0x3] (!%p481_p2), %vm1125_vm5, %v2028_v3  ;;  %v1991_v29 = vld [vmem:[%s2406_s9 + $0x10] sm:$0xff] (!%p481_p2)   ;;  %v1992_v30 = vld [vmem:[%s2406_s9 + $0x18] sm:$0xff] (!%p481_p2)  }
   0xd   : > { %1828 = vmatprep.subr.bf16.mxu1 (!%p481_p2), %v2028_v3 }
   0xe   : > { %s2417_s22 = smov (!%p538_p3, %s1700_s22), 1  ;;  %1839 = vmatpush3.bf16.msra.mxu0 %v730_v9 }
   0xf   : > { %s2127_s23 = sshll.u32 %s2417_s22, 4  ;;  %1946 = vmatprep.subr.bf16.mxu0 %v2030_v34  ;;  %s550_s18 = scalar_lea.vmem %s2399_s2, %s2417_s22 }
  0x10   : > { %s547_s26 = scalar_lea.vmem %s2398_s1, %s2127_s23  ;;  %s555_s29 = scalar_lea.vmem %s2413_s16, %s2127_s23 }
  0x11   : > { %v559_v1 = vld [vmem:[%s547_s26] sm:$0xff]  ;;  %v560_v2 = vld [vmem:[%s547_s26 + $0x8] sm:$0xff]  ;;  %s542_s26 = scalar_lea.vmem %s2415_s25, %s2127_s23 }
  0x12   : > { %563 = vperm.xlu0 %1976, %v559_v1   ;;  %v557_v10 = vld [vmem:[%s542_s26] sm:$0xff]  ;;  %v558_v13 = vld [vmem:[%s542_s26 + $0x8] sm:$0xff] }
  0x16   : > { %568 = vperm.xlu0 %1976, %v560_v2  }
  0x91   : > { %v2165_v11 = vpop.permute.xlu0 %563 }
  0x92   : > { %v2168_v12 = vmul.f32 %v2165_v11, %v557_v10 }
  0x94   : > { %582 = vst.msk [vmem:[#allocation2 + $0x1] sm:$0xff] %vm577_vm0, %v2168_v12 }
  0x95   : > { %v2172_v14 = vpop.permute.xlu0 %568 }
  0x96   : > { %v2175_v15 = vmul.f32 %v2172_v14, %v558_v13  ;;  %v1983_v13 = vld [vmem:[%s2404_s7] sm:$0xff]  }
  0x98   : > { %583 = vst.msk [vmem:[#allocation2 + $0x9] sm:$0xff] %vm577_vm0, %v2175_v15  ;;  %v1553_v16 = vpack.c.bf16 %v2175_v15, %v2168_v12  ;;  %v1759_v15 = vld [vmem:[%s2408_s11] ss:$0 sm:$0xff] }
  0x9b   : > { %v590_v17 = vld [vmem:[#allocation2 + $0x1] sm:$0xff] }
  0x9c   : > { %v584_v27 = vld [vmem:[#allocation2] sm:$0xff] }
  0x9f   : > { %v591_v19 = vld [vmem:[#allocation2 + $0x9] sm:$0xff] }
  0xa0   : > { %v710_v20 = vld [vmem:[#allocation2 + $0x2] sm:$0xff]  ;;  %v711_v21 = vld [vmem:[#allocation2 + $0xa] sm:$0xff]  ;;  %v592_v22 = vpack.c.bf16 %v591_v19, %v590_v17 }
  0xa1   : > { %v712_v23 = vpack.c.bf16 %v711_v21, %v710_v20  ;;  %v585_v26 = vld [vmem:[#allocation2 + $0x8] sm:$0xff]  ;;  %v1985_v21 = vld [vmem:[%s2404_s7 + $0x10] sm:$0xff]  }
  0xa2   : > { %1825 = vmatmul.mubr.msk.bf16.vlgmr.msra.gmra.mrb[0].mxu1 %vm577_vm0, %v592_v22  ;;  %v586_v28 = vpack.c.bf16 %v585_v26, %v584_v27  ;;  %v1984_v20 = vld [vmem:[%s2404_s7 + $0x8] sm:$0xff]   ;;  %v1986_v22 = vld [vmem:[%s2404_s7 + $0x18] sm:$0xff]   ;;  %v1008_v27 = vld [vmem:[%s550_s18] sm:$0x1] }
  0xa3   : > { %1841 = vmatmul.mubr.msk.bf16.vlgmr.msra.gmra.mrb[0].mxu0 %vm577_vm0, %v712_v23  ;;  %1829 = vmatpush3.bf16.msra.mxu1 %v1981_v18  ;;  %v1987_v23 = vld [vmem:[%s2404_s7 + $0x20] sm:$0xff]   ;;  %v1990_v26 = vld [vmem:[%s2404_s7 + $0x38] sm:$0xff]  }
  0xa4   : > { %1832 = vmatprep.mubr.msk.bf16.mxu1 %vm2029_vm3, %v2028_v3  ;;  %1830 = vmatprep.subr.bf16.mxu1 %v2028_v3 }
  0xa5   : > { %1863 = vmatprep.mubr.msk.f32.mxu0 %vm2029_vm3, %v2028_v3  ;;  %1948 = vmatpush3.bf16.msra.mxu0 %v2208_v31 }
  0xa6   : > { %1949 = vmatprep.subr.bf16.mxu0 %v2030_v34 }
  0xa7   : > { %1831 = vmatpush3.bf16.msra.mxu1 %v667_v25  ;;  %v1989_v25 = vld [vmem:[%s2404_s7 + $0x30] sm:$0xff]  }
  0xa8   : > { %1940 = vmatprep.subr.bf16.mxu1 %v2030_v34 }
  0xa9   : > { %1951 = vmatpush3.bf16.msra.mxu0 %v2220_v35 }
  0xaa   : > { %1833 = vmatmul.mubr.msk.bf16.vlgmr.msra.gmra.mrb[4].mxu1 %vm577_vm0, %v586_v28  ;;  %1886 = vmatprep.subr.bf16.mxu0 %v2028_v3  ;;  %v1009_v28 = vpack.c.bf16 %v1008_v27, %v1008_v27 }
  0xab   : > { %1852 = vmatprep.mubr.msk.f32.mxu1 %vm2029_vm3, %v2028_v3  ;;  %1942 = vmatpush3.bf16.msra.mxu1 %v2208_v31 }
  0xac   : > { %1943 = vmatprep.subr.bf16.mxu1 %v2030_v34 }
  0xaf   : > { %1945 = vmatpush3.bf16.msra.mxu1 %v2220_v35 }
  0xb0   : > { %1866 = vmatprep.subr.bf16.mxu1 %v2028_v3 }
 0x175   : > { %v647_v36 = vpop.f32.mrb[0].mxu1 }
 0x176   : > { %v766_v37 = vpop.f32.mrb[0].mxu0  ;;  %v1826_v38 = vpop.f32.mrb[1].mxu1 }
 0x177   : > { %v1842_v39 = vpop.f32.mrb[1].mxu0  ;;  %v650_v40 = vpop.f32.mrb[2].mxu1 }
 0x178   : > { %v769_v41 = vpop.f32.mrb[2].mxu0  ;;  %v1827_v42 = vpop.f32.mrb[3].mxu1 }
 0x179   : > { %v1843_v43 = vpop.f32.mrb[3].mxu0 }
 0x17d   : > { %v703_v44 = vpop.f32.mrb[4].mxu1 }
 0x17e   : > { %v704_v45 = vadd.f32 %v703_v44, %v647_v36  ;;  %v1834_v46 = vpop.f32.mrb[5].mxu1 }
 0x17f   : > { %v706_v48 = vpop.f32.mrb[6].mxu1 }
 0x180   : > { %v773_v49 = vadd.f32 %v766_v37, %v704_v45  ;;  %v707_v50 = vadd.f32 %v706_v48, %v650_v40  ;;  %v1835_v51 = vpop.f32.mrb[7].mxu1  ;;  %v958_v37 = vlaneseq }
 0x182   : > { %v2231_v52 = vadd.f32 %v1726_v47, %v773_v49  ;;  %v774_v53 = vadd.f32 %v769_v41, %v707_v50  ;;  %v959_v42 = vshrl.u32 %v958_v37, 7  ;;  %v1729_v49 = vld [vmem:[%s2402_s5] ss:$0 sm:$0xff]  ;;  %v1994_v37 = vld [vmem:[%s2406_s9 + $0x8] sm:$0xff]  }
 0x184   : > { %v798_v54 = vmul.f32 %v2231_v52, %v2231_v52  ;;  %v2235_v55 = vadd.f32 %v1726_v47, %v774_v53  ;;  %v787_v56 = vsel %vm786_vm4, %v2231_v52, 0.0  ;;  %v2301_v43 = vsub.s32 0, %v959_v42  ;;  %v1730_v53 = vld [vmem:[%s2403_s6] ss:$0 sm:$0xff]  ;;  %v1996_v42 = vld [vmem:[%s2406_s9 + $0x28] sm:$0xff]  }
 0x186   : > { %v788_v57 = vsel %vm786_vm4, %v2235_v55, 0.0  ;;  %v799_v58 = vmul.f32 %v2235_v55, %v2235_v55  ;;  %v800_v60 = vsel %vm786_vm4, %v798_v54, 0.0 }
 0x187   : > { %v789_v59 = vadd.f32 %v788_v57, %v787_v56 }
 0x188   : > { %v801_v61 = vsel %vm786_vm4, %v799_v58, 0.0 }
 0x189   : > { %v790_v62 = vrot.slane %v789_v59, 4  ;;  %v802_v63 = vadd.f32 %v801_v61, %v800_v60 }
 0x18b   : > { %v791_v0 = vadd.f32 %v790_v62, %v789_v59  ;;  %v803_v1 = vrot.slane %v802_v63, 4 }
 0x18d   : > { %v792_v2 = vrot.slane %v791_v0, 2  ;;  %v804_v4 = vadd.f32 %v803_v1, %v802_v63 }
 0x18f   : > { %v793_v5 = vadd.f32 %v792_v2, %v791_v0  ;;  %v805_v6 = vrot.slane %v804_v4, 2 }
 0x191   : > { %v794_v7 = vrot.slane %v793_v5, 1  ;;  %v806_v8 = vadd.f32 %v805_v6, %v804_v4 }
 0x193   : > { %v795_v9 = vadd.f32 %v794_v7, %v793_v5  ;;  %v807_v10 = vrot.slane %v806_v8, 1 }
 0x195   : > { %v797_v17 = vmul.f32 0.0625, %v795_v9  ;;  %v808_v18 = vadd.f32 %v807_v10, %v806_v8  ;;  %v1026_v10 = vld [vmem:[%s2405_s8] sm:$0x1] }
 0x197   : > { %1853 = vmatmul.mubr.msk.f32.vlgmr.msra.gmra.mrb[8].mxu1 %vm786_vm4, %v797_v17  ;;  %v809_v19 = vmul.f32 0.0625, %v808_v18 }
 0x198   : > { %1867 = vmatpush3.bf16.msra.mxu1 %v1983_v13  ;;  %1882 = vmatprep.mubr.msk.bf16.mxu1 %vm2029_vm3, %v2028_v3 }
 0x199   : > { %1864 = vmatmul.mubr.msk.f32.vlgmr.msra.gmra.mrb[4].mxu0 %vm786_vm4, %v809_v19  ;;  %1868 = vmatprep.subr.bf16.mxu1 %v2028_v3 }
 0x19a   : > { %1890 = vmatprep.mubr.msk.bf16.mxu0 %vm2029_vm3, %v2028_v3  ;;  %1887 = vmatpush3.bf16.msra.mxu0 %v1991_v29 }
 0x19b   : > { %1888 = vmatprep.subr.bf16.mxu0 %v2028_v3 }
 0x19c   : > { %1869 = vmatpush3.bf16.msra.mxu1 %v1984_v20 }
 0x19d   : > { %1870 = vmatprep.subr.bf16.mxu1 %v2028_v3 }
 0x19e   : > { %1889 = vmatpush3.bf16.msra.mxu0 %v1992_v30 }
 0x19f   : > { %1894 = vmatprep.subr.bf16.mxu0 %v2028_v3 }
 0x1a0   : > { %1871 = vmatpush3.bf16.msra.mxu1 %v1985_v21 }
 0x1a1   : > { %1872 = vmatprep.subr.bf16.mxu1 %v2028_v3 }
 0x1a4   : > { %1873 = vmatpush3.bf16.msra.mxu1 %v1986_v22 }
 0x1a5   : > { %1874 = vmatprep.subr.bf16.mxu1 %v2028_v3 }
 0x1a8   : > { %1875 = vmatpush3.bf16.msra.mxu1 %v1987_v23 }
 0x1a9   : > { %1876 = vmatprep.subr.bf16.mxu1 %v2028_v3 }
 0x1ac   : > { %1877 = vmatpush3.bf16.msra.mxu1 %v1988_v24 }
 0x1ad   : > { %1878 = vmatprep.subr.bf16.mxu1 %v2028_v3 }
 0x1b0   : > { %1879 = vmatpush3.bf16.msra.mxu1 %v1989_v25 }
 0x1b1   : > { %1880 = vmatprep.subr.bf16.mxu1 %v2028_v3 }
 0x1b4   : > { %1881 = vmatpush3.bf16.msra.mxu1 %v1990_v26 }
 0x1b5   : > { %1958 = vmatprep.subr.bf16.mxu1 %v2030_v34 }
 0x1b7   : > { %1883 = vmatmul.mubr.bf16.vlgmr.msra.gmra.mrb[12].mxu1 %v1009_v28 }
 0x1b8   : > { %1960 = vmatpush3.bf16.msra.mxu1 %v2208_v31  ;;  %1929 = vmatprep.mubr.msk.f32.mxu1 %vm2029_vm3, %v2028_v3 }
 0x1b9   : > { %1961 = vmatprep.subr.bf16.mxu1 %v2030_v34 }
 0x1bc   : > { %1963 = vmatpush3.bf16.msra.mxu1 %v2220_v35 }
 0x26a   : > { %v879_v32 = vpop.f32.mrb[8].mxu1 }
 0x26b   : > { %v956_v33 = vmul.f32 %v879_v32, %v879_v32  ;;  %v1854_v36 = vpop.f32.mrb[9].mxu1  ;;  %v961_v44 = vrot.slane %v879_v32, %v2301_v43 }
 0x26c   : > { %v952_v38 = vpop.f32.mrb[4].mxu0 }
 0x26d   : > { %v957_v39 = vsub.f32 %v952_v38, %v956_v33  ;;  %v1865_v40 = vpop.f32.mrb[5].mxu0  ;;  %v962_v46 = vsub.f32 %v2231_v52, %v961_v44  ;;  %v963_v47 = vsub.f32 %v2235_v55, %v961_v44  ;;  %v1993_v33 = vld [vmem:[%s2406_s9] sm:$0xff]  }
 0x26e   : > { %v1995_v40 = vld [vmem:[%s2406_s9 + $0x20] sm:$0xff]  }
 0x26f   : > { %v964_v41 = vadd.f32 1e-05, %v957_v39 }
 0x271   : > { %1999 = vrsqrt.f32 %v964_v41 }
 0x27b   : > { %v2000_v45 = vpop.eup %1999 }
 0x27c   : > { %v969_v48 = vrot.slane %v2000_v45, %v2301_v43 }
 0x27e   : > { %v970_v50 = vmul.f32 %v969_v48, %v962_v46  ;;  %v971_v51 = vmul.f32 %v969_v48, %v963_v47 }
 0x280   : > { %v978_v54 = vmul.f32 %v1729_v49, %v970_v50  ;;  %v979_v56 = vmul.f32 %v1729_v49, %v971_v51 }
 0x282   : > { %v986_v57 = vadd.f32 %v1730_v53, %v978_v54  ;;  %v987_v58 = vadd.f32 %v1730_v53, %v979_v56 }
 0x284   : > { %v988_v59 = vmin.f32 %v986_v57, 30.0  ;;  %v989_v52 = vmin.f32 %v987_v58, 30.0 }
 0x286   : > { %v990_v60 = vmul.f32 1.442695, %v988_v59  ;;  %v992_v55 = vmul.f32 1.442695, %v989_v52  ;;  %v1756_v59 = vld [vmem:[%s2407_s10] ss:$0 sm:$0xff] }
 0x288   : > { %2001 = vpow2.f32 %v990_v60 }
 0x289   : > { %2003 = vpow2.f32 %v992_v55 }
 0x28a   : > { %v1109_v61 = vpop.f32.mrb[12].mxu1 }
 0x28b   : > { %v1884_v62 = vpop.f32.mrb[13].mxu1  ;;  %v1110_v13 = vadd.f32 %v1109_v61, %v1026_v10 }
 0x28c   : > { %v1112_v63 = vpop.f32.mrb[14].mxu1 }
 0x28d   : > { %v1885_v0 = vpop.f32.mrb[15].mxu1  ;;  %v1118_v22 = vrot.slane %v1110_v13, %v2301_v43 }
 0x292   : > { %v2002_v1 = vpop.eup %2001 }
 0x293   : > { %v2004_v2 = vpop.eup %2003  ;;  %v994_v4 = vadd.f32 2.0, %v2002_v1 }
 0x294   : > { %v995_v5 = vadd.f32 2.0, %v2004_v2 }
 0x295   : > { %v996_v6 = vmul.f32 %v2002_v1, %v994_v4 }
 0x296   : > { %v997_v7 = vmul.f32 %v2004_v2, %v995_v5 }
 0x297   : > { %v1000_v8 = vadd.f32 2.0, %v996_v6  ;;  %v998_v17 = vmul.f32 %v996_v6, %v986_v57 }
 0x298   : > { %v1001_v9 = vadd.f32 2.0, %v997_v7  ;;  %v999_v19 = vmul.f32 %v997_v7, %v987_v58 }
 0x299   : > { %2005 = vrcp.f32 %v1000_v8 }
 0x29a   : > { %2007 = vrcp.f32 %v1001_v9 }
 0x2a3   : > { %v2006_v18 = vpop.eup %2005 }
 0x2a4   : > { %v2008_v20 = vpop.eup %2007  ;;  %v1003_v21 = vmul.f32 %v2006_v18, %v998_v17 }
 0x2a5   : > { %v1005_v23 = vmul.f32 %v2008_v20, %v999_v19 }
 0x2a6   : > { %v1006_v24 = vmul.f32 %v1003_v21, %v2165_v11 }
 0x2a7   : > { %v1007_v25 = vmul.f32 %v1005_v23, %v2172_v14 }
 0x2a8   : > { %v1119_v26 = vadd.f32 %v1118_v22, %v1006_v24  ;;  %v1997_v24 = vld [vmem:[%s2410_s13] sm:$0xff]  }
 0x2a9   : > { %v1120_v27 = vadd.f32 %v1118_v22, %v1007_v25 }
 0x2aa   : > { %v1121_v28 = vmul.f32 %v1119_v26, %v2165_v11 }
 0x2ab   : > { %v1122_v29 = vmul.f32 %v1120_v27, %v2172_v14  ;;  %v1998_v27 = vld [vmem:[%s2410_s13 + $0x8] ss:$0 sps:$4 sm:$0xff]  }
 0x2ac   : > { %1127 = vst.msk [vmem:[#allocation3 + $0x1] sm:$0xff] %vm786_vm4, %v1121_v28 }
 0x2ad   : > { %1128 = vst.msk [vmem:[#allocation3 + $0x9] sm:$0xff] %vm786_vm4, %v1122_v29  ;;  %v1577_v29 = vsel %vm609_vm2, %v1998_v27, 0 }
 0x2b3   : > { %v1136_v30 = vld [vmem:[#allocation3 + $0x1] sm:$0xff] }
 0x2b4   : > { %v1137_v32 = vld [vmem:[#allocation3 + $0x9] sm:$0xff]  ;;  %v1129_v38 = vld [vmem:[#allocation3] sm:$0xff] }
 0x2b5   : > { %v1138_v36 = vpack.c.bf16 %v1137_v32, %v1136_v30  ;;  %v1130_v39 = vld [vmem:[#allocation3 + $0x8] sm:$0xff] }
 0x2b6   : > { %v1131_v41 = vpack.c.bf16 %v1130_v39, %v1129_v38  ;;  %v1256_v44 = vld [vmem:[#allocation3 + $0x2] sm:$0xff]  ;;  %v1257_v45 = vld [vmem:[#allocation3 + $0xa] sm:$0xff] }
 0x2b7   : > { %1891 = vmatmul.mubr.msk.bf16.vlgmr.msra.gmra.mrb[8].mxu0 %vm786_vm4, %v1138_v36  ;;  %v1258_v46 = vpack.c.bf16 %v1257_v45, %v1256_v44 }
 0x2b8   : > { %1895 = vmatpush3.bf16.msra.mxu0 %v1993_v33  ;;  %1898 = vmatprep.mubr.msk.bf16.mxu0 %vm2029_vm3, %v2028_v3 }
 0x2b9   : > { %1896 = vmatprep.subr.bf16.mxu0 %v2028_v3 }
 0x2bc   : > { %1897 = vmatpush3.bf16.msra.mxu0 %v1994_v37 }
 0x2bd   : > { %1902 = vmatprep.subr.bf16.mxu0 %v2028_v3 }
 0x2bf   : > { %1899 = vmatmul.mubr.msk.bf16.vlgmr.msra.gmra.mrb[12].mxu0 %vm786_vm4, %v1131_v41 }
 0x2c0   : > { %1903 = vmatpush3.bf16.msra.mxu0 %v1995_v40  ;;  %1906 = vmatprep.mubr.msk.bf16.mxu0 %vm2029_vm3, %v2028_v3 }
 0x2c1   : > { %1904 = vmatprep.subr.bf16.mxu0 %v2028_v3 }
 0x2c4   : > { %1905 = vmatpush3.bf16.msra.mxu0 %v1996_v42 }
 0x2c5   : > { %1952 = vmatprep.subr.bf16.mxu0 %v2030_v34 }
 0x2c7   : > { %1907 = vmatmul.mubr.msk.bf16.vlgmr.msra.gmra.mrb[16].mxu0 %vm786_vm4, %v1258_v46 }
 0x2c8   : > { %1954 = vmatpush3.bf16.msra.mxu0 %v2208_v31  ;;  %1918 = vmatprep.mubr.msk.f32.mxu0 %vm2029_vm3, %v2028_v3 }
 0x2c9   : > { %1955 = vmatprep.subr.bf16.mxu0 %v2030_v34 }
 0x2cc   : > { %1957 = vmatpush3.bf16.msra.mxu0 %v2220_v35 }
 0x2cd   : > { %1932 = vmatprep.subr.bf16.mxu0 %v2028_v3 }
 0x38a   : > { %v1193_v47 = vpop.f32.mrb[8].mxu0 }
 0x38b   : > { %v1892_v48 = vpop.f32.mrb[9].mxu0 }
 0x38c   : > { %v1196_v49 = vpop.f32.mrb[10].mxu0 }
 0x38d   : > { %v1893_v50 = vpop.f32.mrb[11].mxu0 }
 0x392   : > { %v1249_v51 = vpop.f32.mrb[12].mxu0 }
 0x393   : > { %v1250_v53 = vadd.f32 %v1249_v51, %v1193_v47  ;;  %v1900_v54 = vpop.f32.mrb[13].mxu0 }
 0x394   : > { %v1252_v56 = vpop.f32.mrb[14].mxu0 }
 0x395   : > { %v1253_v57 = vadd.f32 %v1252_v56, %v1196_v49  ;;  %v1901_v58 = vpop.f32.mrb[15].mxu0  ;;  %v1760_v49 = vld [vmem:[%s2409_s12] ss:$0 sm:$0xff] }
 0x39a   : > { %v1313_v31 = vpop.f32.mrb[16].mxu0 }
 0x39b   : > { %v1320_v34 = vadd.f32 %v1313_v31, %v1250_v53  ;;  %v1908_v52 = vpop.f32.mrb[17].mxu0 }
 0x39c   : > { %v1316_v35 = vpop.f32.mrb[18].mxu0 }
 0x39d   : > { %v1329_v60 = vadd.f32 %v1756_v59, %v1320_v34  ;;  %v1321_v55 = vadd.f32 %v1316_v35, %v1253_v57  ;;  %v1909_v61 = vpop.f32.mrb[19].mxu0 }
 0x39f   : > { %v1343_v62 = vmul.f32 %v1329_v60, %v1329_v60  ;;  %v1330_v63 = vadd.f32 %v1756_v59, %v1321_v55  ;;  %v1333_v0 = vsel %vm786_vm4, %v1329_v60, 0.0 }
 0x3a1   : > { %v1334_v1 = vsel %vm786_vm4, %v1330_v63, 0.0  ;;  %v1344_v2 = vmul.f32 %v1330_v63, %v1330_v63  ;;  %v1345_v5 = vsel %vm786_vm4, %v1343_v62, 0.0 }
 0x3a2   : > { %v1335_v4 = vadd.f32 %v1334_v1, %v1333_v0  ;;  %v1761_v0 = vld [vmem:[%s2411_s14] ss:$0 sm:$0xff] }
 0x3a3   : > { %v1346_v6 = vsel %vm786_vm4, %v1344_v2, 0.0 }
 0x3a4   : > { %v1336_v7 = vrot.slane %v1335_v4, 4  ;;  %v1347_v8 = vadd.f32 %v1346_v6, %v1345_v5 }
 0x3a6   : > { %v1337_v9 = vadd.f32 %v1336_v7, %v1335_v4  ;;  %v1348_v10 = vrot.slane %v1347_v8, 4 }
 0x3a8   : > { %v1338_v13 = vrot.slane %v1337_v9, 2  ;;  %v1349_v17 = vadd.f32 %v1348_v10, %v1347_v8 }
 0x3aa   : > { %v1339_v18 = vadd.f32 %v1338_v13, %v1337_v9  ;;  %v1350_v19 = vrot.slane %v1349_v17, 2 }
 0x3ac   : > { %v1340_v20 = vrot.slane %v1339_v18, 1  ;;  %v1351_v21 = vadd.f32 %v1350_v19, %v1349_v17 }
 0x3ae   : > { %v1341_v22 = vadd.f32 %v1340_v20, %v1339_v18  ;;  %v1352_v23 = vrot.slane %v1351_v21, 1 }
 0x3b0   : > { %v1342_v25 = vmul.f32 0.0625, %v1341_v22  ;;  %v1353_v26 = vadd.f32 %v1352_v23, %v1351_v21 }
 0x3b2   : > { %1919 = vmatmul.mubr.msk.f32.vlgmr.msra.gmra.mrb[6].mxu0 %vm786_vm4, %v1342_v25  ;;  %v1354_v28 = vmul.f32 0.0625, %v1353_v26 }
 0x3b3   : > { %1933 = vmatpush3.bf16.msra.mxu0 %v1997_v24  ;;  %1936 = vmatprep.mubr.msk.bf16.mxu0 %vm2029_vm3, %v2028_v3 }
 0x3b4   : > { %1930 = vmatmul.mubr.msk.f32.vlgmr.msra.gmra.mrb[10].mxu1 %vm786_vm4, %v1354_v28  ;;  %1934 = vmatprep.subr.bf16.mxu0 %v2028_v3 }
 0x3b7   : > { %1935 = vmatpush3.bf16.msra.mxu0 %v1577_v29 }
 0x3ba   : > { %1937 = vmatmul.mubr.msk.bf16.vlgmr.msra.gmra.mrb[20].mxu0 %vm577_vm0, %v1553_v16 }
 0x485   : > { %v1424_v30 = vpop.f32.mrb[6].mxu0 }
 0x486   : > { %v1501_v32 = vmul.f32 %v1424_v30, %v1424_v30  ;;  %v1920_v33 = vpop.f32.mrb[7].mxu0  ;;  %v1506_v44 = vrot.slane %v1424_v30, %v2301_v43 }
 0x487   : > { %v1497_v36 = vpop.f32.mrb[10].mxu1 }
 0x488   : > { %v1502_v37 = vsub.f32 %v1497_v36, %v1501_v32  ;;  %v1931_v38 = vpop.f32.mrb[11].mxu1  ;;  %v1507_v46 = vsub.f32 %v1329_v60, %v1506_v44  ;;  %v1508_v47 = vsub.f32 %v1330_v63, %v1506_v44 }
 0x48a   : > { %v1509_v39 = vadd.f32 1e-05, %v1502_v37 }
 0x48c   : > { %2009 = vrsqrt.f32 %v1509_v39 }
 0x48d   : > { %v1613_v40 = vpop.f32.mrb[20].mxu0 }
 0x48e   : > { %v1938_v41 = vpop.f32.mrb[21].mxu0  ;;  %v1614_v7 = vadd.f32 %v1761_v0, %v1613_v40 }
 0x48f   : > { %v1616_v42 = vpop.f32.mrb[22].mxu0 }
 0x490   : > { %v1939_v3 = vpop.f32.mrb[23].mxu0  ;;  %v1617_v9 = vadd.f32 %v1761_v0, %v1616_v42 }
 0x496   : > { %v2010_v45 = vpop.eup %2009 }
 0x497   : > { %v1514_v12 = vrot.slane %v2010_v45, %v2301_v43 }
 0x499   : > { %v1515_v16 = vmul.f32 %v1514_v12, %v1507_v46  ;;  %v1516_v48 = vmul.f32 %v1514_v12, %v1508_v47 }
 0x49b   : > { %v1523_v50 = vmul.f32 %v1759_v15, %v1515_v16  ;;  %v1524_v51 = vmul.f32 %v1759_v15, %v1516_v48 }
 0x49d   : > { %v1531_v53 = vadd.f32 %v1760_v49, %v1523_v50  ;;  %v1532_v54 = vadd.f32 %v1760_v49, %v1524_v51 }
 0x49f   : > { %v1533_v56 = vmin.f32 %v1531_v53, 30.0  ;;  %v1534_v57 = vmin.f32 %v1532_v54, 30.0 }
 0x4a1   : > { %v1535_v58 = vmul.f32 1.442695, %v1533_v56  ;;  %v1537_v31 = vmul.f32 1.442695, %v1534_v57 }
 0x4a3   : > { %2011 = vpow2.f32 %v1535_v58 }
 0x4a4   : > { %2013 = vpow2.f32 %v1537_v31 }
 0x4ad   : > { %v2012_v43 = vpop.eup %2011 }
 0x4ae   : > { %v2014_v59 = vpop.eup %2013  ;;  %v1539_v34 = vadd.f32 2.0, %v2012_v43 }
 0x4af   : > { %v1540_v52 = vadd.f32 2.0, %v2014_v59 }
 0x4b0   : > { %v1541_v35 = vmul.f32 %v2012_v43, %v1539_v34 }
 0x4b1   : > { %v1542_v60 = vmul.f32 %v2014_v59, %v1540_v52 }
 0x4b2   : > { %v1545_v55 = vadd.f32 2.0, %v1541_v35  ;;  %v1543_v62 = vmul.f32 %v1541_v35, %v1531_v53 }
 0x4b3   : > { %v1546_v61 = vadd.f32 2.0, %v1542_v60  ;;  %v1544_v1 = vmul.f32 %v1542_v60, %v1532_v54 }
 0x4b4   : > { %2015 = vrcp.f32 %v1545_v55 }
 0x4b5   : > { %2017 = vrcp.f32 %v1546_v61 }
 0x4be   : > { %v2016_v63 = vpop.eup %2015 }
 0x4bf   : > { %v2018_v2 = vpop.eup %2017  ;;  %v1548_v4 = vmul.f32 %v2016_v63, %v1543_v62 }
 0x4c0   : > { %v1550_v5 = vmul.f32 %v2018_v2, %v1544_v1 }
 0x4c1   : > { %v1551_v6 = vmul.f32 %v1548_v4, %v2165_v11 }
 0x4c2   : > { %v1552_v8 = vmul.f32 %v1550_v5, %v2172_v14 }
 0x4c3   : > { %v1620_v10 = vadd.f32 %v1614_v7, %v1551_v6 }
 0x4c4   : > { %v1621_v13 = vadd.f32 %v1617_v9, %v1552_v8 }
 0x4c5   : > { %1622 = vst.msk [vmem:[%s555_s29] sm:$0xff] %vm786_vm4, %v1620_v10 }
 0x4c6   : > { %1623 = vst.msk [vmem:[%s555_s29 + $0x8] sm:$0xff] %vm786_vm4, %v1621_v13 }
 0x4c7 PF: > { %s26_s21 = sadd.s32 1, %s2025_s21  }
 0x4c8   : > { %p23_p4 = scmp.ge.s32.totalorder %s26_s21, 4  }
 0x4ca   :  { %25 = sbr.rel (!%p23_p4) target bundleno = 2 (0x2), region = 124 }

// kernel: conditional_decoder_forward.22
= control target key start
LH: loop header
LB: loop body
LE: loop exit
PB: predicated region body
PF: predicated region fallthrough
CT: control target
= control target key end

     0   :  { %s599_s15 = smov 0   ;;  %s654_s0 = inlined_call_operand.vmem [shape: f32[2,8,32], index: 0, kind: input, shape index: {}]   ;;  %s655_s1 = inlined_call_operand.vmem [shape: f32[2,8,1], index: 1, kind: input, shape index: {}]   ;;  %s656_s2 = inlined_call_operand.vmem [shape: bf16[3,32,32], index: 2, kind: input, shape index: {}]   ;;  %s657_s3 = inlined_call_operand.vmem [shape: f32[1,32], index: 3, kind: input, shape index: {}]   ;;  %s658_s4 = inlined_call_operand.vmem [shape: f32[2,8,32], index: 4, kind: output, shape index: {}]  }
   0x1 LB: > { %s484_s16 = sadd.s32 4294967295, %s569_s15   ;;  %p488_p0 = scmp.ge.s32.totalorder %s569_s15, 1  ;;  %s569_s15 = sphi %s599_s15, %s14_s15  }
   0x2   : > { %p170_p1 = scmp.lt.s32.totalorder %s569_s15, 3 }
   0x4   : > { %p171_p2 = pnand %p488_p0, %p170_p1 }
   0x5   : > { %p198_p3 = scmp.lt.s32.totalorder (!%p171_p2), %s484_s16, 1  ;;  %vm219_vm0 = vcmask (!%p171_p2), 261120   ;;  %vm221_vm1 = vcmask (!%p171_p2), 254976   ;;  %v571_v0 = vmov (!%p171_p2), 0   ;;  %v572_v1 = vmov (!%p171_p2), 0.0   ;;  %v557_v3 = vld [vmem:[%s656_s2 + $0x10] sm:$0xff] (!%p171_p2)  }
   0x6   : > { %174 = sbr.rel (%p171_p2) target bundleno = 382 (0x17e), region = 36  ;;  %556 = vset.pattern.permute.xlu0 (!%p171_p2), %v571_v0  ;;  %220 = vst.msk [vmem:[#allocation2] sm:$0xff] (!%p171_p2), %vm219_vm0, %v572_v1  ;;  %521 = vmatprep.subr.bf16.mxu0 (!%p171_p2), %v572_v1  ;;  %v558_v4 = vld [vmem:[%s656_s2] sm:$0xff] (!%p171_p2)   ;;  %vm573_vm2 = vmmov (!%p171_p2), 0   ;;  %v559_v5 = vld [vmem:[%s656_s2 + $0x18] sm:$0xff] (!%p171_p2)   ;;  %v560_v6 = vld [vmem:[%s656_s2 + $0x8] sm:$0xff] (!%p171_p2)  }
   0x7   : > { %222 = vst.msk [vmem:[#allocation2 + $0x8] sm:$0x3] (!%p171_p2), %vm221_vm1, %v572_v1  ;;  %529 = vmatprep.subr.bf16.mxu1 (!%p171_p2), %v572_v1  ;;  %525 = vmatprep.mubr.msk.bf16.mxu0 (!%p171_p2), %vm573_vm2, %v572_v1  ;;  %v561_v12 = vld [vmem:[%s656_s2 + $0x20] sm:$0xff] (!%p171_p2)   ;;  %v562_v15 = vld [vmem:[%s656_s2 + $0x28] sm:$0xff] (!%p171_p2)  }
   0x8   : > { %533 = vmatprep.mubr.msk.bf16.mxu1 (!%p171_p2), %vm573_vm2, %v572_v1  ;;  %522 = vmatpush3.bf16.msra.mxu0 (!%p171_p2), %v557_v3  ;;  %v509_v28 = vld [vmem:[%s657_s3] ss:$0 sm:$0xff] (!%p171_p2) }
   0x9   : > { %530 = vmatpush3.bf16.msra.mxu1 (!%p171_p2), %v558_v4  ;;  %523 = vmatprep.subr.bf16.mxu0 (!%p171_p2), %v572_v1 }
   0xa   : > { %531 = vmatprep.subr.bf16.mxu1 (!%p171_p2), %v572_v1 }
   0xc   : > { %524 = vmatpush3.bf16.msra.mxu0 (!%p171_p2), %v559_v5 }
   0xd   : > { %s660_s16 = smov (!%p198_p3, %s484_s16), 1  ;;  %532 = vmatpush3.bf16.msra.mxu1 %v560_v6  ;;  %537 = vmatprep.subr.bf16.mxu0 %v572_v1 }
   0xe   : > { %s608_s17 = sshll.u32 %s660_s16, 3 }
   0xf   : > { %s205_s20 = scalar_lea.vmem %s655_s1, %s608_s17  ;;  %s201_s5 = scalar_lea.vmem %s654_s0, %s608_s17 }
  0x10   : > { %v212_v2 = vld [vmem:[%s205_s20] sm:$0xff]  ;;  %s209_s14 = scalar_lea.vmem %s658_s4, %s608_s17 }
  0x11   : > { %215 = vperm.xlu0 %556, %v212_v2   ;;  %v211_v7 = vld [vmem:[%s201_s5] sm:$0xff] }
  0x90   : > { %v216_v8 = vpop.permute.xlu0 %215 }
  0x91   : > { %v218_v9 = vmul.f32 %v216_v8, %v211_v7 }
  0x93   : > { %223 = vst.msk [vmem:[#allocation2 + $0x1] sm:$0xff] %vm219_vm0, %v218_v9 }
  0x9a   : > { %v230_v10 = vld [vmem:[#allocation2 + $0x1] sm:$0xff] }
  0x9b   : > { %v224_v11 = vld [vmem:[#allocation2] sm:$0xff]  ;;  %v231_v13 = vpack.c.bf16 %v230_v10, %v230_v10 }
  0x9c   : > { %v225_v14 = vpack.c.bf16 %v224_v11, %v224_v11  ;;  %v347_v16 = vld [vmem:[#allocation2 + $0x2] sm:$0xff] }
  0x9d   : > { %526 = vmatmul.mubr.msk.bf16.vlgmr.msra.gmra.mrb[0].mxu0 %vm219_vm0, %v231_v13  ;;  %v348_v17 = vpack.c.bf16 %v347_v16, %v347_v16 }
  0x9e   : > { %534 = vmatmul.mubr.msk.bf16.vlgmr.msra.gmra.mrb[0].mxu1 %vm219_vm0, %v225_v14  ;;  %538 = vmatpush3.bf16.msra.mxu0 %v561_v12 }
  0x9f   : > { %541 = vmatprep.mubr.msk.bf16.mxu0 %vm573_vm2, %v572_v1  ;;  %539 = vmatprep.subr.bf16.mxu0 %v572_v1 }
  0xa2   : > { %540 = vmatpush3.bf16.msra.mxu0 %v562_v15 }
  0xa5   : > { %542 = vmatmul.mubr.msk.bf16.vlgmr.msra.gmra.mrb[4].mxu0 %vm219_vm0, %v348_v17 }
 0x170   : > { %v286_v18 = vpop.f32.mrb[0].mxu0 }
 0x171   : > { %v341_v19 = vpop.f32.mrb[0].mxu1  ;;  %v527_v21 = vpop.f32.mrb[1].mxu0 }
 0x172   : > { %v342_v20 = vadd.f32 %v341_v19, %v286_v18  ;;  %v535_v22 = vpop.f32.mrb[1].mxu1  ;;  %v289_v23 = vpop.f32.mrb[2].mxu0 }
 0x173   : > { %v344_v24 = vpop.f32.mrb[2].mxu1  ;;  %v528_v25 = vpop.f32.mrb[3].mxu0 }
 0x174   : > { %v536_v26 = vpop.f32.mrb[3].mxu1 }
 0x178   : > { %v403_v27 = vpop.f32.mrb[4].mxu0 }
 0x179   : > { %v409_v29 = vadd.f32 %v403_v27, %v342_v20  ;;  %v543_v30 = vpop.f32.mrb[5].mxu0 }
 0x17a   : > { %v406_v31 = vpop.f32.mrb[6].mxu0 }
 0x17b   : > { %v417_v32 = vadd.f32 %v509_v28, %v409_v29  ;;  %v544_v33 = vpop.f32.mrb[7].mxu0 }
 0x17d   : > { %418 = vst.msk [vmem:[%s209_s14] sm:$0xff] %vm219_vm0, %v417_v32 }
 0x17e PF: > { %s14_s15 = sadd.s32 1, %s569_s15  }
 0x17f   : > { %p11_p4 = scmp.ge.s32.totalorder %s14_s15, 4  }
 0x181   :  { %13 = sbr.rel (!%p11_p4) target bundleno = 1 (0x1), region = 71 }

// kernel: conditional_decoder_forward.20
= control target key start
LH: loop header
LB: loop body
LE: loop exit
PB: predicated region body
PF: predicated region fallthrough
CT: control target
= control target key end

     0   :  { %s2024_s21 = smov 0   ;;  %s2272_s0 = inlined_call_operand.vmem [shape: f32[2,8,32], index: 0, kind: input, shape index: {}]   ;;  %s2273_s1 = inlined_call_operand.vmem [shape: f32[2,8,1], index: 1, kind: input, shape index: {}]   ;;  %s2274_s2 = inlined_call_operand.vmem [shape: f32[2,1,128], index: 2, kind: input, shape index: {}]   ;;  %s2275_s3 = inlined_call_operand.vmem [shape: bf16[3,32,32], index: 3, kind: input, shape index: {}]   ;;  %s2276_s4 = inlined_call_operand.vmem [shape: f32[1,32], index: 4, kind: input, shape index: {}, may-alias: {4,6,8,10,12,14}]   ;;  %s2277_s5 = inlined_call_operand.vmem [shape: f32[1,32], index: 5, kind: input, shape index: {}, may-alias: {5,11}]   ;;  %s2278_s6 = inlined_call_operand.vmem [shape: f32[1,32], index: 6, kind: input, shape index: {}, may-alias: {4,6,8,10,12,14}]   ;;  %s2279_s7 = inlined_call_operand.vmem [shape: bf16[128,32], index: 7, kind: input, shape index: {}]   ;;  %s2280_s8 = inlined_call_operand.vmem [shape: f32[1,32], index: 8, kind: input, shape index: {}, may-alias: {4,6,8,10,12,14}]   ;;  %s2281_s9 = inlined_call_operand.vmem [shape: bf16[3,32,32], index: 9, kind: input, shape index: {}]   ;;  %s2282_s10 = inlined_call_operand.vmem [shape: f32[1,32], index: 10, kind: input, shape index: {}, may-alias: {4,6,8,10,12,14}]   ;;  %s2283_s11 = inlined_call_operand.vmem [shape: f32[1,32], index: 11, kind: input, shape index: {}, may-alias: {5,11}]   ;;  %s2284_s12 = inlined_call_operand.vmem [shape: f32[1,32], index: 12, kind: input, shape index: {}, may-alias: {4,6,8,10,12,14}]   ;;  %s2285_s13 = inlined_call_operand.vmem [shape: bf16[32,32], index: 13, kind: input, shape index: {}]   ;;  %s2286_s14 = inlined_call_operand.vmem [shape: f32[1,32], index: 14, kind: input, shape index: {}, may-alias: {4,6,8,10,12,14}]   ;;  %s2287_s15 = inlined_call_operand.vmem [shape: f32[32,32], index: 15, kind: input, shape index: {}]   ;;  %s2288_s16 = inlined_call_operand.vmem [shape: f32[2,8,32], index: 16, kind: output, shape index: {}]  }
   0x1   :  { %2289 = sst [smem:[#allocation4_spill]] %s2272_s0 }
   0x2 LB: > { %s1620_s22 = sadd.s32 4294967295, %s1933_s21   ;;  %p1624_p0 = scmp.ge.s32.totalorder %s1933_s21, 1  ;;  %s1933_s21 = sphi %s2024_s21, %s26_s21  }
   0x3   : > { %p478_p1 = scmp.lt.s32.totalorder %s1933_s21, 3 }
   0x5   : > { %p479_p2 = pnand %p1624_p0, %p478_p1 }
   0x6   : > { %p533_p3 = scmp.lt.s32.totalorder (!%p479_p2), %s1620_s22, 1  ;;  %vm561_vm0 = vcmask (!%p479_p2), 261120   ;;  %vm563_vm1 = vcmask (!%p479_p2), 254976   ;;  %v1935_v0 = vmov (!%p479_p2), 0   ;;  %v1936_v1 = vmov (!%p479_p2), 0.0   ;;  %v1893_v3 = vld [vmem:[%s2275_s3 + $0x10] sm:$0xff] (!%p479_p2)  }
   0x7   : > { %482 = sbr.rel (%p479_p2) target bundleno = 1209 (0x4b9), region = 84  ;;  %1892 = vset.pattern.permute.xlu0 (!%p479_p2), %v1935_v0  ;;  %562 = vst.msk [vmem:[#allocation2] sm:$0xff] (!%p479_p2), %vm561_vm0, %v1936_v1  ;;  %1077 = vst.msk [vmem:[#allocation3] sm:$0xff] (!%p479_p2), %vm561_vm0, %v1936_v1  ;;  %1736 = vmatprep.subr.bf16.mxu1 (!%p479_p2), %v1936_v1  ;;  %v1894_v4 = vld [vmem:[%s2275_s3 + $0x20] sm:$0xff] (!%p479_p2)   ;;  %v1895_v5 = vld [vmem:[%s2275_s3 + $0x18] sm:$0xff] (!%p479_p2)   ;;  %vm1937_vm2 = vmmov (!%p479_p2), 0  }
   0x8   : > { %564 = vst.msk [vmem:[#allocation2 + $0x8] sm:$0x3] (!%p479_p2), %vm563_vm1, %v1936_v1  ;;  %1078 = vst.msk [vmem:[#allocation3 + $0x8] sm:$0x3] (!%p479_p2), %vm563_vm1, %v1936_v1  ;;  %1752 = vmatprep.subr.bf16.mxu0 (!%p479_p2), %v1936_v1  ;;  %v1896_v6 = vld [vmem:[%s2275_s3 + $0x28] sm:$0xff] (!%p479_p2)   ;;  %1740 = vmatprep.mubr.msk.bf16.mxu1 (!%p479_p2), %vm1937_vm2, %v1936_v1  ;;  %s2290_s25 = sld [smem:[#allocation4_spill]] (!%p479_p2) }
   0x9   : > { %1756 = vmatprep.mubr.msk.bf16.mxu0 (!%p479_p2), %vm1937_vm2, %v1936_v1  ;;  %1737 = vmatpush3.bf16.msra.mxu1 (!%p479_p2), %v1893_v3  ;;  %v1897_v11 = vld [vmem:[%s2275_s3] sm:$0xff] (!%p479_p2)   ;;  %v1898_v15 = vld [vmem:[%s2275_s3 + $0x8] sm:$0xff] (!%p479_p2)   ;;  %v1938_v21 = vmov (!%p479_p2), 0.0|0.0   ;;  %v559_v22 = vld [vmem:[%s2287_s15 + $0x10] sm:$0xff] (!%p479_p2) }
   0xa   : > { %1753 = vmatpush3.bf16.msra.mxu0 (!%p479_p2), %v1894_v4  ;;  %1738 = vmatprep.subr.bf16.mxu1 (!%p479_p2), %v1936_v1  ;;  %v557_v18 = vld [vmem:[%s2287_s15] sm:$0xff] (!%p479_p2)  ;;  %v558_v19 = vld [vmem:[%s2287_s15 + $0x8] sm:$0xff] (!%p479_p2)  ;;  %v560_v23 = vld [vmem:[%s2287_s15 + $0x18] sm:$0xff] (!%p479_p2) }
   0xb   : > { %1754 = vmatprep.subr.bf16.mxu0 (!%p479_p2), %v1936_v1  ;;  %v2101_v20 = vpack.c.bf16 (!%p479_p2), %v558_v19, %v557_v18  ;;  %v2115_v24 = vpack.c.bf16 (!%p479_p2), %v560_v23, %v559_v22  ;;  %v1645_v36 = vld [vmem:[%s2276_s4] ss:$0 sm:$0xff] (!%p479_p2)  ;;  %v1900_v59 = vld [vmem:[%s2279_s7 + $0x8] sm:$0xff] (!%p479_p2)   ;;  %v1901_v60 = vld [vmem:[%s2279_s7 + $0x10] sm:$0xff] (!%p479_p2)  }
   0xc   : > { %v1899_v55 = vld [vmem:[%s2279_s7] sm:$0xff] (!%p479_p2)   ;;  %v1902_v61 = vld [vmem:[%s2279_s7 + $0x18] sm:$0xff] (!%p479_p2)   ;;  %v1904_v63 = vld [vmem:[%s2279_s7 + $0x28] sm:$0xff] (!%p479_p2)  }
   0xd   : > { %1739 = vmatpush3.bf16.msra.mxu1 (!%p479_p2), %v1895_v5  ;;  %v1903_v62 = vld [vmem:[%s2279_s7 + $0x20] sm:$0xff] (!%p479_p2)   ;;  %v1905_v0 = vld [vmem:[%s2279_s7 + $0x30] sm:$0xff] (!%p479_p2)   ;;  %v1906_v3 = vld [vmem:[%s2279_s7 + $0x38] sm:$0xff] (!%p479_p2)  }
   0xe   : > { %s2292_s22 = smov (!%p533_p3, %s1620_s22), 1  ;;  %1755 = vmatpush3.bf16.msra.mxu0 %v1896_v6  ;;  %1744 = vmatprep.subr.bf16.mxu1 %v1936_v1  ;;  %v1907_v5 = vld [vmem:[%s2281_s9 + $0x10] sm:$0xff]   ;;  %v1908_v6 = vld [vmem:[%s2281_s9 + $0x18] sm:$0xff]  }
   0xf   : > { %s2043_s23 = sshll.u32 %s2292_s22, 3  ;;  %1862 = vmatprep.subr.bf16.mxu0 %v1938_v21  ;;  %s543_s18 = scalar_lea.vmem %s2274_s2, %s2292_s22 }
  0x10   : > { %s540_s26 = scalar_lea.vmem %s2273_s1, %s2043_s23  ;;  %s547_s29 = scalar_lea.vmem %s2288_s16, %s2043_s23 }
  0x11   : > { %v550_v2 = vld [vmem:[%s540_s26] sm:$0xff]  ;;  %s536_s26 = scalar_lea.vmem %s2290_s25, %s2043_s23 }
  0x12   : > { %553 = vperm.xlu0 %1892, %v550_v2   ;;  %v549_v7 = vld [vmem:[%s536_s26] sm:$0xff] }
  0x13   : > { %v964_v2 = vld [vmem:[%s543_s18] sm:$0x1] }
  0x14   : > { %v965_v4 = vpack.c.bf16 %v964_v2, %v964_v2 }
  0x91   : > { %v2072_v8 = vpop.permute.xlu0 %553 }
  0x92   : > { %v2075_v9 = vmul.f32 %v2072_v8, %v549_v7 }
  0x94   : > { %565 = vst.msk [vmem:[#allocation2 + $0x1] sm:$0xff] %vm561_vm0, %v2075_v9 }
  0x9b   : > { %v572_v10 = vld [vmem:[#allocation2 + $0x1] sm:$0xff] }
  0x9c   : > { %v689_v12 = vld [vmem:[#allocation2 + $0x2] sm:$0xff]  ;;  %v573_v13 = vpack.c.bf16 %v572_v10, %v572_v10 }
  0x9d   : > { %v690_v14 = vpack.c.bf16 %v689_v12, %v689_v12  ;;  %v566_v16 = vld [vmem:[#allocation2] sm:$0xff]  ;;  %v928_v12 = vlaneseq }
  0x9e   : > { %1741 = vmatmul.mubr.msk.bf16.vlgmr.msra.gmra.mrb[0].mxu1 %vm561_vm0, %v573_v13  ;;  %v567_v17 = vpack.c.bf16 %v566_v16, %v566_v16 }
  0x9f   : > { %1757 = vmatmul.mubr.msk.bf16.vlgmr.msra.gmra.mrb[0].mxu0 %vm561_vm0, %v690_v14  ;;  %1745 = vmatpush3.bf16.msra.mxu1 %v1897_v11 }
  0xa0   : > { %1748 = vmatprep.mubr.msk.bf16.mxu1 %vm1937_vm2, %v1936_v1  ;;  %1746 = vmatprep.subr.bf16.mxu1 %v1936_v1 }
  0xa1   : > { %1779 = vmatprep.mubr.msk.f32.mxu0 %vm1937_vm2, %v1936_v1  ;;  %1864 = vmatpush3.bf16.msra.mxu0 %v2101_v20 }
  0xa2   : > { %1865 = vmatprep.subr.bf16.mxu0 %v1938_v21 }
  0xa3   : > { %1747 = vmatpush3.bf16.msra.mxu1 %v1898_v15 }
  0xa4   : > { %1856 = vmatprep.subr.bf16.mxu1 %v1938_v21 }
  0xa5   : > { %1867 = vmatpush3.bf16.msra.mxu0 %v2115_v24 }
  0xa6   : > { %1749 = vmatmul.mubr.msk.bf16.vlgmr.msra.gmra.mrb[4].mxu1 %vm561_vm0, %v567_v17  ;;  %1802 = vmatprep.subr.bf16.mxu0 %v1936_v1  ;;  %v929_v17 = vshrl.u32 %v928_v12, 7 }
  0xa7   : > { %1768 = vmatprep.mubr.msk.f32.mxu1 %vm1937_vm2, %v1936_v1  ;;  %1858 = vmatpush3.bf16.msra.mxu1 %v2101_v20 }
  0xa8   : > { %1859 = vmatprep.subr.bf16.mxu1 %v1938_v21  ;;  %v2186_v18 = vsub.s32 0, %v929_v17 }
  0xab   : > { %1861 = vmatpush3.bf16.msra.mxu1 %v2115_v24 }
  0xac   : > { %1782 = vmatprep.subr.bf16.mxu1 %v1936_v1 }
 0x171   : > { %v628_v25 = vpop.f32.mrb[0].mxu1 }
 0x172   : > { %v745_v26 = vpop.f32.mrb[0].mxu0  ;;  %v1742_v27 = vpop.f32.mrb[1].mxu1 }
 0x173   : > { %v1758_v28 = vpop.f32.mrb[1].mxu0  ;;  %v631_v29 = vpop.f32.mrb[2].mxu1 }
 0x174   : > { %v748_v30 = vpop.f32.mrb[2].mxu0  ;;  %v1743_v31 = vpop.f32.mrb[3].mxu1  ;;  %v1649_v28 = vld [vmem:[%s2278_s6] ss:$0 sm:$0xff] }
 0x175   : > { %v1759_v32 = vpop.f32.mrb[3].mxu0 }
 0x179   : > { %v683_v33 = vpop.f32.mrb[4].mxu1 }
 0x17a   : > { %v684_v34 = vadd.f32 %v683_v33, %v628_v25  ;;  %v1750_v35 = vpop.f32.mrb[5].mxu1 }
 0x17b   : > { %v686_v37 = vpop.f32.mrb[6].mxu1 }
 0x17c   : > { %v751_v38 = vadd.f32 %v745_v26, %v684_v34  ;;  %v1751_v39 = vpop.f32.mrb[7].mxu1  ;;  %v1648_v26 = vld [vmem:[%s2277_s5] ss:$0 sm:$0xff] }
 0x17e   : > { %v2124_v40 = vadd.f32 %v1645_v36, %v751_v38 }
 0x180   : > { %v762_v41 = vsel %vm561_vm0, %v2124_v40, 0.0  ;;  %v771_v42 = vmul.f32 %v2124_v40, %v2124_v40 }
 0x181   : > { %v763_v43 = vrot.slane %v762_v41, 4 }
 0x182   : > { %v772_v44 = vsel %vm561_vm0, %v771_v42, 0.0 }
 0x183   : > { %v764_v45 = vadd.f32 %v763_v43, %v762_v41  ;;  %v773_v46 = vrot.slane %v772_v44, 4  ;;  %v982_v41 = vld [vmem:[%s2280_s8] sm:$0x1] }
 0x185   : > { %v765_v47 = vrot.slane %v764_v45, 2  ;;  %v774_v48 = vadd.f32 %v773_v46, %v772_v44 }
 0x187   : > { %v766_v49 = vadd.f32 %v765_v47, %v764_v45  ;;  %v775_v50 = vrot.slane %v774_v48, 2 }
 0x189   : > { %v767_v51 = vrot.slane %v766_v49, 1  ;;  %v776_v52 = vadd.f32 %v775_v50, %v774_v48 }
 0x18b   : > { %v768_v53 = vadd.f32 %v767_v51, %v766_v49  ;;  %v777_v54 = vrot.slane %v776_v52, 1  ;;  %v1909_v51 = vld [vmem:[%s2281_s9] sm:$0xff]  }
 0x18d   : > { %v770_v56 = vmul.f32 0.125, %v768_v53  ;;  %v778_v57 = vadd.f32 %v777_v54, %v776_v52  ;;  %v1910_v53 = vld [vmem:[%s2281_s9 + $0x8] sm:$0xff]  }
 0x18f   : > { %1769 = vmatmul.mubr.msk.f32.vlgmr.msra.gmra.mrb[8].mxu1 %vm561_vm0, %v770_v56  ;;  %v779_v58 = vmul.f32 0.125, %v778_v57  ;;  %v1912_v57 = vld [vmem:[%s2281_s9 + $0x28] sm:$0xff]  }
 0x190   : > { %1783 = vmatpush3.bf16.msra.mxu1 %v1899_v55  ;;  %1798 = vmatprep.mubr.msk.bf16.mxu1 %vm1937_vm2, %v1936_v1  ;;  %v1911_v55 = vld [vmem:[%s2281_s9 + $0x20] sm:$0xff]  }
 0x191   : > { %1780 = vmatmul.mubr.msk.f32.vlgmr.msra.gmra.mrb[4].mxu0 %vm561_vm0, %v779_v58  ;;  %1784 = vmatprep.subr.bf16.mxu1 %v1936_v1 }
 0x192   : > { %1806 = vmatprep.mubr.msk.bf16.mxu0 %vm1937_vm2, %v1936_v1  ;;  %1803 = vmatpush3.bf16.msra.mxu0 %v1907_v5 }
 0x193   : > { %1804 = vmatprep.subr.bf16.mxu0 %v1936_v1 }
 0x194   : > { %1785 = vmatpush3.bf16.msra.mxu1 %v1900_v59 }
 0x195   : > { %1786 = vmatprep.subr.bf16.mxu1 %v1936_v1 }
 0x196   : > { %1805 = vmatpush3.bf16.msra.mxu0 %v1908_v6 }
 0x197   : > { %1810 = vmatprep.subr.bf16.mxu0 %v1936_v1 }
 0x198   : > { %1787 = vmatpush3.bf16.msra.mxu1 %v1901_v60 }
 0x199   : > { %1788 = vmatprep.subr.bf16.mxu1 %v1936_v1 }
 0x19c   : > { %1789 = vmatpush3.bf16.msra.mxu1 %v1902_v61 }
 0x19d   : > { %1790 = vmatprep.subr.bf16.mxu1 %v1936_v1 }
 0x1a0   : > { %1791 = vmatpush3.bf16.msra.mxu1 %v1903_v62 }
 0x1a1   : > { %1792 = vmatprep.subr.bf16.mxu1 %v1936_v1 }
 0x1a4   : > { %1793 = vmatpush3.bf16.msra.mxu1 %v1904_v63 }
 0x1a5   : > { %1794 = vmatprep.subr.bf16.mxu1 %v1936_v1 }
 0x1a8   : > { %1795 = vmatpush3.bf16.msra.mxu1 %v1905_v0 }
 0x1a9   : > { %1796 = vmatprep.subr.bf16.mxu1 %v1936_v1 }
 0x1ac   : > { %1797 = vmatpush3.bf16.msra.mxu1 %v1906_v3 }
 0x1ad   : > { %1874 = vmatprep.subr.bf16.mxu1 %v1938_v21 }
 0x1af   : > { %1799 = vmatmul.mubr.bf16.vlgmr.msra.gmra.mrb[12].mxu1 %v965_v4 }
 0x1b0   : > { %1876 = vmatpush3.bf16.msra.mxu1 %v2101_v20  ;;  %1845 = vmatprep.mubr.msk.f32.mxu1 %vm1937_vm2, %v1936_v1 }
 0x1b1   : > { %1877 = vmatprep.subr.bf16.mxu1 %v1938_v21 }
 0x1b4   : > { %1879 = vmatpush3.bf16.msra.mxu1 %v2115_v24 }
 0x262   : > { %v849_v7 = vpop.f32.mrb[8].mxu1 }
 0x263   : > { %v926_v10 = vmul.f32 %v849_v7, %v849_v7  ;;  %v1770_v11 = vpop.f32.mrb[9].mxu1  ;;  %v931_v19 = vrot.slane %v849_v7, %v2186_v18 }
 0x264   : > { %v922_v13 = vpop.f32.mrb[4].mxu0 }
 0x265   : > { %v927_v14 = vsub.f32 %v922_v13, %v926_v10  ;;  %v1781_v15 = vpop.f32.mrb[5].mxu0  ;;  %v932_v23 = vsub.f32 %v2124_v40, %v931_v19 }
 0x267   : > { %v933_v16 = vadd.f32 1e-05, %v927_v14 }
 0x269   : > { %1915 = vrsqrt.f32 %v933_v16 }
 0x273   : > { %v1916_v22 = vpop.eup %1915 }
 0x274   : > { %v938_v25 = vrot.slane %v1916_v22, %v2186_v18 }
 0x276   : > { %v939_v27 = vmul.f32 %v938_v25, %v932_v23 }
 0x278   : > { %v946_v29 = vmul.f32 %v1648_v26, %v939_v27 }
 0x27a   : > { %v953_v30 = vadd.f32 %v1649_v28, %v946_v29 }
 0x27c   : > { %v954_v31 = vmin.f32 %v953_v30, 30.0 }
 0x27e   : > { %v955_v32 = vmul.f32 1.442695, %v954_v31 }
 0x280   : > { %1917 = vpow2.f32 %v955_v32 }
 0x282   : > { %v1065_v33 = vpop.f32.mrb[12].mxu1 }
 0x283   : > { %v1800_v34 = vpop.f32.mrb[13].mxu1  ;;  %v1066_v42 = vadd.f32 %v1065_v33, %v982_v41 }
 0x284   : > { %v1068_v35 = vpop.f32.mrb[14].mxu1  ;;  %v1914_v34 = vld [vmem:[%s2285_s13 + $0x8] sm:$0xff]  }
 0x285   : > { %v1801_v36 = vpop.f32.mrb[15].mxu1  ;;  %v1074_v46 = vrot.slane %v1066_v42, %v2186_v18  ;;  %v1477_v35 = vpack.c.bf16 %v2075_v9, %v2075_v9 }
 0x28a   : > { %v1918_v37 = vpop.eup %1917 }
 0x28b   : > { %v957_v38 = vadd.f32 2.0, %v1918_v37 }
 0x28d   : > { %v958_v39 = vmul.f32 %v1918_v37, %v957_v38 }
 0x28f   : > { %v960_v40 = vadd.f32 2.0, %v958_v39  ;;  %v959_v43 = vmul.f32 %v958_v39, %v953_v30  ;;  %v1913_v30 = vld [vmem:[%s2285_s13] sm:$0xff]  }
 0x291   : > { %1919 = vrcp.f32 %v960_v40 }
 0x29b   : > { %v1920_v44 = vpop.eup %1919 }
 0x29c   : > { %v962_v45 = vmul.f32 %v1920_v44, %v959_v43 }
 0x29e   : > { %v963_v47 = vmul.f32 %v962_v45, %v2072_v8 }
 0x2a0   : > { %v1075_v48 = vadd.f32 %v1074_v46, %v963_v47 }
 0x2a2   : > { %v1076_v49 = vmul.f32 %v1075_v48, %v2072_v8 }
 0x2a4   : > { %1079 = vst.msk [vmem:[#allocation3 + $0x1] sm:$0xff] %vm561_vm0, %v1076_v49  ;;  %v1678_v49 = vld [vmem:[%s2283_s11] ss:$0 sm:$0xff] }
 0x2ab   : > { %v1086_v50 = vld [vmem:[#allocation3 + $0x1] sm:$0xff] }
 0x2ac   : > { %v1087_v52 = vpack.c.bf16 %v1086_v50, %v1086_v50  ;;  %v1080_v54 = vld [vmem:[#allocation3] sm:$0xff] }
 0x2ad   : > { %v1081_v56 = vpack.c.bf16 %v1080_v54, %v1080_v54  ;;  %v1203_v58 = vld [vmem:[#allocation3 + $0x2] sm:$0xff] }
 0x2ae   : > { %1807 = vmatmul.mubr.msk.bf16.vlgmr.msra.gmra.mrb[8].mxu0 %vm561_vm0, %v1087_v52  ;;  %v1204_v59 = vpack.c.bf16 %v1203_v58, %v1203_v58 }
 0x2af   : > { %1811 = vmatpush3.bf16.msra.mxu0 %v1909_v51  ;;  %1814 = vmatprep.mubr.msk.bf16.mxu0 %vm1937_vm2, %v1936_v1  ;;  %v1679_v51 = vld [vmem:[%s2284_s12] ss:$0 sm:$0xff] }
 0x2b0   : > { %1812 = vmatprep.subr.bf16.mxu0 %v1936_v1 }
 0x2b3   : > { %1813 = vmatpush3.bf16.msra.mxu0 %v1910_v53 }
 0x2b4   : > { %1818 = vmatprep.subr.bf16.mxu0 %v1936_v1 }
 0x2b6   : > { %1815 = vmatmul.mubr.msk.bf16.vlgmr.msra.gmra.mrb[12].mxu0 %vm561_vm0, %v1081_v56 }
 0x2b7   : > { %1819 = vmatpush3.bf16.msra.mxu0 %v1911_v55  ;;  %1822 = vmatprep.mubr.msk.bf16.mxu0 %vm1937_vm2, %v1936_v1 }
 0x2b8   : > { %1820 = vmatprep.subr.bf16.mxu0 %v1936_v1 }
 0x2bb   : > { %1821 = vmatpush3.bf16.msra.mxu0 %v1912_v57 }
 0x2bc   : > { %1868 = vmatprep.subr.bf16.mxu0 %v1938_v21 }
 0x2be   : > { %1823 = vmatmul.mubr.msk.bf16.vlgmr.msra.gmra.mrb[16].mxu0 %vm561_vm0, %v1204_v59 }
 0x2bf   : > { %1870 = vmatpush3.bf16.msra.mxu0 %v2101_v20  ;;  %1834 = vmatprep.mubr.msk.f32.mxu0 %vm1937_vm2, %v1936_v1  ;;  %v1675_v20 = vld [vmem:[%s2282_s10] ss:$0 sm:$0xff] }
 0x2c0   : > { %1871 = vmatprep.subr.bf16.mxu0 %v1938_v21 }
 0x2c3   : > { %1873 = vmatpush3.bf16.msra.mxu0 %v2115_v24 }
 0x2c4   : > { %1848 = vmatprep.subr.bf16.mxu0 %v1936_v1 }
 0x381   : > { %v1142_v60 = vpop.f32.mrb[8].mxu0 }
 0x382   : > { %v1808_v61 = vpop.f32.mrb[9].mxu0 }
 0x383   : > { %v1145_v62 = vpop.f32.mrb[10].mxu0  ;;  %v1680_v61 = vld [vmem:[%s2286_s14] ss:$0 sm:$0xff] }
 0x384   : > { %v1809_v63 = vpop.f32.mrb[11].mxu0 }
 0x389   : > { %v1197_v0 = vpop.f32.mrb[12].mxu0 }
 0x38a   : > { %v1198_v2 = vadd.f32 %v1197_v0, %v1142_v60  ;;  %v1816_v3 = vpop.f32.mrb[13].mxu0 }
 0x38b   : > { %v1200_v4 = vpop.f32.mrb[14].mxu0 }
 0x38c   : > { %v1817_v5 = vpop.f32.mrb[15].mxu0 }
 0x391   : > { %v1259_v6 = vpop.f32.mrb[16].mxu0 }
 0x392   : > { %v1265_v7 = vadd.f32 %v1259_v6, %v1198_v2  ;;  %v1824_v21 = vpop.f32.mrb[17].mxu0 }
 0x393   : > { %v1262_v10 = vpop.f32.mrb[18].mxu0 }
 0x394   : > { %v1273_v24 = vadd.f32 %v1675_v20, %v1265_v7  ;;  %v1825_v11 = vpop.f32.mrb[19].mxu0 }
 0x396   : > { %v1276_v12 = vsel %vm561_vm0, %v1273_v24, 0.0  ;;  %v1284_v13 = vmul.f32 %v1273_v24, %v1273_v24 }
 0x397   : > { %v1277_v14 = vrot.slane %v1276_v12, 4 }
 0x398   : > { %v1285_v15 = vsel %vm561_vm0, %v1284_v13, 0.0 }
 0x399   : > { %v1278_v16 = vadd.f32 %v1277_v14, %v1276_v12  ;;  %v1286_v17 = vrot.slane %v1285_v15, 4 }
 0x39b   : > { %v1279_v19 = vrot.slane %v1278_v16, 2  ;;  %v1287_v22 = vadd.f32 %v1286_v17, %v1285_v15 }
 0x39d   : > { %v1280_v23 = vadd.f32 %v1279_v19, %v1278_v16  ;;  %v1288_v25 = vrot.slane %v1287_v22, 2 }
 0x39f   : > { %v1281_v26 = vrot.slane %v1280_v23, 1  ;;  %v1289_v27 = vadd.f32 %v1288_v25, %v1287_v22 }
 0x3a1   : > { %v1282_v28 = vadd.f32 %v1281_v26, %v1280_v23  ;;  %v1290_v29 = vrot.slane %v1289_v27, 1 }
 0x3a3   : > { %v1283_v31 = vmul.f32 0.125, %v1282_v28  ;;  %v1291_v32 = vadd.f32 %v1290_v29, %v1289_v27 }
 0x3a5   : > { %1835 = vmatmul.mubr.msk.f32.vlgmr.msra.gmra.mrb[6].mxu0 %vm561_vm0, %v1283_v31  ;;  %v1292_v33 = vmul.f32 0.125, %v1291_v32 }
 0x3a6   : > { %1849 = vmatpush3.bf16.msra.mxu0 %v1913_v30  ;;  %1852 = vmatprep.mubr.msk.bf16.mxu0 %vm1937_vm2, %v1936_v1 }
 0x3a7   : > { %1846 = vmatmul.mubr.msk.f32.vlgmr.msra.gmra.mrb[10].mxu1 %vm561_vm0, %v1292_v33  ;;  %1850 = vmatprep.subr.bf16.mxu0 %v1936_v1 }
 0x3aa   : > { %1851 = vmatpush3.bf16.msra.mxu0 %v1914_v34 }
 0x3ad   : > { %1853 = vmatmul.mubr.msk.bf16.vlgmr.msra.gmra.mrb[20].mxu0 %vm561_vm0, %v1477_v35 }
 0x478   : > { %v1362_v36 = vpop.f32.mrb[6].mxu0 }
 0x479   : > { %v1439_v37 = vmul.f32 %v1362_v36, %v1362_v36  ;;  %v1836_v38 = vpop.f32.mrb[7].mxu0  ;;  %v1444_v1 = vrot.slane %v1362_v36, %v2186_v18 }
 0x47a   : > { %v1435_v39 = vpop.f32.mrb[10].mxu1 }
 0x47b   : > { %v1440_v40 = vsub.f32 %v1435_v39, %v1439_v37  ;;  %v1847_v41 = vpop.f32.mrb[11].mxu1  ;;  %v1445_v48 = vsub.f32 %v1273_v24, %v1444_v1 }
 0x47d   : > { %v1446_v42 = vadd.f32 1e-05, %v1440_v40 }
 0x47f   : > { %1921 = vrsqrt.f32 %v1446_v42 }
 0x480   : > { %v1538_v43 = vpop.f32.mrb[20].mxu0 }
 0x481   : > { %v1854_v44 = vpop.f32.mrb[21].mxu0  ;;  %v1539_v0 = vadd.f32 %v1680_v61, %v1538_v43 }
 0x482   : > { %v1541_v45 = vpop.f32.mrb[22].mxu0 }
 0x483   : > { %v1855_v46 = vpop.f32.mrb[23].mxu0 }
 0x489   : > { %v1922_v47 = vpop.eup %1921 }
 0x48a   : > { %v1451_v9 = vrot.slane %v1922_v47, %v2186_v18 }
 0x48c   : > { %v1452_v50 = vmul.f32 %v1451_v9, %v1445_v48 }
 0x48e   : > { %v1459_v52 = vmul.f32 %v1678_v49, %v1452_v50 }
 0x490   : > { %v1466_v53 = vadd.f32 %v1679_v51, %v1459_v52 }
 0x492   : > { %v1467_v54 = vmin.f32 %v1466_v53, 30.0 }
 0x494   : > { %v1468_v55 = vmul.f32 1.442695, %v1467_v54 }
 0x496   : > { %1923 = vpow2.f32 %v1468_v55 }
 0x4a0   : > { %v1924_v56 = vpop.eup %1923 }
 0x4a1   : > { %v1470_v57 = vadd.f32 2.0, %v1924_v56 }
 0x4a3   : > { %v1471_v58 = vmul.f32 %v1924_v56, %v1470_v57 }
 0x4a5   : > { %v1473_v59 = vadd.f32 2.0, %v1471_v58  ;;  %v1472_v18 = vmul.f32 %v1471_v58, %v1466_v53 }
 0x4a7   : > { %1925 = vrcp.f32 %v1473_v59 }
 0x4b1   : > { %v1926_v60 = vpop.eup %1925 }
 0x4b2   : > { %v1475_v62 = vmul.f32 %v1926_v60, %v1472_v18 }
 0x4b4   : > { %v1476_v63 = vmul.f32 %v1475_v62, %v2072_v8 }
 0x4b6   : > { %v1544_v2 = vadd.f32 %v1539_v0, %v1476_v63 }
 0x4b8   : > { %1545 = vst.msk [vmem:[%s547_s29] sm:$0xff] %vm561_vm0, %v1544_v2 }
 0x4b9 PF: > { %s26_s21 = sadd.s32 1, %s1933_s21  }
 0x4ba   : > { %p23_p4 = scmp.ge.s32.totalorder %s26_s21, 4  }
 0x4bc   :  { %25 = sbr.rel (!%p23_p4) target bundleno = 2 (0x2), region = 124 }

// kernel: conditional_decoder_forward.21
= control target key start
LH: loop header
LB: loop body
LE: loop exit
PB: predicated region body
PF: predicated region fallthrough
CT: control target
= control target key end

     0   :  { %s2137_s27 = smov 0   ;;  %s2393_s0 = inlined_call_operand.vmem [shape: f32[2,8,32], index: 0, kind: input, shape index: {}]   ;;  %s2394_s1 = inlined_call_operand.vmem [shape: f32[2,8,1], index: 1, kind: input, shape index: {}]   ;;  %s2395_s2 = inlined_call_operand.vmem [shape: f32[2,1,8], index: 2, kind: input, shape index: {}]   ;;  %s2396_s3 = inlined_call_operand.vmem [shape: f32[1,32], index: 3, kind: input, shape index: {}, may-alias: {3,10}]   ;;  %s2397_s4 = inlined_call_operand.vmem [shape: f32[1,32], index: 4, kind: input, shape index: {}, may-alias: {4,9,11,17}]   ;;  %s2398_s5 = inlined_call_operand.vmem [shape: bf16[2,32,16], index: 5, kind: input, shape index: {}]   ;;  %s2399_s6 = inlined_call_operand.vmem [shape: bf16[2,32,16], index: 6, kind: input, shape index: {}]   ;;  %s2400_s7 = inlined_call_operand.vmem [shape: bf16[2,32,16], index: 7, kind: input, shape index: {}]   ;;  %s2401_s8 = inlined_call_operand.vmem [shape: bf16[2,16,32], index: 8, kind: input, shape index: {}]   ;;  %s2402_s9 = inlined_call_operand.vmem [shape: f32[1,32], index: 9, kind: input, shape index: {}, may-alias: {4,9,11,17}]   ;;  %s2403_s10 = inlined_call_operand.vmem [shape: f32[1,32], index: 10, kind: input, shape index: {}, may-alias: {3,10}]   ;;  %s2404_s11 = inlined_call_operand.vmem [shape: f32[1,32], index: 11, kind: input, shape index: {}, may-alias: {4,9,11,17}]   ;;  %s2405_s12 = inlined_call_operand.vmem [shape: bf16[32,128], index: 12, kind: input, shape index: {}]   ;;  %s2406_s13 = inlined_call_operand.vmem [shape: f32[1,128], index: 13, kind: input, shape index: {}]   ;;  %s2407_s14 = inlined_call_operand.vmem [shape: f32[1,128], index: 14, kind: input, shape index: {}, may-alias: {14,15}]   ;;  %s2408_s15 = inlined_call_operand.vmem [shape: f32[1,128], index: 15, kind: input, shape index: {}, may-alias: {14,15}]   ;;  %s2409_s16 = inlined_call_operand.vmem [shape: bf16[128,32], index: 16, kind: input, shape index: {}]   ;;  %s2410_s17 = inlined_call_operand.vmem [shape: f32[1,32], index: 17, kind: input, shape index: {}, may-alias: {4,9,11,17}]   ;;  %s2411_s18 = inlined_call_operand.vmem [shape: f32[2,8,32], index: 18, kind: output, shape index: {}]  }
   0x1   :  { %2412 = sst [smem:[#allocation2_spill]] %s2393_s0 }
   0x2   :  { %2413 = sst [smem:[#allocation3_spill]] %s2394_s1 }
   0x3   :  { %2414 = sst [smem:[#allocation4_spill]] %s2395_s2 }
   0x4 LB: > { %s1733_s28 = sadd.s32 4294967295, %s2031_s27   ;;  %p1737_p0 = scmp.ge.s32.totalorder %s2031_s27, 1  ;;  %s2031_s27 = sphi %s2137_s27, %s28_s27  }
   0x5   : > { %p528_p1 = scmp.lt.s32.totalorder %s2031_s27, 3 }
   0x7   : > { %p529_p2 = pnand %p1737_p0, %p528_p1 }
   0x8   : > { %p587_p3 = scmp.lt.s32.totalorder (!%p529_p2), %s1733_s28, 1  ;;  %vm620_vm0 = vcmask (!%p529_p2), 261120   ;;  %s2415_s19 = sld [smem:[#allocation2_spill]] (!%p529_p2)  ;;  %v1985_v7 = vld [vmem:[%s2398_s5] sm:$0xff] (!%p529_p2)   ;;  %v2033_v8 = vmov (!%p529_p2), 0.0   ;;  %v1986_v9 = vld [vmem:[%s2398_s5 + $0x8] sm:$0xff] (!%p529_p2)  }
   0x9   : > { %532 = sbr.rel (%p529_p2) target bundleno = 3122 (0xc32), region = 92  ;;  %1850 = vmatprep.subr.bf16.mxu0 (!%p529_p2), %v2033_v8  ;;  %1874 = vmatprep.subr.bf16.mxu1 (!%p529_p2), %v2033_v8  ;;  %vm2034_vm1 = vmmov (!%p529_p2), 0   ;;  %v1742_v14 = vld [vmem:[%s2396_s3] ss:$0 sm:$0xff] (!%p529_p2)  ;;  %v1988_v21 = vld [vmem:[%s2399_s6 + $0x8] sm:$0xff] (!%p529_p2)   ;;  %s2416_s25 = sld [smem:[#allocation3_spill]] (!%p529_p2) }
   0xa   : > { %1851 = vmatpush3.bf16.msra.mxu0 (!%p529_p2), %v1985_v7  ;;  %1854 = vmatprep.mubr.msk.bf16.mxu0 (!%p529_p2), %vm2034_vm1, %v2033_v8  ;;  %v1743_v16 = vld [vmem:[%s2397_s4] ss:$0 sm:$0xff] (!%p529_p2)  ;;  %v1990_v23 = vld [vmem:[%s2400_s7 + $0x8] sm:$0xff] (!%p529_p2)   ;;  %v2035_v24 = vmov (!%p529_p2), 0   ;;  %vm824_vm2 = vcmask (!%p529_p2), 130048   ;;  %vm889_vm3 = vcmask (!%p529_p2), 1043456  }
   0xb   : > { %1852 = vmatprep.subr.bf16.mxu0 (!%p529_p2), %v2033_v8  ;;  %1876 = vmatprep.mubr.msk.bf16.mxu1 (!%p529_p2), %vm2034_vm1, %v2033_v8  ;;  %v1987_v19 = vld [vmem:[%s2399_s6] sm:$0xff] (!%p529_p2)   ;;  %v1991_v38 = vld [vmem:[%s2398_s5 + $0x10] sm:$0xff] (!%p529_p2)   ;;  %v1992_v45 = vld [vmem:[%s2398_s5 + $0x18] sm:$0xff] (!%p529_p2)   ;;  %vm872_vm4 = vcmask (!%p529_p2), 64512  }
   0xc   : > { %v1989_v22 = vld [vmem:[%s2400_s7] sm:$0xff] (!%p529_p2)   ;;  %1983 = vset.pattern.permute.xlu1 (!%p529_p2), %v2035_v24  ;;  %1984 = vset.pattern.permute.xlu0 (!%p529_p2), %v2035_v24  ;;  %v1993_v46 = vld [vmem:[%s2400_s7 + $0x10] sm:$0xff] (!%p529_p2)   ;;  %v1994_v47 = vld [vmem:[%s2400_s7 + $0x18] sm:$0xff] (!%p529_p2)  }
   0xe   : > { %1853 = vmatpush3.bf16.msra.mxu0 (!%p529_p2), %v1986_v9 }
   0xf   : > { %1858 = vmatprep.subr.bf16.mxu0 (!%p529_p2), %v2033_v8 }
  0x10   : > { %s2419_s28 = smov (!%p587_p3, %s1733_s28), 1 }
  0x11   : > { %s2148_s29 = sshll.u32 %s2419_s28, 3 }
  0x12   : > { %s590_s1 = scalar_lea.vmem %s2415_s19, %s2148_s29  ;;  %s594_s26 = scalar_lea.vmem %s2416_s25, %s2148_s29 }
  0x13   : > { %v2154_v0 = vld [vmem:[%s590_s1] sm:$0xff]  ;;  %s2417_s25 = sld [smem:[#allocation4_spill]]  ;;  %s601_s20 = scalar_lea.vmem %s2411_s18, %s2148_s29 }
  0x14   : > { %v621_v1 = vsel %vm620_vm0, %v2154_v0, 0.0  ;;  %v604_v25 = vld [vmem:[%s594_s26] sm:$0xff] }
  0x15   : > { %622 = vadd.xlane.f32.xlu0 %v621_v1  ;;  %608 = vperm.xlu1 %1983, %v604_v25  }
  0x19   : > { %s597_s26 = scalar_lea.vmem %s2417_s25, %s2419_s28 }
  0x1a   : > { %v1741_v48 = vld [vmem:[%s597_s26] ss:$0 sm:$0xff] }
  0x94   : > { %v609_v49 = vpop.permute.xlu1 %608 }
  0x95   : > { %v617_v50 = vmul.f32 %v1741_v48, %v609_v49 }
  0xa2   : > { %v623_v2 = vpop.xlane.xlu0 %622 }
  0xa3   : > { %v625_v3 = vmul.f32 0.03125, %v623_v2 }
  0xa5   : > { %v626_v4 = vsub.f32 %v2154_v0, %v625_v3 }
  0xa7   : > { %v627_v5 = vmul.f32 %v626_v4, %v626_v4 }
  0xa9   : > { %v628_v6 = vsel %vm620_vm0, %v627_v5, 0.0 }
  0xaa   : > { %629 = vadd.xlane.f32.xlu0 %v628_v6 }
 0x137   : > { %v630_v10 = vpop.xlane.xlu0 %629 }
 0x138   : > { %v631_v11 = vmul.f32 0.03125, %v630_v10 }
 0x13a   : > { %v632_v12 = vadd.f32 1e-05, %v631_v11 }
 0x13c   : > { %2009 = vrsqrt.f32 %v632_v12 }
 0x146   : > { %v2010_v13 = vpop.eup %2009 }
 0x147   : > { %v634_v15 = vmul.f32 %v2010_v13, %v626_v4  ;;  %v1995_v13 = vld [vmem:[%s2399_s6 + $0x10] sm:$0xff]  }
 0x149   : > { %v641_v17 = vmul.f32 %v1742_v14, %v634_v15  ;;  %v1996_v15 = vld [vmem:[%s2399_s6 + $0x18] sm:$0xff]  }
 0x14b   : > { %v648_v18 = vadd.f32 %v1743_v16, %v641_v17 }
 0x14d   : > { %v2183_v20 = vpack.c.bf16 %v648_v18, %v648_v18 }
 0x14f   : > { %1855 = vmatmul.mubr.msk.bf16.vlgmr.msra.gmra.mrb[0].mxu0 %vm620_vm0, %v2183_v20 }
 0x150   : > { %1859 = vmatpush3.bf16.msra.mxu0 %v1987_v19  ;;  %1862 = vmatprep.mubr.msk.bf16.mxu0 %vm2034_vm1, %v2033_v8 }
 0x151   : > { %1860 = vmatprep.subr.bf16.mxu0 %v2033_v8 }
 0x154   : > { %1861 = vmatpush3.bf16.msra.mxu0 %v1988_v21 }
 0x155   : > { %1866 = vmatprep.subr.bf16.mxu0 %v2033_v8 }
 0x157   : > { %1863 = vmatmul.mubr.msk.bf16.vlgmr.msra.gmra.mrb[4].mxu0 %vm620_vm0, %v2183_v20 }
 0x158   : > { %1867 = vmatpush3.bf16.msra.mxu0 %v1989_v22  ;;  %1870 = vmatprep.mubr.msk.bf16.mxu0 %vm2034_vm1, %v2033_v8 }
 0x159   : > { %1868 = vmatprep.subr.bf16.mxu0 %v2033_v8 }
 0x15c   : > { %1869 = vmatpush3.bf16.msra.mxu0 %v1990_v23 }
 0x15d   : > { %1880 = vmatprep.subr.bf16.mxu0 %v2033_v8 }
 0x15f   : > { %1871 = vmatmul.mubr.msk.bf16.vlgmr.msra.gmra.mrb[8].mxu0 %vm620_vm0, %v2183_v20 }
 0x160   : > { %1882 = vmatprep.mubr.msk.bf16.mxu0 %vm2034_vm1, %v2033_v8 }
 0x222   : > { %v703_v26 = vpop.f32.mrb[0].mxu0 }
 0x223   : > { %v1856_v27 = vpop.f32.mrb[1].mxu0  ;;  %v709_v36 = vmul.f32 0.25, %v703_v26 }
 0x224   : > { %v706_v28 = vpop.f32.mrb[2].mxu0 }
 0x225   : > { %v1857_v29 = vpop.f32.mrb[3].mxu0  ;;  %v822_v39 = vpack.c.bf16 %v709_v36, %v709_v36 }
 0x22a   : > { %v760_v30 = vpop.f32.mrb[4].mxu0 }
 0x22b   : > { %v823_v31 = vpack.c.bf16 %v760_v30, %v760_v30  ;;  %v1864_v32 = vpop.f32.mrb[5].mxu0 }
 0x22c   : > { %v763_v33 = vpop.f32.mrb[6].mxu0 }
 0x22d   : > { %v1865_v34 = vpop.f32.mrb[7].mxu0  ;;  %v829_v35 = vsel %vm824_vm2, %v823_v31, 0 }
 0x22e   : > { %1875 = vmatpush3.bf16.xpose.msra.mxu1 %v829_v35 }
 0x22f   : > { %1886 = vmatprep.subr.bf16.mxu1 %v2033_v8 }
 0x232   : > { %v816_v37 = vpop.f32.mrb[8].mxu0 }
 0x233   : > { %v885_v40 = vpack.c.bf16 %v816_v37, %v816_v37  ;;  %v1872_v41 = vpop.f32.mrb[9].mxu0 }
 0x234   : > { %v819_v42 = vpop.f32.mrb[10].mxu0 }
 0x235   : > { %v891_v43 = vsel %vm889_vm3, %v885_v40, 0  ;;  %v1873_v44 = vpop.f32.mrb[11].mxu0  ;;  %1877 = vmatmul.mubr.msk.bf16.vlgmr.msra.gmra.mrb[0].mxu1 %vm824_vm2, %v822_v39  ;;  %v1998_v39 = vld [vmem:[%s2401_s8 + $0x8] sm:$0xff]  }
 0x236   : > { %1881 = vmatpush3.bf16.msra.mxu0 %v891_v43  ;;  %1887 = vmatpush3.bf16.msra.mxu1 %v1991_v38  ;;  %v1997_v43 = vld [vmem:[%s2401_s8] sm:$0xff]  }
 0x237   : > { %1888 = vmatprep.subr.bf16.mxu1 %v2033_v8  ;;  %1890 = vmatprep.mubr.msk.bf16.mxu1 %vm2034_vm1, %v2033_v8 }
 0x238   : > { %1894 = vmatprep.subr.bf16.mxu0 %v2033_v8 }
 0x23a   : > { %1889 = vmatpush3.bf16.msra.mxu1 %v1992_v45 }
 0x23b   : > { %1902 = vmatprep.subr.bf16.mxu1 %v2033_v8 }
 0x23d   : > { %1891 = vmatmul.mubr.msk.bf16.vlgmr.msra.gmra.mrb[4].mxu1 %vm620_vm0, %v2183_v20 }
 0x23e   : > { %1903 = vmatpush3.bf16.msra.mxu1 %v1993_v46  ;;  %1906 = vmatprep.mubr.msk.bf16.mxu1 %vm2034_vm1, %v2033_v8 }
 0x23f   : > { %1904 = vmatprep.subr.bf16.mxu1 %v2033_v8 }
 0x242   : > { %1905 = vmatpush3.bf16.msra.mxu1 %v1994_v47 }
 0x243   : > { %1916 = vmatprep.subr.bf16.mxu1 %v2033_v8 }
 0x245   : > { %1907 = vmatmul.mubr.msk.bf16.vlgmr.msra.gmra.mrb[8].mxu1 %vm620_vm0, %v2183_v20 }
 0x246   : > { %1918 = vmatprep.mubr.msk.bf16.mxu1 %vm2034_vm1, %v2033_v8 }
 0x308   : > { %v865_v51 = vpop.f32.mrb[0].mxu1 }
 0x309   : > { %v871_v52 = vadd.f32 %v865_v51, %v617_v50  ;;  %v1878_v53 = vpop.f32.mrb[1].mxu1 }
 0x30a   : > { %v868_v54 = vpop.f32.mrb[2].mxu1 }
 0x30b   : > { %v1879_v55 = vpop.f32.mrb[3].mxu1  ;;  %v873_v56 = vsel %vm872_vm4, %v871_v52, -inf }
 0x30c   : > { %874 = vmax.xlane.f32.xlu1 %v873_v56 }
 0x310   : > { %v987_v57 = vpop.f32.mrb[4].mxu1 }
 0x311   : > { %v1892_v58 = vpop.f32.mrb[5].mxu1  ;;  %v993_v27 = vmul.f32 0.25, %v987_v57 }
 0x312   : > { %v990_v59 = vpop.f32.mrb[6].mxu1  ;;  %v1784_v58 = vld [vmem:[%s2402_s9] ss:$0 sm:$0xff] }
 0x313   : > { %v1893_v60 = vpop.f32.mrb[7].mxu1  ;;  %v1108_v28 = vpack.c.bf16 %v993_v27, %v993_v27  ;;  %v1787_v27 = vld [vmem:[%s2406_s13] ss:$0 sm:$0xff] }
 0x318   : > { %v1102_v61 = vpop.f32.mrb[8].mxu1 }
 0x319   : > { %v1169_v62 = vpack.c.bf16 %v1102_v61, %v1102_v61  ;;  %v1908_v63 = vpop.f32.mrb[9].mxu1 }
 0x31a   : > { %v1105_v1 = vpop.f32.mrb[10].mxu1 }
 0x31b   : > { %v1174_v2 = vsel %vm889_vm3, %v1169_v62, 0  ;;  %v1909_v3 = vpop.f32.mrb[11].mxu1 }
 0x31c   : > { %1917 = vmatpush3.bf16.msra.mxu1 %v1174_v2 }
 0x31d   : > { %1928 = vmatprep.subr.bf16.mxu1 %v2033_v8 }
 0x399   : > { %v875_v4 = vpop.xlane.xlu1 %874 }
 0x39a   : > { %v876_v5 = vsub.f32 %v871_v52, %v875_v4 }
 0x39c   : > { %v877_v6 = vmul.f32 1.442695, %v876_v5 }
 0x39e   : > { %2011 = vpow2.f32 %v877_v6  ;;  %v1999_v6 = vld [vmem:[%s2405_s12] sm:$0xff]  }
 0x3a8   : > { %v2012_v7 = vpop.eup %2011 }
 0x3a9   : > { %v879_v9 = vsel %vm872_vm4, %v2012_v7, 0.0 }
 0x3aa   : > { %880 = vadd.xlane.f32.xlu0 %v879_v9 }
 0x437   : > { %v881_v10 = vpop.xlane.xlu0 %880 }
 0x438   : > { %2013 = vrcp.f32 %v881_v10 }
 0x442   : > { %v2014_v11 = vpop.eup %2013 }
 0x443   : > { %v883_v12 = vmul.f32 %v2014_v11, %v2012_v7 }
 0x445   : > { %v884_v14 = vpack.c.bf16 %v883_v12, %v883_v12  ;;  %v1785_v12 = vld [vmem:[%s2403_s10] ss:$0 sm:$0xff] }
 0x447   : > { %1883 = vmatmul.mubr.msk.bf16.vlgmr.msra.gmra.mrb[12].mxu0 %vm872_vm4, %v884_v14  ;;  %v1786_v14 = vld [vmem:[%s2404_s11] ss:$0 sm:$0xff] }
 0x448   : > { %1895 = vmatpush3.bf16.msra.mxu0 %v1995_v13  ;;  %1898 = vmatprep.mubr.msk.bf16.mxu0 %vm2034_vm1, %v2033_v8 }
 0x449   : > { %1896 = vmatprep.subr.bf16.mxu0 %v2033_v8 }
 0x44c   : > { %1897 = vmatpush3.bf16.msra.mxu0 %v1996_v15 }
 0x44d   : > { %1910 = vmatprep.subr.bf16.mxu0 %v2033_v8 }
 0x44f   : > { %1899 = vmatmul.mubr.msk.bf16.vlgmr.msra.gmra.mrb[16].mxu0 %vm620_vm0, %v2183_v20 }
 0x450   : > { %1912 = vmatprep.mubr.msk.bf16.mxu0 %vm2034_vm1, %v2033_v8 }
 0x51a   : > { %v927_v16 = vpop.f32.mrb[12].mxu0 }
 0x51b   : > { %v1884_v17 = vpop.f32.mrb[13].mxu0  ;;  %v933_v45 = vpack.c.bf16 %v927_v16, %v927_v16 }
 0x51c   : > { %v930_v18 = vpop.f32.mrb[14].mxu0 }
 0x51d   : > { %v1885_v19 = vpop.f32.mrb[15].mxu0  ;;  %v2001_v18 = vld [vmem:[%s2409_s16] sm:$0xff]  }
 0x51e   : > { %v2002_v19 = vld [vmem:[%s2409_s16 + $0x8] sm:$0xff]  }
 0x522   : > { %v1045_v21 = vpop.f32.mrb[16].mxu0 }
 0x523   : > { %v1109_v22 = vpack.c.bf16 %v1045_v21, %v1045_v21  ;;  %v1900_v23 = vpop.f32.mrb[17].mxu0  ;;  %v2003_v21 = vld [vmem:[%s2409_s16 + $0x10] sm:$0xff]  }
 0x524   : > { %v1048_v24 = vpop.f32.mrb[18].mxu0  ;;  %v2005_v23 = vld [vmem:[%s2409_s16 + $0x20] sm:$0xff]  }
 0x525   : > { %v1114_v25 = vsel %vm824_vm2, %v1109_v22, 0  ;;  %v1901_v26 = vpop.f32.mrb[19].mxu0  ;;  %v2004_v22 = vld [vmem:[%s2409_s16 + $0x18] sm:$0xff]   ;;  %v2006_v24 = vld [vmem:[%s2409_s16 + $0x28] sm:$0xff]  }
 0x526   : > { %1911 = vmatpush3.bf16.xpose.msra.mxu0 %v1114_v25  ;;  %v2007_v25 = vld [vmem:[%s2409_s16 + $0x30] sm:$0xff]   ;;  %v2008_v26 = vld [vmem:[%s2409_s16 + $0x38] sm:$0xff]  }
 0x527   : > { %1922 = vmatprep.subr.bf16.mxu0 %v2033_v8 }
 0x52d   : > { %1913 = vmatmul.mubr.msk.bf16.vlgmr.msra.gmra.mrb[20].mxu0 %vm824_vm2, %v1108_v28 }
 0x52e   : > { %1924 = vmatprep.mubr.msk.bf16.mxu0 %vm2034_vm1, %v2033_v8  ;;  %1923 = vmatpush3.bf16.msra.mxu0 %v1998_v39 }
 0x52f   : > { %1934 = vmatprep.subr.bf16.mxu0 %v2033_v8 }
 0x600   : > { %v1150_v20 = vpop.f32.mrb[20].mxu0 }
 0x601   : > { %v1156_v29 = vadd.f32 %v1150_v20, %v617_v50  ;;  %v1914_v30 = vpop.f32.mrb[21].mxu0  ;;  %v1791_v20 = vld [vmem:[%s2407_s14] ss:$0 sm:$0xff] }
 0x602   : > { %v1153_v31 = vpop.f32.mrb[22].mxu0 }
 0x603   : > { %v1915_v32 = vpop.f32.mrb[23].mxu0  ;;  %v1157_v33 = vsel %vm872_vm4, %v1156_v29, -inf }
 0x604   : > { %1158 = vmax.xlane.f32.xlu0 %v1157_v33 }
 0x691   : > { %v1159_v34 = vpop.xlane.xlu0 %1158 }
 0x692   : > { %v1160_v35 = vsub.f32 %v1156_v29, %v1159_v34 }
 0x694   : > { %v1161_v36 = vmul.f32 1.442695, %v1160_v35 }
 0x696   : > { %2015 = vpow2.f32 %v1161_v36 }
 0x6a0   : > { %v2016_v37 = vpop.eup %2015 }
 0x6a1   : > { %v1163_v38 = vsel %vm872_vm4, %v2016_v37, 0.0 }
 0x6a2   : > { %1164 = vadd.xlane.f32.xlu0 %v1163_v38 }
 0x72f   : > { %v1165_v40 = vpop.xlane.xlu0 %1164 }
 0x730   : > { %2017 = vrcp.f32 %v1165_v40 }
 0x73a   : > { %v2018_v41 = vpop.eup %2017 }
 0x73b   : > { %v1167_v42 = vmul.f32 %v2018_v41, %v2016_v37 }
 0x73d   : > { %v1168_v44 = vpack.c.bf16 %v1167_v42, %v1167_v42 }
 0x73f   : > { %1919 = vmatmul.mubr.msk.bf16.vlgmr.msra.gmra.mrb[12].mxu1 %vm872_vm4, %v1168_v44 }
 0x740   : > { %1929 = vmatpush3.bf16.msra.mxu1 %v1997_v43  ;;  %1930 = vmatprep.mubr.msk.bf16.mxu1 %vm2034_vm1, %v2033_v8  ;;  %v2036_v43 = vmov 683565275  }
 0x741   : > { %1942 = vmatprep.subr.bf16.mxu1 %v2033_v8 }
 0x747   : > { %1931 = vmatmul.mubr.msk.bf16.vlgmr.msra.gmra.mrb[16].mxu1 %vm824_vm2, %v933_v45  ;;  %v2037_v45 = vmov 2475754826  }
 0x748   : > { %1958 = vmatprep.mubr.msk.bf16.mxu1 %vm2034_vm1, %v2033_v8  ;;  %1943 = vmatpush3.bf16.msra.mxu1 %v2001_v18 }
 0x749   : > { %1944 = vmatprep.subr.bf16.mxu1 %v2033_v8 }
 0x74c   : > { %1945 = vmatpush3.bf16.msra.mxu1 %v2002_v19 }
 0x74d   : > { %1946 = vmatprep.subr.bf16.mxu1 %v2033_v8 }
 0x750   : > { %1947 = vmatpush3.bf16.msra.mxu1 %v2003_v21 }
 0x751   : > { %1948 = vmatprep.subr.bf16.mxu1 %v2033_v8 }
 0x754   : > { %1949 = vmatpush3.bf16.msra.mxu1 %v2004_v22 }
 0x755   : > { %1950 = vmatprep.subr.bf16.mxu1 %v2033_v8 }
 0x758   : > { %1951 = vmatpush3.bf16.msra.mxu1 %v2005_v23 }
 0x759   : > { %1952 = vmatprep.subr.bf16.mxu1 %v2033_v8 }
 0x75c   : > { %1953 = vmatpush3.bf16.msra.mxu1 %v2006_v24 }
 0x75d   : > { %1954 = vmatprep.subr.bf16.mxu1 %v2033_v8 }
 0x760   : > { %1955 = vmatpush3.bf16.msra.mxu1 %v2007_v25 }
 0x761   : > { %1956 = vmatprep.subr.bf16.mxu1 %v2033_v8 }
 0x764   : > { %1957 = vmatpush3.bf16.msra.mxu1 %v2008_v26 }
 0x812   : > { %v1210_v46 = vpop.f32.mrb[12].mxu1 }
 0x813   : > { %v1216_v47 = vpack.c.bf16 %v1210_v46, %v1210_v46  ;;  %v1920_v48 = vpop.f32.mrb[13].mxu1 }
 0x814   : > { %v1213_v49 = vpop.f32.mrb[14].mxu1  ;;  %v2038_v48 = vmov 2131351028  }
 0x815   : > { %v1921_v50 = vpop.f32.mrb[15].mxu1  ;;  %1925 = vmatmul.mubr.msk.bf16.vlgmr.msra.gmra.mrb[24].mxu0 %vm824_vm2, %v1216_v47 }
 0x816   : > { %1938 = vmatprep.mubr.msk.bf16.mxu0 %vm2034_vm1, %v2033_v8  ;;  %1935 = vmatpush3.bf16.msra.mxu0 %v1999_v6 }
 0x817   : > { %1936 = vmatprep.subr.bf16.mxu0 %v2033_v8 }
 0x81a   : > { %v1312_v51 = vpop.f32.mrb[16].mxu1 }
 0x81b   : > { %v1932_v52 = vpop.f32.mrb[17].mxu1 }
 0x81c   : > { %v1315_v53 = vpop.f32.mrb[18].mxu1 }
 0x81d   : > { %v1933_v54 = vpop.f32.mrb[19].mxu1 }
 0x81e   : > { %v2040_v54 = vmov 920167782  }
 0x8e8   : > { %v1263_v55 = vpop.f32.mrb[24].mxu0 }
 0x8e9   : > { %v1313_v56 = vadd.f32 %v1312_v51, %v1263_v55  ;;  %v1926_v57 = vpop.f32.mrb[25].mxu0  ;;  %v2039_v51 = vmov 2102212464  }
 0x8ea   : > { %v1266_v59 = vpop.f32.mrb[26].mxu0  ;;  %v2041_v57 = vmov 1326507024  }
 0x8eb   : > { %v1318_v60 = vadd.f32 %v1313_v56, %v2154_v0  ;;  %v1927_v61 = vpop.f32.mrb[27].mxu0  ;;  %v2000_v0 = vld [vmem:[%s2405_s12 + $0x8] sm:$0xff]  }
 0x8ec   : > { %1937 = vmatpush3.bf16.msra.mxu0 %v2000_v0 }
 0x8ed   : > { %v2296_v62 = vadd.f32 %v1784_v58, %v1318_v60 }
 0x8ef   : > { %v1329_v63 = vsel %vm620_vm0, %v2296_v62, 0.0 }
 0x8f0   : > { %1330 = vadd.xlane.f32.xlu0 %v1329_v63 }
 0x97d   : > { %v1331_v1 = vpop.xlane.xlu0 %1330 }
 0x97e   : > { %v1332_v2 = vmul.f32 0.03125, %v1331_v1 }
 0x980   : > { %v1333_v3 = vsub.f32 %v2296_v62, %v1332_v2 }
 0x982   : > { %v1334_v4 = vmul.f32 %v1333_v3, %v1333_v3 }
 0x984   : > { %v1335_v5 = vsel %vm620_vm0, %v1334_v4, 0.0 }
 0x985   : > { %1336 = vadd.xlane.f32.xlu0 %v1335_v5 }
 0xa12   : > { %v1337_v7 = vpop.xlane.xlu0 %1336 }
 0xa13   : > { %v1338_v9 = vmul.f32 0.03125, %v1337_v7 }
 0xa15   : > { %v1339_v10 = vadd.f32 1e-05, %v1338_v9 }
 0xa17   : > { %2019 = vrsqrt.f32 %v1339_v10 }
 0xa21   : > { %v2020_v11 = vpop.eup %2019 }
 0xa22   : > { %v1341_v13 = vmul.f32 %v2020_v11, %v1333_v3 }
 0xa24   : > { %v1348_v15 = vmul.f32 %v1785_v12, %v1341_v13 }
 0xa26   : > { %v1355_v16 = vadd.f32 %v1786_v14, %v1348_v15 }
 0xa28   : > { %v1356_v17 = vpack.c.bf16 %v1355_v16, %v1355_v16 }
 0xa2a   : > { %1939 = vmatmul.mubr.msk.bf16.vlgmr.msra.gmra.mrb[28].mxu0 %vm620_vm0, %v1356_v17 }
 0xafd   : > { %v1417_v28 = vpop.f32.mrb[28].mxu0 }
 0xafe   : > { %v2353_v29 = vadd.f32 %v1787_v27, %v1417_v28  ;;  %v1940_v30 = vpop.f32.mrb[29].mxu0 }
 0xaff   : > { %v1420_v31 = vpop.f32.mrb[30].mxu0 }
 0xb00   : > { %v2356_v8 = vmul.f32 %v1791_v20, %v2353_v29  ;;  %v1941_v32 = vpop.f32.mrb[31].mxu0 }
 0xb02   : > { %v1435_v33 = vand.u32 2139095040, %v2356_v8  ;;  %v1432_v37 = vand.u32 2147483647, %v2356_v8  ;;  %vm1434_vm12 = vcmp.lt.s32.totalorder %v2356_v8, 0  ;;  %vm1524_vm2 = vweird.f32 %v2356_v8 }
 0xb04   : > { %v1436_v34 = vshrl.u32 %v1435_v33, 23  ;;  %v1439_v40 = vand.u32 8388607, %v1432_v37  ;;  %vm1433_vm13 = vcmp.le.f32.partialorder %v1432_v37, 0.7853982 }
 0xb06   : > { %v1792_v35 = vadd.s32 4294967169, %v1436_v34  ;;  %v1440_v59 = vor.u32 8388608, %v1439_v40 }
 0xb08   : > { %v1442_v36 = vadd.s32 1, %v1792_v35  ;;  %v1480_v11 = vshll.u32 %v1440_v59, 8 }
 0xb0a   : > { %vm1443_vm5 = vcmp.gt.s32.totalorder %v1442_v36, 0 }
 0xb0b   : > { %v1444_v38 = vsel %vm1443_vm5, %v1442_v36, 0 }
 0xb0c   : > { %v1446_v39 = vand.u32 31, %v1444_v38  ;;  %v1445_v42 = vshrl.u32 %v1444_v38, 5 }
 0xb0e   : > { %v1447_v41 = vsub.s32 32, %v1446_v39  ;;  %v1449_v44 = vshll.u32 %v2036_v43, %v1446_v39  ;;  %v1452_v46 = vshll.u32 %v2037_v45, %v1446_v39  ;;  %v1455_v50 = vshll.u32 %v2038_v48, %v1446_v39 }
 0xb0f   : > { %v1458_v53 = vshll.u32 %v2039_v51, %v1446_v39  ;;  %v1461_v56 = vshll.u32 %v2040_v54, %v1446_v39  ;;  %vm1464_vm6 = vcmp.lt.s32.totalorder %v1445_v42, 1  ;;  %vm1467_vm7 = vcmp.lt.s32.totalorder %v1445_v42, 4 }
 0xb10   : > { %v1450_v47 = vshrl.u32 %v2037_v45, %v1447_v41  ;;  %v1453_v49 = vshrl.u32 %v2038_v48, %v1447_v41  ;;  %v1456_v52 = vshrl.u32 %v2039_v51, %v1447_v41  ;;  %v1459_v55 = vshrl.u32 %v2040_v54, %v1447_v41 }
 0xb11   : > { %v1462_v58 = vshrl.u32 %v2041_v57, %v1447_v41  ;;  %v1448_v6 = vshrl.u32 %v2036_v43, %v1447_v41  ;;  %vm1466_vm8 = vcmp.lt.s32.totalorder %v1445_v42, 3  ;;  %vm1465_vm9 = vcmp.lt.s32.totalorder %v1445_v42, 2 }
 0xb12   : > { %v1451_v60 = vor.u32 %v1450_v47, %v1449_v44  ;;  %v1454_v61 = vor.u32 %v1453_v49, %v1452_v46  ;;  %v1457_v63 = vor.u32 %v1456_v52, %v1455_v50  ;;  %v1460_v1 = vor.u32 %v1459_v55, %v1458_v53 }
 0xb13   : > { %v1463_v2 = vor.u32 %v1462_v58, %v1461_v56 }
 0xb14   : > { %v1469_v3 = vsel %vm1467_vm7, %v1457_v63, 2102212464  ;;  %v1472_v4 = vsel %vm1464_vm6, %v1451_v60, %v1454_v61  ;;  %v1476_v5 = vsel %vm1464_vm6, %v1454_v61, %v1457_v63  ;;  %v1473_v0 = vsel %vm1467_vm7, %v1460_v1, 920167782 }
 0xb15   : > { %v1477_v7 = vsel %vm1467_vm7, %v1463_v2, 1326507024  ;;  %v1474_v9 = vsel %vm1466_vm8, %v1457_v63, %v1473_v0  ;;  %v1468_v12 = vsel %vm1464_vm6, %v1448_v6, %v1451_v60  ;;  %v1470_v13 = vsel %vm1466_vm8, %v1454_v61, %v1469_v3  ;;  %v1796_v63 = vld [vmem:[%s2408_s15] ss:$0 sm:$0xff] }
 0xb16   : > { %v1478_v10 = vsel %vm1466_vm8, %v1460_v1, %v1477_v7  ;;  %v1475_v14 = vsel %vm1465_vm9, %v1472_v4, %v1474_v9  ;;  %v1471_v21 = vsel %vm1465_vm9, %v1468_v12, %v1470_v13  ;;  %v1797_v6 = vld [vmem:[%s2410_s17] ss:$0 sm:$0xff] }
 0xb17   : > { %v1479_v15 = vsel %vm1465_vm9, %v1476_v5, %v1478_v10  ;;  %v2365_v18 = vmul.u32.u64.low %v1480_v11, %v1475_v14  ;;  %v2366_v19 = vmul.u32.u64.high %v1480_v11, %v1475_v14, %v2365_v18  ;;  %v1487_v23 = vmul.u32 %v1480_v11, %v1471_v21 }
 0xb18   : > { %v2362_v16 = vmul.u32.u64.low %v1480_v11, %v1479_v15  ;;  %v2363_v17 = vmul.u32.u64.high %v1480_v11, %v1479_v15, %v2362_v16 }
 0xb19   : > { %v1490_v22 = vadd.s32 1, %v2366_v19 }
 0xb1a   : > { %vm1489_vm10 = vc.u32 %v2363_v17, %v2365_v18  ;;  %v1488_v35 = vadd.s32 %v2365_v18, %v2363_v17 }
 0xb1b   : > { %v1491_v24 = vsel %vm1489_vm10, %v1490_v22, %v2366_v19 }
 0xb1c   : > { %v1492_v25 = vadd.s32 %v1491_v24, %v1487_v23 }
 0xb1e   : > { %v1493_v26 = vadd.s32 536870912, %v1492_v25 }
 0xb20   : > { %v1494_v27 = vshrl.u32 %v1493_v26, 30 }
 0xb22   : > { %v1495_v28 = vshll.u32 %v1494_v27, 30  ;;  %v1518_v48 = vsub.s32 4, %v1494_v27 }
 0xb24   : > { %v1496_v20 = vsub.s32 %v1492_v25, %v1495_v28  ;;  %v1519_v51 = vsel %vm1434_vm12, %v1518_v48, %v1494_v27 }
 0xb25   : > { %v1521_v53 = vsel %vm1433_vm13, 0, %v1519_v51 }
 0xb26   : > { %v1498_v30 = vsub.s32 0, %v1496_v20  ;;  %v1525_v54 = vadd.s32 3, %v1521_v53 }
 0xb28   : > { %v1793_v31 = vmin.u32 %v1498_v30, %v1496_v20  ;;  %v1526_v55 = vand.u32 3, %v1525_v54 }
 0xb2a   : > { %v1500_v32 = vclz %v1793_v31  ;;  %vm1531_vm14 = vcmp.eq.s32.totalorder %v1526_v55, 2  ;;  %vm1528_vm15 = vcmp.eq.s32.totalorder %v1526_v55, 0  ;;  %vm1527_vm1 = vcmp.lt.s32.totalorder %v1526_v55, 2 }
 0xb2c   : > { %v1794_v33 = vadd.s32 4294967294, %v1500_v32 }
 0xb2e   : > { %vm1795_vm11 = vcmp.lt.s32.totalorder %v1794_v33, 0 }
 0xb2f   : > { %v1503_v34 = vsel %vm1795_vm11, 0, %v1794_v33 }
 0xb30   : > { %v1504_v36 = vsub.s32 32, %v1503_v34  ;;  %v1508_v38 = vsub.s32 4294967266, %v1503_v34  ;;  %v1505_v39 = vshll.u32 %v1496_v20, %v1503_v34 }
 0xb32   : > { %v1506_v40 = vshrl.u32 %v1488_v35, %v1504_v36  ;;  %v1509_v41 = vadd.s32 127, %v1508_v38 }
 0xb34   : > { %v1507_v42 = vor.u32 %v1506_v40, %v1505_v39  ;;  %v1510_v43 = vshll.u32 %v1509_v41, 23 }
 0xb36   : > { %v1511_v44 = vor.u32 4788187, %v1510_v43  ;;  %v1514_v46 = vcvt.s32.f32 %v1507_v42 }
 0xb38   : > { %v1512_v45 = vand.u32 2147483647, %v1511_v44 }
 0xb3a   : > { %v1515_v47 = vmul.f32 %v1514_v46, %v1512_v45 }
 0xb3c   : > { %v1516_v49 = vxor.u32 2147483648, %v1515_v47 }
 0xb3e   : > { %v1517_v50 = vsel %vm1434_vm12, %v1516_v49, %v1515_v47 }
 0xb3f   : > { %v1520_v52 = vsel %vm1433_vm13, %v2356_v8, %v1517_v50 }
 0xb40   : > { %2021 = vcosq.f32 %v1520_v52 }
 0xb41   : > { %2023 = vsinq.f32 %v1520_v52 }
 0xb4a   : > { %v2022_v56 = vpop.eup %2021 }
 0xb4b   : > { %v2024_v57 = vpop.eup %2023  ;;  %v1532_v58 = vxor.u32 2147483648, %v2022_v56 }
 0xb4c   : > { %v1529_v59 = vxor.u32 2147483648, %v2024_v57 }
 0xb4d   : > { %v1533_v60 = vsel %vm1531_vm14, %v1532_v58, %v2024_v57 }
 0xb4e   : > { %v1530_v61 = vsel %vm1528_vm15, %v2022_v56, %v1529_v59 }
 0xb4f   : > { %v1534_v37 = vsel %vm1527_vm1, %v1530_v61, %v1533_v60 }
 0xb50   : > { %v1535_v1 = vsel %vm1524_vm2, nan, %v1534_v37 }
 0xb51   : > { %v1536_v2 = vmul.f32 %v1535_v1, %v1535_v1 }
 0xb53   : > { %v1543_v3 = vmul.f32 %v1796_v63, %v1536_v2 }
 0xb55   : > { %v1544_v4 = vadd.f32 %v1543_v3, %v2353_v29 }
 0xb57   : > { %v1545_v5 = vpack.c.bf16 %v1544_v4, %v1544_v4 }
 0xb59   : > { %1959 = vmatmul.mubr.bf16.vlgmr.msra.gmra.mrb[20].mxu1 %v1545_v5 }
 0xc2c   : > { %v1651_v0 = vpop.f32.mrb[20].mxu1 }
 0xc2d   : > { %v1652_v7 = vadd.f32 %v1797_v6, %v1651_v0  ;;  %v1960_v9 = vpop.f32.mrb[21].mxu1 }
 0xc2e   : > { %v1654_v8 = vpop.f32.mrb[22].mxu1 }
 0xc2f   : > { %v1657_v10 = vadd.f32 %v1652_v7, %v2296_v62  ;;  %v1961_v11 = vpop.f32.mrb[23].mxu1 }
 0xc31   : > { %1658 = vst.msk [vmem:[%s601_s20] sm:$0xff] %vm620_vm0, %v1657_v10 }
 0xc32 PF: > { %s28_s27 = sadd.s32 1, %s2031_s27  }
 0xc33   : > { %p25_p4 = scmp.ge.s32.totalorder %s28_s27, 4  }
 0xc35   :  { %27 = sbr.rel (!%p25_p4) target bundleno = 4 (0x4), region = 132 }

// kernel: conditional_decoder_forward.27
= control target key start
LH: loop header
LB: loop body
LE: loop exit
PB: predicated region body
PF: predicated region fallthrough
CT: control target
= control target key end

     0   :  { %s600_s15 = smov 0   ;;  %s654_s0 = inlined_call_operand.vmem [shape: f32[2,8,32], index: 0, kind: input, shape index: {}]   ;;  %s655_s1 = inlined_call_operand.vmem [shape: f32[2,8,1], index: 1, kind: input, shape index: {}]   ;;  %s656_s2 = inlined_call_operand.vmem [shape: bf16[3,32,64], index: 2, kind: input, shape index: {}]   ;;  %s657_s3 = inlined_call_operand.vmem [shape: f32[1,64], index: 3, kind: input, shape index: {}]   ;;  %s658_s4 = inlined_call_operand.vmem [shape: f32[2,8,64], index: 4, kind: output, shape index: {}]  }
   0x1 LB: > { %s485_s16 = sadd.s32 4294967295, %s570_s15   ;;  %p489_p0 = scmp.ge.s32.totalorder %s570_s15, 1  ;;  %s570_s15 = sphi %s600_s15, %s14_s15  }
   0x2   : > { %p170_p1 = scmp.lt.s32.totalorder %s570_s15, 3 }
   0x4   : > { %p171_p2 = pnand %p489_p0, %p170_p1 }
   0x5   : > { %p198_p3 = scmp.lt.s32.totalorder (!%p171_p2), %s485_s16, 1  ;;  %v572_v0 = vmov (!%p171_p2), 0   ;;  %v558_v2 = vld [vmem:[%s656_s2 + $0x10] sm:$0xff] (!%p171_p2)   ;;  %v559_v3 = vld [vmem:[%s656_s2] sm:$0xff] (!%p171_p2)   ;;  %vm219_vm0 = vcmask (!%p171_p2), 261120   ;;  %v573_v4 = vmov (!%p171_p2), 0.0  }
   0x6   : > { %174 = sbr.rel (%p171_p2) target bundleno = 382 (0x17e), region = 36  ;;  %557 = vset.pattern.permute.xlu0 (!%p171_p2), %v572_v0  ;;  %522 = vmatprep.subr.bf16.mxu0 (!%p171_p2), %v573_v4  ;;  %220 = vst.msk [vmem:[#allocation2] sm:$0xff] (!%p171_p2), %vm219_vm0, %v573_v4  ;;  %vm221_vm1 = vcmask (!%p171_p2), 254976   ;;  %v560_v5 = vld [vmem:[%s656_s2 + $0x18] sm:$0xff] (!%p171_p2)   ;;  %v561_v6 = vld [vmem:[%s656_s2 + $0x8] sm:$0xff] (!%p171_p2)   ;;  %vm574_vm2 = vmmov (!%p171_p2), 0  }
   0x7   : > { %530 = vmatprep.subr.bf16.mxu1 (!%p171_p2), %v573_v4  ;;  %523 = vmatpush3.bf16.msra.mxu0 (!%p171_p2), %v558_v2  ;;  %222 = vst.msk [vmem:[#allocation2 + $0x8] sm:$0x3] (!%p171_p2), %vm221_vm1, %v573_v4  ;;  %v562_v12 = vld [vmem:[%s656_s2 + $0x20] sm:$0xff] (!%p171_p2)   ;;  %v563_v15 = vld [vmem:[%s656_s2 + $0x28] sm:$0xff] (!%p171_p2)   ;;  %vm418_vm3 = vcmask (!%p171_p2), 523264  }
   0x8   : > { %531 = vmatpush3.bf16.msra.mxu1 (!%p171_p2), %v559_v3  ;;  %524 = vmatprep.subr.bf16.mxu0 (!%p171_p2), %v573_v4  ;;  %v510_v28 = vld [vmem:[%s657_s3] ss:$0 sm:$0xff] (!%p171_p2) }
   0x9   : > { %532 = vmatprep.subr.bf16.mxu1 (!%p171_p2), %v573_v4  ;;  %526 = vmatprep.mubr.msk.bf16.mxu0 (!%p171_p2), %vm574_vm2, %v573_v4 }
   0xa   : > { %534 = vmatprep.mubr.msk.bf16.mxu1 (!%p171_p2), %vm574_vm2, %v573_v4 }
   0xb   : > { %525 = vmatpush3.bf16.msra.mxu0 (!%p171_p2), %v560_v5 }
   0xc   : > { %533 = vmatpush3.bf16.msra.mxu1 (!%p171_p2), %v561_v6  ;;  %538 = vmatprep.subr.bf16.mxu0 (!%p171_p2), %v573_v4 }
   0xd   : > { %s660_s16 = smov (!%p198_p3, %s485_s16), 1 }
   0xe   : > { %s608_s17 = sshll.u32 %s660_s16, 3 }
   0xf   : > { %s205_s20 = scalar_lea.vmem %s655_s1, %s608_s17  ;;  %s201_s5 = scalar_lea.vmem %s654_s0, %s608_s17 }
  0x10   : > { %v212_v1 = vld [vmem:[%s205_s20] sm:$0xff]  ;;  %s209_s14 = scalar_lea.vmem %s658_s4, %s608_s17 }
  0x11   : > { %215 = vperm.xlu0 %557, %v212_v1   ;;  %v211_v7 = vld [vmem:[%s201_s5] sm:$0xff] }
  0x90   : > { %v216_v8 = vpop.permute.xlu0 %215 }
  0x91   : > { %v218_v9 = vmul.f32 %v216_v8, %v211_v7 }
  0x93   : > { %223 = vst.msk [vmem:[#allocation2 + $0x1] sm:$0xff] %vm219_vm0, %v218_v9 }
  0x9a   : > { %v230_v10 = vld [vmem:[#allocation2 + $0x1] sm:$0xff] }
  0x9b   : > { %v224_v11 = vld [vmem:[#allocation2] sm:$0xff]  ;;  %v231_v13 = vpack.c.bf16 %v230_v10, %v230_v10 }
  0x9c   : > { %v225_v14 = vpack.c.bf16 %v224_v11, %v224_v11  ;;  %v347_v16 = vld [vmem:[#allocation2 + $0x2] sm:$0xff] }
  0x9d   : > { %527 = vmatmul.mubr.msk.bf16.vlgmr.msra.gmra.mrb[0].mxu0 %vm219_vm0, %v231_v13  ;;  %v348_v17 = vpack.c.bf16 %v347_v16, %v347_v16 }
  0x9e   : > { %535 = vmatmul.mubr.msk.bf16.vlgmr.msra.gmra.mrb[0].mxu1 %vm219_vm0, %v225_v14  ;;  %539 = vmatpush3.bf16.msra.mxu0 %v562_v12 }
  0x9f   : > { %542 = vmatprep.mubr.msk.bf16.mxu0 %vm574_vm2, %v573_v4  ;;  %540 = vmatprep.subr.bf16.mxu0 %v573_v4 }
  0xa2   : > { %541 = vmatpush3.bf16.msra.mxu0 %v563_v15 }
  0xa5   : > { %543 = vmatmul.mubr.msk.bf16.vlgmr.msra.gmra.mrb[4].mxu0 %vm219_vm0, %v348_v17 }
 0x170   : > { %v286_v18 = vpop.f32.mrb[0].mxu0 }
 0x171   : > { %v341_v19 = vpop.f32.mrb[0].mxu1  ;;  %v528_v21 = vpop.f32.mrb[1].mxu0 }
 0x172   : > { %v342_v20 = vadd.f32 %v341_v19, %v286_v18  ;;  %v536_v22 = vpop.f32.mrb[1].mxu1  ;;  %v289_v23 = vpop.f32.mrb[2].mxu0 }
 0x173   : > { %v344_v24 = vpop.f32.mrb[2].mxu1  ;;  %v529_v25 = vpop.f32.mrb[3].mxu0 }
 0x174   : > { %v537_v26 = vpop.f32.mrb[3].mxu1 }
 0x178   : > { %v403_v27 = vpop.f32.mrb[4].mxu0 }
 0x179   : > { %v409_v29 = vadd.f32 %v403_v27, %v342_v20  ;;  %v544_v30 = vpop.f32.mrb[5].mxu0 }
 0x17a   : > { %v406_v31 = vpop.f32.mrb[6].mxu0 }
 0x17b   : > { %v417_v32 = vadd.f32 %v510_v28, %v409_v29  ;;  %v545_v33 = vpop.f32.mrb[7].mxu0 }
 0x17d   : > { %419 = vst.msk [vmem:[%s209_s14] sm:$0xff] %vm418_vm3, %v417_v32 }
 0x17e PF: > { %s14_s15 = sadd.s32 1, %s570_s15  }
 0x17f   : > { %p11_p4 = scmp.ge.s32.totalorder %s14_s15, 4  }
 0x181   :  { %13 = sbr.rel (!%p11_p4) target bundleno = 1 (0x1), region = 71 }

// kernel: conditional_decoder_forward.25
= control target key start
LH: loop header
LB: loop body
LE: loop exit
PB: predicated region body
PF: predicated region fallthrough
CT: control target
= control target key end

     0   :  { %s2138_s21 = smov 0   ;;  %s2418_s0 = inlined_call_operand.vmem [shape: f32[2,8,64], index: 0, kind: input, shape index: {}]   ;;  %s2419_s1 = inlined_call_operand.vmem [shape: f32[2,8,1], index: 1, kind: input, shape index: {}]   ;;  %s2420_s2 = inlined_call_operand.vmem [shape: f32[2,1,128], index: 2, kind: input, shape index: {}]   ;;  %s2421_s3 = inlined_call_operand.vmem [shape: bf16[3,64,32], index: 3, kind: input, shape index: {}]   ;;  %s2422_s4 = inlined_call_operand.vmem [shape: f32[1,32], index: 4, kind: input, shape index: {}, may-alias: {4,6,8,10,12,14}]   ;;  %s2423_s5 = inlined_call_operand.vmem [shape: f32[1,32], index: 5, kind: input, shape index: {}, may-alias: {5,11}]   ;;  %s2424_s6 = inlined_call_operand.vmem [shape: f32[1,32], index: 6, kind: input, shape index: {}, may-alias: {4,6,8,10,12,14}]   ;;  %s2425_s7 = inlined_call_operand.vmem [shape: bf16[128,32], index: 7, kind: input, shape index: {}]   ;;  %s2426_s8 = inlined_call_operand.vmem [shape: f32[1,32], index: 8, kind: input, shape index: {}, may-alias: {4,6,8,10,12,14}]   ;;  %s2427_s9 = inlined_call_operand.vmem [shape: bf16[3,32,32], index: 9, kind: input, shape index: {}]   ;;  %s2428_s10 = inlined_call_operand.vmem [shape: f32[1,32], index: 10, kind: input, shape index: {}, may-alias: {4,6,8,10,12,14}]   ;;  %s2429_s11 = inlined_call_operand.vmem [shape: f32[1,32], index: 11, kind: input, shape index: {}, may-alias: {5,11}]   ;;  %s2430_s12 = inlined_call_operand.vmem [shape: f32[1,32], index: 12, kind: input, shape index: {}, may-alias: {4,6,8,10,12,14}]   ;;  %s2431_s13 = inlined_call_operand.vmem [shape: bf16[64,32], index: 13, kind: input, shape index: {}]   ;;  %s2432_s14 = inlined_call_operand.vmem [shape: f32[1,32], index: 14, kind: input, shape index: {}, may-alias: {4,6,8,10,12,14}]   ;;  %s2433_s15 = inlined_call_operand.vmem [shape: f32[32,32], index: 15, kind: input, shape index: {}]   ;;  %s2434_s16 = inlined_call_operand.vmem [shape: f32[2,8,32], index: 16, kind: output, shape index: {}]  }
   0x1   :  { %2435 = sst [smem:[#allocation4_spill]] %s2418_s0 }
   0x2 LB: > { %s1686_s22 = sadd.s32 4294967295, %s2047_s21   ;;  %p1690_p0 = scmp.ge.s32.totalorder %s2047_s21, 1  ;;  %s2047_s21 = sphi %s2138_s21, %s26_s21  }
   0x3   : > { %p478_p1 = scmp.lt.s32.totalorder %s2047_s21, 3 }
   0x5   : > { %p479_p2 = pnand %p1690_p0, %p478_p1 }
   0x6   : > { %p533_p3 = scmp.lt.s32.totalorder (!%p479_p2), %s1686_s22, 1  ;;  %v1999_v0 = vld [vmem:[%s2421_s3 + $0x20] sm:$0xff] (!%p479_p2)   ;;  %v2049_v1 = vmov (!%p479_p2), 0   ;;  %v2050_v2 = vmov (!%p479_p2), 0.0   ;;  %v2001_v4 = vld [vmem:[%s2421_s3 + $0x28] sm:$0xff] (!%p479_p2)   ;;  %vm561_vm0 = vcmask (!%p479_p2), 523264  }
   0x7   : > { %482 = sbr.rel (%p479_p2) target bundleno = 1215 (0x4bf), region = 84  ;;  %1998 = vset.pattern.permute.xlu0 (!%p479_p2), %v2049_v1  ;;  %1826 = vmatprep.subr.bf16.mxu0 (!%p479_p2), %v2050_v2  ;;  %v2000_v3 = vld [vmem:[%s2421_s3] sm:$0xff] (!%p479_p2)   ;;  %v2002_v6 = vld [vmem:[%s2421_s3 + $0x8] sm:$0xff] (!%p479_p2)   ;;  %562 = vst.msk [vmem:[#allocation2] sm:$0xff] (!%p479_p2), %vm561_vm0, %v2050_v2  ;;  %vm563_vm1 = vcmask (!%p479_p2), 517120   ;;  %v2003_v7 = vld [vmem:[%s2421_s3 + $0x30] sm:$0xff] (!%p479_p2)  }
   0x8   : > { %1827 = vmatpush3.bf16.msra.mxu0 (!%p479_p2), %v1999_v0  ;;  %1838 = vmatprep.subr.bf16.mxu1 (!%p479_p2), %v2050_v2  ;;  %v2004_v8 = vld [vmem:[%s2421_s3 + $0x10] sm:$0xff] (!%p479_p2)   ;;  %v2005_v9 = vld [vmem:[%s2421_s3 + $0x38] sm:$0xff] (!%p479_p2)   ;;  %564 = vst.msk [vmem:[#allocation2 + $0x8] sm:$0x3] (!%p479_p2), %vm563_vm1, %v2050_v2  ;;  %vm2051_vm2 = vmmov (!%p479_p2), 0   ;;  %s2436_s18 = sld [smem:[#allocation4_spill]] (!%p479_p2) }
   0x9   : > { %1828 = vmatprep.subr.bf16.mxu0 (!%p479_p2), %v2050_v2  ;;  %1839 = vmatpush3.bf16.msra.mxu1 (!%p479_p2), %v2000_v3  ;;  %v2006_v10 = vld [vmem:[%s2421_s3 + $0x18] sm:$0xff] (!%p479_p2)   ;;  %v2007_v16 = vld [vmem:[%s2421_s3 + $0x40] sm:$0xff] (!%p479_p2)   ;;  %v2008_v19 = vld [vmem:[%s2421_s3 + $0x48] sm:$0xff] (!%p479_p2)   ;;  %vm810_vm3 = vcmask (!%p479_p2), 261120   ;;  %v2052_v27 = vmov (!%p479_p2), 0.0|0.0   ;;  %vm1127_vm4 = vcmask (!%p479_p2), 254976  }
   0xa   : > { %1840 = vmatprep.subr.bf16.mxu1 (!%p479_p2), %v2050_v2  ;;  %1834 = vmatprep.mubr.msk.bf16.mxu0 (!%p479_p2), %vm2051_vm2, %v2050_v2  ;;  %v2009_v20 = vld [vmem:[%s2421_s3 + $0x50] sm:$0xff] (!%p479_p2)   ;;  %v2010_v21 = vld [vmem:[%s2421_s3 + $0x58] sm:$0xff] (!%p479_p2)   ;;  %1126 = vst.msk [vmem:[#allocation3] sm:$0xff] (!%p479_p2), %vm810_vm3, %v2050_v2  ;;  %v557_v24 = vld [vmem:[%s2433_s15] sm:$0xff] (!%p479_p2) }
   0xb   : > { %1846 = vmatprep.mubr.msk.bf16.mxu1 (!%p479_p2), %vm2051_vm2, %v2050_v2  ;;  %v558_v25 = vld [vmem:[%s2433_s15 + $0x8] sm:$0xff] (!%p479_p2)  ;;  %v559_v28 = vld [vmem:[%s2433_s15 + $0x10] sm:$0xff] (!%p479_p2)  ;;  %v560_v29 = vld [vmem:[%s2433_s15 + $0x18] sm:$0xff] (!%p479_p2)  ;;  %1128 = vst.msk [vmem:[#allocation3 + $0x8] sm:$0x3] (!%p479_p2), %vm1127_vm4, %v2050_v2 }
   0xc   : > { %1829 = vmatpush3.bf16.msra.mxu0 (!%p479_p2), %v2001_v4  ;;  %v2238_v26 = vpack.c.bf16 (!%p479_p2), %v558_v25, %v557_v24  ;;  %v2252_v30 = vpack.c.bf16 (!%p479_p2), %v560_v29, %v559_v28  ;;  %v1725_v41 = vld [vmem:[%s2422_s4] ss:$0 sm:$0xff] (!%p479_p2)  ;;  %v2012_v1 = vld [vmem:[%s2425_s7 + $0x8] sm:$0xff] (!%p479_p2)   ;;  %v2013_v3 = vld [vmem:[%s2425_s7 + $0x10] sm:$0xff] (!%p479_p2)  }
   0xd   : > { %1841 = vmatpush3.bf16.msra.mxu1 (!%p479_p2), %v2002_v6  ;;  %1830 = vmatprep.subr.bf16.mxu0 (!%p479_p2), %v2050_v2  ;;  %v2011_v61 = vld [vmem:[%s2425_s7] sm:$0xff] (!%p479_p2)   ;;  %v2014_v4 = vld [vmem:[%s2425_s7 + $0x18] sm:$0xff] (!%p479_p2)   ;;  %v2016_v6 = vld [vmem:[%s2425_s7 + $0x28] sm:$0xff] (!%p479_p2)  }
   0xe   : > { %s2438_s22 = smov (!%p533_p3, %s1686_s22), 1  ;;  %1842 = vmatprep.subr.bf16.mxu1 %v2050_v2 }
   0xf   : > { %s2158_s27 = sshll.u32 %s2438_s22, 3 }
  0x10   : > { %s540_s30 = scalar_lea.vmem %s2419_s1, %s2158_s27  ;;  %1831 = vmatpush3.bf16.msra.mxu0 %v2003_v7  ;;  %s536_s19 = scalar_lea.vmem %s2436_s18, %s2158_s27  ;;  %v2017_v7 = vld [vmem:[%s2425_s7 + $0x30] sm:$0xff]  }
  0x11   : > { %v550_v5 = vld [vmem:[%s540_s30] sm:$0xff]  ;;  %1843 = vmatpush3.bf16.msra.mxu1 %v2004_v8  ;;  %1832 = vmatprep.subr.bf16.mxu0 %v2050_v2  ;;  %s543_s18 = scalar_lea.vmem %s2420_s2, %s2438_s22 }
  0x12   : > { %553 = vperm.xlu0 %1998, %v550_v5   ;;  %1844 = vmatprep.subr.bf16.mxu1 %v2050_v2  ;;  %v549_v11 = vld [vmem:[%s536_s19] sm:$0xff] }
  0x13   : > { %v2015_v5 = vld [vmem:[%s2425_s7 + $0x20] sm:$0xff]  }
  0x14   : > { %1833 = vmatpush3.bf16.msra.mxu0 %v2005_v9  ;;  %v1013_v8 = vld [vmem:[%s543_s18] sm:$0x1]  ;;  %v2018_v9 = vld [vmem:[%s2425_s7 + $0x38] sm:$0xff]   ;;  %s547_s18 = scalar_lea.vmem %s2434_s16, %s2158_s27 }
  0x15   : > { %1845 = vmatpush3.bf16.msra.mxu1 %v2006_v10  ;;  %1850 = vmatprep.subr.bf16.mxu0 %v2050_v2  ;;  %v1014_v10 = vpack.c.bf16 %v1013_v8, %v1013_v8 }
  0x16   : > { %1968 = vmatprep.subr.bf16.mxu1 %v2052_v27 }
  0x91   : > { %v2199_v12 = vpop.permute.xlu0 %553 }
  0x92   : > { %v2202_v13 = vmul.f32 %v2199_v12, %v549_v11  ;;  %v2019_v11 = vld [vmem:[%s2427_s9 + $0x10] sm:$0xff]  }
  0x94   : > { %565 = vst.msk [vmem:[#allocation2 + $0x1] sm:$0xff] %vm561_vm0, %v2202_v13 }
  0x9b   : > { %v576_v14 = vld [vmem:[#allocation2 + $0x1] sm:$0xff] }
  0x9c   : > { %v566_v15 = vld [vmem:[#allocation2] sm:$0xff]  ;;  %v577_v17 = vpack.c.bf16 %v576_v14, %v576_v14  ;;  %v2020_v14 = vld [vmem:[%s2427_s9 + $0x18] sm:$0xff]  }
  0x9d   : > { %v567_v18 = vpack.c.bf16 %v566_v15, %v566_v15  ;;  %v721_v22 = vld [vmem:[#allocation2 + $0x2] sm:$0xff] }
  0x9e   : > { %1835 = vmatmul.mubr.msk.bf16.vlgmr.msra.gmra.mrb[0].mxu0 %vm561_vm0, %v577_v17  ;;  %v722_v23 = vpack.c.bf16 %v721_v22, %v721_v22 }
  0x9f   : > { %1847 = vmatmul.mubr.msk.bf16.vlgmr.msra.gmra.mrb[0].mxu1 %vm561_vm0, %v567_v18  ;;  %1851 = vmatpush3.bf16.msra.mxu0 %v2007_v16  ;;  %v977_v18 = vlaneseq }
  0xa0   : > { %1858 = vmatprep.mubr.msk.bf16.mxu0 %vm2051_vm2, %v2050_v2  ;;  %1852 = vmatprep.subr.bf16.mxu0 %v2050_v2 }
  0xa1   : > { %1881 = vmatprep.mubr.msk.f32.mxu1 %vm2051_vm2, %v2050_v2  ;;  %1970 = vmatpush3.bf16.msra.mxu1 %v2238_v26 }
  0xa2   : > { %1971 = vmatprep.subr.bf16.mxu1 %v2052_v27 }
  0xa3   : > { %1853 = vmatpush3.bf16.msra.mxu0 %v2008_v19 }
  0xa4   : > { %1854 = vmatprep.subr.bf16.mxu0 %v2050_v2 }
  0xa5   : > { %1973 = vmatpush3.bf16.msra.mxu1 %v2252_v30 }
  0xa6   : > { %1904 = vmatprep.subr.bf16.mxu1 %v2050_v2 }
  0xa7   : > { %1855 = vmatpush3.bf16.msra.mxu0 %v2009_v20 }
  0xa8   : > { %1856 = vmatprep.subr.bf16.mxu0 %v2050_v2 }
  0xab   : > { %1857 = vmatpush3.bf16.msra.mxu0 %v2010_v21 }
  0xac   : > { %1962 = vmatprep.subr.bf16.mxu0 %v2052_v27 }
  0xae   : > { %1859 = vmatmul.mubr.msk.bf16.vlgmr.msra.gmra.mrb[4].mxu0 %vm561_vm0, %v722_v23  ;;  %v978_v23 = vshrl.u32 %v977_v18, 7 }
  0xaf   : > { %1870 = vmatprep.mubr.msk.f32.mxu0 %vm2051_vm2, %v2050_v2  ;;  %1964 = vmatpush3.bf16.msra.mxu0 %v2238_v26 }
  0xb0   : > { %1965 = vmatprep.subr.bf16.mxu0 %v2052_v27  ;;  %v2324_v24 = vsub.s32 0, %v978_v23 }
  0xb3   : > { %1967 = vmatpush3.bf16.msra.mxu0 %v2252_v30 }
  0xb4   : > { %1884 = vmatprep.subr.bf16.mxu0 %v2050_v2 }
 0x171   : > { %v648_v31 = vpop.f32.mrb[0].mxu0 }
 0x172   : > { %v715_v32 = vpop.f32.mrb[0].mxu1  ;;  %v1836_v34 = vpop.f32.mrb[1].mxu0 }
 0x173   : > { %v716_v33 = vadd.f32 %v715_v32, %v648_v31  ;;  %v1848_v35 = vpop.f32.mrb[1].mxu1  ;;  %v651_v36 = vpop.f32.mrb[2].mxu0  ;;  %v1728_v32 = vld [vmem:[%s2423_s5] ss:$0 sm:$0xff] }
 0x174   : > { %v718_v37 = vpop.f32.mrb[2].mxu1  ;;  %v1837_v38 = vpop.f32.mrb[3].mxu0  ;;  %v1729_v34 = vld [vmem:[%s2424_s6] ss:$0 sm:$0xff] }
 0x175   : > { %v1849_v39 = vpop.f32.mrb[3].mxu1 }
 0x181   : > { %v793_v40 = vpop.f32.mrb[4].mxu0 }
 0x182   : > { %v799_v42 = vadd.f32 %v793_v40, %v716_v33  ;;  %v1860_v43 = vpop.f32.mrb[5].mxu0 }
 0x183   : > { %v796_v44 = vpop.f32.mrb[6].mxu0 }
 0x184   : > { %v2261_v45 = vadd.f32 %v1725_v41, %v799_v42  ;;  %v1861_v46 = vpop.f32.mrb[7].mxu0 }
 0x186   : > { %v811_v47 = vsel %vm810_vm3, %v2261_v45, 0.0  ;;  %v820_v48 = vmul.f32 %v2261_v45, %v2261_v45 }
 0x187   : > { %v812_v49 = vrot.slane %v811_v47, 4 }
 0x188   : > { %v821_v50 = vsel %vm810_vm3, %v820_v48, 0.0 }
 0x189   : > { %v813_v51 = vadd.f32 %v812_v49, %v811_v47  ;;  %v822_v52 = vrot.slane %v821_v50, 4  ;;  %v1031_v47 = vld [vmem:[%s2426_s8] sm:$0x1] }
 0x18b   : > { %v814_v53 = vrot.slane %v813_v51, 2  ;;  %v823_v54 = vadd.f32 %v822_v52, %v821_v50 }
 0x18d   : > { %v815_v55 = vadd.f32 %v814_v53, %v813_v51  ;;  %v824_v56 = vrot.slane %v823_v54, 2 }
 0x18f   : > { %v816_v57 = vrot.slane %v815_v55, 1  ;;  %v825_v58 = vadd.f32 %v824_v56, %v823_v54 }
 0x191   : > { %v817_v59 = vadd.f32 %v816_v57, %v815_v55  ;;  %v826_v60 = vrot.slane %v825_v58, 1  ;;  %v2021_v57 = vld [vmem:[%s2427_s9] sm:$0xff]  }
 0x193   : > { %v819_v62 = vmul.f32 0.125, %v817_v59  ;;  %v827_v63 = vadd.f32 %v826_v60, %v825_v58  ;;  %v2022_v59 = vld [vmem:[%s2427_s9 + $0x8] sm:$0xff]  }
 0x195   : > { %1871 = vmatmul.mubr.msk.f32.vlgmr.msra.gmra.mrb[8].mxu0 %vm810_vm3, %v819_v62  ;;  %v828_v0 = vmul.f32 0.125, %v827_v63  ;;  %v2024_v63 = vld [vmem:[%s2427_s9 + $0x28] sm:$0xff]  }
 0x196   : > { %1885 = vmatpush3.bf16.msra.mxu0 %v2011_v61  ;;  %1900 = vmatprep.mubr.msk.bf16.mxu0 %vm2051_vm2, %v2050_v2  ;;  %v2023_v61 = vld [vmem:[%s2427_s9 + $0x20] sm:$0xff]  }
 0x197   : > { %1882 = vmatmul.mubr.msk.f32.vlgmr.msra.gmra.mrb[4].mxu1 %vm810_vm3, %v828_v0  ;;  %1886 = vmatprep.subr.bf16.mxu0 %v2050_v2 }
 0x198   : > { %1908 = vmatprep.mubr.msk.bf16.mxu1 %vm2051_vm2, %v2050_v2  ;;  %1905 = vmatpush3.bf16.msra.mxu1 %v2019_v11 }
 0x199   : > { %1906 = vmatprep.subr.bf16.mxu1 %v2050_v2 }
 0x19a   : > { %1887 = vmatpush3.bf16.msra.mxu0 %v2012_v1 }
 0x19b   : > { %1888 = vmatprep.subr.bf16.mxu0 %v2050_v2 }
 0x19c   : > { %1907 = vmatpush3.bf16.msra.mxu1 %v2020_v14 }
 0x19d   : > { %1912 = vmatprep.subr.bf16.mxu1 %v2050_v2 }
 0x19e   : > { %1889 = vmatpush3.bf16.msra.mxu0 %v2013_v3 }
 0x19f   : > { %1890 = vmatprep.subr.bf16.mxu0 %v2050_v2 }
 0x1a2   : > { %1891 = vmatpush3.bf16.msra.mxu0 %v2014_v4 }
 0x1a3   : > { %1892 = vmatprep.subr.bf16.mxu0 %v2050_v2 }
 0x1a6   : > { %1893 = vmatpush3.bf16.msra.mxu0 %v2015_v5 }
 0x1a7   : > { %1894 = vmatprep.subr.bf16.mxu0 %v2050_v2 }
 0x1aa   : > { %1895 = vmatpush3.bf16.msra.mxu0 %v2016_v6 }
 0x1ab   : > { %1896 = vmatprep.subr.bf16.mxu0 %v2050_v2 }
 0x1ae   : > { %1897 = vmatpush3.bf16.msra.mxu0 %v2017_v7 }
 0x1af   : > { %1898 = vmatprep.subr.bf16.mxu0 %v2050_v2 }
 0x1b2   : > { %1899 = vmatpush3.bf16.msra.mxu0 %v2018_v9 }
 0x1b3   : > { %1980 = vmatprep.subr.bf16.mxu0 %v2052_v27 }
 0x1b5   : > { %1901 = vmatmul.mubr.bf16.vlgmr.msra.gmra.mrb[12].mxu0 %v1014_v10 }
 0x1b6   : > { %1982 = vmatpush3.bf16.msra.mxu0 %v2238_v26  ;;  %1947 = vmatprep.mubr.msk.f32.mxu0 %vm2051_vm2, %v2050_v2 }
 0x1b7   : > { %1983 = vmatprep.subr.bf16.mxu0 %v2052_v27 }
 0x1ba   : > { %1985 = vmatpush3.bf16.msra.mxu0 %v2252_v30 }
 0x268   : > { %v898_v15 = vpop.f32.mrb[8].mxu0 }
 0x269   : > { %v975_v16 = vmul.f32 %v898_v15, %v898_v15  ;;  %v1872_v17 = vpop.f32.mrb[9].mxu0  ;;  %v980_v25 = vrot.slane %v898_v15, %v2324_v24 }
 0x26a   : > { %v971_v19 = vpop.f32.mrb[4].mxu1 }
 0x26b   : > { %v976_v20 = vsub.f32 %v971_v19, %v975_v16  ;;  %v1883_v21 = vpop.f32.mrb[5].mxu1  ;;  %v981_v29 = vsub.f32 %v2261_v45, %v980_v25 }
 0x26d   : > { %v982_v22 = vadd.f32 1e-05, %v976_v20 }
 0x26f   : > { %2029 = vrsqrt.f32 %v982_v22 }
 0x279   : > { %v2030_v28 = vpop.eup %2029 }
 0x27a   : > { %v987_v31 = vrot.slane %v2030_v28, %v2324_v24 }
 0x27c   : > { %v988_v33 = vmul.f32 %v987_v31, %v981_v29 }
 0x27e   : > { %v995_v35 = vmul.f32 %v1728_v32, %v988_v33 }
 0x280   : > { %v1002_v36 = vadd.f32 %v1729_v34, %v995_v35 }
 0x282   : > { %v1003_v37 = vmin.f32 %v1002_v36, 30.0 }
 0x284   : > { %v1004_v38 = vmul.f32 1.442695, %v1003_v37 }
 0x286   : > { %2031 = vpow2.f32 %v1004_v38 }
 0x288   : > { %v1114_v39 = vpop.f32.mrb[12].mxu0 }
 0x289   : > { %v1902_v40 = vpop.f32.mrb[13].mxu0  ;;  %v1115_v48 = vadd.f32 %v1114_v39, %v1031_v47 }
 0x28a   : > { %v1117_v41 = vpop.f32.mrb[14].mxu0  ;;  %v2026_v40 = vld [vmem:[%s2431_s13 + $0x8] sm:$0xff]  }
 0x28b   : > { %v1903_v42 = vpop.f32.mrb[15].mxu0  ;;  %v1123_v52 = vrot.slane %v1115_v48, %v2324_v24  ;;  %v2027_v41 = vld [vmem:[%s2431_s13 + $0x10] sm:$0xff]  }
 0x28c   : > { %v2028_v42 = vld [vmem:[%s2431_s13 + $0x18] sm:$0xff]  }
 0x290   : > { %v2032_v43 = vpop.eup %2031 }
 0x291   : > { %v1006_v44 = vadd.f32 2.0, %v2032_v43 }
 0x293   : > { %v1007_v45 = vmul.f32 %v2032_v43, %v1006_v44  ;;  %v1527_v43 = vpack.c.bf16 %v2202_v13, %v2202_v13  ;;  %v1758_v13 = vld [vmem:[%s2429_s11] ss:$0 sm:$0xff] }
 0x295   : > { %v1009_v46 = vadd.f32 2.0, %v1007_v45  ;;  %v1008_v49 = vmul.f32 %v1007_v45, %v1002_v36  ;;  %v2025_v36 = vld [vmem:[%s2431_s13] sm:$0xff]  }
 0x297   : > { %2033 = vrcp.f32 %v1009_v46 }
 0x2a1   : > { %v2034_v50 = vpop.eup %2033 }
 0x2a2   : > { %v1011_v51 = vmul.f32 %v2034_v50, %v1008_v49 }
 0x2a4   : > { %v1012_v53 = vmul.f32 %v1011_v51, %v2199_v12 }
 0x2a6   : > { %v1124_v54 = vadd.f32 %v1123_v52, %v1012_v53 }
 0x2a8   : > { %v1125_v55 = vmul.f32 %v1124_v54, %v2199_v12 }
 0x2aa   : > { %1129 = vst.msk [vmem:[#allocation3 + $0x1] sm:$0xff] %vm810_vm3, %v1125_v55 }
 0x2b1   : > { %v1136_v56 = vld [vmem:[#allocation3 + $0x1] sm:$0xff] }
 0x2b2   : > { %v1137_v58 = vpack.c.bf16 %v1136_v56, %v1136_v56  ;;  %v1130_v60 = vld [vmem:[#allocation3] sm:$0xff] }
 0x2b3   : > { %v1131_v62 = vpack.c.bf16 %v1130_v60, %v1130_v60  ;;  %v1253_v0 = vld [vmem:[#allocation3 + $0x2] sm:$0xff] }
 0x2b4   : > { %1909 = vmatmul.mubr.msk.bf16.vlgmr.msra.gmra.mrb[8].mxu1 %vm810_vm3, %v1137_v58  ;;  %v1254_v1 = vpack.c.bf16 %v1253_v0, %v1253_v0 }
 0x2b5   : > { %1913 = vmatpush3.bf16.msra.mxu1 %v2021_v57  ;;  %1916 = vmatprep.mubr.msk.bf16.mxu1 %vm2051_vm2, %v2050_v2 }
 0x2b6   : > { %1914 = vmatprep.subr.bf16.mxu1 %v2050_v2 }
 0x2b9   : > { %1915 = vmatpush3.bf16.msra.mxu1 %v2022_v59  ;;  %v1759_v59 = vld [vmem:[%s2430_s12] ss:$0 sm:$0xff] }
 0x2ba   : > { %1920 = vmatprep.subr.bf16.mxu1 %v2050_v2 }
 0x2bc   : > { %1917 = vmatmul.mubr.msk.bf16.vlgmr.msra.gmra.mrb[12].mxu1 %vm810_vm3, %v1131_v62 }
 0x2bd   : > { %1921 = vmatpush3.bf16.msra.mxu1 %v2023_v61  ;;  %1924 = vmatprep.mubr.msk.bf16.mxu1 %vm2051_vm2, %v2050_v2 }
 0x2be   : > { %1922 = vmatprep.subr.bf16.mxu1 %v2050_v2 }
 0x2c1   : > { %1923 = vmatpush3.bf16.msra.mxu1 %v2024_v63 }
 0x2c2   : > { %1974 = vmatprep.subr.bf16.mxu1 %v2052_v27 }
 0x2c4   : > { %1925 = vmatmul.mubr.msk.bf16.vlgmr.msra.gmra.mrb[16].mxu1 %vm810_vm3, %v1254_v1 }
 0x2c5   : > { %1976 = vmatpush3.bf16.msra.mxu1 %v2238_v26  ;;  %1936 = vmatprep.mubr.msk.f32.mxu1 %vm2051_vm2, %v2050_v2  ;;  %v1755_v26 = vld [vmem:[%s2428_s10] ss:$0 sm:$0xff] }
 0x2c6   : > { %1977 = vmatprep.subr.bf16.mxu1 %v2052_v27 }
 0x2c9   : > { %1979 = vmatpush3.bf16.msra.mxu1 %v2252_v30 }
 0x2ca   : > { %1950 = vmatprep.subr.bf16.mxu1 %v2050_v2 }
 0x387   : > { %v1192_v3 = vpop.f32.mrb[8].mxu1 }
 0x388   : > { %v1910_v4 = vpop.f32.mrb[9].mxu1 }
 0x389   : > { %v1195_v5 = vpop.f32.mrb[10].mxu1 }
 0x38a   : > { %v1911_v6 = vpop.f32.mrb[11].mxu1 }
 0x38b   : > { %v1760_v6 = vld [vmem:[%s2432_s14] ss:$0 sm:$0xff] }
 0x38f   : > { %v1247_v7 = vpop.f32.mrb[12].mxu1 }
 0x390   : > { %v1248_v8 = vadd.f32 %v1247_v7, %v1192_v3  ;;  %v1918_v9 = vpop.f32.mrb[13].mxu1 }
 0x391   : > { %v1250_v10 = vpop.f32.mrb[14].mxu1 }
 0x392   : > { %v1919_v11 = vpop.f32.mrb[15].mxu1 }
 0x397   : > { %v1309_v14 = vpop.f32.mrb[16].mxu1 }
 0x398   : > { %v1315_v15 = vadd.f32 %v1309_v14, %v1248_v8  ;;  %v1926_v27 = vpop.f32.mrb[17].mxu1 }
 0x399   : > { %v1312_v16 = vpop.f32.mrb[18].mxu1 }
 0x39a   : > { %v1323_v30 = vadd.f32 %v1755_v26, %v1315_v15  ;;  %v1927_v17 = vpop.f32.mrb[19].mxu1 }
 0x39c   : > { %v1326_v18 = vsel %vm810_vm3, %v1323_v30, 0.0  ;;  %v1334_v19 = vmul.f32 %v1323_v30, %v1323_v30 }
 0x39d   : > { %v1327_v20 = vrot.slane %v1326_v18, 4 }
 0x39e   : > { %v1335_v21 = vsel %vm810_vm3, %v1334_v19, 0.0 }
 0x39f   : > { %v1328_v22 = vadd.f32 %v1327_v20, %v1326_v18  ;;  %v1336_v23 = vrot.slane %v1335_v21, 4 }
 0x3a1   : > { %v1329_v25 = vrot.slane %v1328_v22, 2  ;;  %v1337_v28 = vadd.f32 %v1336_v23, %v1335_v21 }
 0x3a3   : > { %v1330_v29 = vadd.f32 %v1329_v25, %v1328_v22  ;;  %v1338_v31 = vrot.slane %v1337_v28, 2 }
 0x3a5   : > { %v1331_v32 = vrot.slane %v1330_v29, 1  ;;  %v1339_v33 = vadd.f32 %v1338_v31, %v1337_v28 }
 0x3a7   : > { %v1332_v34 = vadd.f32 %v1331_v32, %v1330_v29  ;;  %v1340_v35 = vrot.slane %v1339_v33, 1 }
 0x3a9   : > { %v1333_v37 = vmul.f32 0.125, %v1332_v34  ;;  %v1341_v38 = vadd.f32 %v1340_v35, %v1339_v33 }
 0x3ab   : > { %1937 = vmatmul.mubr.msk.f32.vlgmr.msra.gmra.mrb[6].mxu1 %vm810_vm3, %v1333_v37  ;;  %v1342_v39 = vmul.f32 0.125, %v1341_v38 }
 0x3ac   : > { %1951 = vmatpush3.bf16.msra.mxu1 %v2025_v36  ;;  %1958 = vmatprep.mubr.msk.bf16.mxu1 %vm2051_vm2, %v2050_v2 }
 0x3ad   : > { %1948 = vmatmul.mubr.msk.f32.vlgmr.msra.gmra.mrb[10].mxu0 %vm810_vm3, %v1342_v39  ;;  %1952 = vmatprep.subr.bf16.mxu1 %v2050_v2 }
 0x3b0   : > { %1953 = vmatpush3.bf16.msra.mxu1 %v2026_v40 }
 0x3b1   : > { %1954 = vmatprep.subr.bf16.mxu1 %v2050_v2 }
 0x3b4   : > { %1955 = vmatpush3.bf16.msra.mxu1 %v2027_v41 }
 0x3b5   : > { %1956 = vmatprep.subr.bf16.mxu1 %v2050_v2 }
 0x3b8   : > { %1957 = vmatpush3.bf16.msra.mxu1 %v2028_v42 }
 0x3bb   : > { %1959 = vmatmul.mubr.msk.bf16.vlgmr.msra.gmra.mrb[20].mxu1 %vm561_vm0, %v1527_v43 }
 0x47e   : > { %v1412_v44 = vpop.f32.mrb[6].mxu1 }
 0x47f   : > { %v1489_v45 = vmul.f32 %v1412_v44, %v1412_v44  ;;  %v1938_v46 = vpop.f32.mrb[7].mxu1  ;;  %v1494_v51 = vrot.slane %v1412_v44, %v2324_v24 }
 0x480   : > { %v1485_v47 = vpop.f32.mrb[10].mxu0 }
 0x481   : > { %v1490_v48 = vsub.f32 %v1485_v47, %v1489_v45  ;;  %v1949_v49 = vpop.f32.mrb[11].mxu0  ;;  %v1495_v2 = vsub.f32 %v1323_v30, %v1494_v51 }
 0x483   : > { %v1496_v50 = vadd.f32 1e-05, %v1490_v48 }
 0x485   : > { %2035 = vrsqrt.f32 %v1496_v50 }
 0x48e   : > { %v1604_v52 = vpop.f32.mrb[20].mxu1 }
 0x48f   : > { %v2036_v53 = vpop.eup %2035  ;;  %v1960_v54 = vpop.f32.mrb[21].mxu1  ;;  %v1605_v9 = vadd.f32 %v1760_v6, %v1604_v52 }
 0x490   : > { %v1501_v55 = vrot.slane %v2036_v53, %v2324_v24  ;;  %v1607_v56 = vpop.f32.mrb[22].mxu1 }
 0x491   : > { %v1961_v57 = vpop.f32.mrb[23].mxu1 }
 0x492   : > { %v1502_v58 = vmul.f32 %v1501_v55, %v1495_v2 }
 0x494   : > { %v1509_v60 = vmul.f32 %v1758_v13, %v1502_v58 }
 0x496   : > { %v1516_v61 = vadd.f32 %v1759_v59, %v1509_v60 }
 0x498   : > { %v1517_v62 = vmin.f32 %v1516_v61, 30.0 }
 0x49a   : > { %v1518_v63 = vmul.f32 1.442695, %v1517_v62 }
 0x49c   : > { %2037 = vpow2.f32 %v1518_v63 }
 0x4a6   : > { %v2038_v0 = vpop.eup %2037 }
 0x4a7   : > { %v1520_v1 = vadd.f32 2.0, %v2038_v0 }
 0x4a9   : > { %v1521_v24 = vmul.f32 %v2038_v0, %v1520_v1 }
 0x4ab   : > { %v1523_v3 = vadd.f32 2.0, %v1521_v24  ;;  %v1522_v4 = vmul.f32 %v1521_v24, %v1516_v61 }
 0x4ad   : > { %2039 = vrcp.f32 %v1523_v3 }
 0x4b7   : > { %v2040_v5 = vpop.eup %2039 }
 0x4b8   : > { %v1525_v7 = vmul.f32 %v2040_v5, %v1522_v4 }
 0x4ba   : > { %v1526_v8 = vmul.f32 %v1525_v7, %v2199_v12 }
 0x4bc   : > { %v1610_v10 = vadd.f32 %v1605_v9, %v1526_v8 }
 0x4be   : > { %1611 = vst.msk [vmem:[%s547_s18] sm:$0xff] %vm810_vm3, %v1610_v10 }
 0x4bf PF: > { %s26_s21 = sadd.s32 1, %s2047_s21  }
 0x4c0   : > { %p23_p4 = scmp.ge.s32.totalorder %s26_s21, 4  }
 0x4c2   :  { %25 = sbr.rel (!%p23_p4) target bundleno = 2 (0x2), region = 124 }

// kernel: conditional_decoder_forward.31
= control target key start
LH: loop header
LB: loop body
LE: loop exit
PB: predicated region body
PF: predicated region fallthrough
CT: control target
= control target key end

     0   :  { %s1169_s30 = smov 0   ;;  %s1289_s0 = inlined_call_operand.vmem [shape: f32[2,16,32], index: 0, kind: input, shape index: {}]   ;;  %s1290_s1 = inlined_call_operand.vmem [shape: f32[2,16,1], index: 1, kind: input, shape index: {}]   ;;  %s1291_s2 = inlined_call_operand.vmem [shape: bf16[3,32,32], index: 2, kind: input, shape index: {}]   ;;  %s1292_s3 = inlined_call_operand.vmem [shape: f32[1,32], index: 3, kind: input, shape index: {}, may-alias: {3,5}]   ;;  %s1293_s4 = inlined_call_operand.vmem [shape: f32[1,32], index: 4, kind: input, shape index: {}]   ;;  %s1294_s5 = inlined_call_operand.vmem [shape: f32[1,32], index: 5, kind: input, shape index: {}, may-alias: {3,5}]   ;;  %s1295_s6 = inlined_call_operand.vmem [shape: f32[32,32], index: 6, kind: input, shape index: {}]   ;;  %s1296_s7 = inlined_call_operand.vmem [shape: bf16[32,8], index: 7, kind: input, shape index: {}]   ;;  %s1297_s8 = inlined_call_operand.vmem [shape: f32[1,8], index: 8, kind: input, shape index: {}]   ;;  %s1298_s9 = inlined_call_operand.vmem [shape: f32[2,16,8], index: 9, kind: output, shape index: {}]  }
   0x1 LB: > { %s946_s10 = sadd.s32 4294967295, %s1113_s30   ;;  %p950_p0 = scmp.ge.s32.totalorder %s1113_s30, 1  ;;  %s1113_s30 = sphi %s1169_s30, %s19_s30  }
   0x2   : > { %p297_p1 = scmp.lt.s32.totalorder %s1113_s30, 3 }
   0x4   : > { %p298_p2 = pnand %p950_p0, %p297_p1 }
   0x5   : > { %p338_p3 = scmp.lt.s32.totalorder (!%p298_p2), %s946_s10, 1  ;;  %vm370_vm0 = vcmask (!%p298_p2), 261120   ;;  %v1115_v0 = vmov (!%p298_p2), 0   ;;  %v1116_v1 = vmov (!%p298_p2), 0.0   ;;  %vm373_vm1 = vcmask (!%p298_p2), 254976   ;;  %v1089_v4 = vld [vmem:[%s1291_s2 + $0x10] sm:$0xff] (!%p298_p2)  }
   0x6   : > { %301 = sbr.rel (%p298_p2) target bundleno = 899 (0x383), region = 56  ;;  %1088 = vset.pattern.permute.xlu0 (!%p298_p2), %v1115_v0  ;;  %371 = vst.msk [vmem:[#allocation2] sm:$0xff] (!%p298_p2), %vm370_vm0, %v1116_v1  ;;  %372 = vst.msk [vmem:[#allocation2 + $0x8] sm:$0xff] (!%p298_p2), %vm370_vm0, %v1116_v1  ;;  %1010 = vmatprep.subr.bf16.mxu0 (!%p298_p2), %v1116_v1  ;;  %v1090_v5 = vld [vmem:[%s1291_s2] sm:$0xff] (!%p298_p2)   ;;  %vm1117_vm2 = vmmov (!%p298_p2), 0   ;;  %v1091_v6 = vld [vmem:[%s1291_s2 + $0x18] sm:$0xff] (!%p298_p2)  }
   0x7   : > { %1018 = vmatprep.subr.bf16.mxu1 (!%p298_p2), %v1116_v1  ;;  %374 = vst.msk [vmem:[#allocation2 + $0x10] sm:$0x3] (!%p298_p2), %vm373_vm1, %v1116_v1  ;;  %1014 = vmatprep.mubr.msk.bf16.mxu0 (!%p298_p2), %vm1117_vm2, %v1116_v1  ;;  %v1092_v7 = vld [vmem:[%s1291_s2 + $0x8] sm:$0xff] (!%p298_p2)   ;;  %v1093_v15 = vld [vmem:[%s1291_s2 + $0x20] sm:$0xff] (!%p298_p2)   ;;  %v1118_v28 = vmov (!%p298_p2), 0.0|0.0   ;;  %v581_v29 = vld [vmem:[%s1295_s6 + $0x10] sm:$0xff] (!%p298_p2) }
   0x8   : > { %1022 = vmatprep.mubr.msk.bf16.mxu1 (!%p298_p2), %vm1117_vm2, %v1116_v1  ;;  %1011 = vmatpush3.bf16.msra.mxu0 (!%p298_p2), %v1089_v4  ;;  %v1094_v21 = vld [vmem:[%s1291_s2 + $0x28] sm:$0xff] (!%p298_p2)   ;;  %v579_v25 = vld [vmem:[%s1295_s6] sm:$0xff] (!%p298_p2)  ;;  %v582_v30 = vld [vmem:[%s1295_s6 + $0x18] sm:$0xff] (!%p298_p2)  ;;  %vm876_vm3 = vcmask (!%p298_p2), 64512  }
   0x9   : > { %1019 = vmatpush3.bf16.msra.mxu1 (!%p298_p2), %v1090_v5  ;;  %1012 = vmatprep.subr.bf16.mxu0 (!%p298_p2), %v1116_v1  ;;  %v580_v26 = vld [vmem:[%s1295_s6 + $0x8] sm:$0xff] (!%p298_p2)  ;;  %v1068_v31 = vpack.c.bf16 (!%p298_p2), %v582_v30, %v581_v29  ;;  %v974_v43 = vld [vmem:[%s1292_s3] ss:$0 sm:$0xff] (!%p298_p2) }
   0xa   : > { %1020 = vmatprep.subr.bf16.mxu1 (!%p298_p2), %v1116_v1  ;;  %v1065_v27 = vpack.c.bf16 (!%p298_p2), %v580_v26, %v579_v25 }
   0xc   : > { %1013 = vmatpush3.bf16.msra.mxu0 (!%p298_p2), %v1091_v6 }
   0xd   : > { %s1300_s10 = smov (!%p338_p3, %s946_s10), 1  ;;  %1021 = vmatpush3.bf16.msra.mxu1 %v1092_v7  ;;  %1026 = vmatprep.subr.bf16.mxu0 %v1116_v1 }
   0xe   : > { %s1183_s11 = sshll.u32 %s1300_s10, 4  ;;  %1064 = vmatprep.subr.bf16.mxu1 %v1118_v28 }
   0xf   : > { %s347_s14 = scalar_lea.vmem %s1290_s1, %s1183_s11  ;;  %s342_s25 = scalar_lea.vmem %s1289_s0, %s1183_s11 }
  0x10   : > { %v354_v2 = vld [vmem:[%s347_s14] sm:$0xff]  ;;  %v355_v3 = vld [vmem:[%s347_s14 + $0x8] sm:$0xff]  ;;  %s352_s14 = scalar_lea.vmem %s1298_s9, %s1183_s11 }
  0x11   : > { %360 = vperm.xlu0 %1088, %v354_v2   ;;  %v356_v8 = vld [vmem:[%s342_s25] sm:$0xff]  ;;  %v357_v11 = vld [vmem:[%s342_s25 + $0x8] sm:$0xff] }
  0x15   : > { %365 = vperm.xlu0 %1088, %v355_v3  }
  0x90   : > { %v1213_v9 = vpop.permute.xlu0 %360 }
  0x91   : > { %v368_v10 = vmul.f32 %v1213_v9, %v356_v8 }
  0x93   : > { %375 = vst.msk [vmem:[#allocation2 + $0x1] sm:$0xff] %vm370_vm0, %v368_v10 }
  0x94   : > { %v1217_v12 = vpop.permute.xlu0 %365 }
  0x95   : > { %v369_v13 = vmul.f32 %v1217_v12, %v357_v11  ;;  %v1095_v11 = vld [vmem:[%s1296_s7] sm:$0xff]  }
  0x97   : > { %376 = vst.msk [vmem:[#allocation2 + $0x9] sm:$0xff] %vm370_vm0, %v369_v13  ;;  %v1096_v13 = vld [vmem:[%s1296_s7 + $0x8] sm:$0xff]  }
  0x9a   : > { %v384_v14 = vld [vmem:[#allocation2 + $0x1] sm:$0xff] }
  0x9b   : > { %v377_v17 = vld [vmem:[#allocation2] sm:$0xff] }
  0x9e   : > { %v385_v16 = vld [vmem:[#allocation2 + $0x9] sm:$0xff] }
  0x9f   : > { %v378_v18 = vld [vmem:[#allocation2 + $0x8] sm:$0xff]  ;;  %v386_v19 = vpack.c.bf16 %v385_v16, %v384_v14 }
  0xa0   : > { %v379_v20 = vpack.c.bf16 %v378_v18, %v377_v17  ;;  %v504_v22 = vld [vmem:[#allocation2 + $0x2] sm:$0xff]  ;;  %v505_v23 = vld [vmem:[#allocation2 + $0xa] sm:$0xff]  ;;  %v756_v17 = vlaneseq }
  0xa1   : > { %1015 = vmatmul.mubr.msk.bf16.vlgmr.msra.gmra.mrb[0].mxu0 %vm370_vm0, %v386_v19  ;;  %v506_v24 = vpack.c.bf16 %v505_v23, %v504_v22 }
  0xa2   : > { %1023 = vmatmul.mubr.msk.bf16.vlgmr.msra.gmra.mrb[0].mxu1 %vm370_vm0, %v379_v20  ;;  %1027 = vmatpush3.bf16.msra.mxu0 %v1093_v15  ;;  %v757_v22 = vshrl.u32 %v756_v17, 7 }
  0xa3   : > { %1030 = vmatprep.mubr.msk.bf16.mxu0 %vm1117_vm2, %v1116_v1  ;;  %1028 = vmatprep.subr.bf16.mxu0 %v1116_v1 }
  0xa4   : > { %1042 = vmatprep.mubr.msk.f32.mxu1 %vm1117_vm2, %v1116_v1  ;;  %1066 = vmatpush3.bf16.msra.mxu1 %v1065_v27  ;;  %v758_v23 = vsub.s32 0, %v757_v22 }
  0xa5   : > { %1067 = vmatprep.subr.bf16.mxu1 %v1118_v28 }
  0xa6   : > { %1029 = vmatpush3.bf16.msra.mxu0 %v1094_v21 }
  0xa7   : > { %1070 = vmatprep.subr.bf16.mxu0 %v1118_v28 }
  0xa8   : > { %1069 = vmatpush3.bf16.msra.mxu1 %v1068_v31 }
  0xa9   : > { %1031 = vmatmul.mubr.msk.bf16.vlgmr.msra.gmra.mrb[4].mxu0 %vm370_vm0, %v506_v24  ;;  %1056 = vmatprep.subr.bf16.mxu1 %v1116_v1 }
  0xaa   : > { %1053 = vmatprep.mubr.msk.f32.mxu0 %vm1117_vm2, %v1116_v1  ;;  %1072 = vmatpush3.bf16.msra.mxu0 %v1065_v27 }
  0xab   : > { %1073 = vmatprep.subr.bf16.mxu0 %v1118_v28 }
  0xae   : > { %1075 = vmatpush3.bf16.msra.mxu0 %v1068_v31  ;;  %v978_v31 = vld [vmem:[%s1294_s5] ss:$0 sm:$0xff] }
 0x174   : > { %v441_v32 = vpop.f32.mrb[0].mxu0 }
 0x175   : > { %v497_v33 = vpop.f32.mrb[0].mxu1  ;;  %v1016_v35 = vpop.f32.mrb[1].mxu0 }
 0x176   : > { %v498_v34 = vadd.f32 %v497_v33, %v441_v32  ;;  %v1024_v36 = vpop.f32.mrb[1].mxu1  ;;  %v444_v37 = vpop.f32.mrb[2].mxu0 }
 0x177   : > { %v500_v38 = vpop.f32.mrb[2].mxu1  ;;  %v1017_v40 = vpop.f32.mrb[3].mxu0 }
 0x178   : > { %v501_v39 = vadd.f32 %v500_v38, %v444_v37  ;;  %v1025_v41 = vpop.f32.mrb[3].mxu1 }
 0x17c   : > { %v561_v42 = vpop.f32.mrb[4].mxu0 }
 0x17d   : > { %v568_v44 = vadd.f32 %v561_v42, %v498_v34  ;;  %v1032_v45 = vpop.f32.mrb[5].mxu0 }
 0x17e   : > { %v564_v46 = vpop.f32.mrb[6].mxu0 }
 0x17f   : > { %v577_v47 = vadd.f32 %v974_v43, %v568_v44  ;;  %v569_v48 = vadd.f32 %v564_v46, %v501_v39  ;;  %v1033_v49 = vpop.f32.mrb[7].mxu0 }
 0x181   : > { %v596_v50 = vmul.f32 %v577_v47, %v577_v47  ;;  %v578_v51 = vadd.f32 %v974_v43, %v569_v48  ;;  %v585_v52 = vsel %vm370_vm0, %v577_v47, 0.0 }
 0x183   : > { %v586_v53 = vsel %vm370_vm0, %v578_v51, 0.0  ;;  %v597_v54 = vmul.f32 %v578_v51, %v578_v51  ;;  %v598_v56 = vsel %vm370_vm0, %v596_v50, 0.0 }
 0x184   : > { %v587_v55 = vadd.f32 %v586_v53, %v585_v52 }
 0x185   : > { %v599_v57 = vsel %vm370_vm0, %v597_v54, 0.0 }
 0x186   : > { %v588_v58 = vrot.slane %v587_v55, 4  ;;  %v600_v59 = vadd.f32 %v599_v57, %v598_v56  ;;  %v979_v57 = vld [vmem:[%s1297_s8] ss:$0 sm:$0xff] }
 0x188   : > { %v589_v60 = vadd.f32 %v588_v58, %v587_v55  ;;  %v601_v61 = vrot.slane %v600_v59, 4 }
 0x18a   : > { %v590_v62 = vrot.slane %v589_v60, 2  ;;  %v602_v63 = vadd.f32 %v601_v61, %v600_v59 }
 0x18c   : > { %v591_v0 = vadd.f32 %v590_v62, %v589_v60  ;;  %v603_v2 = vrot.slane %v602_v63, 2 }
 0x18e   : > { %v592_v3 = vrot.slane %v591_v0, 1  ;;  %v604_v4 = vadd.f32 %v603_v2, %v602_v63 }
 0x190   : > { %v593_v5 = vadd.f32 %v592_v3, %v591_v0  ;;  %v605_v6 = vrot.slane %v604_v4, 1 }
 0x192   : > { %v595_v7 = vmul.f32 0.0625, %v593_v5  ;;  %v606_v8 = vadd.f32 %v605_v6, %v604_v4 }
 0x194   : > { %1043 = vmatmul.mubr.msk.f32.vlgmr.msra.gmra.mrb[4].mxu1 %vm370_vm0, %v595_v7  ;;  %v607_v10 = vmul.f32 0.0625, %v606_v8 }
 0x195   : > { %1060 = vmatprep.mubr.msk.bf16.mxu1 %vm1117_vm2, %v1116_v1  ;;  %1057 = vmatpush3.bf16.msra.mxu1 %v1095_v11 }
 0x196   : > { %1054 = vmatmul.mubr.msk.f32.vlgmr.msra.gmra.mrb[8].mxu0 %vm370_vm0, %v607_v10  ;;  %1058 = vmatprep.subr.bf16.mxu1 %v1116_v1  ;;  %v977_v1 = vld [vmem:[%s1293_s4] ss:$0 sm:$0xff] }
 0x199   : > { %1059 = vmatpush3.bf16.msra.mxu1 %v1096_v13 }
 0x267   : > { %v677_v14 = vpop.f32.mrb[4].mxu1 }
 0x268   : > { %v754_v15 = vmul.f32 %v677_v14, %v677_v14  ;;  %v1044_v16 = vpop.f32.mrb[5].mxu1  ;;  %v759_v24 = vrot.slane %v677_v14, %v758_v23 }
 0x269   : > { %v750_v18 = vpop.f32.mrb[8].mxu0 }
 0x26a   : > { %v755_v19 = vsub.f32 %v750_v18, %v754_v15  ;;  %v1055_v20 = vpop.f32.mrb[9].mxu0  ;;  %v760_v26 = vsub.f32 %v577_v47, %v759_v24  ;;  %v761_v27 = vsub.f32 %v578_v51, %v759_v24 }
 0x26c   : > { %v762_v21 = vadd.f32 1e-05, %v755_v19 }
 0x26e   : > { %1097 = vrsqrt.f32 %v762_v21 }
 0x278   : > { %v1098_v25 = vpop.eup %1097 }
 0x279   : > { %v767_v28 = vrot.slane %v1098_v25, %v758_v23 }
 0x27b   : > { %v768_v29 = vmul.f32 %v767_v28, %v760_v26  ;;  %v769_v30 = vmul.f32 %v767_v28, %v761_v27 }
 0x27d   : > { %v776_v32 = vmul.f32 %v977_v1, %v768_v29  ;;  %v777_v33 = vmul.f32 %v977_v1, %v769_v30 }
 0x27f   : > { %v784_v34 = vadd.f32 %v978_v31, %v776_v32  ;;  %v785_v35 = vadd.f32 %v978_v31, %v777_v33 }
 0x281   : > { %v786_v36 = vmin.f32 %v784_v34, 30.0  ;;  %v787_v37 = vmin.f32 %v785_v35, 30.0 }
 0x283   : > { %v788_v38 = vmul.f32 1.442695, %v786_v36  ;;  %v790_v39 = vmul.f32 1.442695, %v787_v37 }
 0x285   : > { %1099 = vpow2.f32 %v788_v38 }
 0x286   : > { %1101 = vpow2.f32 %v790_v39 }
 0x28f   : > { %v1100_v40 = vpop.eup %1099 }
 0x290   : > { %v1102_v41 = vpop.eup %1101  ;;  %v792_v42 = vadd.f32 2.0, %v1100_v40 }
 0x291   : > { %v793_v43 = vadd.f32 2.0, %v1102_v41 }
 0x292   : > { %v794_v44 = vmul.f32 %v1100_v40, %v792_v42 }
 0x293   : > { %v795_v45 = vmul.f32 %v1102_v41, %v793_v43 }
 0x294   : > { %v798_v46 = vadd.f32 2.0, %v794_v44  ;;  %v796_v48 = vmul.f32 %v794_v44, %v784_v34 }
 0x295   : > { %v799_v47 = vadd.f32 2.0, %v795_v45  ;;  %v797_v50 = vmul.f32 %v795_v45, %v785_v35 }
 0x296   : > { %1103 = vrcp.f32 %v798_v46 }
 0x297   : > { %1105 = vrcp.f32 %v799_v47 }
 0x2a0   : > { %v1104_v49 = vpop.eup %1103 }
 0x2a1   : > { %v1106_v51 = vpop.eup %1105  ;;  %v801_v52 = vmul.f32 %v1104_v49, %v796_v48 }
 0x2a2   : > { %v803_v53 = vmul.f32 %v1106_v51, %v797_v50 }
 0x2a3   : > { %v804_v54 = vmul.f32 %v801_v52, %v1213_v9 }
 0x2a4   : > { %v805_v55 = vmul.f32 %v803_v53, %v1217_v12 }
 0x2a6   : > { %v806_v56 = vpack.c.bf16 %v805_v55, %v804_v54 }
 0x2a8   : > { %1061 = vmatmul.mubr.msk.bf16.vlgmr.msra.gmra.mrb[8].mxu1 %vm370_vm0, %v806_v56 }
 0x37b   : > { %v867_v58 = vpop.f32.mrb[8].mxu1 }
 0x37c   : > { %v868_v59 = vadd.f32 %v979_v57, %v867_v58  ;;  %v1062_v60 = vpop.f32.mrb[9].mxu1 }
 0x37d   : > { %v870_v61 = vpop.f32.mrb[10].mxu1 }
 0x37e   : > { %v874_v62 = vmul.f32 %v868_v59, %v1213_v9  ;;  %v871_v63 = vadd.f32 %v979_v57, %v870_v61  ;;  %v1063_v0 = vpop.f32.mrb[11].mxu1 }
 0x380   : > { %877 = vst.msk [vmem:[%s352_s14] sm:$0xff] %vm876_vm3, %v874_v62  ;;  %v875_v2 = vmul.f32 %v871_v63, %v1217_v12 }
 0x382   : > { %878 = vst.msk [vmem:[%s352_s14 + $0x8] sm:$0xff] %vm876_vm3, %v875_v2 }
 0x383 PF: > { %s19_s30 = sadd.s32 1, %s1113_s30  }
 0x384   : > { %p16_p4 = scmp.ge.s32.totalorder %s19_s30, 4  }
 0x386   :  { %18 = sbr.rel (!%p16_p4) target bundleno = 1 (0x1), region = 91 }

// kernel: conditional_decoder_forward.28
= control target key start
LH: loop header
LB: loop body
LE: loop exit
PB: predicated region body
PF: predicated region fallthrough
CT: control target
= control target key end

     0   :  { %s2233_s21 = smov 0   ;;  %s2542_s0 = inlined_call_operand.vmem [shape: f32[2,16,64], index: 0, kind: input, shape index: {}]   ;;  %s2543_s1 = inlined_call_operand.vmem [shape: f32[2,16,1], index: 1, kind: input, shape index: {}]   ;;  %s2544_s2 = inlined_call_operand.vmem [shape: f32[2,1,128], index: 2, kind: input, shape index: {}]   ;;  %s2545_s3 = inlined_call_operand.vmem [shape: bf16[3,64,32], index: 3, kind: input, shape index: {}]   ;;  %s2546_s4 = inlined_call_operand.vmem [shape: f32[1,32], index: 4, kind: input, shape index: {}, may-alias: {4,6,8,10,12,14}]   ;;  %s2547_s5 = inlined_call_operand.vmem [shape: f32[1,32], index: 5, kind: input, shape index: {}, may-alias: {5,11}]   ;;  %s2548_s6 = inlined_call_operand.vmem [shape: f32[1,32], index: 6, kind: input, shape index: {}, may-alias: {4,6,8,10,12,14}]   ;;  %s2549_s7 = inlined_call_operand.vmem [shape: bf16[128,32], index: 7, kind: input, shape index: {}]   ;;  %s2550_s8 = inlined_call_operand.vmem [shape: f32[1,32], index: 8, kind: input, shape index: {}, may-alias: {4,6,8,10,12,14}]   ;;  %s2551_s9 = inlined_call_operand.vmem [shape: bf16[3,32,32], index: 9, kind: input, shape index: {}]   ;;  %s2552_s10 = inlined_call_operand.vmem [shape: f32[1,32], index: 10, kind: input, shape index: {}, may-alias: {4,6,8,10,12,14}]   ;;  %s2553_s11 = inlined_call_operand.vmem [shape: f32[1,32], index: 11, kind: input, shape index: {}, may-alias: {5,11}]   ;;  %s2554_s12 = inlined_call_operand.vmem [shape: f32[1,32], index: 12, kind: input, shape index: {}, may-alias: {4,6,8,10,12,14}]   ;;  %s2555_s13 = inlined_call_operand.vmem [shape: bf16[64,32], index: 13, kind: input, shape index: {}]   ;;  %s2556_s14 = inlined_call_operand.vmem [shape: f32[1,32], index: 14, kind: input, shape index: {}, may-alias: {4,6,8,10,12,14}]   ;;  %s2557_s15 = inlined_call_operand.vmem [shape: f32[32,32], index: 15, kind: input, shape index: {}]   ;;  %s2558_s16 = inlined_call_operand.vmem [shape: f32[2,16,32], index: 16, kind: output, shape index: {}]  }
   0x1   :  { %2559 = sst [smem:[#allocation4_spill]] %s2542_s0 }
   0x2 LB: > { %s1767_s22 = sadd.s32 4294967295, %s2142_s21   ;;  %p1771_p0 = scmp.ge.s32.totalorder %s2142_s21, 1  ;;  %s2142_s21 = sphi %s2233_s21, %s26_s21  }
   0x3   : > { %p480_p1 = scmp.lt.s32.totalorder %s2142_s21, 3 }
   0x5   : > { %p481_p2 = pnand %p1771_p0, %p480_p1 }
   0x6   : > { %p538_p3 = scmp.lt.s32.totalorder (!%p481_p2), %s1767_s22, 1  ;;  %v2144_v0 = vmov (!%p481_p2), 0   ;;  %v2145_v1 = vmov (!%p481_p2), 0.0   ;;  %v2086_v2 = vld [vmem:[%s2545_s3 + $0x20] sm:$0xff] (!%p481_p2)   ;;  %vm577_vm0 = vcmask (!%p481_p2), 523264   ;;  %vm580_vm1 = vcmask (!%p481_p2), 517120  }
   0x7   : > { %484 = sbr.rel (%p481_p2) target bundleno = 1229 (0x4cd), region = 84  ;;  %2085 = vset.pattern.permute.xlu0 (!%p481_p2), %v2144_v0  ;;  %1913 = vmatprep.subr.bf16.mxu0 (!%p481_p2), %v2145_v1  ;;  %v2087_v4 = vld [vmem:[%s2545_s3] sm:$0xff] (!%p481_p2)   ;;  %578 = vst.msk [vmem:[#allocation2] sm:$0xff] (!%p481_p2), %vm577_vm0, %v2145_v1  ;;  %579 = vst.msk [vmem:[#allocation2 + $0x8] sm:$0xff] (!%p481_p2), %vm577_vm0, %v2145_v1  ;;  %v2088_v6 = vld [vmem:[%s2545_s3 + $0x28] sm:$0xff] (!%p481_p2)   ;;  %vm2146_vm2 = vmmov (!%p481_p2), 0  }
   0x8   : > { %1925 = vmatprep.subr.bf16.mxu1 (!%p481_p2), %v2145_v1  ;;  %1914 = vmatpush3.bf16.msra.mxu0 (!%p481_p2), %v2086_v2  ;;  %581 = vst.msk [vmem:[#allocation2 + $0x10] sm:$0x3] (!%p481_p2), %vm580_vm1, %v2145_v1  ;;  %v2089_v7 = vld [vmem:[%s2545_s3 + $0x8] sm:$0xff] (!%p481_p2)   ;;  %v2090_v8 = vld [vmem:[%s2545_s3 + $0x30] sm:$0xff] (!%p481_p2)   ;;  %v2092_v10 = vld [vmem:[%s2545_s3 + $0x38] sm:$0xff] (!%p481_p2)   ;;  %s2560_s18 = sld [smem:[#allocation4_spill]] (!%p481_p2) }
   0x9   : > { %1926 = vmatpush3.bf16.msra.mxu1 (!%p481_p2), %v2087_v4  ;;  %1915 = vmatprep.subr.bf16.mxu0 (!%p481_p2), %v2145_v1  ;;  %v2091_v9 = vld [vmem:[%s2545_s3 + $0x10] sm:$0xff] (!%p481_p2)   ;;  %v2093_v11 = vld [vmem:[%s2545_s3 + $0x18] sm:$0xff] (!%p481_p2)   ;;  %v2094_v20 = vld [vmem:[%s2545_s3 + $0x40] sm:$0xff] (!%p481_p2)   ;;  %vm836_vm3 = vcmask (!%p481_p2), 261120   ;;  %v2147_v35 = vmov (!%p481_p2), 0.0|0.0   ;;  %vm1175_vm4 = vcmask (!%p481_p2), 254976  }
   0xa   : > { %1927 = vmatprep.subr.bf16.mxu1 (!%p481_p2), %v2145_v1  ;;  %1921 = vmatprep.mubr.msk.bf16.mxu0 (!%p481_p2), %vm2146_vm2, %v2145_v1  ;;  %v2095_v26 = vld [vmem:[%s2545_s3 + $0x48] sm:$0xff] (!%p481_p2)   ;;  %v2096_v27 = vld [vmem:[%s2545_s3 + $0x50] sm:$0xff] (!%p481_p2)   ;;  %v2097_v28 = vld [vmem:[%s2545_s3 + $0x58] sm:$0xff] (!%p481_p2)   ;;  %1173 = vst.msk [vmem:[#allocation3] sm:$0xff] (!%p481_p2), %vm836_vm3, %v2145_v1 }
   0xb   : > { %1933 = vmatprep.mubr.msk.bf16.mxu1 (!%p481_p2), %vm2146_vm2, %v2145_v1  ;;  %1174 = vst.msk [vmem:[#allocation3 + $0x8] sm:$0xff] (!%p481_p2), %vm836_vm3, %v2145_v1  ;;  %v573_v32 = vld [vmem:[%s2557_s15] sm:$0xff] (!%p481_p2)  ;;  %v574_v33 = vld [vmem:[%s2557_s15 + $0x8] sm:$0xff] (!%p481_p2)  ;;  %v575_v36 = vld [vmem:[%s2557_s15 + $0x10] sm:$0xff] (!%p481_p2) }
   0xc   : > { %1916 = vmatpush3.bf16.msra.mxu0 (!%p481_p2), %v2088_v6  ;;  %v2346_v34 = vpack.c.bf16 (!%p481_p2), %v574_v33, %v573_v32  ;;  %v576_v37 = vld [vmem:[%s2557_s15 + $0x18] sm:$0xff] (!%p481_p2)  ;;  %v1809_v50 = vld [vmem:[%s2546_s4] ss:$0 sm:$0xff] (!%p481_p2)  ;;  %1176 = vst.msk [vmem:[#allocation3 + $0x10] sm:$0x3] (!%p481_p2), %vm1175_vm4, %v2145_v1  ;;  %v2106_v32 = vld [vmem:[%s2551_s9 + $0x10] sm:$0xff] (!%p481_p2)  }
   0xd   : > { %1928 = vmatpush3.bf16.msra.mxu1 (!%p481_p2), %v2089_v7  ;;  %1917 = vmatprep.subr.bf16.mxu0 (!%p481_p2), %v2145_v1  ;;  %v2360_v38 = vpack.c.bf16 (!%p481_p2), %v576_v37, %v575_v36  ;;  %v2107_v33 = vld [vmem:[%s2551_s9 + $0x18] sm:$0xff] (!%p481_p2)  }
   0xe   : > { %s2562_s22 = smov (!%p538_p3, %s1767_s22), 1  ;;  %1929 = vmatprep.subr.bf16.mxu1 %v2145_v1 }
   0xf   : > { %s2246_s23 = sshll.u32 %s2562_s22, 4 }
  0x10   : > { %s547_s26 = scalar_lea.vmem %s2543_s1, %s2246_s23  ;;  %1918 = vmatpush3.bf16.msra.mxu0 %v2090_v8  ;;  %s542_s19 = scalar_lea.vmem %s2560_s18, %s2246_s23 }
  0x11   : > { %v559_v3 = vld [vmem:[%s547_s26] sm:$0xff]  ;;  %v560_v5 = vld [vmem:[%s547_s26 + $0x8] sm:$0xff]  ;;  %1930 = vmatpush3.bf16.msra.mxu1 %v2091_v9  ;;  %1919 = vmatprep.subr.bf16.mxu0 %v2145_v1  ;;  %s550_s18 = scalar_lea.vmem %s2544_s2, %s2562_s22 }
  0x12   : > { %563 = vperm.xlu0 %2085, %v559_v3   ;;  %1931 = vmatprep.subr.bf16.mxu1 %v2145_v1  ;;  %v557_v12 = vld [vmem:[%s542_s19] sm:$0xff]  ;;  %v558_v15 = vld [vmem:[%s542_s19 + $0x8] sm:$0xff] }
  0x14   : > { %1920 = vmatpush3.bf16.msra.mxu0 %v2092_v10 }
  0x15   : > { %1932 = vmatpush3.bf16.msra.mxu1 %v2093_v11  ;;  %1937 = vmatprep.subr.bf16.mxu0 %v2145_v1 }
  0x16   : > { %568 = vperm.xlu0 %2085, %v560_v5   ;;  %2055 = vmatprep.subr.bf16.mxu1 %v2147_v35 }
  0x91   : > { %v2296_v13 = vpop.permute.xlu0 %563 }
  0x92   : > { %v2299_v14 = vmul.f32 %v2296_v13, %v557_v12 }
  0x94   : > { %582 = vst.msk [vmem:[#allocation2 + $0x1] sm:$0xff] %vm577_vm0, %v2299_v14 }
  0x95   : > { %v2303_v16 = vpop.permute.xlu0 %568 }
  0x96   : > { %v2306_v17 = vmul.f32 %v2303_v16, %v558_v15 }
  0x98   : > { %583 = vst.msk [vmem:[#allocation2 + $0x9] sm:$0xff] %vm577_vm0, %v2306_v17  ;;  %v1603_v18 = vpack.c.bf16 %v2306_v17, %v2299_v14  ;;  %v1842_v17 = vld [vmem:[%s2553_s11] ss:$0 sm:$0xff] }
  0x9b   : > { %v595_v19 = vld [vmem:[#allocation2 + $0x1] sm:$0xff] }
  0x9c   : > { %v584_v22 = vld [vmem:[#allocation2] sm:$0xff] }
  0x9f   : > { %v596_v21 = vld [vmem:[#allocation2 + $0x9] sm:$0xff] }
  0xa0   : > { %v585_v23 = vld [vmem:[#allocation2 + $0x8] sm:$0xff]  ;;  %v597_v24 = vpack.c.bf16 %v596_v21, %v595_v19  ;;  %v2098_v19 = vld [vmem:[%s2549_s7] sm:$0xff]  }
  0xa1   : > { %v586_v25 = vpack.c.bf16 %v585_v23, %v584_v22  ;;  %v743_v29 = vld [vmem:[#allocation2 + $0x2] sm:$0xff]  ;;  %v744_v30 = vld [vmem:[#allocation2 + $0xa] sm:$0xff] }
  0xa2   : > { %1922 = vmatmul.mubr.msk.bf16.vlgmr.msra.gmra.mrb[0].mxu0 %vm577_vm0, %v597_v24  ;;  %v745_v31 = vpack.c.bf16 %v744_v30, %v743_v29  ;;  %v2099_v23 = vld [vmem:[%s2549_s7 + $0x8] sm:$0xff]   ;;  %v2100_v24 = vld [vmem:[%s2549_s7 + $0x10] sm:$0xff]   ;;  %v2105_v29 = vld [vmem:[%s2549_s7 + $0x38] sm:$0xff]  }
  0xa3   : > { %1934 = vmatmul.mubr.msk.bf16.vlgmr.msra.gmra.mrb[0].mxu1 %vm577_vm0, %v586_v25  ;;  %1938 = vmatpush3.bf16.msra.mxu0 %v2094_v20  ;;  %v2101_v25 = vld [vmem:[%s2549_s7 + $0x18] sm:$0xff]   ;;  %v1058_v30 = vld [vmem:[%s550_s18] sm:$0x1]  ;;  %s555_s18 = scalar_lea.vmem %s2558_s16, %s2246_s23 }
  0xa4   : > { %1945 = vmatprep.mubr.msk.bf16.mxu0 %vm2146_vm2, %v2145_v1  ;;  %1939 = vmatprep.subr.bf16.mxu0 %v2145_v1 }
  0xa5   : > { %1968 = vmatprep.mubr.msk.f32.mxu1 %vm2146_vm2, %v2145_v1  ;;  %2057 = vmatpush3.bf16.msra.mxu1 %v2346_v34 }
  0xa6   : > { %2058 = vmatprep.subr.bf16.mxu1 %v2147_v35 }
  0xa7   : > { %1940 = vmatpush3.bf16.msra.mxu0 %v2095_v26  ;;  %v2102_v26 = vld [vmem:[%s2549_s7 + $0x20] sm:$0xff]  }
  0xa8   : > { %1941 = vmatprep.subr.bf16.mxu0 %v2145_v1 }
  0xa9   : > { %2060 = vmatpush3.bf16.msra.mxu1 %v2360_v38 }
  0xaa   : > { %1991 = vmatprep.subr.bf16.mxu1 %v2145_v1 }
  0xab   : > { %1942 = vmatpush3.bf16.msra.mxu0 %v2096_v27  ;;  %v2103_v27 = vld [vmem:[%s2549_s7 + $0x28] sm:$0xff]  }
  0xac   : > { %1943 = vmatprep.subr.bf16.mxu0 %v2145_v1 }
  0xaf   : > { %1944 = vmatpush3.bf16.msra.mxu0 %v2097_v28  ;;  %v2104_v28 = vld [vmem:[%s2549_s7 + $0x30] sm:$0xff]  }
  0xb0   : > { %2049 = vmatprep.subr.bf16.mxu0 %v2147_v35 }
  0xb2   : > { %1946 = vmatmul.mubr.msk.bf16.vlgmr.msra.gmra.mrb[4].mxu0 %vm577_vm0, %v745_v31  ;;  %v1059_v31 = vpack.c.bf16 %v1058_v30, %v1058_v30 }
  0xb3   : > { %1957 = vmatprep.mubr.msk.f32.mxu0 %vm2146_vm2, %v2145_v1  ;;  %2051 = vmatpush3.bf16.msra.mxu0 %v2346_v34 }
  0xb4   : > { %2052 = vmatprep.subr.bf16.mxu0 %v2147_v35 }
  0xb7   : > { %2054 = vmatpush3.bf16.msra.mxu0 %v2360_v38 }
  0xb8   : > { %1971 = vmatprep.subr.bf16.mxu0 %v2145_v1 }
 0x175   : > { %v668_v39 = vpop.f32.mrb[0].mxu0 }
 0x176   : > { %v736_v40 = vpop.f32.mrb[0].mxu1  ;;  %v1923_v42 = vpop.f32.mrb[1].mxu0 }
 0x177   : > { %v737_v41 = vadd.f32 %v736_v40, %v668_v39  ;;  %v1935_v43 = vpop.f32.mrb[1].mxu1  ;;  %v671_v44 = vpop.f32.mrb[2].mxu0  ;;  %v1008_v40 = vlaneseq }
 0x178   : > { %v739_v45 = vpop.f32.mrb[2].mxu1  ;;  %v1924_v47 = vpop.f32.mrb[3].mxu0 }
 0x179   : > { %v740_v46 = vadd.f32 %v739_v45, %v671_v44  ;;  %v1936_v48 = vpop.f32.mrb[3].mxu1  ;;  %v1009_v45 = vshrl.u32 %v1008_v40, 7  ;;  %v2109_v40 = vld [vmem:[%s2551_s9 + $0x8] sm:$0xff]  }
 0x185   : > { %v816_v49 = vpop.f32.mrb[4].mxu0 }
 0x186   : > { %v823_v51 = vadd.f32 %v816_v49, %v737_v41  ;;  %v1947_v52 = vpop.f32.mrb[5].mxu0 }
 0x187   : > { %v819_v53 = vpop.f32.mrb[6].mxu0  ;;  %v1812_v52 = vld [vmem:[%s2547_s5] ss:$0 sm:$0xff] }
 0x188   : > { %v2369_v54 = vadd.f32 %v1809_v50, %v823_v51  ;;  %v824_v55 = vadd.f32 %v819_v53, %v740_v46  ;;  %v1948_v56 = vpop.f32.mrb[7].mxu0  ;;  %v2439_v46 = vsub.s32 0, %v1009_v45  ;;  %v2111_v45 = vld [vmem:[%s2551_s9 + $0x28] sm:$0xff]  }
 0x189   : > { %v1813_v56 = vld [vmem:[%s2548_s6] ss:$0 sm:$0xff] }
 0x18a   : > { %v848_v57 = vmul.f32 %v2369_v54, %v2369_v54  ;;  %v2373_v58 = vadd.f32 %v1809_v50, %v824_v55  ;;  %v837_v59 = vsel %vm836_vm3, %v2369_v54, 0.0 }
 0x18c   : > { %v838_v60 = vsel %vm836_vm3, %v2373_v58, 0.0  ;;  %v849_v61 = vmul.f32 %v2373_v58, %v2373_v58  ;;  %v850_v63 = vsel %vm836_vm3, %v848_v57, 0.0 }
 0x18d   : > { %v839_v62 = vadd.f32 %v838_v60, %v837_v59 }
 0x18e   : > { %v851_v0 = vsel %vm836_vm3, %v849_v61, 0.0 }
 0x18f   : > { %v840_v2 = vrot.slane %v839_v62, 4  ;;  %v852_v3 = vadd.f32 %v851_v0, %v850_v63 }
 0x191   : > { %v841_v4 = vadd.f32 %v840_v2, %v839_v62  ;;  %v853_v5 = vrot.slane %v852_v3, 4 }
 0x193   : > { %v842_v6 = vrot.slane %v841_v4, 2  ;;  %v854_v7 = vadd.f32 %v853_v5, %v852_v3 }
 0x195   : > { %v843_v8 = vadd.f32 %v842_v6, %v841_v4  ;;  %v855_v9 = vrot.slane %v854_v7, 2 }
 0x197   : > { %v844_v10 = vrot.slane %v843_v8, 1  ;;  %v856_v11 = vadd.f32 %v855_v9, %v854_v7 }
 0x199   : > { %v845_v12 = vadd.f32 %v844_v10, %v843_v8  ;;  %v857_v15 = vrot.slane %v856_v11, 1 }
 0x19b   : > { %v847_v20 = vmul.f32 0.0625, %v845_v12  ;;  %v858_v21 = vadd.f32 %v857_v15, %v856_v11  ;;  %v1076_v15 = vld [vmem:[%s2550_s8] sm:$0x1] }
 0x19d   : > { %1958 = vmatmul.mubr.msk.f32.vlgmr.msra.gmra.mrb[8].mxu0 %vm836_vm3, %v847_v20  ;;  %v859_v22 = vmul.f32 0.0625, %v858_v21 }
 0x19e   : > { %1972 = vmatpush3.bf16.msra.mxu0 %v2098_v19  ;;  %1987 = vmatprep.mubr.msk.bf16.mxu0 %vm2146_vm2, %v2145_v1 }
 0x19f   : > { %1969 = vmatmul.mubr.msk.f32.vlgmr.msra.gmra.mrb[4].mxu1 %vm836_vm3, %v859_v22  ;;  %1973 = vmatprep.subr.bf16.mxu0 %v2145_v1 }
 0x1a0   : > { %1995 = vmatprep.mubr.msk.bf16.mxu1 %vm2146_vm2, %v2145_v1  ;;  %1992 = vmatpush3.bf16.msra.mxu1 %v2106_v32 }
 0x1a1   : > { %1993 = vmatprep.subr.bf16.mxu1 %v2145_v1 }
 0x1a2   : > { %1974 = vmatpush3.bf16.msra.mxu0 %v2099_v23 }
 0x1a3   : > { %1975 = vmatprep.subr.bf16.mxu0 %v2145_v1 }
 0x1a4   : > { %1994 = vmatpush3.bf16.msra.mxu1 %v2107_v33 }
 0x1a5   : > { %1999 = vmatprep.subr.bf16.mxu1 %v2145_v1 }
 0x1a6   : > { %1976 = vmatpush3.bf16.msra.mxu0 %v2100_v24 }
 0x1a7   : > { %1977 = vmatprep.subr.bf16.mxu0 %v2145_v1 }
 0x1aa   : > { %1978 = vmatpush3.bf16.msra.mxu0 %v2101_v25 }
 0x1ab   : > { %1979 = vmatprep.subr.bf16.mxu0 %v2145_v1 }
 0x1ae   : > { %1980 = vmatpush3.bf16.msra.mxu0 %v2102_v26 }
 0x1af   : > { %1981 = vmatprep.subr.bf16.mxu0 %v2145_v1 }
 0x1b2   : > { %1982 = vmatpush3.bf16.msra.mxu0 %v2103_v27 }
 0x1b3   : > { %1983 = vmatprep.subr.bf16.mxu0 %v2145_v1 }
 0x1b6   : > { %1984 = vmatpush3.bf16.msra.mxu0 %v2104_v28 }
 0x1b7   : > { %1985 = vmatprep.subr.bf16.mxu0 %v2145_v1 }
 0x1ba   : > { %1986 = vmatpush3.bf16.msra.mxu0 %v2105_v29 }
 0x1bb   : > { %2067 = vmatprep.subr.bf16.mxu0 %v2147_v35 }
 0x1bd   : > { %1988 = vmatmul.mubr.bf16.vlgmr.msra.gmra.mrb[12].mxu0 %v1059_v31 }
 0x1be   : > { %2069 = vmatpush3.bf16.msra.mxu0 %v2346_v34  ;;  %2034 = vmatprep.mubr.msk.f32.mxu0 %vm2146_vm2, %v2145_v1 }
 0x1bf   : > { %2070 = vmatprep.subr.bf16.mxu0 %v2147_v35 }
 0x1c2   : > { %2072 = vmatpush3.bf16.msra.mxu0 %v2360_v38 }
 0x270   : > { %v929_v36 = vpop.f32.mrb[8].mxu0 }
 0x271   : > { %v1006_v37 = vmul.f32 %v929_v36, %v929_v36  ;;  %v1959_v39 = vpop.f32.mrb[9].mxu0  ;;  %v1011_v47 = vrot.slane %v929_v36, %v2439_v46 }
 0x272   : > { %v1002_v41 = vpop.f32.mrb[4].mxu1 }
 0x273   : > { %v1007_v42 = vsub.f32 %v1002_v41, %v1006_v37  ;;  %v1970_v43 = vpop.f32.mrb[5].mxu1  ;;  %v1012_v49 = vsub.f32 %v2369_v54, %v1011_v47  ;;  %v1013_v50 = vsub.f32 %v2373_v58, %v1011_v47  ;;  %v2108_v37 = vld [vmem:[%s2551_s9] sm:$0xff]  }
 0x274   : > { %v2110_v43 = vld [vmem:[%s2551_s9 + $0x20] sm:$0xff]  }
 0x275   : > { %v1014_v44 = vadd.f32 1e-05, %v1007_v42 }
 0x277   : > { %2116 = vrsqrt.f32 %v1014_v44 }
 0x281   : > { %v2117_v48 = vpop.eup %2116 }
 0x282   : > { %v1019_v51 = vrot.slane %v2117_v48, %v2439_v46 }
 0x284   : > { %v1020_v53 = vmul.f32 %v1019_v51, %v1012_v49  ;;  %v1021_v55 = vmul.f32 %v1019_v51, %v1013_v50 }
 0x286   : > { %v1028_v57 = vmul.f32 %v1812_v52, %v1020_v53  ;;  %v1029_v59 = vmul.f32 %v1812_v52, %v1021_v55 }
 0x288   : > { %v1036_v60 = vadd.f32 %v1813_v56, %v1028_v57  ;;  %v1037_v61 = vadd.f32 %v1813_v56, %v1029_v59 }
 0x28a   : > { %v1038_v62 = vmin.f32 %v1036_v60, 30.0  ;;  %v1039_v54 = vmin.f32 %v1037_v61, 30.0 }
 0x28c   : > { %v1040_v63 = vmul.f32 1.442695, %v1038_v62  ;;  %v1042_v58 = vmul.f32 1.442695, %v1039_v54  ;;  %v1839_v62 = vld [vmem:[%s2552_s10] ss:$0 sm:$0xff] }
 0x28e   : > { %2118 = vpow2.f32 %v1040_v63 }
 0x28f   : > { %2120 = vpow2.f32 %v1042_v58 }
 0x290   : > { %v1159_v0 = vpop.f32.mrb[12].mxu0 }
 0x291   : > { %v1989_v2 = vpop.f32.mrb[13].mxu0  ;;  %v1160_v19 = vadd.f32 %v1159_v0, %v1076_v15 }
 0x292   : > { %v1162_v3 = vpop.f32.mrb[14].mxu0 }
 0x293   : > { %v1990_v4 = vpop.f32.mrb[15].mxu0  ;;  %v1168_v25 = vrot.slane %v1160_v19, %v2439_v46 }
 0x298   : > { %v2119_v5 = vpop.eup %2118 }
 0x299   : > { %v2121_v6 = vpop.eup %2120  ;;  %v1044_v7 = vadd.f32 2.0, %v2119_v5 }
 0x29a   : > { %v1045_v8 = vadd.f32 2.0, %v2121_v6 }
 0x29b   : > { %v1046_v9 = vmul.f32 %v2119_v5, %v1044_v7 }
 0x29c   : > { %v1047_v10 = vmul.f32 %v2121_v6, %v1045_v8 }
 0x29d   : > { %v1050_v11 = vadd.f32 2.0, %v1046_v9  ;;  %v1048_v20 = vmul.f32 %v1046_v9, %v1036_v60 }
 0x29e   : > { %v1051_v12 = vadd.f32 2.0, %v1047_v10  ;;  %v1049_v22 = vmul.f32 %v1047_v10, %v1037_v61 }
 0x29f   : > { %2122 = vrcp.f32 %v1050_v11 }
 0x2a0   : > { %2124 = vrcp.f32 %v1051_v12 }
 0x2a9   : > { %v2123_v21 = vpop.eup %2122 }
 0x2aa   : > { %v2125_v23 = vpop.eup %2124  ;;  %v1053_v24 = vmul.f32 %v2123_v21, %v1048_v20 }
 0x2ab   : > { %v1055_v26 = vmul.f32 %v2125_v23, %v1049_v22 }
 0x2ac   : > { %v1056_v27 = vmul.f32 %v1053_v24, %v2296_v13 }
 0x2ad   : > { %v1057_v28 = vmul.f32 %v1055_v26, %v2303_v16 }
 0x2ae   : > { %v1169_v29 = vadd.f32 %v1168_v25, %v1056_v27  ;;  %v2112_v27 = vld [vmem:[%s2555_s13] sm:$0xff]  }
 0x2af   : > { %v1170_v30 = vadd.f32 %v1168_v25, %v1057_v28 }
 0x2b0   : > { %v1171_v31 = vmul.f32 %v1169_v29, %v2296_v13 }
 0x2b1   : > { %v1172_v32 = vmul.f32 %v1170_v30, %v2303_v16 }
 0x2b2   : > { %1177 = vst.msk [vmem:[#allocation3 + $0x1] sm:$0xff] %vm836_vm3, %v1171_v31  ;;  %v2113_v31 = vld [vmem:[%s2555_s13 + $0x8] sm:$0xff]  }
 0x2b3   : > { %1178 = vst.msk [vmem:[#allocation3 + $0x9] sm:$0xff] %vm836_vm3, %v1172_v32  ;;  %v2114_v32 = vld [vmem:[%s2555_s13 + $0x10] sm:$0xff]  }
 0x2b9   : > { %v1186_v33 = vld [vmem:[#allocation3 + $0x1] sm:$0xff] }
 0x2ba   : > { %v1187_v36 = vld [vmem:[#allocation3 + $0x9] sm:$0xff]  ;;  %v1179_v41 = vld [vmem:[#allocation3] sm:$0xff] }
 0x2bb   : > { %v1188_v39 = vpack.c.bf16 %v1187_v36, %v1186_v33  ;;  %v1180_v42 = vld [vmem:[#allocation3 + $0x8] sm:$0xff]  ;;  %v2115_v33 = vld [vmem:[%s2555_s13 + $0x18] sm:$0xff]  }
 0x2bc   : > { %v1181_v44 = vpack.c.bf16 %v1180_v42, %v1179_v41  ;;  %v1306_v47 = vld [vmem:[#allocation3 + $0x2] sm:$0xff]  ;;  %v1307_v48 = vld [vmem:[#allocation3 + $0xa] sm:$0xff] }
 0x2bd   : > { %1996 = vmatmul.mubr.msk.bf16.vlgmr.msra.gmra.mrb[8].mxu1 %vm836_vm3, %v1188_v39  ;;  %v1308_v49 = vpack.c.bf16 %v1307_v48, %v1306_v47 }
 0x2be   : > { %2000 = vmatpush3.bf16.msra.mxu1 %v2108_v37  ;;  %2003 = vmatprep.mubr.msk.bf16.mxu1 %vm2146_vm2, %v2145_v1 }
 0x2bf   : > { %2001 = vmatprep.subr.bf16.mxu1 %v2145_v1 }
 0x2c2   : > { %2002 = vmatpush3.bf16.msra.mxu1 %v2109_v40 }
 0x2c3   : > { %2007 = vmatprep.subr.bf16.mxu1 %v2145_v1 }
 0x2c5   : > { %2004 = vmatmul.mubr.msk.bf16.vlgmr.msra.gmra.mrb[12].mxu1 %vm836_vm3, %v1181_v44 }
 0x2c6   : > { %2008 = vmatpush3.bf16.msra.mxu1 %v2110_v43  ;;  %2011 = vmatprep.mubr.msk.bf16.mxu1 %vm2146_vm2, %v2145_v1 }
 0x2c7   : > { %2009 = vmatprep.subr.bf16.mxu1 %v2145_v1 }
 0x2ca   : > { %2010 = vmatpush3.bf16.msra.mxu1 %v2111_v45 }
 0x2cb   : > { %2061 = vmatprep.subr.bf16.mxu1 %v2147_v35 }
 0x2cd   : > { %2012 = vmatmul.mubr.msk.bf16.vlgmr.msra.gmra.mrb[16].mxu1 %vm836_vm3, %v1308_v49 }
 0x2ce   : > { %2063 = vmatpush3.bf16.msra.mxu1 %v2346_v34  ;;  %2023 = vmatprep.mubr.msk.f32.mxu1 %vm2146_vm2, %v2145_v1 }
 0x2cf   : > { %2064 = vmatprep.subr.bf16.mxu1 %v2147_v35 }
 0x2d2   : > { %2066 = vmatpush3.bf16.msra.mxu1 %v2360_v38 }
 0x2d3   : > { %2037 = vmatprep.subr.bf16.mxu1 %v2145_v1 }
 0x390   : > { %v1243_v50 = vpop.f32.mrb[8].mxu1 }
 0x391   : > { %v1997_v51 = vpop.f32.mrb[9].mxu1 }
 0x392   : > { %v1246_v52 = vpop.f32.mrb[10].mxu1 }
 0x393   : > { %v1998_v53 = vpop.f32.mrb[11].mxu1 }
 0x394   : > { %v1843_v53 = vld [vmem:[%s2554_s12] ss:$0 sm:$0xff] }
 0x398   : > { %v1299_v55 = vpop.f32.mrb[12].mxu1 }
 0x399   : > { %v1300_v56 = vadd.f32 %v1299_v55, %v1243_v50  ;;  %v2005_v57 = vpop.f32.mrb[13].mxu1 }
 0x39a   : > { %v1302_v59 = vpop.f32.mrb[14].mxu1 }
 0x39b   : > { %v1303_v60 = vadd.f32 %v1302_v59, %v1246_v52  ;;  %v2006_v61 = vpop.f32.mrb[15].mxu1 }
 0x3a0   : > { %v1363_v34 = vpop.f32.mrb[16].mxu1 }
 0x3a1   : > { %v1370_v35 = vadd.f32 %v1363_v34, %v1300_v56  ;;  %v2013_v54 = vpop.f32.mrb[17].mxu1 }
 0x3a2   : > { %v1366_v38 = vpop.f32.mrb[18].mxu1 }
 0x3a3   : > { %v1379_v63 = vadd.f32 %v1839_v62, %v1370_v35  ;;  %v1371_v58 = vadd.f32 %v1366_v38, %v1303_v60  ;;  %v2014_v0 = vpop.f32.mrb[19].mxu1 }
 0x3a5   : > { %v1393_v2 = vmul.f32 %v1379_v63, %v1379_v63  ;;  %v1380_v3 = vadd.f32 %v1839_v62, %v1371_v58  ;;  %v1383_v4 = vsel %vm836_vm3, %v1379_v63, 0.0 }
 0x3a7   : > { %v1384_v5 = vsel %vm836_vm3, %v1380_v3, 0.0  ;;  %v1394_v6 = vmul.f32 %v1380_v3, %v1380_v3  ;;  %v1395_v8 = vsel %vm836_vm3, %v1393_v2, 0.0 }
 0x3a8   : > { %v1385_v7 = vadd.f32 %v1384_v5, %v1383_v4  ;;  %v1844_v5 = vld [vmem:[%s2556_s14] ss:$0 sm:$0xff] }
 0x3a9   : > { %v1396_v9 = vsel %vm836_vm3, %v1394_v6, 0.0 }
 0x3aa   : > { %v1386_v10 = vrot.slane %v1385_v7, 4  ;;  %v1397_v11 = vadd.f32 %v1396_v9, %v1395_v8 }
 0x3ac   : > { %v1387_v12 = vadd.f32 %v1386_v10, %v1385_v7  ;;  %v1398_v15 = vrot.slane %v1397_v11, 4 }
 0x3ae   : > { %v1388_v19 = vrot.slane %v1387_v12, 2  ;;  %v1399_v20 = vadd.f32 %v1398_v15, %v1397_v11 }
 0x3b0   : > { %v1389_v21 = vadd.f32 %v1388_v19, %v1387_v12  ;;  %v1400_v22 = vrot.slane %v1399_v20, 2 }
 0x3b2   : > { %v1390_v23 = vrot.slane %v1389_v21, 1  ;;  %v1401_v24 = vadd.f32 %v1400_v22, %v1399_v20 }
 0x3b4   : > { %v1391_v25 = vadd.f32 %v1390_v23, %v1389_v21  ;;  %v1402_v26 = vrot.slane %v1401_v24, 1 }
 0x3b6   : > { %v1392_v28 = vmul.f32 0.0625, %v1391_v25  ;;  %v1403_v29 = vadd.f32 %v1402_v26, %v1401_v24 }
 0x3b8   : > { %2024 = vmatmul.mubr.msk.f32.vlgmr.msra.gmra.mrb[6].mxu1 %vm836_vm3, %v1392_v28  ;;  %v1404_v30 = vmul.f32 0.0625, %v1403_v29 }
 0x3b9   : > { %2038 = vmatpush3.bf16.msra.mxu1 %v2112_v27  ;;  %2045 = vmatprep.mubr.msk.bf16.mxu1 %vm2146_vm2, %v2145_v1 }
 0x3ba   : > { %2035 = vmatmul.mubr.msk.f32.vlgmr.msra.gmra.mrb[10].mxu0 %vm836_vm3, %v1404_v30  ;;  %2039 = vmatprep.subr.bf16.mxu1 %v2145_v1 }
 0x3bd   : > { %2040 = vmatpush3.bf16.msra.mxu1 %v2113_v31 }
 0x3be   : > { %2041 = vmatprep.subr.bf16.mxu1 %v2145_v1 }
 0x3c1   : > { %2042 = vmatpush3.bf16.msra.mxu1 %v2114_v32 }
 0x3c2   : > { %2043 = vmatprep.subr.bf16.mxu1 %v2145_v1 }
 0x3c5   : > { %2044 = vmatpush3.bf16.msra.mxu1 %v2115_v33 }
 0x3c8   : > { %2046 = vmatmul.mubr.msk.bf16.vlgmr.msra.gmra.mrb[20].mxu1 %vm577_vm0, %v1603_v18 }
 0x48b   : > { %v1474_v36 = vpop.f32.mrb[6].mxu1 }
 0x48c   : > { %v1551_v37 = vmul.f32 %v1474_v36, %v1474_v36  ;;  %v2025_v39 = vpop.f32.mrb[7].mxu1  ;;  %v1556_v44 = vrot.slane %v1474_v36, %v2439_v46 }
 0x48d   : > { %v1547_v40 = vpop.f32.mrb[10].mxu0 }
 0x48e   : > { %v1552_v41 = vsub.f32 %v1547_v40, %v1551_v37  ;;  %v2036_v42 = vpop.f32.mrb[11].mxu0  ;;  %v1557_v1 = vsub.f32 %v1379_v63, %v1556_v44  ;;  %v1558_v49 = vsub.f32 %v1380_v3, %v1556_v44 }
 0x490   : > { %v1559_v43 = vadd.f32 1e-05, %v1552_v41 }
 0x492   : > { %2126 = vrsqrt.f32 %v1559_v43 }
 0x49b   : > { %v1680_v45 = vpop.f32.mrb[20].mxu1 }
 0x49c   : > { %v2127_v47 = vpop.eup %2126  ;;  %v2047_v48 = vpop.f32.mrb[21].mxu1  ;;  %v1681_v11 = vadd.f32 %v1844_v5, %v1680_v45 }
 0x49d   : > { %v1564_v50 = vrot.slane %v2127_v47, %v2439_v46  ;;  %v1683_v14 = vpop.f32.mrb[22].mxu1 }
 0x49e   : > { %v2048_v18 = vpop.f32.mrb[23].mxu1  ;;  %v1684_v15 = vadd.f32 %v1844_v5, %v1683_v14 }
 0x49f   : > { %v1565_v51 = vmul.f32 %v1564_v50, %v1557_v1  ;;  %v1566_v52 = vmul.f32 %v1564_v50, %v1558_v49 }
 0x4a1   : > { %v1573_v55 = vmul.f32 %v1842_v17, %v1565_v51  ;;  %v1574_v56 = vmul.f32 %v1842_v17, %v1566_v52 }
 0x4a3   : > { %v1581_v57 = vadd.f32 %v1843_v53, %v1573_v55  ;;  %v1582_v59 = vadd.f32 %v1843_v53, %v1574_v56 }
 0x4a5   : > { %v1583_v60 = vmin.f32 %v1581_v57, 30.0  ;;  %v1584_v61 = vmin.f32 %v1582_v59, 30.0 }
 0x4a7   : > { %v1585_v34 = vmul.f32 1.442695, %v1583_v60  ;;  %v1587_v46 = vmul.f32 1.442695, %v1584_v61 }
 0x4a9   : > { %2128 = vpow2.f32 %v1585_v34 }
 0x4aa   : > { %2130 = vpow2.f32 %v1587_v46 }
 0x4b3   : > { %v2129_v62 = vpop.eup %2128 }
 0x4b4   : > { %v2131_v35 = vpop.eup %2130  ;;  %v1589_v54 = vadd.f32 2.0, %v2129_v62 }
 0x4b5   : > { %v1590_v38 = vadd.f32 2.0, %v2131_v35 }
 0x4b6   : > { %v1591_v63 = vmul.f32 %v2129_v62, %v1589_v54 }
 0x4b7   : > { %v1592_v58 = vmul.f32 %v2131_v35, %v1590_v38 }
 0x4b8   : > { %v1595_v0 = vadd.f32 2.0, %v1591_v63  ;;  %v1593_v3 = vmul.f32 %v1591_v63, %v1581_v57 }
 0x4b9   : > { %v1596_v2 = vadd.f32 2.0, %v1592_v58  ;;  %v1594_v6 = vmul.f32 %v1592_v58, %v1582_v59 }
 0x4ba   : > { %2132 = vrcp.f32 %v1595_v0 }
 0x4bb   : > { %2134 = vrcp.f32 %v1596_v2 }
 0x4c4   : > { %v2133_v4 = vpop.eup %2132 }
 0x4c5   : > { %v2135_v7 = vpop.eup %2134  ;;  %v1598_v8 = vmul.f32 %v2133_v4, %v1593_v3 }
 0x4c6   : > { %v1600_v9 = vmul.f32 %v2135_v7, %v1594_v6 }
 0x4c7   : > { %v1601_v10 = vmul.f32 %v1598_v8, %v2296_v13 }
 0x4c8   : > { %v1602_v12 = vmul.f32 %v1600_v9, %v2303_v16 }
 0x4c9   : > { %v1687_v19 = vadd.f32 %v1681_v11, %v1601_v10 }
 0x4ca   : > { %v1688_v20 = vadd.f32 %v1684_v15, %v1602_v12 }
 0x4cb   : > { %1689 = vst.msk [vmem:[%s555_s18] sm:$0xff] %vm836_vm3, %v1687_v19 }
 0x4cc   : > { %1690 = vst.msk [vmem:[%s555_s18 + $0x8] sm:$0xff] %vm836_vm3, %v1688_v20 }
 0x4cd PF: > { %s26_s21 = sadd.s32 1, %s2142_s21  }
 0x4ce   : > { %p23_p4 = scmp.ge.s32.totalorder %s26_s21, 4  }
 0x4d0   :  { %25 = sbr.rel (!%p23_p4) target bundleno = 2 (0x2), region = 124 }

</bundles_post_ra>
